<compile_context>
chip_gen: v7x
topology: tpu7x:2x2x1
jax: 0.10.0
libtpu: 0.0.40
codegen_flags: <defaults>
</compile_context>

<pallas_src>
import jax
import jax.numpy as jnp
from jax.experimental import pallas as pl
from jax.experimental.pallas import tpu as pltpu


# --------------------------------------------------------------------------- #
# Kernel
# --------------------------------------------------------------------------- #
def lstm_head_kernel(seq_ref, emb_ref, w_ih_ref, w_hh_ref, w_pred_ref, b_pred_ref,
                     out_ref, x_scr, gx_scr, h_scr, c_scr):
    """One grid step processes TS timesteps of the sequence.

    seq_ref:    (S*Bp,)      int32 SMEM  token ids, scalar-prefetched
    emb_ref:    (V, 1, Ep)   bf16  embedding table (col E is the constant 1.0 lane)
    w_ih_ref:   (Ep, 4*Hp)   bf16  input->hidden weights, gate order (i,f,o,g);
                                   row E holds the combined bias b_ih+b_hh
    w_hh_ref:   (Hp, 4*Hp)   bf16  hidden->hidden weights, gate order (i,f,o,g)
    w_pred_ref: (Hp, OUTP)   bf16  predictor weights (cols >= 6 zero pad)
    b_pred_ref: (1, OUTP)    f32   predictor bias
    out_ref:    (Bp, OUTP)   f32   predictions (written on the last grid step)
    x_scr:      (TS*Bp, Ep)  f32   gathered embeddings for this block
    gx_scr:     (TS*Bp, 4Hp) f32   hoisted input-projection gates (bias included)
    h_scr/c_scr:(Bp, Hp)     f32   recurrent state carried across grid steps
    """
    s = pl.program_id(0)
    Bp, Hp = h_scr.shape
    TS = gx_scr.shape[0] // Bp

    @pl.when(s == 0)
    def _init():
        h_scr[...] = jnp.zeros_like(h_scr)
        c_scr[...] = jnp.zeros_like(c_scr)

    # ---- in-kernel embedding gather: no (S,Bp,Ep) HBM round trip ----------- #
    # Static-row stores, dynamic leading-dim loads (token ids from SMEM).
    base = s * (TS * Bp)
    for r in range(TS * Bp):
        tok = seq_ref[base + r]
        x_scr[r:r + 1, :] = emb_ref[tok].astype(jnp.float32)

    # ---- hoisted input projection; combined bias folded into w_ih --------- #
    gx_scr[...] = jnp.dot(x_scr[...].astype(jnp.bfloat16), w_ih_ref[...],
                          preferred_element_type=jnp.float32)

    w_hh = w_hh_ref[...]          # loop-invariant weight load hoisted
    h = h_scr[...]
    c = c_scr[...]
    # TODO(synk): if the bundle dump shows Mosaic re-pushing w_hh into the MXU on
    # every unrolled step, switch to explicit pltpu.matmul_push_rhs /
    # matmul_acc_lhs / matmul_pop staging so only the (Bp,Hp) LHS is serial.
    for t in range(TS):
        g = (gx_scr[t * Bp:(t + 1) * Bp, :]
             + jnp.dot(h.astype(w_hh.dtype), w_hh,
                       preferred_element_type=jnp.float32))
        # Gate order (i, f, o, g): one sigmoid covers i,f,o; one tanh covers g.
        sg = jax.nn.sigmoid(g[:, :3 * Hp])
        i_g = sg[:, 0 * Hp:1 * Hp]
        f_g = sg[:, 1 * Hp:2 * Hp]
        o_g = sg[:, 2 * Hp:3 * Hp]
        g_g = jnp.tanh(g[:, 3 * Hp:4 * Hp])
        c = f_g * c + i_g * g_g
        h = o_g * jnp.tanh(c)
    h_scr[...] = h
    c_scr[...] = c

    @pl.when(s == pl.num_programs(0) - 1)
    def _final():
        # predictor(hdn[-1]) into a lane-dense (Bp, 128) output block.
        out_ref[...] = (jnp.dot(h.astype(w_pred_ref.dtype), w_pred_ref[...],
                                preferred_element_type=jnp.float32)
                        + b_pred_ref[...])


# --------------------------------------------------------------------------- #
# Wrapper
# --------------------------------------------------------------------------- #
def _round_up(n, m):
    return ((n + m - 1) // m) * m


def _reorder_pad_gates(w, h, hp):
    """(..., 4*h) in PyTorch gate order (i,f,g,o) -> (..., 4*hp) in kernel order
    (i,f,o,g), each gate zero-padded to hp lanes."""
    lead = w.shape[:-1]
    w4 = w.reshape(*lead, 4, h)
    w4 = jnp.take(w4, jnp.array([0, 1, 3, 2]), axis=-2)      # (i,f,g,o)->(i,f,o,g)
    w4 = jnp.pad(w4, [(0, 0)] * len(lead) + [(0, 0), (0, hp - h)])
    return w4.reshape(*lead, 4 * hp)


def _block_len(seq_len, target):
    # Largest divisor of seq_len that is <= target.  For awkward/prime seq_len
    # this degenerates toward 1 (correct, just more grid steps).
    ts = min(target, seq_len)
    while seq_len % ts != 0:
        ts -= 1
    return ts


def simple_lstm_baseline_forward(seq, params, *, ts_target=32):
    """seq: (S, B) int32 token ids.  Returns (B, 6) float32 predictions."""
    emb = params["embedding"]      # (V, E)
    w_ih = params["w_ih"]          # (E, 4H)   gate order i,f,g,o (PyTorch)
    w_hh = params["w_hh"]          # (H, 4H)
    b = params["b"]                # (1, 4H)   combined bias b_ih + b_hh
    w_pred = params["w_pred"]      # (H, 6)
    b_pred = params["b_pred"]      # (1, 6)

    S, B = seq.shape
    V, E = emb.shape
    H = w_hh.shape[0]
    OUT = w_pred.shape[1]

    # Padded / aligned dims: gates lane-aligned (128), batch sublane-aligned (8),
    # one extra embedding column reserved for the constant-1.0 bias lane.
    Hp = _round_up(H, 128)
    Ep = _round_up(E + 1, 128)
    Bp = _round_up(B, 8)
    OUTP = 128
    TS = _block_len(S, ts_target)

    # --- pad / reorder / cast weights (zero padding is semantics-preserving) --
    # Embedding: real dims in cols [0,E), constant 1.0 in col E (bias lane).
    emb_full = jnp.zeros((V, Ep), jnp.float32)
    emb_full = emb_full.at[:, :E].set(emb.astype(jnp.float32)).at[:, E].set(1.0)
    emb_p = emb_full.astype(jnp.bfloat16).reshape(V, 1, Ep)   # row-addressable

    w_ih_rp = _reorder_pad_gates(w_ih, H, Hp)                 # (E, 4Hp)
    b_rp = _reorder_pad_gates(b, H, Hp)                       # (1, 4Hp)
    w_ih_full = jnp.zeros((Ep, 4 * Hp), jnp.float32)
    w_ih_full = w_ih_full.at[:E].set(w_ih_rp).at[E].set(b_rp[0])   # bias folded
    w_ih_p = w_ih_full.astype(jnp.bfloat16)

    w_hh_p = jnp.pad(_reorder_pad_gates(w_hh, H, Hp),
                     ((0, Hp - H), (0, 0))).astype(jnp.bfloat16)
    w_pred_p = jnp.pad(w_pred, ((0, Hp - H), (0, OUTP - OUT))).astype(jnp.bfloat16)
    b_pred_p = jnp.pad(b_pred, ((0, 0), (0, OUTP - OUT))).astype(jnp.float32)

    # Token ids: pad batch to Bp with token 0 (padded rows are discarded at the
    # end).  Note: ids must be in [0, V); PyTorch's nn.Embedding would raise on
    # out-of-range ids, the kernel gather has no bounds check.
    seq_flat = jnp.pad(seq, ((0, 0), (0, Bp - B))).reshape(S * Bp).astype(jnp.int32)

    # --- VMEM budget (v7x: 64 MiB physical, 32 MiB default scoped) -----------
    bf2, f4 = 2, 4
    vmem_est = 2 * (V * 16 * Ep * bf2            # emb rows pad to 16 sublanes (bf16)
                    + Ep * 4 * Hp * bf2          # w_ih
                    + Hp * 4 * Hp * bf2          # w_hh
                    + Hp * OUTP * bf2            # w_pred
                    + 8 * OUTP * f4              # b_pred
                    + Bp * OUTP * f4)            # output block
    vmem_est += (TS * Bp * Ep * f4               # x_scr
                 + TS * Bp * 4 * Hp * f4         # gx_scr
                 + 2 * Bp * Hp * f4)             # h, c
    vmem_limit = int(min(64 << 20, max(16 << 20, 2 * vmem_est)))

    grid_spec = pltpu.PrefetchScalarGridSpec(
        num_scalar_prefetch=1,                   # seq ids -> SMEM
        grid=(S // TS,),
        in_specs=[
            pl.BlockSpec((V, 1, Ep), lambda s, seq: (0, 0, 0)),   # resident table
            pl.BlockSpec((Ep, 4 * Hp), lambda s, seq: (0, 0)),    # resident weights
            pl.BlockSpec((Hp, 4 * Hp), lambda s, seq: (0, 0)),
            pl.BlockSpec((Hp, OUTP), lambda s, seq: (0, 0)),
            pl.BlockSpec((1, OUTP), lambda s, seq: (0, 0)),
        ],
        out_specs=pl.BlockSpec((Bp, OUTP), lambda s, seq: (0, 0)),  # resident output
        scratch_shapes=[
            pltpu.VMEM((TS * Bp, Ep), jnp.float32),      # gathered x block
            pltpu.VMEM((TS * Bp, 4 * Hp), jnp.float32),  # hoisted gate projections
            pltpu.VMEM((Bp, Hp), jnp.float32),           # h
            pltpu.VMEM((Bp, Hp), jnp.float32),           # c
        ],
    )

    out_padded = pl.pallas_call(
        lstm_head_kernel,
        out_shape=jax.ShapeDtypeStruct((Bp, OUTP), jnp.float32),
        grid_spec=grid_spec,
        compiler_params=pltpu.CompilerParams(
            dimension_semantics=("arbitrary",),          # serial recurrence over S
            vmem_limit_bytes=vmem_limit),
    )(seq_flat, emb_p, w_ih_p, w_hh_p, w_pred_p, b_pred_p)

    return out_padded[:B, :OUT]


# --------------------------------------------------------------------------- #
# Pure-JAX reference (f32, unpadded) — matches PyTorch semantics.
# --------------------------------------------------------------------------- #
def _reference_forward(seq, params):
    x = jnp.take(params["embedding"], seq, axis=0).astype(jnp.float32)
    H = params["w_hh"].shape[0]
    S, B, _ = x.shape
    h = jnp.zeros((B, H), jnp.float32)
    c = jnp.zeros((B, H), jnp.float32)
    for t in range(S):
        gates = x[t] @ params["w_ih"] + h @ params["w_hh"] + params["b"]
        i_g = jax.nn.sigmoid(gates[:, 0 * H:1 * H])
        f_g = jax.nn.sigmoid(gates[:, 1 * H:2 * H])
        g_g = jnp.tanh(gates[:, 2 * H:3 * H])
        o_g = jax.nn.sigmoid(gates[:, 3 * H:4 * H])
        c = f_g * c + i_g * g_g
        h = o_g * jnp.tanh(c)
    return h @ params["w_pred"] + params["b_pred"]


def init_params(key, vocab_size, emb_dim, hidden_dim):
    ks = jax.random.split(key, 6)
    scale = 0.1
    return {
        "embedding": scale * jax.random.normal(ks[0], (vocab_size, emb_dim), jnp.float32),
        # PyTorch stores weight_ih_l0 as (4H, E); we keep (E, 4H). Gate order i,f,g,o.
        "w_ih": scale * jax.random.normal(ks[1], (emb_dim, 4 * hidden_dim), jnp.float32),
        "w_hh": scale * jax.random.normal(ks[2], (hidden_dim, 4 * hidden_dim), jnp.float32),
        "b": scale * jax.random.normal(ks[3], (1, 4 * hidden_dim), jnp.float32),
        "w_pred": scale * jax.random.normal(ks[4], (hidden_dim, 6), jnp.float32),
        "b_pred": scale * jax.random.normal(ks[5], (1, 6), jnp.float32),
    }


if __name__ == "__main__":
    VOCAB = 50
    EMB = 48      # emb_dim (module default 300, shrunk; padded to 128 in-wrapper)
    HID = 32      # hidden_dim (padded per-gate to 128 lanes in-wrapper)
    SEQ = 16
    BATCH = 4     # padded to 8 sublanes in-wrapper
    # num_linear=1 -> no intermediate linear layers (matches module default).

    key = jax.random.PRNGKey(0)
    k_par, k_seq = jax.random.split(key)
    params = init_params(k_par, VOCAB, EMB, HID)
    seq = jax.random.randint(k_seq, (SEQ, BATCH), 0, VOCAB, dtype=jnp.int32)

    preds = simple_lstm_baseline_forward(seq, params)
    preds = jax.block_until_ready(preds)

    ref = _reference_forward(seq, params)
    assert preds.shape == (BATCH, 6), preds.shape
    # bf16 weights/activations (incl. the bias folded through the bf16 GEMM) with
    # f32 accumulation and f32 recurrent state -> loosened tolerance.
    max_err = float(jnp.max(jnp.abs(preds - ref)))
    assert jnp.allclose(preds, ref, atol=2e-2, rtol=2e-2), f"mismatch, max|err|={max_err}"

    print("KERNEL_OK")
</pallas_src>

<mosaic_0001>
module attributes {stable_mosaic.version = 11 : i64} {
  func.func @lstm_head_kernel(%arg0: i32, %arg1: memref<128xi32, #tpu.memory_space<smem>>, %arg2: memref<50x1x128xbf16, #tpu.memory_space<vmem>>, %arg3: memref<128x512xbf16, #tpu.memory_space<vmem>>, %arg4: memref<128x512xbf16, #tpu.memory_space<vmem>>, %arg5: memref<128x128xbf16, #tpu.memory_space<vmem>>, %arg6: memref<1x128xf32, #tpu.memory_space<vmem>>, %arg7: memref<8x128xf32, #tpu.memory_space<vmem>>, %arg8: memref<128x128xf32, #tpu.memory_space<vmem>>, %arg9: memref<128x512xf32, #tpu.memory_space<vmem>>, %arg10: memref<8x128xf32, #tpu.memory_space<vmem>>, %arg11: memref<8x128xf32, #tpu.memory_space<vmem>>) attributes {dimension_semantics = [#tpu.dimension_semantics<arbitrary>], iteration_bounds = array<i64: 1>, scalar_prefetch = 1 : i64, scratch_operands = 4 : i64, tpu.core_type = #tpu.core_type<tc>, window_params = [{pipeline_mode = #tpu.pipeline_mode<synchronous>, transform_indices = @transform_0, window_bounds = array<i64: 50, 1, 128>}, {pipeline_mode = #tpu.pipeline_mode<synchronous>, transform_indices = @transform_1, window_bounds = array<i64: 128, 512>}, {pipeline_mode = #tpu.pipeline_mode<synchronous>, transform_indices = @transform_2, window_bounds = array<i64: 128, 512>}, {pipeline_mode = #tpu.pipeline_mode<synchronous>, transform_indices = @transform_3, window_bounds = array<i64: 128, 128>}, {pipeline_mode = #tpu.pipeline_mode<synchronous>, transform_indices = @transform_4, window_bounds = array<i64: 1, 128>}, {pipeline_mode = #tpu.pipeline_mode<synchronous>, transform_indices = @transform_5, window_bounds = array<i64: 8, 128>}]} {
    %c0_i32 = arith.constant 0 : i32
    %0 = arith.cmpi eq, %arg0, %c0_i32 : i32
    %1 = arith.extui %0 : i1 to i32
    %c0_i32_0 = arith.constant 0 : i32
    %2 = arith.cmpi ne, %1, %c0_i32_0 : i32
    scf.if %2 {
      %cst_468 = arith.constant 0.000000e+00 : f32
      %1361 = vector.broadcast %cst_468 : f32 to vector<8x128xf32>
      %c0_469 = arith.constant 0 : index
      %c0_470 = arith.constant 0 : index
      %1362 = vector.load %arg10[%c0_469, %c0_470] : memref<8x128xf32, #tpu.memory_space<vmem>>, vector<8x128xf32>
      tpu.vector_store %arg10[%c0_469, %c0_470], %1361 {strides = array<i32>} : memref<8x128xf32, #tpu.memory_space<vmem>>, vector<8x128xf32>,
      %cst_471 = arith.constant 0.000000e+00 : f32
      %1363 = vector.broadcast %cst_471 : f32 to vector<8x128xf32>
      %c0_472 = arith.constant 0 : index
      %c0_473 = arith.constant 0 : index
      %1364 = vector.load %arg11[%c0_472, %c0_473] : memref<8x128xf32, #tpu.memory_space<vmem>>, vector<8x128xf32>
      tpu.vector_store %arg11[%c0_472, %c0_473], %1363 {strides = array<i32>} : memref<8x128xf32, #tpu.memory_space<vmem>>, vector<8x128xf32>,
    } else {
    }
    %c128_i32 = arith.constant 128 : i32
    %3 = arith.muli %arg0, %c128_i32 : i32
    %c0_i32_1 = arith.constant 0 : i32
    %4 = arith.addi %3, %c0_i32_1 : i32
    %5 = arith.index_cast %4 : i32 to index
    %6 = memref.load %arg1[%5] : memref<128xi32, #tpu.memory_space<smem>>
    %7 = arith.index_cast %6 : i32 to index
    %c0 = arith.constant 0 : index
    %c0_2 = arith.constant 0 : index
    %8 = vector.load %arg2[%7, %c0, %c0_2] : memref<50x1x128xbf16, #tpu.memory_space<vmem>>, vector<1x1x128xbf16>
    %9 = vector.shape_cast %8 : vector<1x1x128xbf16> to vector<1x128xbf16>
    %10 = arith.extf %9 : vector<1x128xbf16> to vector<1x128xf32>
    %c0_3 = arith.constant 0 : index
    %c0_4 = arith.constant 0 : index
    %11 = vector.load %arg8[%c0_3, %c0_4] : memref<128x128xf32, #tpu.memory_space<vmem>>, vector<1x128xf32>
    tpu.vector_store %arg8[%c0_3, %c0_4], %10 {strides = array<i32>} : memref<128x128xf32, #tpu.memory_space<vmem>>, vector<1x128xf32>,
    %c1_i32 = arith.constant 1 : i32
    %12 = arith.addi %3, %c1_i32 : i32
    %13 = arith.index_cast %12 : i32 to index
    %14 = memref.load %arg1[%13] : memref<128xi32, #tpu.memory_space<smem>>
    %15 = arith.index_cast %14 : i32 to index
    %c0_5 = arith.constant 0 : index
    %c0_6 = arith.constant 0 : index
    %16 = vector.load %arg2[%15, %c0_5, %c0_6] : memref<50x1x128xbf16, #tpu.memory_space<vmem>>, vector<1x1x128xbf16>
    %17 = vector.shape_cast %16 : vector<1x1x128xbf16> to vector<1x128xbf16>
    %18 = arith.extf %17 : vector<1x128xbf16> to vector<1x128xf32>
    %c1 = arith.constant 1 : index
    %c0_7 = arith.constant 0 : index
    %19 = vector.load %arg8[%c1, %c0_7] : memref<128x128xf32, #tpu.memory_space<vmem>>, vector<1x128xf32>
    tpu.vector_store %arg8[%c1, %c0_7], %18 {strides = array<i32>} : memref<128x128xf32, #tpu.memory_space<vmem>>, vector<1x128xf32>,
    %c2_i32 = arith.constant 2 : i32
    %20 = arith.addi %3, %c2_i32 : i32
    %21 = arith.index_cast %20 : i32 to index
    %22 = memref.load %arg1[%21] : memref<128xi32, #tpu.memory_space<smem>>
    %23 = arith.index_cast %22 : i32 to index
    %c0_8 = arith.constant 0 : index
    %c0_9 = arith.constant 0 : index
    %24 = vector.load %arg2[%23, %c0_8, %c0_9] : memref<50x1x128xbf16, #tpu.memory_space<vmem>>, vector<1x1x128xbf16>
    %25 = vector.shape_cast %24 : vector<1x1x128xbf16> to vector<1x128xbf16>
    %26 = arith.extf %25 : vector<1x128xbf16> to vector<1x128xf32>
    %c2 = arith.constant 2 : index
    %c0_10 = arith.constant 0 : index
    %27 = vector.load %arg8[%c2, %c0_10] : memref<128x128xf32, #tpu.memory_space<vmem>>, vector<1x128xf32>
    tpu.vector_store %arg8[%c2, %c0_10], %26 {strides = array<i32>} : memref<128x128xf32, #tpu.memory_space<vmem>>, vector<1x128xf32>,
    %c3_i32 = arith.constant 3 : i32
    %28 = arith.addi %3, %c3_i32 : i32
    %29 = arith.index_cast %28 : i32 to index
    %30 = memref.load %arg1[%29] : memref<128xi32, #tpu.memory_space<smem>>
    %31 = arith.index_cast %30 : i32 to index
    %c0_11 = arith.constant 0 : index
    %c0_12 = arith.constant 0 : index
    %32 = vector.load %arg2[%31, %c0_11, %c0_12] : memref<50x1x128xbf16, #tpu.memory_space<vmem>>, vector<1x1x128xbf16>
    %33 = vector.shape_cast %32 : vector<1x1x128xbf16> to vector<1x128xbf16>
    %34 = arith.extf %33 : vector<1x128xbf16> to vector<1x128xf32>
    %c3 = arith.constant 3 : index
    %c0_13 = arith.constant 0 : index
    %35 = vector.load %arg8[%c3, %c0_13] : memref<128x128xf32, #tpu.memory_space<vmem>>, vector<1x128xf32>
    tpu.vector_store %arg8[%c3, %c0_13], %34 {strides = array<i32>} : memref<128x128xf32, #tpu.memory_space<vmem>>, vector<1x128xf32>,
    %c4_i32 = arith.constant 4 : i32
    %36 = arith.addi %3, %c4_i32 : i32
    %37 = arith.index_cast %36 : i32 to index
    %38 = memref.load %arg1[%37] : memref<128xi32, #tpu.memory_space<smem>>
    %39 = arith.index_cast %38 : i32 to index
    %c0_14 = arith.constant 0 : index
    %c0_15 = arith.constant 0 : index
    %40 = vector.load %arg2[%39, %c0_14, %c0_15] : memref<50x1x128xbf16, #tpu.memory_space<vmem>>, vector<1x1x128xbf16>
    %41 = vector.shape_cast %40 : vector<1x1x128xbf16> to vector<1x128xbf16>
    %42 = arith.extf %41 : vector<1x128xbf16> to vector<1x128xf32>
    %c4 = arith.constant 4 : index
    %c0_16 = arith.constant 0 : index
    %43 = vector.load %arg8[%c4, %c0_16] : memref<128x128xf32, #tpu.memory_space<vmem>>, vector<1x128xf32>
    tpu.vector_store %arg8[%c4, %c0_16], %42 {strides = array<i32>} : memref<128x128xf32, #tpu.memory_space<vmem>>, vector<1x128xf32>,
    %c5_i32 = arith.constant 5 : i32
    %44 = arith.addi %3, %c5_i32 : i32
    %45 = arith.index_cast %44 : i32 to index
    %46 = memref.load %arg1[%45] : memref<128xi32, #tpu.memory_space<smem>>
    %47 = arith.index_cast %46 : i32 to index
    %c0_17 = arith.constant 0 : index
    %c0_18 = arith.constant 0 : index
    %48 = vector.load %arg2[%47, %c0_17, %c0_18] : memref<50x1x128xbf16, #tpu.memory_space<vmem>>, vector<1x1x128xbf16>
    %49 = vector.shape_cast %48 : vector<1x1x128xbf16> to vector<1x128xbf16>
    %50 = arith.extf %49 : vector<1x128xbf16> to vector<1x128xf32>
    %c5 = arith.constant 5 : index
    %c0_19 = arith.constant 0 : index
    %51 = vector.load %arg8[%c5, %c0_19] : memref<128x128xf32, #tpu.memory_space<vmem>>, vector<1x128xf32>
    tpu.vector_store %arg8[%c5, %c0_19], %50 {strides = array<i32>} : memref<128x128xf32, #tpu.memory_space<vmem>>, vector<1x128xf32>,
    %c6_i32 = arith.constant 6 : i32
    %52 = arith.addi %3, %c6_i32 : i32
    %53 = arith.index_cast %52 : i32 to index
    %54 = memref.load %arg1[%53] : memref<128xi32, #tpu.memory_space<smem>>
    %55 = arith.index_cast %54 : i32 to index
    %c0_20 = arith.constant 0 : index
    %c0_21 = arith.constant 0 : index
    %56 = vector.load %arg2[%55, %c0_20, %c0_21] : memref<50x1x128xbf16, #tpu.memory_space<vmem>>, vector<1x1x128xbf16>
    %57 = vector.shape_cast %56 : vector<1x1x128xbf16> to vector<1x128xbf16>
    %58 = arith.extf %57 : vector<1x128xbf16> to vector<1x128xf32>
    %c6 = arith.constant 6 : index
    %c0_22 = arith.constant 0 : index
    %59 = vector.load %arg8[%c6, %c0_22] : memref<128x128xf32, #tpu.memory_space<vmem>>, vector<1x128xf32>
    tpu.vector_store %arg8[%c6, %c0_22], %58 {strides = array<i32>} : memref<128x128xf32, #tpu.memory_space<vmem>>, vector<1x128xf32>,
    %c7_i32 = arith.constant 7 : i32
    %60 = arith.addi %3, %c7_i32 : i32
    %61 = arith.index_cast %60 : i32 to index
    %62 = memref.load %arg1[%61] : memref<128xi32, #tpu.memory_space<smem>>
    %63 = arith.index_cast %62 : i32 to index
    %c0_23 = arith.constant 0 : index
    %c0_24 = arith.constant 0 : index
    %64 = vector.load %arg2[%63, %c0_23, %c0_24] : memref<50x1x128xbf16, #tpu.memory_space<vmem>>, vector<1x1x128xbf16>
    %65 = vector.shape_cast %64 : vector<1x1x128xbf16> to vector<1x128xbf16>
    %66 = arith.extf %65 : vector<1x128xbf16> to vector<1x128xf32>
    %c7 = arith.constant 7 : index
    %c0_25 = arith.constant 0 : index
    %67 = vector.load %arg8[%c7, %c0_25] : memref<128x128xf32, #tpu.memory_space<vmem>>, vector<1x128xf32>
    tpu.vector_store %arg8[%c7, %c0_25], %66 {strides = array<i32>} : memref<128x128xf32, #tpu.memory_space<vmem>>, vector<1x128xf32>,
    %c8_i32 = arith.constant 8 : i32
    %68 = arith.addi %3, %c8_i32 : i32
    %69 = arith.index_cast %68 : i32 to index
    %70 = memref.load %arg1[%69] : memref<128xi32, #tpu.memory_space<smem>>
    %71 = arith.index_cast %70 : i32 to index
    %c0_26 = arith.constant 0 : index
    %c0_27 = arith.constant 0 : index
    %72 = vector.load %arg2[%71, %c0_26, %c0_27] : memref<50x1x128xbf16, #tpu.memory_space<vmem>>, vector<1x1x128xbf16>
    %73 = vector.shape_cast %72 : vector<1x1x128xbf16> to vector<1x128xbf16>
    %74 = arith.extf %73 : vector<1x128xbf16> to vector<1x128xf32>
    %c8 = arith.constant 8 : index
    %c0_28 = arith.constant 0 : index
    %75 = vector.load %arg8[%c8, %c0_28] : memref<128x128xf32, #tpu.memory_space<vmem>>, vector<1x128xf32>
    tpu.vector_store %arg8[%c8, %c0_28], %74 {strides = array<i32>} : memref<128x128xf32, #tpu.memory_space<vmem>>, vector<1x128xf32>,
    %c9_i32 = arith.constant 9 : i32
    %76 = arith.addi %3, %c9_i32 : i32
    %77 = arith.index_cast %76 : i32 to index
    %78 = memref.load %arg1[%77] : memref<128xi32, #tpu.memory_space<smem>>
    %79 = arith.index_cast %78 : i32 to index
    %c0_29 = arith.constant 0 : index
    %c0_30 = arith.constant 0 : index
    %80 = vector.load %arg2[%79, %c0_29, %c0_30] : memref<50x1x128xbf16, #tpu.memory_space<vmem>>, vector<1x1x128xbf16>
    %81 = vector.shape_cast %80 : vector<1x1x128xbf16> to vector<1x128xbf16>
    %82 = arith.extf %81 : vector<1x128xbf16> to vector<1x128xf32>
    %c9 = arith.constant 9 : index
    %c0_31 = arith.constant 0 : index
    %83 = vector.load %arg8[%c9, %c0_31] : memref<128x128xf32, #tpu.memory_space<vmem>>, vector<1x128xf32>
    tpu.vector_store %arg8[%c9, %c0_31], %82 {strides = array<i32>} : memref<128x128xf32, #tpu.memory_space<vmem>>, vector<1x128xf32>,
    %c10_i32 = arith.constant 10 : i32
    %84 = arith.addi %3, %c10_i32 : i32
    %85 = arith.index_cast %84 : i32 to index
    %86 = memref.load %arg1[%85] : memref<128xi32, #tpu.memory_space<smem>>
    %87 = arith.index_cast %86 : i32 to index
    %c0_32 = arith.constant 0 : index
    %c0_33 = arith.constant 0 : index
    %88 = vector.load %arg2[%87, %c0_32, %c0_33] : memref<50x1x128xbf16, #tpu.memory_space<vmem>>, vector<1x1x128xbf16>
    %89 = vector.shape_cast %88 : vector<1x1x128xbf16> to vector<1x128xbf16>
    %90 = arith.extf %89 : vector<1x128xbf16> to vector<1x128xf32>
    %c10 = arith.constant 10 : index
    %c0_34 = arith.constant 0 : index
    %91 = vector.load %arg8[%c10, %c0_34] : memref<128x128xf32, #tpu.memory_space<vmem>>, vector<1x128xf32>
    tpu.vector_store %arg8[%c10, %c0_34], %90 {strides = array<i32>} : memref<128x128xf32, #tpu.memory_space<vmem>>, vector<1x128xf32>,
    %c11_i32 = arith.constant 11 : i32
    %92 = arith.addi %3, %c11_i32 : i32
    %93 = arith.index_cast %92 : i32 to index
    %94 = memref.load %arg1[%93] : memref<128xi32, #tpu.memory_space<smem>>
    %95 = arith.index_cast %94 : i32 to index
    %c0_35 = arith.constant 0 : index
    %c0_36 = arith.constant 0 : index
    %96 = vector.load %arg2[%95, %c0_35, %c0_36] : memref<50x1x128xbf16, #tpu.memory_space<vmem>>, vector<1x1x128xbf16>
    %97 = vector.shape_cast %96 : vector<1x1x128xbf16> to vector<1x128xbf16>
    %98 = arith.extf %97 : vector<1x128xbf16> to vector<1x128xf32>
    %c11 = arith.constant 11 : index
    %c0_37 = arith.constant 0 : index
    %99 = vector.load %arg8[%c11, %c0_37] : memref<128x128xf32, #tpu.memory_space<vmem>>, vector<1x128xf32>
    tpu.vector_store %arg8[%c11, %c0_37], %98 {strides = array<i32>} : memref<128x128xf32, #tpu.memory_space<vmem>>, vector<1x128xf32>,
    %c12_i32 = arith.constant 12 : i32
    %100 = arith.addi %3, %c12_i32 : i32
    %101 = arith.index_cast %100 : i32 to index
    %102 = memref.load %arg1[%101] : memref<128xi32, #tpu.memory_space<smem>>
    %103 = arith.index_cast %102 : i32 to index
    %c0_38 = arith.constant 0 : index
    %c0_39 = arith.constant 0 : index
    %104 = vector.load %arg2[%103, %c0_38, %c0_39] : memref<50x1x128xbf16, #tpu.memory_space<vmem>>, vector<1x1x128xbf16>
    %105 = vector.shape_cast %104 : vector<1x1x128xbf16> to vector<1x128xbf16>
    %106 = arith.extf %105 : vector<1x128xbf16> to vector<1x128xf32>
    %c12 = arith.constant 12 : index
    %c0_40 = arith.constant 0 : index
    %107 = vector.load %arg8[%c12, %c0_40] : memref<128x128xf32, #tpu.memory_space<vmem>>, vector<1x128xf32>
    tpu.vector_store %arg8[%c12, %c0_40], %106 {strides = array<i32>} : memref<128x128xf32, #tpu.memory_space<vmem>>, vector<1x128xf32>,
    %c13_i32 = arith.constant 13 : i32
    %108 = arith.addi %3, %c13_i32 : i32
    %109 = arith.index_cast %108 : i32 to index
    %110 = memref.load %arg1[%109] : memref<128xi32, #tpu.memory_space<smem>>
    %111 = arith.index_cast %110 : i32 to index
    %c0_41 = arith.constant 0 : index
    %c0_42 = arith.constant 0 : index
    %112 = vector.load %arg2[%111, %c0_41, %c0_42] : memref<50x1x128xbf16, #tpu.memory_space<vmem>>, vector<1x1x128xbf16>
    %113 = vector.shape_cast %112 : vector<1x1x128xbf16> to vector<1x128xbf16>
    %114 = arith.extf %113 : vector<1x128xbf16> to vector<1x128xf32>
    %c13 = arith.constant 13 : index
    %c0_43 = arith.constant 0 : index
    %115 = vector.load %arg8[%c13, %c0_43] : memref<128x128xf32, #tpu.memory_space<vmem>>, vector<1x128xf32>
    tpu.vector_store %arg8[%c13, %c0_43], %114 {strides = array<i32>} : memref<128x128xf32, #tpu.memory_space<vmem>>, vector<1x128xf32>,
    %c14_i32 = arith.constant 14 : i32
    %116 = arith.addi %3, %c14_i32 : i32
    %117 = arith.index_cast %116 : i32 to index
    %118 = memref.load %arg1[%117] : memref<128xi32, #tpu.memory_space<smem>>
    %119 = arith.index_cast %118 : i32 to index
    %c0_44 = arith.constant 0 : index
    %c0_45 = arith.constant 0 : index
    %120 = vector.load %arg2[%119, %c0_44, %c0_45] : memref<50x1x128xbf16, #tpu.memory_space<vmem>>, vector<1x1x128xbf16>
    %121 = vector.shape_cast %120 : vector<1x1x128xbf16> to vector<1x128xbf16>
    %122 = arith.extf %121 : vector<1x128xbf16> to vector<1x128xf32>
    %c14 = arith.constant 14 : index
    %c0_46 = arith.constant 0 : index
    %123 = vector.load %arg8[%c14, %c0_46] : memref<128x128xf32, #tpu.memory_space<vmem>>, vector<1x128xf32>
    tpu.vector_store %arg8[%c14, %c0_46], %122 {strides = array<i32>} : memref<128x128xf32, #tpu.memory_space<vmem>>, vector<1x128xf32>,
    %c15_i32 = arith.constant 15 : i32
    %124 = arith.addi %3, %c15_i32 : i32
    %125 = arith.index_cast %124 : i32 to index
    %126 = memref.load %arg1[%125] : memref<128xi32, #tpu.memory_space<smem>>
    %127 = arith.index_cast %126 : i32 to index
    %c0_47 = arith.constant 0 : index
    %c0_48 = arith.constant 0 : index
    %128 = vector.load %arg2[%127, %c0_47, %c0_48] : memref<50x1x128xbf16, #tpu.memory_space<vmem>>, vector<1x1x128xbf16>
    %129 = vector.shape_cast %128 : vector<1x1x128xbf16> to vector<1x128xbf16>
    %130 = arith.extf %129 : vector<1x128xbf16> to vector<1x128xf32>
    %c15 = arith.constant 15 : index
    %c0_49 = arith.constant 0 : index
    %131 = vector.load %arg8[%c15, %c0_49] : memref<128x128xf32, #tpu.memory_space<vmem>>, vector<1x128xf32>
    tpu.vector_store %arg8[%c15, %c0_49], %130 {strides = array<i32>} : memref<128x128xf32, #tpu.memory_space<vmem>>, vector<1x128xf32>,
    %c16_i32 = arith.constant 16 : i32
    %132 = arith.addi %3, %c16_i32 : i32
    %133 = arith.index_cast %132 : i32 to index
    %134 = memref.load %arg1[%133] : memref<128xi32, #tpu.memory_space<smem>>
    %135 = arith.index_cast %134 : i32 to index
    %c0_50 = arith.constant 0 : index
    %c0_51 = arith.constant 0 : index
    %136 = vector.load %arg2[%135, %c0_50, %c0_51] : memref<50x1x128xbf16, #tpu.memory_space<vmem>>, vector<1x1x128xbf16>
    %137 = vector.shape_cast %136 : vector<1x1x128xbf16> to vector<1x128xbf16>
    %138 = arith.extf %137 : vector<1x128xbf16> to vector<1x128xf32>
    %c16 = arith.constant 16 : index
    %c0_52 = arith.constant 0 : index
    %139 = vector.load %arg8[%c16, %c0_52] : memref<128x128xf32, #tpu.memory_space<vmem>>, vector<1x128xf32>
    tpu.vector_store %arg8[%c16, %c0_52], %138 {strides = array<i32>} : memref<128x128xf32, #tpu.memory_space<vmem>>, vector<1x128xf32>,
    %c17_i32 = arith.constant 17 : i32
    %140 = arith.addi %3, %c17_i32 : i32
    %141 = arith.index_cast %140 : i32 to index
    %142 = memref.load %arg1[%141] : memref<128xi32, #tpu.memory_space<smem>>
    %143 = arith.index_cast %142 : i32 to index
    %c0_53 = arith.constant 0 : index
    %c0_54 = arith.constant 0 : index
    %144 = vector.load %arg2[%143, %c0_53, %c0_54] : memref<50x1x128xbf16, #tpu.memory_space<vmem>>, vector<1x1x128xbf16>
    %145 = vector.shape_cast %144 : vector<1x1x128xbf16> to vector<1x128xbf16>
    %146 = arith.extf %145 : vector<1x128xbf16> to vector<1x128xf32>
    %c17 = arith.constant 17 : index
    %c0_55 = arith.constant 0 : index
    %147 = vector.load %arg8[%c17, %c0_55] : memref<128x128xf32, #tpu.memory_space<vmem>>, vector<1x128xf32>
    tpu.vector_store %arg8[%c17, %c0_55], %146 {strides = array<i32>} : memref<128x128xf32, #tpu.memory_space<vmem>>, vector<1x128xf32>,
    %c18_i32 = arith.constant 18 : i32
    %148 = arith.addi %3, %c18_i32 : i32
    %149 = arith.index_cast %148 : i32 to index
    %150 = memref.load %arg1[%149] : memref<128xi32, #tpu.memory_space<smem>>
    %151 = arith.index_cast %150 : i32 to index
    %c0_56 = arith.constant 0 : index
    %c0_57 = arith.constant 0 : index
    %152 = vector.load %arg2[%151, %c0_56, %c0_57] : memref<50x1x128xbf16, #tpu.memory_space<vmem>>, vector<1x1x128xbf16>
    %153 = vector.shape_cast %152 : vector<1x1x128xbf16> to vector<1x128xbf16>
    %154 = arith.extf %153 : vector<1x128xbf16> to vector<1x128xf32>
    %c18 = arith.constant 18 : index
    %c0_58 = arith.constant 0 : index
    %155 = vector.load %arg8[%c18, %c0_58] : memref<128x128xf32, #tpu.memory_space<vmem>>, vector<1x128xf32>
    tpu.vector_store %arg8[%c18, %c0_58], %154 {strides = array<i32>} : memref<128x128xf32, #tpu.memory_space<vmem>>, vector<1x128xf32>,
    %c19_i32 = arith.constant 19 : i32
    %156 = arith.addi %3, %c19_i32 : i32
    %157 = arith.index_cast %156 : i32 to index
    %158 = memref.load %arg1[%157] : memref<128xi32, #tpu.memory_space<smem>>
    %159 = arith.index_cast %158 : i32 to index
    %c0_59 = arith.constant 0 : index
    %c0_60 = arith.constant 0 : index
    %160 = vector.load %arg2[%159, %c0_59, %c0_60] : memref<50x1x128xbf16, #tpu.memory_space<vmem>>, vector<1x1x128xbf16>
    %161 = vector.shape_cast %160 : vector<1x1x128xbf16> to vector<1x128xbf16>
    %162 = arith.extf %161 : vector<1x128xbf16> to vector<1x128xf32>
    %c19 = arith.constant 19 : index
    %c0_61 = arith.constant 0 : index
    %163 = vector.load %arg8[%c19, %c0_61] : memref<128x128xf32, #tpu.memory_space<vmem>>, vector<1x128xf32>
    tpu.vector_store %arg8[%c19, %c0_61], %162 {strides = array<i32>} : memref<128x128xf32, #tpu.memory_space<vmem>>, vector<1x128xf32>,
    %c20_i32 = arith.constant 20 : i32
    %164 = arith.addi %3, %c20_i32 : i32
    %165 = arith.index_cast %164 : i32 to index
    %166 = memref.load %arg1[%165] : memref<128xi32, #tpu.memory_space<smem>>
    %167 = arith.index_cast %166 : i32 to index
    %c0_62 = arith.constant 0 : index
    %c0_63 = arith.constant 0 : index
    %168 = vector.load %arg2[%167, %c0_62, %c0_63] : memref<50x1x128xbf16, #tpu.memory_space<vmem>>, vector<1x1x128xbf16>
    %169 = vector.shape_cast %168 : vector<1x1x128xbf16> to vector<1x128xbf16>
    %170 = arith.extf %169 : vector<1x128xbf16> to vector<1x128xf32>
    %c20 = arith.constant 20 : index
    %c0_64 = arith.constant 0 : index
    %171 = vector.load %arg8[%c20, %c0_64] : memref<128x128xf32, #tpu.memory_space<vmem>>, vector<1x128xf32>
    tpu.vector_store %arg8[%c20, %c0_64], %170 {strides = array<i32>} : memref<128x128xf32, #tpu.memory_space<vmem>>, vector<1x128xf32>,
    %c21_i32 = arith.constant 21 : i32
    %172 = arith.addi %3, %c21_i32 : i32
    %173 = arith.index_cast %172 : i32 to index
    %174 = memref.load %arg1[%173] : memref<128xi32, #tpu.memory_space<smem>>
    %175 = arith.index_cast %174 : i32 to index
    %c0_65 = arith.constant 0 : index
    %c0_66 = arith.constant 0 : index
    %176 = vector.load %arg2[%175, %c0_65, %c0_66] : memref<50x1x128xbf16, #tpu.memory_space<vmem>>, vector<1x1x128xbf16>
    %177 = vector.shape_cast %176 : vector<1x1x128xbf16> to vector<1x128xbf16>
    %178 = arith.extf %177 : vector<1x128xbf16> to vector<1x128xf32>
    %c21 = arith.constant 21 : index
    %c0_67 = arith.constant 0 : index
    %179 = vector.load %arg8[%c21, %c0_67] : memref<128x128xf32, #tpu.memory_space<vmem>>, vector<1x128xf32>
    tpu.vector_store %arg8[%c21, %c0_67], %178 {strides = array<i32>} : memref<128x128xf32, #tpu.memory_space<vmem>>, vector<1x128xf32>,
    %c22_i32 = arith.constant 22 : i32
    %180 = arith.addi %3, %c22_i32 : i32
    %181 = arith.index_cast %180 : i32 to index
    %182 = memref.load %arg1[%181] : memref<128xi32, #tpu.memory_space<smem>>
    %183 = arith.index_cast %182 : i32 to index
    %c0_68 = arith.constant 0 : index
    %c0_69 = arith.constant 0 : index
    %184 = vector.load %arg2[%183, %c0_68, %c0_69] : memref<50x1x128xbf16, #tpu.memory_space<vmem>>, vector<1x1x128xbf16>
    %185 = vector.shape_cast %184 : vector<1x1x128xbf16> to vector<1x128xbf16>
    %186 = arith.extf %185 : vector<1x128xbf16> to vector<1x128xf32>
    %c22 = arith.constant 22 : index
    %c0_70 = arith.constant 0 : index
    %187 = vector.load %arg8[%c22, %c0_70] : memref<128x128xf32, #tpu.memory_space<vmem>>, vector<1x128xf32>
    tpu.vector_store %arg8[%c22, %c0_70], %186 {strides = array<i32>} : memref<128x128xf32, #tpu.memory_space<vmem>>, vector<1x128xf32>,
    %c23_i32 = arith.constant 23 : i32
    %188 = arith.addi %3, %c23_i32 : i32
    %189 = arith.index_cast %188 : i32 to index
    %190 = memref.load %arg1[%189] : memref<128xi32, #tpu.memory_space<smem>>
    %191 = arith.index_cast %190 : i32 to index
    %c0_71 = arith.constant 0 : index
    %c0_72 = arith.constant 0 : index
    %192 = vector.load %arg2[%191, %c0_71, %c0_72] : memref<50x1x128xbf16, #tpu.memory_space<vmem>>, vector<1x1x128xbf16>
    %193 = vector.shape_cast %192 : vector<1x1x128xbf16> to vector<1x128xbf16>
    %194 = arith.extf %193 : vector<1x128xbf16> to vector<1x128xf32>
    %c23 = arith.constant 23 : index
    %c0_73 = arith.constant 0 : index
    %195 = vector.load %arg8[%c23, %c0_73] : memref<128x128xf32, #tpu.memory_space<vmem>>, vector<1x128xf32>
    tpu.vector_store %arg8[%c23, %c0_73], %194 {strides = array<i32>} : memref<128x128xf32, #tpu.memory_space<vmem>>, vector<1x128xf32>,
    %c24_i32 = arith.constant 24 : i32
    %196 = arith.addi %3, %c24_i32 : i32
    %197 = arith.index_cast %196 : i32 to index
    %198 = memref.load %arg1[%197] : memref<128xi32, #tpu.memory_space<smem>>
    %199 = arith.index_cast %198 : i32 to index
    %c0_74 = arith.constant 0 : index
    %c0_75 = arith.constant 0 : index
    %200 = vector.load %arg2[%199, %c0_74, %c0_75] : memref<50x1x128xbf16, #tpu.memory_space<vmem>>, vector<1x1x128xbf16>
    %201 = vector.shape_cast %200 : vector<1x1x128xbf16> to vector<1x128xbf16>
    %202 = arith.extf %201 : vector<1x128xbf16> to vector<1x128xf32>
    %c24 = arith.constant 24 : index
    %c0_76 = arith.constant 0 : index
    %203 = vector.load %arg8[%c24, %c0_76] : memref<128x128xf32, #tpu.memory_space<vmem>>, vector<1x128xf32>
    tpu.vector_store %arg8[%c24, %c0_76], %202 {strides = array<i32>} : memref<128x128xf32, #tpu.memory_space<vmem>>, vector<1x128xf32>,
    %c25_i32 = arith.constant 25 : i32
    %204 = arith.addi %3, %c25_i32 : i32
    %205 = arith.index_cast %204 : i32 to index
    %206 = memref.load %arg1[%205] : memref<128xi32, #tpu.memory_space<smem>>
    %207 = arith.index_cast %206 : i32 to index
    %c0_77 = arith.constant 0 : index
    %c0_78 = arith.constant 0 : index
    %208 = vector.load %arg2[%207, %c0_77, %c0_78] : memref<50x1x128xbf16, #tpu.memory_space<vmem>>, vector<1x1x128xbf16>
    %209 = vector.shape_cast %208 : vector<1x1x128xbf16> to vector<1x128xbf16>
    %210 = arith.extf %209 : vector<1x128xbf16> to vector<1x128xf32>
    %c25 = arith.constant 25 : index
    %c0_79 = arith.constant 0 : index
    %211 = vector.load %arg8[%c25, %c0_79] : memref<128x128xf32, #tpu.memory_space<vmem>>, vector<1x128xf32>
    tpu.vector_store %arg8[%c25, %c0_79], %210 {strides = array<i32>} : memref<128x128xf32, #tpu.memory_space<vmem>>, vector<1x128xf32>,
    %c26_i32 = arith.constant 26 : i32
    %212 = arith.addi %3, %c26_i32 : i32
    %213 = arith.index_cast %212 : i32 to index
    %214 = memref.load %arg1[%213] : memref<128xi32, #tpu.memory_space<smem>>
    %215 = arith.index_cast %214 : i32 to index
    %c0_80 = arith.constant 0 : index
    %c0_81 = arith.constant 0 : index
    %216 = vector.load %arg2[%215, %c0_80, %c0_81] : memref<50x1x128xbf16, #tpu.memory_space<vmem>>, vector<1x1x128xbf16>
    %217 = vector.shape_cast %216 : vector<1x1x128xbf16> to vector<1x128xbf16>
    %218 = arith.extf %217 : vector<1x128xbf16> to vector<1x128xf32>
    %c26 = arith.constant 26 : index
    %c0_82 = arith.constant 0 : index
    %219 = vector.load %arg8[%c26, %c0_82] : memref<128x128xf32, #tpu.memory_space<vmem>>, vector<1x128xf32>
    tpu.vector_store %arg8[%c26, %c0_82], %218 {strides = array<i32>} : memref<128x128xf32, #tpu.memory_space<vmem>>, vector<1x128xf32>,
    %c27_i32 = arith.constant 27 : i32
    %220 = arith.addi %3, %c27_i32 : i32
    %221 = arith.index_cast %220 : i32 to index
    %222 = memref.load %arg1[%221] : memref<128xi32, #tpu.memory_space<smem>>
    %223 = arith.index_cast %222 : i32 to index
    %c0_83 = arith.constant 0 : index
    %c0_84 = arith.constant 0 : index
    %224 = vector.load %arg2[%223, %c0_83, %c0_84] : memref<50x1x128xbf16, #tpu.memory_space<vmem>>, vector<1x1x128xbf16>
    %225 = vector.shape_cast %224 : vector<1x1x128xbf16> to vector<1x128xbf16>
    %226 = arith.extf %225 : vector<1x128xbf16> to vector<1x128xf32>
    %c27 = arith.constant 27 : index
    %c0_85 = arith.constant 0 : index
    %227 = vector.load %arg8[%c27, %c0_85] : memref<128x128xf32, #tpu.memory_space<vmem>>, vector<1x128xf32>
    tpu.vector_store %arg8[%c27, %c0_85], %226 {strides = array<i32>} : memref<128x128xf32, #tpu.memory_space<vmem>>, vector<1x128xf32>,
    %c28_i32 = arith.constant 28 : i32
    %228 = arith.addi %3, %c28_i32 : i32
    %229 = arith.index_cast %228 : i32 to index
    %230 = memref.load %arg1[%229] : memref<128xi32, #tpu.memory_space<smem>>
    %231 = arith.index_cast %230 : i32 to index
    %c0_86 = arith.constant 0 : index
    %c0_87 = arith.constant 0 : index
    %232 = vector.load %arg2[%231, %c0_86, %c0_87] : memref<50x1x128xbf16, #tpu.memory_space<vmem>>, vector<1x1x128xbf16>
    %233 = vector.shape_cast %232 : vector<1x1x128xbf16> to vector<1x128xbf16>
    %234 = arith.extf %233 : vector<1x128xbf16> to vector<1x128xf32>
    %c28 = arith.constant 28 : index
    %c0_88 = arith.constant 0 : index
    %235 = vector.load %arg8[%c28, %c0_88] : memref<128x128xf32, #tpu.memory_space<vmem>>, vector<1x128xf32>
    tpu.vector_store %arg8[%c28, %c0_88], %234 {strides = array<i32>} : memref<128x128xf32, #tpu.memory_space<vmem>>, vector<1x128xf32>,
    %c29_i32 = arith.constant 29 : i32
    %236 = arith.addi %3, %c29_i32 : i32
    %237 = arith.index_cast %236 : i32 to index
    %238 = memref.load %arg1[%237] : memref<128xi32, #tpu.memory_space<smem>>
    %239 = arith.index_cast %238 : i32 to index
    %c0_89 = arith.constant 0 : index
    %c0_90 = arith.constant 0 : index
    %240 = vector.load %arg2[%239, %c0_89, %c0_90] : memref<50x1x128xbf16, #tpu.memory_space<vmem>>, vector<1x1x128xbf16>
    %241 = vector.shape_cast %240 : vector<1x1x128xbf16> to vector<1x128xbf16>
    %242 = arith.extf %241 : vector<1x128xbf16> to vector<1x128xf32>
    %c29 = arith.constant 29 : index
    %c0_91 = arith.constant 0 : index
    %243 = vector.load %arg8[%c29, %c0_91] : memref<128x128xf32, #tpu.memory_space<vmem>>, vector<1x128xf32>
    tpu.vector_store %arg8[%c29, %c0_91], %242 {strides = array<i32>} : memref<128x128xf32, #tpu.memory_space<vmem>>, vector<1x128xf32>,
    %c30_i32 = arith.constant 30 : i32
    %244 = arith.addi %3, %c30_i32 : i32
    %245 = arith.index_cast %244 : i32 to index
    %246 = memref.load %arg1[%245] : memref<128xi32, #tpu.memory_space<smem>>
    %247 = arith.index_cast %246 : i32 to index
    %c0_92 = arith.constant 0 : index
    %c0_93 = arith.constant 0 : index
    %248 = vector.load %arg2[%247, %c0_92, %c0_93] : memref<50x1x128xbf16, #tpu.memory_space<vmem>>, vector<1x1x128xbf16>
    %249 = vector.shape_cast %248 : vector<1x1x128xbf16> to vector<1x128xbf16>
    %250 = arith.extf %249 : vector<1x128xbf16> to vector<1x128xf32>
    %c30 = arith.constant 30 : index
    %c0_94 = arith.constant 0 : index
    %251 = vector.load %arg8[%c30, %c0_94] : memref<128x128xf32, #tpu.memory_space<vmem>>, vector<1x128xf32>
    tpu.vector_store %arg8[%c30, %c0_94], %250 {strides = array<i32>} : memref<128x128xf32, #tpu.memory_space<vmem>>, vector<1x128xf32>,
    %c31_i32 = arith.constant 31 : i32
    %252 = arith.addi %3, %c31_i32 : i32
    %253 = arith.index_cast %252 : i32 to index
    %254 = memref.load %arg1[%253] : memref<128xi32, #tpu.memory_space<smem>>
    %255 = arith.index_cast %254 : i32 to index
    %c0_95 = arith.constant 0 : index
    %c0_96 = arith.constant 0 : index
    %256 = vector.load %arg2[%255, %c0_95, %c0_96] : memref<50x1x128xbf16, #tpu.memory_space<vmem>>, vector<1x1x128xbf16>
    %257 = vector.shape_cast %256 : vector<1x1x128xbf16> to vector<1x128xbf16>
    %258 = arith.extf %257 : vector<1x128xbf16> to vector<1x128xf32>
    %c31 = arith.constant 31 : index
    %c0_97 = arith.constant 0 : index
    %259 = vector.load %arg8[%c31, %c0_97] : memref<128x128xf32, #tpu.memory_space<vmem>>, vector<1x128xf32>
    tpu.vector_store %arg8[%c31, %c0_97], %258 {strides = array<i32>} : memref<128x128xf32, #tpu.memory_space<vmem>>, vector<1x128xf32>,
    %c32_i32 = arith.constant 32 : i32
    %260 = arith.addi %3, %c32_i32 : i32
    %261 = arith.index_cast %260 : i32 to index
    %262 = memref.load %arg1[%261] : memref<128xi32, #tpu.memory_space<smem>>
    %263 = arith.index_cast %262 : i32 to index
    %c0_98 = arith.constant 0 : index
    %c0_99 = arith.constant 0 : index
    %264 = vector.load %arg2[%263, %c0_98, %c0_99] : memref<50x1x128xbf16, #tpu.memory_space<vmem>>, vector<1x1x128xbf16>
    %265 = vector.shape_cast %264 : vector<1x1x128xbf16> to vector<1x128xbf16>
    %266 = arith.extf %265 : vector<1x128xbf16> to vector<1x128xf32>
    %c32 = arith.constant 32 : index
    %c0_100 = arith.constant 0 : index
    %267 = vector.load %arg8[%c32, %c0_100] : memref<128x128xf32, #tpu.memory_space<vmem>>, vector<1x128xf32>
    tpu.vector_store %arg8[%c32, %c0_100], %266 {strides = array<i32>} : memref<128x128xf32, #tpu.memory_space<vmem>>, vector<1x128xf32>,
    %c33_i32 = arith.constant 33 : i32
    %268 = arith.addi %3, %c33_i32 : i32
    %269 = arith.index_cast %268 : i32 to index
    %270 = memref.load %arg1[%269] : memref<128xi32, #tpu.memory_space<smem>>
    %271 = arith.index_cast %270 : i32 to index
    %c0_101 = arith.constant 0 : index
    %c0_102 = arith.constant 0 : index
    %272 = vector.load %arg2[%271, %c0_101, %c0_102] : memref<50x1x128xbf16, #tpu.memory_space<vmem>>, vector<1x1x128xbf16>
    %273 = vector.shape_cast %272 : vector<1x1x128xbf16> to vector<1x128xbf16>
    %274 = arith.extf %273 : vector<1x128xbf16> to vector<1x128xf32>
    %c33 = arith.constant 33 : index
    %c0_103 = arith.constant 0 : index
    %275 = vector.load %arg8[%c33, %c0_103] : memref<128x128xf32, #tpu.memory_space<vmem>>, vector<1x128xf32>
    tpu.vector_store %arg8[%c33, %c0_103], %274 {strides = array<i32>} : memref<128x128xf32, #tpu.memory_space<vmem>>, vector<1x128xf32>,
    %c34_i32 = arith.constant 34 : i32
    %276 = arith.addi %3, %c34_i32 : i32
    %277 = arith.index_cast %276 : i32 to index
    %278 = memref.load %arg1[%277] : memref<128xi32, #tpu.memory_space<smem>>
    %279 = arith.index_cast %278 : i32 to index
    %c0_104 = arith.constant 0 : index
    %c0_105 = arith.constant 0 : index
    %280 = vector.load %arg2[%279, %c0_104, %c0_105] : memref<50x1x128xbf16, #tpu.memory_space<vmem>>, vector<1x1x128xbf16>
    %281 = vector.shape_cast %280 : vector<1x1x128xbf16> to vector<1x128xbf16>
    %282 = arith.extf %281 : vector<1x128xbf16> to vector<1x128xf32>
    %c34 = arith.constant 34 : index
    %c0_106 = arith.constant 0 : index
    %283 = vector.load %arg8[%c34, %c0_106] : memref<128x128xf32, #tpu.memory_space<vmem>>, vector<1x128xf32>
    tpu.vector_store %arg8[%c34, %c0_106], %282 {strides = array<i32>} : memref<128x128xf32, #tpu.memory_space<vmem>>, vector<1x128xf32>,
    %c35_i32 = arith.constant 35 : i32
    %284 = arith.addi %3, %c35_i32 : i32
    %285 = arith.index_cast %284 : i32 to index
    %286 = memref.load %arg1[%285] : memref<128xi32, #tpu.memory_space<smem>>
    %287 = arith.index_cast %286 : i32 to index
    %c0_107 = arith.constant 0 : index
    %c0_108 = arith.constant 0 : index
    %288 = vector.load %arg2[%287, %c0_107, %c0_108] : memref<50x1x128xbf16, #tpu.memory_space<vmem>>, vector<1x1x128xbf16>
    %289 = vector.shape_cast %288 : vector<1x1x128xbf16> to vector<1x128xbf16>
    %290 = arith.extf %289 : vector<1x128xbf16> to vector<1x128xf32>
    %c35 = arith.constant 35 : index
    %c0_109 = arith.constant 0 : index
    %291 = vector.load %arg8[%c35, %c0_109] : memref<128x128xf32, #tpu.memory_space<vmem>>, vector<1x128xf32>
    tpu.vector_store %arg8[%c35, %c0_109], %290 {strides = array<i32>} : memref<128x128xf32, #tpu.memory_space<vmem>>, vector<1x128xf32>,
    %c36_i32 = arith.constant 36 : i32
    %292 = arith.addi %3, %c36_i32 : i32
    %293 = arith.index_cast %292 : i32 to index
    %294 = memref.load %arg1[%293] : memref<128xi32, #tpu.memory_space<smem>>
    %295 = arith.index_cast %294 : i32 to index
    %c0_110 = arith.constant 0 : index
    %c0_111 = arith.constant 0 : index
    %296 = vector.load %arg2[%295, %c0_110, %c0_111] : memref<50x1x128xbf16, #tpu.memory_space<vmem>>, vector<1x1x128xbf16>
    %297 = vector.shape_cast %296 : vector<1x1x128xbf16> to vector<1x128xbf16>
    %298 = arith.extf %297 : vector<1x128xbf16> to vector<1x128xf32>
    %c36 = arith.constant 36 : index
    %c0_112 = arith.constant 0 : index
    %299 = vector.load %arg8[%c36, %c0_112] : memref<128x128xf32, #tpu.memory_space<vmem>>, vector<1x128xf32>
    tpu.vector_store %arg8[%c36, %c0_112], %298 {strides = array<i32>} : memref<128x128xf32, #tpu.memory_space<vmem>>, vector<1x128xf32>,
    %c37_i32 = arith.constant 37 : i32
    %300 = arith.addi %3, %c37_i32 : i32
    %301 = arith.index_cast %300 : i32 to index
    %302 = memref.load %arg1[%301] : memref<128xi32, #tpu.memory_space<smem>>
    %303 = arith.index_cast %302 : i32 to index
    %c0_113 = arith.constant 0 : index
    %c0_114 = arith.constant 0 : index
    %304 = vector.load %arg2[%303, %c0_113, %c0_114] : memref<50x1x128xbf16, #tpu.memory_space<vmem>>, vector<1x1x128xbf16>
    %305 = vector.shape_cast %304 : vector<1x1x128xbf16> to vector<1x128xbf16>
    %306 = arith.extf %305 : vector<1x128xbf16> to vector<1x128xf32>
    %c37 = arith.constant 37 : index
    %c0_115 = arith.constant 0 : index
    %307 = vector.load %arg8[%c37, %c0_115] : memref<128x128xf32, #tpu.memory_space<vmem>>, vector<1x128xf32>
    tpu.vector_store %arg8[%c37, %c0_115], %306 {strides = array<i32>} : memref<128x128xf32, #tpu.memory_space<vmem>>, vector<1x128xf32>,
    %c38_i32 = arith.constant 38 : i32
    %308 = arith.addi %3, %c38_i32 : i32
    %309 = arith.index_cast %308 : i32 to index
    %310 = memref.load %arg1[%309] : memref<128xi32, #tpu.memory_space<smem>>
    %311 = arith.index_cast %310 : i32 to index
    %c0_116 = arith.constant 0 : index
    %c0_117 = arith.constant 0 : index
    %312 = vector.load %arg2[%311, %c0_116, %c0_117] : memref<50x1x128xbf16, #tpu.memory_space<vmem>>, vector<1x1x128xbf16>
    %313 = vector.shape_cast %312 : vector<1x1x128xbf16> to vector<1x128xbf16>
    %314 = arith.extf %313 : vector<1x128xbf16> to vector<1x128xf32>
    %c38 = arith.constant 38 : index
    %c0_118 = arith.constant 0 : index
    %315 = vector.load %arg8[%c38, %c0_118] : memref<128x128xf32, #tpu.memory_space<vmem>>, vector<1x128xf32>
    tpu.vector_store %arg8[%c38, %c0_118], %314 {strides = array<i32>} : memref<128x128xf32, #tpu.memory_space<vmem>>, vector<1x128xf32>,
    %c39_i32 = arith.constant 39 : i32
    %316 = arith.addi %3, %c39_i32 : i32
    %317 = arith.index_cast %316 : i32 to index
    %318 = memref.load %arg1[%317] : memref<128xi32, #tpu.memory_space<smem>>
    %319 = arith.index_cast %318 : i32 to index
    %c0_119 = arith.constant 0 : index
    %c0_120 = arith.constant 0 : index
    %320 = vector.load %arg2[%319, %c0_119, %c0_120] : memref<50x1x128xbf16, #tpu.memory_space<vmem>>, vector<1x1x128xbf16>
    %321 = vector.shape_cast %320 : vector<1x1x128xbf16> to vector<1x128xbf16>
    %322 = arith.extf %321 : vector<1x128xbf16> to vector<1x128xf32>
    %c39 = arith.constant 39 : index
    %c0_121 = arith.constant 0 : index
    %323 = vector.load %arg8[%c39, %c0_121] : memref<128x128xf32, #tpu.memory_space<vmem>>, vector<1x128xf32>
    tpu.vector_store %arg8[%c39, %c0_121], %322 {strides = array<i32>} : memref<128x128xf32, #tpu.memory_space<vmem>>, vector<1x128xf32>,
    %c40_i32 = arith.constant 40 : i32
    %324 = arith.addi %3, %c40_i32 : i32
    %325 = arith.index_cast %324 : i32 to index
    %326 = memref.load %arg1[%325] : memref<128xi32, #tpu.memory_space<smem>>
    %327 = arith.index_cast %326 : i32 to index
    %c0_122 = arith.constant 0 : index
    %c0_123 = arith.constant 0 : index
    %328 = vector.load %arg2[%327, %c0_122, %c0_123] : memref<50x1x128xbf16, #tpu.memory_space<vmem>>, vector<1x1x128xbf16>
    %329 = vector.shape_cast %328 : vector<1x1x128xbf16> to vector<1x128xbf16>
    %330 = arith.extf %329 : vector<1x128xbf16> to vector<1x128xf32>
    %c40 = arith.constant 40 : index
    %c0_124 = arith.constant 0 : index
    %331 = vector.load %arg8[%c40, %c0_124] : memref<128x128xf32, #tpu.memory_space<vmem>>, vector<1x128xf32>
    tpu.vector_store %arg8[%c40, %c0_124], %330 {strides = array<i32>} : memref<128x128xf32, #tpu.memory_space<vmem>>, vector<1x128xf32>,
    %c41_i32 = arith.constant 41 : i32
    %332 = arith.addi %3, %c41_i32 : i32
    %333 = arith.index_cast %332 : i32 to index
    %334 = memref.load %arg1[%333] : memref<128xi32, #tpu.memory_space<smem>>
    %335 = arith.index_cast %334 : i32 to index
    %c0_125 = arith.constant 0 : index
    %c0_126 = arith.constant 0 : index
    %336 = vector.load %arg2[%335, %c0_125, %c0_126] : memref<50x1x128xbf16, #tpu.memory_space<vmem>>, vector<1x1x128xbf16>
    %337 = vector.shape_cast %336 : vector<1x1x128xbf16> to vector<1x128xbf16>
    %338 = arith.extf %337 : vector<1x128xbf16> to vector<1x128xf32>
    %c41 = arith.constant 41 : index
    %c0_127 = arith.constant 0 : index
    %339 = vector.load %arg8[%c41, %c0_127] : memref<128x128xf32, #tpu.memory_space<vmem>>, vector<1x128xf32>
    tpu.vector_store %arg8[%c41, %c0_127], %338 {strides = array<i32>} : memref<128x128xf32, #tpu.memory_space<vmem>>, vector<1x128xf32>,
    %c42_i32 = arith.constant 42 : i32
    %340 = arith.addi %3, %c42_i32 : i32
    %341 = arith.index_cast %340 : i32 to index
    %342 = memref.load %arg1[%341] : memref<128xi32, #tpu.memory_space<smem>>
    %343 = arith.index_cast %342 : i32 to index
    %c0_128 = arith.constant 0 : index
    %c0_129 = arith.constant 0 : index
    %344 = vector.load %arg2[%343, %c0_128, %c0_129] : memref<50x1x128xbf16, #tpu.memory_space<vmem>>, vector<1x1x128xbf16>
    %345 = vector.shape_cast %344 : vector<1x1x128xbf16> to vector<1x128xbf16>
    %346 = arith.extf %345 : vector<1x128xbf16> to vector<1x128xf32>
    %c42 = arith.constant 42 : index
    %c0_130 = arith.constant 0 : index
    %347 = vector.load %arg8[%c42, %c0_130] : memref<128x128xf32, #tpu.memory_space<vmem>>, vector<1x128xf32>
    tpu.vector_store %arg8[%c42, %c0_130], %346 {strides = array<i32>} : memref<128x128xf32, #tpu.memory_space<vmem>>, vector<1x128xf32>,
    %c43_i32 = arith.constant 43 : i32
    %348 = arith.addi %3, %c43_i32 : i32
    %349 = arith.index_cast %348 : i32 to index
    %350 = memref.load %arg1[%349] : memref<128xi32, #tpu.memory_space<smem>>
    %351 = arith.index_cast %350 : i32 to index
    %c0_131 = arith.constant 0 : index
    %c0_132 = arith.constant 0 : index
    %352 = vector.load %arg2[%351, %c0_131, %c0_132] : memref<50x1x128xbf16, #tpu.memory_space<vmem>>, vector<1x1x128xbf16>
    %353 = vector.shape_cast %352 : vector<1x1x128xbf16> to vector<1x128xbf16>
    %354 = arith.extf %353 : vector<1x128xbf16> to vector<1x128xf32>
    %c43 = arith.constant 43 : index
    %c0_133 = arith.constant 0 : index
    %355 = vector.load %arg8[%c43, %c0_133] : memref<128x128xf32, #tpu.memory_space<vmem>>, vector<1x128xf32>
    tpu.vector_store %arg8[%c43, %c0_133], %354 {strides = array<i32>} : memref<128x128xf32, #tpu.memory_space<vmem>>, vector<1x128xf32>,
    %c44_i32 = arith.constant 44 : i32
    %356 = arith.addi %3, %c44_i32 : i32
    %357 = arith.index_cast %356 : i32 to index
    %358 = memref.load %arg1[%357] : memref<128xi32, #tpu.memory_space<smem>>
    %359 = arith.index_cast %358 : i32 to index
    %c0_134 = arith.constant 0 : index
    %c0_135 = arith.constant 0 : index
    %360 = vector.load %arg2[%359, %c0_134, %c0_135] : memref<50x1x128xbf16, #tpu.memory_space<vmem>>, vector<1x1x128xbf16>
    %361 = vector.shape_cast %360 : vector<1x1x128xbf16> to vector<1x128xbf16>
    %362 = arith.extf %361 : vector<1x128xbf16> to vector<1x128xf32>
    %c44 = arith.constant 44 : index
    %c0_136 = arith.constant 0 : index
    %363 = vector.load %arg8[%c44, %c0_136] : memref<128x128xf32, #tpu.memory_space<vmem>>, vector<1x128xf32>
    tpu.vector_store %arg8[%c44, %c0_136], %362 {strides = array<i32>} : memref<128x128xf32, #tpu.memory_space<vmem>>, vector<1x128xf32>,
    %c45_i32 = arith.constant 45 : i32
    %364 = arith.addi %3, %c45_i32 : i32
    %365 = arith.index_cast %364 : i32 to index
    %366 = memref.load %arg1[%365] : memref<128xi32, #tpu.memory_space<smem>>
    %367 = arith.index_cast %366 : i32 to index
    %c0_137 = arith.constant 0 : index
    %c0_138 = arith.constant 0 : index
    %368 = vector.load %arg2[%367, %c0_137, %c0_138] : memref<50x1x128xbf16, #tpu.memory_space<vmem>>, vector<1x1x128xbf16>
    %369 = vector.shape_cast %368 : vector<1x1x128xbf16> to vector<1x128xbf16>
    %370 = arith.extf %369 : vector<1x128xbf16> to vector<1x128xf32>
    %c45 = arith.constant 45 : index
    %c0_139 = arith.constant 0 : index
    %371 = vector.load %arg8[%c45, %c0_139] : memref<128x128xf32, #tpu.memory_space<vmem>>, vector<1x128xf32>
    tpu.vector_store %arg8[%c45, %c0_139], %370 {strides = array<i32>} : memref<128x128xf32, #tpu.memory_space<vmem>>, vector<1x128xf32>,
    %c46_i32 = arith.constant 46 : i32
    %372 = arith.addi %3, %c46_i32 : i32
    %373 = arith.index_cast %372 : i32 to index
    %374 = memref.load %arg1[%373] : memref<128xi32, #tpu.memory_space<smem>>
    %375 = arith.index_cast %374 : i32 to index
    %c0_140 = arith.constant 0 : index
    %c0_141 = arith.constant 0 : index
    %376 = vector.load %arg2[%375, %c0_140, %c0_141] : memref<50x1x128xbf16, #tpu.memory_space<vmem>>, vector<1x1x128xbf16>
    %377 = vector.shape_cast %376 : vector<1x1x128xbf16> to vector<1x128xbf16>
    %378 = arith.extf %377 : vector<1x128xbf16> to vector<1x128xf32>
    %c46 = arith.constant 46 : index
    %c0_142 = arith.constant 0 : index
    %379 = vector.load %arg8[%c46, %c0_142] : memref<128x128xf32, #tpu.memory_space<vmem>>, vector<1x128xf32>
    tpu.vector_store %arg8[%c46, %c0_142], %378 {strides = array<i32>} : memref<128x128xf32, #tpu.memory_space<vmem>>, vector<1x128xf32>,
    %c47_i32 = arith.constant 47 : i32
    %380 = arith.addi %3, %c47_i32 : i32
    %381 = arith.index_cast %380 : i32 to index
    %382 = memref.load %arg1[%381] : memref<128xi32, #tpu.memory_space<smem>>
    %383 = arith.index_cast %382 : i32 to index
    %c0_143 = arith.constant 0 : index
    %c0_144 = arith.constant 0 : index
    %384 = vector.load %arg2[%383, %c0_143, %c0_144] : memref<50x1x128xbf16, #tpu.memory_space<vmem>>, vector<1x1x128xbf16>
    %385 = vector.shape_cast %384 : vector<1x1x128xbf16> to vector<1x128xbf16>
    %386 = arith.extf %385 : vector<1x128xbf16> to vector<1x128xf32>
    %c47 = arith.constant 47 : index
    %c0_145 = arith.constant 0 : index
    %387 = vector.load %arg8[%c47, %c0_145] : memref<128x128xf32, #tpu.memory_space<vmem>>, vector<1x128xf32>
    tpu.vector_store %arg8[%c47, %c0_145], %386 {strides = array<i32>} : memref<128x128xf32, #tpu.memory_space<vmem>>, vector<1x128xf32>,
    %c48_i32 = arith.constant 48 : i32
    %388 = arith.addi %3, %c48_i32 : i32
    %389 = arith.index_cast %388 : i32 to index
    %390 = memref.load %arg1[%389] : memref<128xi32, #tpu.memory_space<smem>>
    %391 = arith.index_cast %390 : i32 to index
    %c0_146 = arith.constant 0 : index
    %c0_147 = arith.constant 0 : index
    %392 = vector.load %arg2[%391, %c0_146, %c0_147] : memref<50x1x128xbf16, #tpu.memory_space<vmem>>, vector<1x1x128xbf16>
    %393 = vector.shape_cast %392 : vector<1x1x128xbf16> to vector<1x128xbf16>
    %394 = arith.extf %393 : vector<1x128xbf16> to vector<1x128xf32>
    %c48 = arith.constant 48 : index
    %c0_148 = arith.constant 0 : index
    %395 = vector.load %arg8[%c48, %c0_148] : memref<128x128xf32, #tpu.memory_space<vmem>>, vector<1x128xf32>
    tpu.vector_store %arg8[%c48, %c0_148], %394 {strides = array<i32>} : memref<128x128xf32, #tpu.memory_space<vmem>>, vector<1x128xf32>,
    %c49_i32 = arith.constant 49 : i32
    %396 = arith.addi %3, %c49_i32 : i32
    %397 = arith.index_cast %396 : i32 to index
    %398 = memref.load %arg1[%397] : memref<128xi32, #tpu.memory_space<smem>>
    %399 = arith.index_cast %398 : i32 to index
    %c0_149 = arith.constant 0 : index
    %c0_150 = arith.constant 0 : index
    %400 = vector.load %arg2[%399, %c0_149, %c0_150] : memref<50x1x128xbf16, #tpu.memory_space<vmem>>, vector<1x1x128xbf16>
    %401 = vector.shape_cast %400 : vector<1x1x128xbf16> to vector<1x128xbf16>
    %402 = arith.extf %401 : vector<1x128xbf16> to vector<1x128xf32>
    %c49 = arith.constant 49 : index
    %c0_151 = arith.constant 0 : index
    %403 = vector.load %arg8[%c49, %c0_151] : memref<128x128xf32, #tpu.memory_space<vmem>>, vector<1x128xf32>
    tpu.vector_store %arg8[%c49, %c0_151], %402 {strides = array<i32>} : memref<128x128xf32, #tpu.memory_space<vmem>>, vector<1x128xf32>,
    %c50_i32 = arith.constant 50 : i32
    %404 = arith.addi %3, %c50_i32 : i32
    %405 = arith.index_cast %404 : i32 to index
    %406 = memref.load %arg1[%405] : memref<128xi32, #tpu.memory_space<smem>>
    %407 = arith.index_cast %406 : i32 to index
    %c0_152 = arith.constant 0 : index
    %c0_153 = arith.constant 0 : index
    %408 = vector.load %arg2[%407, %c0_152, %c0_153] : memref<50x1x128xbf16, #tpu.memory_space<vmem>>, vector<1x1x128xbf16>
    %409 = vector.shape_cast %408 : vector<1x1x128xbf16> to vector<1x128xbf16>
    %410 = arith.extf %409 : vector<1x128xbf16> to vector<1x128xf32>
    %c50 = arith.constant 50 : index
    %c0_154 = arith.constant 0 : index
    %411 = vector.load %arg8[%c50, %c0_154] : memref<128x128xf32, #tpu.memory_space<vmem>>, vector<1x128xf32>
    tpu.vector_store %arg8[%c50, %c0_154], %410 {strides = array<i32>} : memref<128x128xf32, #tpu.memory_space<vmem>>, vector<1x128xf32>,
    %c51_i32 = arith.constant 51 : i32
    %412 = arith.addi %3, %c51_i32 : i32
    %413 = arith.index_cast %412 : i32 to index
    %414 = memref.load %arg1[%413] : memref<128xi32, #tpu.memory_space<smem>>
    %415 = arith.index_cast %414 : i32 to index
    %c0_155 = arith.constant 0 : index
    %c0_156 = arith.constant 0 : index
    %416 = vector.load %arg2[%415, %c0_155, %c0_156] : memref<50x1x128xbf16, #tpu.memory_space<vmem>>, vector<1x1x128xbf16>
    %417 = vector.shape_cast %416 : vector<1x1x128xbf16> to vector<1x128xbf16>
    %418 = arith.extf %417 : vector<1x128xbf16> to vector<1x128xf32>
    %c51 = arith.constant 51 : index
    %c0_157 = arith.constant 0 : index
    %419 = vector.load %arg8[%c51, %c0_157] : memref<128x128xf32, #tpu.memory_space<vmem>>, vector<1x128xf32>
    tpu.vector_store %arg8[%c51, %c0_157], %418 {strides = array<i32>} : memref<128x128xf32, #tpu.memory_space<vmem>>, vector<1x128xf32>,
    %c52_i32 = arith.constant 52 : i32
    %420 = arith.addi %3, %c52_i32 : i32
    %421 = arith.index_cast %420 : i32 to index
    %422 = memref.load %arg1[%421] : memref<128xi32, #tpu.memory_space<smem>>
    %423 = arith.index_cast %422 : i32 to index
    %c0_158 = arith.constant 0 : index
    %c0_159 = arith.constant 0 : index
    %424 = vector.load %arg2[%423, %c0_158, %c0_159] : memref<50x1x128xbf16, #tpu.memory_space<vmem>>, vector<1x1x128xbf16>
    %425 = vector.shape_cast %424 : vector<1x1x128xbf16> to vector<1x128xbf16>
    %426 = arith.extf %425 : vector<1x128xbf16> to vector<1x128xf32>
    %c52 = arith.constant 52 : index
    %c0_160 = arith.constant 0 : index
    %427 = vector.load %arg8[%c52, %c0_160] : memref<128x128xf32, #tpu.memory_space<vmem>>, vector<1x128xf32>
    tpu.vector_store %arg8[%c52, %c0_160], %426 {strides = array<i32>} : memref<128x128xf32, #tpu.memory_space<vmem>>, vector<1x128xf32>,
    %c53_i32 = arith.constant 53 : i32
    %428 = arith.addi %3, %c53_i32 : i32
    %429 = arith.index_cast %428 : i32 to index
    %430 = memref.load %arg1[%429] : memref<128xi32, #tpu.memory_space<smem>>
    %431 = arith.index_cast %430 : i32 to index
    %c0_161 = arith.constant 0 : index
    %c0_162 = arith.constant 0 : index
    %432 = vector.load %arg2[%431, %c0_161, %c0_162] : memref<50x1x128xbf16, #tpu.memory_space<vmem>>, vector<1x1x128xbf16>
    %433 = vector.shape_cast %432 : vector<1x1x128xbf16> to vector<1x128xbf16>
    %434 = arith.extf %433 : vector<1x128xbf16> to vector<1x128xf32>
    %c53 = arith.constant 53 : index
    %c0_163 = arith.constant 0 : index
    %435 = vector.load %arg8[%c53, %c0_163] : memref<128x128xf32, #tpu.memory_space<vmem>>, vector<1x128xf32>
    tpu.vector_store %arg8[%c53, %c0_163], %434 {strides = array<i32>} : memref<128x128xf32, #tpu.memory_space<vmem>>, vector<1x128xf32>,
    %c54_i32 = arith.constant 54 : i32
    %436 = arith.addi %3, %c54_i32 : i32
    %437 = arith.index_cast %436 : i32 to index
    %438 = memref.load %arg1[%437] : memref<128xi32, #tpu.memory_space<smem>>
    %439 = arith.index_cast %438 : i32 to index
    %c0_164 = arith.constant 0 : index
    %c0_165 = arith.constant 0 : index
    %440 = vector.load %arg2[%439, %c0_164, %c0_165] : memref<50x1x128xbf16, #tpu.memory_space<vmem>>, vector<1x1x128xbf16>
    %441 = vector.shape_cast %440 : vector<1x1x128xbf16> to vector<1x128xbf16>
    %442 = arith.extf %441 : vector<1x128xbf16> to vector<1x128xf32>
    %c54 = arith.constant 54 : index
    %c0_166 = arith.constant 0 : index
    %443 = vector.load %arg8[%c54, %c0_166] : memref<128x128xf32, #tpu.memory_space<vmem>>, vector<1x128xf32>
    tpu.vector_store %arg8[%c54, %c0_166], %442 {strides = array<i32>} : memref<128x128xf32, #tpu.memory_space<vmem>>, vector<1x128xf32>,
    %c55_i32 = arith.constant 55 : i32
    %444 = arith.addi %3, %c55_i32 : i32
    %445 = arith.index_cast %444 : i32 to index
    %446 = memref.load %arg1[%445] : memref<128xi32, #tpu.memory_space<smem>>
    %447 = arith.index_cast %446 : i32 to index
    %c0_167 = arith.constant 0 : index
    %c0_168 = arith.constant 0 : index
    %448 = vector.load %arg2[%447, %c0_167, %c0_168] : memref<50x1x128xbf16, #tpu.memory_space<vmem>>, vector<1x1x128xbf16>
    %449 = vector.shape_cast %448 : vector<1x1x128xbf16> to vector<1x128xbf16>
    %450 = arith.extf %449 : vector<1x128xbf16> to vector<1x128xf32>
    %c55 = arith.constant 55 : index
    %c0_169 = arith.constant 0 : index
    %451 = vector.load %arg8[%c55, %c0_169] : memref<128x128xf32, #tpu.memory_space<vmem>>, vector<1x128xf32>
    tpu.vector_store %arg8[%c55, %c0_169], %450 {strides = array<i32>} : memref<128x128xf32, #tpu.memory_space<vmem>>, vector<1x128xf32>,
    %c56_i32 = arith.constant 56 : i32
    %452 = arith.addi %3, %c56_i32 : i32
    %453 = arith.index_cast %452 : i32 to index
    %454 = memref.load %arg1[%453] : memref<128xi32, #tpu.memory_space<smem>>
    %455 = arith.index_cast %454 : i32 to index
    %c0_170 = arith.constant 0 : index
    %c0_171 = arith.constant 0 : index
    %456 = vector.load %arg2[%455, %c0_170, %c0_171] : memref<50x1x128xbf16, #tpu.memory_space<vmem>>, vector<1x1x128xbf16>
    %457 = vector.shape_cast %456 : vector<1x1x128xbf16> to vector<1x128xbf16>
    %458 = arith.extf %457 : vector<1x128xbf16> to vector<1x128xf32>
    %c56 = arith.constant 56 : index
    %c0_172 = arith.constant 0 : index
    %459 = vector.load %arg8[%c56, %c0_172] : memref<128x128xf32, #tpu.memory_space<vmem>>, vector<1x128xf32>
    tpu.vector_store %arg8[%c56, %c0_172], %458 {strides = array<i32>} : memref<128x128xf32, #tpu.memory_space<vmem>>, vector<1x128xf32>,
    %c57_i32 = arith.constant 57 : i32
    %460 = arith.addi %3, %c57_i32 : i32
    %461 = arith.index_cast %460 : i32 to index
    %462 = memref.load %arg1[%461] : memref<128xi32, #tpu.memory_space<smem>>
    %463 = arith.index_cast %462 : i32 to index
    %c0_173 = arith.constant 0 : index
    %c0_174 = arith.constant 0 : index
    %464 = vector.load %arg2[%463, %c0_173, %c0_174] : memref<50x1x128xbf16, #tpu.memory_space<vmem>>, vector<1x1x128xbf16>
    %465 = vector.shape_cast %464 : vector<1x1x128xbf16> to vector<1x128xbf16>
    %466 = arith.extf %465 : vector<1x128xbf16> to vector<1x128xf32>
    %c57 = arith.constant 57 : index
    %c0_175 = arith.constant 0 : index
    %467 = vector.load %arg8[%c57, %c0_175] : memref<128x128xf32, #tpu.memory_space<vmem>>, vector<1x128xf32>
    tpu.vector_store %arg8[%c57, %c0_175], %466 {strides = array<i32>} : memref<128x128xf32, #tpu.memory_space<vmem>>, vector<1x128xf32>,
    %c58_i32 = arith.constant 58 : i32
    %468 = arith.addi %3, %c58_i32 : i32
    %469 = arith.index_cast %468 : i32 to index
    %470 = memref.load %arg1[%469] : memref<128xi32, #tpu.memory_space<smem>>
    %471 = arith.index_cast %470 : i32 to index
    %c0_176 = arith.constant 0 : index
    %c0_177 = arith.constant 0 : index
    %472 = vector.load %arg2[%471, %c0_176, %c0_177] : memref<50x1x128xbf16, #tpu.memory_space<vmem>>, vector<1x1x128xbf16>
    %473 = vector.shape_cast %472 : vector<1x1x128xbf16> to vector<1x128xbf16>
    %474 = arith.extf %473 : vector<1x128xbf16> to vector<1x128xf32>
    %c58 = arith.constant 58 : index
    %c0_178 = arith.constant 0 : index
    %475 = vector.load %arg8[%c58, %c0_178] : memref<128x128xf32, #tpu.memory_space<vmem>>, vector<1x128xf32>
    tpu.vector_store %arg8[%c58, %c0_178], %474 {strides = array<i32>} : memref<128x128xf32, #tpu.memory_space<vmem>>, vector<1x128xf32>,
    %c59_i32 = arith.constant 59 : i32
    %476 = arith.addi %3, %c59_i32 : i32
    %477 = arith.index_cast %476 : i32 to index
    %478 = memref.load %arg1[%477] : memref<128xi32, #tpu.memory_space<smem>>
    %479 = arith.index_cast %478 : i32 to index
    %c0_179 = arith.constant 0 : index
    %c0_180 = arith.constant 0 : index
    %480 = vector.load %arg2[%479, %c0_179, %c0_180] : memref<50x1x128xbf16, #tpu.memory_space<vmem>>, vector<1x1x128xbf16>
    %481 = vector.shape_cast %480 : vector<1x1x128xbf16> to vector<1x128xbf16>
    %482 = arith.extf %481 : vector<1x128xbf16> to vector<1x128xf32>
    %c59 = arith.constant 59 : index
    %c0_181 = arith.constant 0 : index
    %483 = vector.load %arg8[%c59, %c0_181] : memref<128x128xf32, #tpu.memory_space<vmem>>, vector<1x128xf32>
    tpu.vector_store %arg8[%c59, %c0_181], %482 {strides = array<i32>} : memref<128x128xf32, #tpu.memory_space<vmem>>, vector<1x128xf32>,
    %c60_i32 = arith.constant 60 : i32
    %484 = arith.addi %3, %c60_i32 : i32
    %485 = arith.index_cast %484 : i32 to index
    %486 = memref.load %arg1[%485] : memref<128xi32, #tpu.memory_space<smem>>
    %487 = arith.index_cast %486 : i32 to index
    %c0_182 = arith.constant 0 : index
    %c0_183 = arith.constant 0 : index
    %488 = vector.load %arg2[%487, %c0_182, %c0_183] : memref<50x1x128xbf16, #tpu.memory_space<vmem>>, vector<1x1x128xbf16>
    %489 = vector.shape_cast %488 : vector<1x1x128xbf16> to vector<1x128xbf16>
    %490 = arith.extf %489 : vector<1x128xbf16> to vector<1x128xf32>
    %c60 = arith.constant 60 : index
    %c0_184 = arith.constant 0 : index
    %491 = vector.load %arg8[%c60, %c0_184] : memref<128x128xf32, #tpu.memory_space<vmem>>, vector<1x128xf32>
    tpu.vector_store %arg8[%c60, %c0_184], %490 {strides = array<i32>} : memref<128x128xf32, #tpu.memory_space<vmem>>, vector<1x128xf32>,
    %c61_i32 = arith.constant 61 : i32
    %492 = arith.addi %3, %c61_i32 : i32
    %493 = arith.index_cast %492 : i32 to index
    %494 = memref.load %arg1[%493] : memref<128xi32, #tpu.memory_space<smem>>
    %495 = arith.index_cast %494 : i32 to index
    %c0_185 = arith.constant 0 : index
    %c0_186 = arith.constant 0 : index
    %496 = vector.load %arg2[%495, %c0_185, %c0_186] : memref<50x1x128xbf16, #tpu.memory_space<vmem>>, vector<1x1x128xbf16>
    %497 = vector.shape_cast %496 : vector<1x1x128xbf16> to vector<1x128xbf16>
    %498 = arith.extf %497 : vector<1x128xbf16> to vector<1x128xf32>
    %c61 = arith.constant 61 : index
    %c0_187 = arith.constant 0 : index
    %499 = vector.load %arg8[%c61, %c0_187] : memref<128x128xf32, #tpu.memory_space<vmem>>, vector<1x128xf32>
    tpu.vector_store %arg8[%c61, %c0_187], %498 {strides = array<i32>} : memref<128x128xf32, #tpu.memory_space<vmem>>, vector<1x128xf32>,
    %c62_i32 = arith.constant 62 : i32
    %500 = arith.addi %3, %c62_i32 : i32
    %501 = arith.index_cast %500 : i32 to index
    %502 = memref.load %arg1[%501] : memref<128xi32, #tpu.memory_space<smem>>
    %503 = arith.index_cast %502 : i32 to index
    %c0_188 = arith.constant 0 : index
    %c0_189 = arith.constant 0 : index
    %504 = vector.load %arg2[%503, %c0_188, %c0_189] : memref<50x1x128xbf16, #tpu.memory_space<vmem>>, vector<1x1x128xbf16>
    %505 = vector.shape_cast %504 : vector<1x1x128xbf16> to vector<1x128xbf16>
    %506 = arith.extf %505 : vector<1x128xbf16> to vector<1x128xf32>
    %c62 = arith.constant 62 : index
    %c0_190 = arith.constant 0 : index
    %507 = vector.load %arg8[%c62, %c0_190] : memref<128x128xf32, #tpu.memory_space<vmem>>, vector<1x128xf32>
    tpu.vector_store %arg8[%c62, %c0_190], %506 {strides = array<i32>} : memref<128x128xf32, #tpu.memory_space<vmem>>, vector<1x128xf32>,
    %c63_i32 = arith.constant 63 : i32
    %508 = arith.addi %3, %c63_i32 : i32
    %509 = arith.index_cast %508 : i32 to index
    %510 = memref.load %arg1[%509] : memref<128xi32, #tpu.memory_space<smem>>
    %511 = arith.index_cast %510 : i32 to index
    %c0_191 = arith.constant 0 : index
    %c0_192 = arith.constant 0 : index
    %512 = vector.load %arg2[%511, %c0_191, %c0_192] : memref<50x1x128xbf16, #tpu.memory_space<vmem>>, vector<1x1x128xbf16>
    %513 = vector.shape_cast %512 : vector<1x1x128xbf16> to vector<1x128xbf16>
    %514 = arith.extf %513 : vector<1x128xbf16> to vector<1x128xf32>
    %c63 = arith.constant 63 : index
    %c0_193 = arith.constant 0 : index
    %515 = vector.load %arg8[%c63, %c0_193] : memref<128x128xf32, #tpu.memory_space<vmem>>, vector<1x128xf32>
    tpu.vector_store %arg8[%c63, %c0_193], %514 {strides = array<i32>} : memref<128x128xf32, #tpu.memory_space<vmem>>, vector<1x128xf32>,
    %c64_i32 = arith.constant 64 : i32
    %516 = arith.addi %3, %c64_i32 : i32
    %517 = arith.index_cast %516 : i32 to index
    %518 = memref.load %arg1[%517] : memref<128xi32, #tpu.memory_space<smem>>
    %519 = arith.index_cast %518 : i32 to index
    %c0_194 = arith.constant 0 : index
    %c0_195 = arith.constant 0 : index
    %520 = vector.load %arg2[%519, %c0_194, %c0_195] : memref<50x1x128xbf16, #tpu.memory_space<vmem>>, vector<1x1x128xbf16>
    %521 = vector.shape_cast %520 : vector<1x1x128xbf16> to vector<1x128xbf16>
    %522 = arith.extf %521 : vector<1x128xbf16> to vector<1x128xf32>
    %c64 = arith.constant 64 : index
    %c0_196 = arith.constant 0 : index
    %523 = vector.load %arg8[%c64, %c0_196] : memref<128x128xf32, #tpu.memory_space<vmem>>, vector<1x128xf32>
    tpu.vector_store %arg8[%c64, %c0_196], %522 {strides = array<i32>} : memref<128x128xf32, #tpu.memory_space<vmem>>, vector<1x128xf32>,
    %c65_i32 = arith.constant 65 : i32
    %524 = arith.addi %3, %c65_i32 : i32
    %525 = arith.index_cast %524 : i32 to index
    %526 = memref.load %arg1[%525] : memref<128xi32, #tpu.memory_space<smem>>
    %527 = arith.index_cast %526 : i32 to index
    %c0_197 = arith.constant 0 : index
    %c0_198 = arith.constant 0 : index
    %528 = vector.load %arg2[%527, %c0_197, %c0_198] : memref<50x1x128xbf16, #tpu.memory_space<vmem>>, vector<1x1x128xbf16>
    %529 = vector.shape_cast %528 : vector<1x1x128xbf16> to vector<1x128xbf16>
    %530 = arith.extf %529 : vector<1x128xbf16> to vector<1x128xf32>
    %c65 = arith.constant 65 : index
    %c0_199 = arith.constant 0 : index
    %531 = vector.load %arg8[%c65, %c0_199] : memref<128x128xf32, #tpu.memory_space<vmem>>, vector<1x128xf32>
    tpu.vector_store %arg8[%c65, %c0_199], %530 {strides = array<i32>} : memref<128x128xf32, #tpu.memory_space<vmem>>, vector<1x128xf32>,
    %c66_i32 = arith.constant 66 : i32
    %532 = arith.addi %3, %c66_i32 : i32
    %533 = arith.index_cast %532 : i32 to index
    %534 = memref.load %arg1[%533] : memref<128xi32, #tpu.memory_space<smem>>
    %535 = arith.index_cast %534 : i32 to index
    %c0_200 = arith.constant 0 : index
    %c0_201 = arith.constant 0 : index
    %536 = vector.load %arg2[%535, %c0_200, %c0_201] : memref<50x1x128xbf16, #tpu.memory_space<vmem>>, vector<1x1x128xbf16>
    %537 = vector.shape_cast %536 : vector<1x1x128xbf16> to vector<1x128xbf16>
    %538 = arith.extf %537 : vector<1x128xbf16> to vector<1x128xf32>
    %c66 = arith.constant 66 : index
    %c0_202 = arith.constant 0 : index
    %539 = vector.load %arg8[%c66, %c0_202] : memref<128x128xf32, #tpu.memory_space<vmem>>, vector<1x128xf32>
    tpu.vector_store %arg8[%c66, %c0_202], %538 {strides = array<i32>} : memref<128x128xf32, #tpu.memory_space<vmem>>, vector<1x128xf32>,
    %c67_i32 = arith.constant 67 : i32
    %540 = arith.addi %3, %c67_i32 : i32
    %541 = arith.index_cast %540 : i32 to index
    %542 = memref.load %arg1[%541] : memref<128xi32, #tpu.memory_space<smem>>
    %543 = arith.index_cast %542 : i32 to index
    %c0_203 = arith.constant 0 : index
    %c0_204 = arith.constant 0 : index
    %544 = vector.load %arg2[%543, %c0_203, %c0_204] : memref<50x1x128xbf16, #tpu.memory_space<vmem>>, vector<1x1x128xbf16>
    %545 = vector.shape_cast %544 : vector<1x1x128xbf16> to vector<1x128xbf16>
    %546 = arith.extf %545 : vector<1x128xbf16> to vector<1x128xf32>
    %c67 = arith.constant 67 : index
    %c0_205 = arith.constant 0 : index
    %547 = vector.load %arg8[%c67, %c0_205] : memref<128x128xf32, #tpu.memory_space<vmem>>, vector<1x128xf32>
    tpu.vector_store %arg8[%c67, %c0_205], %546 {strides = array<i32>} : memref<128x128xf32, #tpu.memory_space<vmem>>, vector<1x128xf32>,
    %c68_i32 = arith.constant 68 : i32
    %548 = arith.addi %3, %c68_i32 : i32
    %549 = arith.index_cast %548 : i32 to index
    %550 = memref.load %arg1[%549] : memref<128xi32, #tpu.memory_space<smem>>
    %551 = arith.index_cast %550 : i32 to index
    %c0_206 = arith.constant 0 : index
    %c0_207 = arith.constant 0 : index
    %552 = vector.load %arg2[%551, %c0_206, %c0_207] : memref<50x1x128xbf16, #tpu.memory_space<vmem>>, vector<1x1x128xbf16>
    %553 = vector.shape_cast %552 : vector<1x1x128xbf16> to vector<1x128xbf16>
    %554 = arith.extf %553 : vector<1x128xbf16> to vector<1x128xf32>
    %c68 = arith.constant 68 : index
    %c0_208 = arith.constant 0 : index
    %555 = vector.load %arg8[%c68, %c0_208] : memref<128x128xf32, #tpu.memory_space<vmem>>, vector<1x128xf32>
    tpu.vector_store %arg8[%c68, %c0_208], %554 {strides = array<i32>} : memref<128x128xf32, #tpu.memory_space<vmem>>, vector<1x128xf32>,
    %c69_i32 = arith.constant 69 : i32
    %556 = arith.addi %3, %c69_i32 : i32
    %557 = arith.index_cast %556 : i32 to index
    %558 = memref.load %arg1[%557] : memref<128xi32, #tpu.memory_space<smem>>
    %559 = arith.index_cast %558 : i32 to index
    %c0_209 = arith.constant 0 : index
    %c0_210 = arith.constant 0 : index
    %560 = vector.load %arg2[%559, %c0_209, %c0_210] : memref<50x1x128xbf16, #tpu.memory_space<vmem>>, vector<1x1x128xbf16>
    %561 = vector.shape_cast %560 : vector<1x1x128xbf16> to vector<1x128xbf16>
    %562 = arith.extf %561 : vector<1x128xbf16> to vector<1x128xf32>
    %c69 = arith.constant 69 : index
    %c0_211 = arith.constant 0 : index
    %563 = vector.load %arg8[%c69, %c0_211] : memref<128x128xf32, #tpu.memory_space<vmem>>, vector<1x128xf32>
    tpu.vector_store %arg8[%c69, %c0_211], %562 {strides = array<i32>} : memref<128x128xf32, #tpu.memory_space<vmem>>, vector<1x128xf32>,
    %c70_i32 = arith.constant 70 : i32
    %564 = arith.addi %3, %c70_i32 : i32
    %565 = arith.index_cast %564 : i32 to index
    %566 = memref.load %arg1[%565] : memref<128xi32, #tpu.memory_space<smem>>
    %567 = arith.index_cast %566 : i32 to index
    %c0_212 = arith.constant 0 : index
    %c0_213 = arith.constant 0 : index
    %568 = vector.load %arg2[%567, %c0_212, %c0_213] : memref<50x1x128xbf16, #tpu.memory_space<vmem>>, vector<1x1x128xbf16>
    %569 = vector.shape_cast %568 : vector<1x1x128xbf16> to vector<1x128xbf16>
    %570 = arith.extf %569 : vector<1x128xbf16> to vector<1x128xf32>
    %c70 = arith.constant 70 : index
    %c0_214 = arith.constant 0 : index
    %571 = vector.load %arg8[%c70, %c0_214] : memref<128x128xf32, #tpu.memory_space<vmem>>, vector<1x128xf32>
    tpu.vector_store %arg8[%c70, %c0_214], %570 {strides = array<i32>} : memref<128x128xf32, #tpu.memory_space<vmem>>, vector<1x128xf32>,
    %c71_i32 = arith.constant 71 : i32
    %572 = arith.addi %3, %c71_i32 : i32
    %573 = arith.index_cast %572 : i32 to index
    %574 = memref.load %arg1[%573] : memref<128xi32, #tpu.memory_space<smem>>
    %575 = arith.index_cast %574 : i32 to index
    %c0_215 = arith.constant 0 : index
    %c0_216 = arith.constant 0 : index
    %576 = vector.load %arg2[%575, %c0_215, %c0_216] : memref<50x1x128xbf16, #tpu.memory_space<vmem>>, vector<1x1x128xbf16>
    %577 = vector.shape_cast %576 : vector<1x1x128xbf16> to vector<1x128xbf16>
    %578 = arith.extf %577 : vector<1x128xbf16> to vector<1x128xf32>
    %c71 = arith.constant 71 : index
    %c0_217 = arith.constant 0 : index
    %579 = vector.load %arg8[%c71, %c0_217] : memref<128x128xf32, #tpu.memory_space<vmem>>, vector<1x128xf32>
    tpu.vector_store %arg8[%c71, %c0_217], %578 {strides = array<i32>} : memref<128x128xf32, #tpu.memory_space<vmem>>, vector<1x128xf32>,
    %c72_i32 = arith.constant 72 : i32
    %580 = arith.addi %3, %c72_i32 : i32
    %581 = arith.index_cast %580 : i32 to index
    %582 = memref.load %arg1[%581] : memref<128xi32, #tpu.memory_space<smem>>
    %583 = arith.index_cast %582 : i32 to index
    %c0_218 = arith.constant 0 : index
    %c0_219 = arith.constant 0 : index
    %584 = vector.load %arg2[%583, %c0_218, %c0_219] : memref<50x1x128xbf16, #tpu.memory_space<vmem>>, vector<1x1x128xbf16>
    %585 = vector.shape_cast %584 : vector<1x1x128xbf16> to vector<1x128xbf16>
    %586 = arith.extf %585 : vector<1x128xbf16> to vector<1x128xf32>
    %c72 = arith.constant 72 : index
    %c0_220 = arith.constant 0 : index
    %587 = vector.load %arg8[%c72, %c0_220] : memref<128x128xf32, #tpu.memory_space<vmem>>, vector<1x128xf32>
    tpu.vector_store %arg8[%c72, %c0_220], %586 {strides = array<i32>} : memref<128x128xf32, #tpu.memory_space<vmem>>, vector<1x128xf32>,
    %c73_i32 = arith.constant 73 : i32
    %588 = arith.addi %3, %c73_i32 : i32
    %589 = arith.index_cast %588 : i32 to index
    %590 = memref.load %arg1[%589] : memref<128xi32, #tpu.memory_space<smem>>
    %591 = arith.index_cast %590 : i32 to index
    %c0_221 = arith.constant 0 : index
    %c0_222 = arith.constant 0 : index
    %592 = vector.load %arg2[%591, %c0_221, %c0_222] : memref<50x1x128xbf16, #tpu.memory_space<vmem>>, vector<1x1x128xbf16>
    %593 = vector.shape_cast %592 : vector<1x1x128xbf16> to vector<1x128xbf16>
    %594 = arith.extf %593 : vector<1x128xbf16> to vector<1x128xf32>
    %c73 = arith.constant 73 : index
    %c0_223 = arith.constant 0 : index
    %595 = vector.load %arg8[%c73, %c0_223] : memref<128x128xf32, #tpu.memory_space<vmem>>, vector<1x128xf32>
    tpu.vector_store %arg8[%c73, %c0_223], %594 {strides = array<i32>} : memref<128x128xf32, #tpu.memory_space<vmem>>, vector<1x128xf32>,
    %c74_i32 = arith.constant 74 : i32
    %596 = arith.addi %3, %c74_i32 : i32
    %597 = arith.index_cast %596 : i32 to index
    %598 = memref.load %arg1[%597] : memref<128xi32, #tpu.memory_space<smem>>
    %599 = arith.index_cast %598 : i32 to index
    %c0_224 = arith.constant 0 : index
    %c0_225 = arith.constant 0 : index
    %600 = vector.load %arg2[%599, %c0_224, %c0_225] : memref<50x1x128xbf16, #tpu.memory_space<vmem>>, vector<1x1x128xbf16>
    %601 = vector.shape_cast %600 : vector<1x1x128xbf16> to vector<1x128xbf16>
    %602 = arith.extf %601 : vector<1x128xbf16> to vector<1x128xf32>
    %c74 = arith.constant 74 : index
    %c0_226 = arith.constant 0 : index
    %603 = vector.load %arg8[%c74, %c0_226] : memref<128x128xf32, #tpu.memory_space<vmem>>, vector<1x128xf32>
    tpu.vector_store %arg8[%c74, %c0_226], %602 {strides = array<i32>} : memref<128x128xf32, #tpu.memory_space<vmem>>, vector<1x128xf32>,
    %c75_i32 = arith.constant 75 : i32
    %604 = arith.addi %3, %c75_i32 : i32
    %605 = arith.index_cast %604 : i32 to index
    %606 = memref.load %arg1[%605] : memref<128xi32, #tpu.memory_space<smem>>
    %607 = arith.index_cast %606 : i32 to index
    %c0_227 = arith.constant 0 : index
    %c0_228 = arith.constant 0 : index
    %608 = vector.load %arg2[%607, %c0_227, %c0_228] : memref<50x1x128xbf16, #tpu.memory_space<vmem>>, vector<1x1x128xbf16>
    %609 = vector.shape_cast %608 : vector<1x1x128xbf16> to vector<1x128xbf16>
    %610 = arith.extf %609 : vector<1x128xbf16> to vector<1x128xf32>
    %c75 = arith.constant 75 : index
    %c0_229 = arith.constant 0 : index
    %611 = vector.load %arg8[%c75, %c0_229] : memref<128x128xf32, #tpu.memory_space<vmem>>, vector<1x128xf32>
    tpu.vector_store %arg8[%c75, %c0_229], %610 {strides = array<i32>} : memref<128x128xf32, #tpu.memory_space<vmem>>, vector<1x128xf32>,
    %c76_i32 = arith.constant 76 : i32
    %612 = arith.addi %3, %c76_i32 : i32
    %613 = arith.index_cast %612 : i32 to index
    %614 = memref.load %arg1[%613] : memref<128xi32, #tpu.memory_space<smem>>
    %615 = arith.index_cast %614 : i32 to index
    %c0_230 = arith.constant 0 : index
    %c0_231 = arith.constant 0 : index
    %616 = vector.load %arg2[%615, %c0_230, %c0_231] : memref<50x1x128xbf16, #tpu.memory_space<vmem>>, vector<1x1x128xbf16>
    %617 = vector.shape_cast %616 : vector<1x1x128xbf16> to vector<1x128xbf16>
    %618 = arith.extf %617 : vector<1x128xbf16> to vector<1x128xf32>
    %c76 = arith.constant 76 : index
    %c0_232 = arith.constant 0 : index
    %619 = vector.load %arg8[%c76, %c0_232] : memref<128x128xf32, #tpu.memory_space<vmem>>, vector<1x128xf32>
    tpu.vector_store %arg8[%c76, %c0_232], %618 {strides = array<i32>} : memref<128x128xf32, #tpu.memory_space<vmem>>, vector<1x128xf32>,
    %c77_i32 = arith.constant 77 : i32
    %620 = arith.addi %3, %c77_i32 : i32
    %621 = arith.index_cast %620 : i32 to index
    %622 = memref.load %arg1[%621] : memref<128xi32, #tpu.memory_space<smem>>
    %623 = arith.index_cast %622 : i32 to index
    %c0_233 = arith.constant 0 : index
    %c0_234 = arith.constant 0 : index
    %624 = vector.load %arg2[%623, %c0_233, %c0_234] : memref<50x1x128xbf16, #tpu.memory_space<vmem>>, vector<1x1x128xbf16>
    %625 = vector.shape_cast %624 : vector<1x1x128xbf16> to vector<1x128xbf16>
    %626 = arith.extf %625 : vector<1x128xbf16> to vector<1x128xf32>
    %c77 = arith.constant 77 : index
    %c0_235 = arith.constant 0 : index
    %627 = vector.load %arg8[%c77, %c0_235] : memref<128x128xf32, #tpu.memory_space<vmem>>, vector<1x128xf32>
    tpu.vector_store %arg8[%c77, %c0_235], %626 {strides = array<i32>} : memref<128x128xf32, #tpu.memory_space<vmem>>, vector<1x128xf32>,
    %c78_i32 = arith.constant 78 : i32
    %628 = arith.addi %3, %c78_i32 : i32
    %629 = arith.index_cast %628 : i32 to index
    %630 = memref.load %arg1[%629] : memref<128xi32, #tpu.memory_space<smem>>
    %631 = arith.index_cast %630 : i32 to index
    %c0_236 = arith.constant 0 : index
    %c0_237 = arith.constant 0 : index
    %632 = vector.load %arg2[%631, %c0_236, %c0_237] : memref<50x1x128xbf16, #tpu.memory_space<vmem>>, vector<1x1x128xbf16>
    %633 = vector.shape_cast %632 : vector<1x1x128xbf16> to vector<1x128xbf16>
    %634 = arith.extf %633 : vector<1x128xbf16> to vector<1x128xf32>
    %c78 = arith.constant 78 : index
    %c0_238 = arith.constant 0 : index
    %635 = vector.load %arg8[%c78, %c0_238] : memref<128x128xf32, #tpu.memory_space<vmem>>, vector<1x128xf32>
    tpu.vector_store %arg8[%c78, %c0_238], %634 {strides = array<i32>} : memref<128x128xf32, #tpu.memory_space<vmem>>, vector<1x128xf32>,
    %c79_i32 = arith.constant 79 : i32
    %636 = arith.addi %3, %c79_i32 : i32
    %637 = arith.index_cast %636 : i32 to index
    %638 = memref.load %arg1[%637] : memref<128xi32, #tpu.memory_space<smem>>
    %639 = arith.index_cast %638 : i32 to index
    %c0_239 = arith.constant 0 : index
    %c0_240 = arith.constant 0 : index
    %640 = vector.load %arg2[%639, %c0_239, %c0_240] : memref<50x1x128xbf16, #tpu.memory_space<vmem>>, vector<1x1x128xbf16>
    %641 = vector.shape_cast %640 : vector<1x1x128xbf16> to vector<1x128xbf16>
    %642 = arith.extf %641 : vector<1x128xbf16> to vector<1x128xf32>
    %c79 = arith.constant 79 : index
    %c0_241 = arith.constant 0 : index
    %643 = vector.load %arg8[%c79, %c0_241] : memref<128x128xf32, #tpu.memory_space<vmem>>, vector<1x128xf32>
    tpu.vector_store %arg8[%c79, %c0_241], %642 {strides = array<i32>} : memref<128x128xf32, #tpu.memory_space<vmem>>, vector<1x128xf32>,
    %c80_i32 = arith.constant 80 : i32
    %644 = arith.addi %3, %c80_i32 : i32
    %645 = arith.index_cast %644 : i32 to index
    %646 = memref.load %arg1[%645] : memref<128xi32, #tpu.memory_space<smem>>
    %647 = arith.index_cast %646 : i32 to index
    %c0_242 = arith.constant 0 : index
    %c0_243 = arith.constant 0 : index
    %648 = vector.load %arg2[%647, %c0_242, %c0_243] : memref<50x1x128xbf16, #tpu.memory_space<vmem>>, vector<1x1x128xbf16>
    %649 = vector.shape_cast %648 : vector<1x1x128xbf16> to vector<1x128xbf16>
    %650 = arith.extf %649 : vector<1x128xbf16> to vector<1x128xf32>
    %c80 = arith.constant 80 : index
    %c0_244 = arith.constant 0 : index
    %651 = vector.load %arg8[%c80, %c0_244] : memref<128x128xf32, #tpu.memory_space<vmem>>, vector<1x128xf32>
    tpu.vector_store %arg8[%c80, %c0_244], %650 {strides = array<i32>} : memref<128x128xf32, #tpu.memory_space<vmem>>, vector<1x128xf32>,
    %c81_i32 = arith.constant 81 : i32
    %652 = arith.addi %3, %c81_i32 : i32
    %653 = arith.index_cast %652 : i32 to index
    %654 = memref.load %arg1[%653] : memref<128xi32, #tpu.memory_space<smem>>
    %655 = arith.index_cast %654 : i32 to index
    %c0_245 = arith.constant 0 : index
    %c0_246 = arith.constant 0 : index
    %656 = vector.load %arg2[%655, %c0_245, %c0_246] : memref<50x1x128xbf16, #tpu.memory_space<vmem>>, vector<1x1x128xbf16>
    %657 = vector.shape_cast %656 : vector<1x1x128xbf16> to vector<1x128xbf16>
    %658 = arith.extf %657 : vector<1x128xbf16> to vector<1x128xf32>
    %c81 = arith.constant 81 : index
    %c0_247 = arith.constant 0 : index
    %659 = vector.load %arg8[%c81, %c0_247] : memref<128x128xf32, #tpu.memory_space<vmem>>, vector<1x128xf32>
    tpu.vector_store %arg8[%c81, %c0_247], %658 {strides = array<i32>} : memref<128x128xf32, #tpu.memory_space<vmem>>, vector<1x128xf32>,
    %c82_i32 = arith.constant 82 : i32
    %660 = arith.addi %3, %c82_i32 : i32
    %661 = arith.index_cast %660 : i32 to index
    %662 = memref.load %arg1[%661] : memref<128xi32, #tpu.memory_space<smem>>
    %663 = arith.index_cast %662 : i32 to index
    %c0_248 = arith.constant 0 : index
    %c0_249 = arith.constant 0 : index
    %664 = vector.load %arg2[%663, %c0_248, %c0_249] : memref<50x1x128xbf16, #tpu.memory_space<vmem>>, vector<1x1x128xbf16>
    %665 = vector.shape_cast %664 : vector<1x1x128xbf16> to vector<1x128xbf16>
    %666 = arith.extf %665 : vector<1x128xbf16> to vector<1x128xf32>
    %c82 = arith.constant 82 : index
    %c0_250 = arith.constant 0 : index
    %667 = vector.load %arg8[%c82, %c0_250] : memref<128x128xf32, #tpu.memory_space<vmem>>, vector<1x128xf32>
    tpu.vector_store %arg8[%c82, %c0_250], %666 {strides = array<i32>} : memref<128x128xf32, #tpu.memory_space<vmem>>, vector<1x128xf32>,
    %c83_i32 = arith.constant 83 : i32
    %668 = arith.addi %3, %c83_i32 : i32
    %669 = arith.index_cast %668 : i32 to index
    %670 = memref.load %arg1[%669] : memref<128xi32, #tpu.memory_space<smem>>
    %671 = arith.index_cast %670 : i32 to index
    %c0_251 = arith.constant 0 : index
    %c0_252 = arith.constant 0 : index
    %672 = vector.load %arg2[%671, %c0_251, %c0_252] : memref<50x1x128xbf16, #tpu.memory_space<vmem>>, vector<1x1x128xbf16>
    %673 = vector.shape_cast %672 : vector<1x1x128xbf16> to vector<1x128xbf16>
    %674 = arith.extf %673 : vector<1x128xbf16> to vector<1x128xf32>
    %c83 = arith.constant 83 : index
    %c0_253 = arith.constant 0 : index
    %675 = vector.load %arg8[%c83, %c0_253] : memref<128x128xf32, #tpu.memory_space<vmem>>, vector<1x128xf32>
    tpu.vector_store %arg8[%c83, %c0_253], %674 {strides = array<i32>} : memref<128x128xf32, #tpu.memory_space<vmem>>, vector<1x128xf32>,
    %c84_i32 = arith.constant 84 : i32
    %676 = arith.addi %3, %c84_i32 : i32
    %677 = arith.index_cast %676 : i32 to index
    %678 = memref.load %arg1[%677] : memref<128xi32, #tpu.memory_space<smem>>
    %679 = arith.index_cast %678 : i32 to index
    %c0_254 = arith.constant 0 : index
    %c0_255 = arith.constant 0 : index
    %680 = vector.load %arg2[%679, %c0_254, %c0_255] : memref<50x1x128xbf16, #tpu.memory_space<vmem>>, vector<1x1x128xbf16>
    %681 = vector.shape_cast %680 : vector<1x1x128xbf16> to vector<1x128xbf16>
    %682 = arith.extf %681 : vector<1x128xbf16> to vector<1x128xf32>
    %c84 = arith.constant 84 : index
    %c0_256 = arith.constant 0 : index
    %683 = vector.load %arg8[%c84, %c0_256] : memref<128x128xf32, #tpu.memory_space<vmem>>, vector<1x128xf32>
    tpu.vector_store %arg8[%c84, %c0_256], %682 {strides = array<i32>} : memref<128x128xf32, #tpu.memory_space<vmem>>, vector<1x128xf32>,
    %c85_i32 = arith.constant 85 : i32
    %684 = arith.addi %3, %c85_i32 : i32
    %685 = arith.index_cast %684 : i32 to index
    %686 = memref.load %arg1[%685] : memref<128xi32, #tpu.memory_space<smem>>
    %687 = arith.index_cast %686 : i32 to index
    %c0_257 = arith.constant 0 : index
    %c0_258 = arith.constant 0 : index
    %688 = vector.load %arg2[%687, %c0_257, %c0_258] : memref<50x1x128xbf16, #tpu.memory_space<vmem>>, vector<1x1x128xbf16>
    %689 = vector.shape_cast %688 : vector<1x1x128xbf16> to vector<1x128xbf16>
    %690 = arith.extf %689 : vector<1x128xbf16> to vector<1x128xf32>
    %c85 = arith.constant 85 : index
    %c0_259 = arith.constant 0 : index
    %691 = vector.load %arg8[%c85, %c0_259] : memref<128x128xf32, #tpu.memory_space<vmem>>, vector<1x128xf32>
    tpu.vector_store %arg8[%c85, %c0_259], %690 {strides = array<i32>} : memref<128x128xf32, #tpu.memory_space<vmem>>, vector<1x128xf32>,
    %c86_i32 = arith.constant 86 : i32
    %692 = arith.addi %3, %c86_i32 : i32
    %693 = arith.index_cast %692 : i32 to index
    %694 = memref.load %arg1[%693] : memref<128xi32, #tpu.memory_space<smem>>
    %695 = arith.index_cast %694 : i32 to index
    %c0_260 = arith.constant 0 : index
    %c0_261 = arith.constant 0 : index
    %696 = vector.load %arg2[%695, %c0_260, %c0_261] : memref<50x1x128xbf16, #tpu.memory_space<vmem>>, vector<1x1x128xbf16>
    %697 = vector.shape_cast %696 : vector<1x1x128xbf16> to vector<1x128xbf16>
    %698 = arith.extf %697 : vector<1x128xbf16> to vector<1x128xf32>
    %c86 = arith.constant 86 : index
    %c0_262 = arith.constant 0 : index
    %699 = vector.load %arg8[%c86, %c0_262] : memref<128x128xf32, #tpu.memory_space<vmem>>, vector<1x128xf32>
    tpu.vector_store %arg8[%c86, %c0_262], %698 {strides = array<i32>} : memref<128x128xf32, #tpu.memory_space<vmem>>, vector<1x128xf32>,
    %c87_i32 = arith.constant 87 : i32
    %700 = arith.addi %3, %c87_i32 : i32
    %701 = arith.index_cast %700 : i32 to index
    %702 = memref.load %arg1[%701] : memref<128xi32, #tpu.memory_space<smem>>
    %703 = arith.index_cast %702 : i32 to index
    %c0_263 = arith.constant 0 : index
    %c0_264 = arith.constant 0 : index
    %704 = vector.load %arg2[%703, %c0_263, %c0_264] : memref<50x1x128xbf16, #tpu.memory_space<vmem>>, vector<1x1x128xbf16>
    %705 = vector.shape_cast %704 : vector<1x1x128xbf16> to vector<1x128xbf16>
    %706 = arith.extf %705 : vector<1x128xbf16> to vector<1x128xf32>
    %c87 = arith.constant 87 : index
    %c0_265 = arith.constant 0 : index
    %707 = vector.load %arg8[%c87, %c0_265] : memref<128x128xf32, #tpu.memory_space<vmem>>, vector<1x128xf32>
    tpu.vector_store %arg8[%c87, %c0_265], %706 {strides = array<i32>} : memref<128x128xf32, #tpu.memory_space<vmem>>, vector<1x128xf32>,
    %c88_i32 = arith.constant 88 : i32
    %708 = arith.addi %3, %c88_i32 : i32
    %709 = arith.index_cast %708 : i32 to index
    %710 = memref.load %arg1[%709] : memref<128xi32, #tpu.memory_space<smem>>
    %711 = arith.index_cast %710 : i32 to index
    %c0_266 = arith.constant 0 : index
    %c0_267 = arith.constant 0 : index
    %712 = vector.load %arg2[%711, %c0_266, %c0_267] : memref<50x1x128xbf16, #tpu.memory_space<vmem>>, vector<1x1x128xbf16>
    %713 = vector.shape_cast %712 : vector<1x1x128xbf16> to vector<1x128xbf16>
    %714 = arith.extf %713 : vector<1x128xbf16> to vector<1x128xf32>
    %c88 = arith.constant 88 : index
    %c0_268 = arith.constant 0 : index
    %715 = vector.load %arg8[%c88, %c0_268] : memref<128x128xf32, #tpu.memory_space<vmem>>, vector<1x128xf32>
    tpu.vector_store %arg8[%c88, %c0_268], %714 {strides = array<i32>} : memref<128x128xf32, #tpu.memory_space<vmem>>, vector<1x128xf32>,
    %c89_i32 = arith.constant 89 : i32
    %716 = arith.addi %3, %c89_i32 : i32
    %717 = arith.index_cast %716 : i32 to index
    %718 = memref.load %arg1[%717] : memref<128xi32, #tpu.memory_space<smem>>
    %719 = arith.index_cast %718 : i32 to index
    %c0_269 = arith.constant 0 : index
    %c0_270 = arith.constant 0 : index
    %720 = vector.load %arg2[%719, %c0_269, %c0_270] : memref<50x1x128xbf16, #tpu.memory_space<vmem>>, vector<1x1x128xbf16>
    %721 = vector.shape_cast %720 : vector<1x1x128xbf16> to vector<1x128xbf16>
    %722 = arith.extf %721 : vector<1x128xbf16> to vector<1x128xf32>
    %c89 = arith.constant 89 : index
    %c0_271 = arith.constant 0 : index
    %723 = vector.load %arg8[%c89, %c0_271] : memref<128x128xf32, #tpu.memory_space<vmem>>, vector<1x128xf32>
    tpu.vector_store %arg8[%c89, %c0_271], %722 {strides = array<i32>} : memref<128x128xf32, #tpu.memory_space<vmem>>, vector<1x128xf32>,
    %c90_i32 = arith.constant 90 : i32
    %724 = arith.addi %3, %c90_i32 : i32
    %725 = arith.index_cast %724 : i32 to index
    %726 = memref.load %arg1[%725] : memref<128xi32, #tpu.memory_space<smem>>
    %727 = arith.index_cast %726 : i32 to index
    %c0_272 = arith.constant 0 : index
    %c0_273 = arith.constant 0 : index
    %728 = vector.load %arg2[%727, %c0_272, %c0_273] : memref<50x1x128xbf16, #tpu.memory_space<vmem>>, vector<1x1x128xbf16>
    %729 = vector.shape_cast %728 : vector<1x1x128xbf16> to vector<1x128xbf16>
    %730 = arith.extf %729 : vector<1x128xbf16> to vector<1x128xf32>
    %c90 = arith.constant 90 : index
    %c0_274 = arith.constant 0 : index
    %731 = vector.load %arg8[%c90, %c0_274] : memref<128x128xf32, #tpu.memory_space<vmem>>, vector<1x128xf32>
    tpu.vector_store %arg8[%c90, %c0_274], %730 {strides = array<i32>} : memref<128x128xf32, #tpu.memory_space<vmem>>, vector<1x128xf32>,
    %c91_i32 = arith.constant 91 : i32
    %732 = arith.addi %3, %c91_i32 : i32
    %733 = arith.index_cast %732 : i32 to index
    %734 = memref.load %arg1[%733] : memref<128xi32, #tpu.memory_space<smem>>
    %735 = arith.index_cast %734 : i32 to index
    %c0_275 = arith.constant 0 : index
    %c0_276 = arith.constant 0 : index
    %736 = vector.load %arg2[%735, %c0_275, %c0_276] : memref<50x1x128xbf16, #tpu.memory_space<vmem>>, vector<1x1x128xbf16>
    %737 = vector.shape_cast %736 : vector<1x1x128xbf16> to vector<1x128xbf16>
    %738 = arith.extf %737 : vector<1x128xbf16> to vector<1x128xf32>
    %c91 = arith.constant 91 : index
    %c0_277 = arith.constant 0 : index
    %739 = vector.load %arg8[%c91, %c0_277] : memref<128x128xf32, #tpu.memory_space<vmem>>, vector<1x128xf32>
    tpu.vector_store %arg8[%c91, %c0_277], %738 {strides = array<i32>} : memref<128x128xf32, #tpu.memory_space<vmem>>, vector<1x128xf32>,
    %c92_i32 = arith.constant 92 : i32
    %740 = arith.addi %3, %c92_i32 : i32
    %741 = arith.index_cast %740 : i32 to index
    %742 = memref.load %arg1[%741] : memref<128xi32, #tpu.memory_space<smem>>
    %743 = arith.index_cast %742 : i32 to index
    %c0_278 = arith.constant 0 : index
    %c0_279 = arith.constant 0 : index
    %744 = vector.load %arg2[%743, %c0_278, %c0_279] : memref<50x1x128xbf16, #tpu.memory_space<vmem>>, vector<1x1x128xbf16>
    %745 = vector.shape_cast %744 : vector<1x1x128xbf16> to vector<1x128xbf16>
    %746 = arith.extf %745 : vector<1x128xbf16> to vector<1x128xf32>
    %c92 = arith.constant 92 : index
    %c0_280 = arith.constant 0 : index
    %747 = vector.load %arg8[%c92, %c0_280] : memref<128x128xf32, #tpu.memory_space<vmem>>, vector<1x128xf32>
    tpu.vector_store %arg8[%c92, %c0_280], %746 {strides = array<i32>} : memref<128x128xf32, #tpu.memory_space<vmem>>, vector<1x128xf32>,
    %c93_i32 = arith.constant 93 : i32
    %748 = arith.addi %3, %c93_i32 : i32
    %749 = arith.index_cast %748 : i32 to index
    %750 = memref.load %arg1[%749] : memref<128xi32, #tpu.memory_space<smem>>
    %751 = arith.index_cast %750 : i32 to index
    %c0_281 = arith.constant 0 : index
    %c0_282 = arith.constant 0 : index
    %752 = vector.load %arg2[%751, %c0_281, %c0_282] : memref<50x1x128xbf16, #tpu.memory_space<vmem>>, vector<1x1x128xbf16>
    %753 = vector.shape_cast %752 : vector<1x1x128xbf16> to vector<1x128xbf16>
    %754 = arith.extf %753 : vector<1x128xbf16> to vector<1x128xf32>
    %c93 = arith.constant 93 : index
    %c0_283 = arith.constant 0 : index
    %755 = vector.load %arg8[%c93, %c0_283] : memref<128x128xf32, #tpu.memory_space<vmem>>, vector<1x128xf32>
    tpu.vector_store %arg8[%c93, %c0_283], %754 {strides = array<i32>} : memref<128x128xf32, #tpu.memory_space<vmem>>, vector<1x128xf32>,
    %c94_i32 = arith.constant 94 : i32
    %756 = arith.addi %3, %c94_i32 : i32
    %757 = arith.index_cast %756 : i32 to index
    %758 = memref.load %arg1[%757] : memref<128xi32, #tpu.memory_space<smem>>
    %759 = arith.index_cast %758 : i32 to index
    %c0_284 = arith.constant 0 : index
    %c0_285 = arith.constant 0 : index
    %760 = vector.load %arg2[%759, %c0_284, %c0_285] : memref<50x1x128xbf16, #tpu.memory_space<vmem>>, vector<1x1x128xbf16>
    %761 = vector.shape_cast %760 : vector<1x1x128xbf16> to vector<1x128xbf16>
    %762 = arith.extf %761 : vector<1x128xbf16> to vector<1x128xf32>
    %c94 = arith.constant 94 : index
    %c0_286 = arith.constant 0 : index
    %763 = vector.load %arg8[%c94, %c0_286] : memref<128x128xf32, #tpu.memory_space<vmem>>, vector<1x128xf32>
    tpu.vector_store %arg8[%c94, %c0_286], %762 {strides = array<i32>} : memref<128x128xf32, #tpu.memory_space<vmem>>, vector<1x128xf32>,
    %c95_i32 = arith.constant 95 : i32
    %764 = arith.addi %3, %c95_i32 : i32
    %765 = arith.index_cast %764 : i32 to index
    %766 = memref.load %arg1[%765] : memref<128xi32, #tpu.memory_space<smem>>
    %767 = arith.index_cast %766 : i32 to index
    %c0_287 = arith.constant 0 : index
    %c0_288 = arith.constant 0 : index
    %768 = vector.load %arg2[%767, %c0_287, %c0_288] : memref<50x1x128xbf16, #tpu.memory_space<vmem>>, vector<1x1x128xbf16>
    %769 = vector.shape_cast %768 : vector<1x1x128xbf16> to vector<1x128xbf16>
    %770 = arith.extf %769 : vector<1x128xbf16> to vector<1x128xf32>
    %c95 = arith.constant 95 : index
    %c0_289 = arith.constant 0 : index
    %771 = vector.load %arg8[%c95, %c0_289] : memref<128x128xf32, #tpu.memory_space<vmem>>, vector<1x128xf32>
    tpu.vector_store %arg8[%c95, %c0_289], %770 {strides = array<i32>} : memref<128x128xf32, #tpu.memory_space<vmem>>, vector<1x128xf32>,
    %c96_i32 = arith.constant 96 : i32
    %772 = arith.addi %3, %c96_i32 : i32
    %773 = arith.index_cast %772 : i32 to index
    %774 = memref.load %arg1[%773] : memref<128xi32, #tpu.memory_space<smem>>
    %775 = arith.index_cast %774 : i32 to index
    %c0_290 = arith.constant 0 : index
    %c0_291 = arith.constant 0 : index
    %776 = vector.load %arg2[%775, %c0_290, %c0_291] : memref<50x1x128xbf16, #tpu.memory_space<vmem>>, vector<1x1x128xbf16>
    %777 = vector.shape_cast %776 : vector<1x1x128xbf16> to vector<1x128xbf16>
    %778 = arith.extf %777 : vector<1x128xbf16> to vector<1x128xf32>
    %c96 = arith.constant 96 : index
    %c0_292 = arith.constant 0 : index
    %779 = vector.load %arg8[%c96, %c0_292] : memref<128x128xf32, #tpu.memory_space<vmem>>, vector<1x128xf32>
    tpu.vector_store %arg8[%c96, %c0_292], %778 {strides = array<i32>} : memref<128x128xf32, #tpu.memory_space<vmem>>, vector<1x128xf32>,
    %c97_i32 = arith.constant 97 : i32
    %780 = arith.addi %3, %c97_i32 : i32
    %781 = arith.index_cast %780 : i32 to index
    %782 = memref.load %arg1[%781] : memref<128xi32, #tpu.memory_space<smem>>
    %783 = arith.index_cast %782 : i32 to index
    %c0_293 = arith.constant 0 : index
    %c0_294 = arith.constant 0 : index
    %784 = vector.load %arg2[%783, %c0_293, %c0_294] : memref<50x1x128xbf16, #tpu.memory_space<vmem>>, vector<1x1x128xbf16>
    %785 = vector.shape_cast %784 : vector<1x1x128xbf16> to vector<1x128xbf16>
    %786 = arith.extf %785 : vector<1x128xbf16> to vector<1x128xf32>
    %c97 = arith.constant 97 : index
    %c0_295 = arith.constant 0 : index
    %787 = vector.load %arg8[%c97, %c0_295] : memref<128x128xf32, #tpu.memory_space<vmem>>, vector<1x128xf32>
    tpu.vector_store %arg8[%c97, %c0_295], %786 {strides = array<i32>} : memref<128x128xf32, #tpu.memory_space<vmem>>, vector<1x128xf32>,
    %c98_i32 = arith.constant 98 : i32
    %788 = arith.addi %3, %c98_i32 : i32
    %789 = arith.index_cast %788 : i32 to index
    %790 = memref.load %arg1[%789] : memref<128xi32, #tpu.memory_space<smem>>
    %791 = arith.index_cast %790 : i32 to index
    %c0_296 = arith.constant 0 : index
    %c0_297 = arith.constant 0 : index
    %792 = vector.load %arg2[%791, %c0_296, %c0_297] : memref<50x1x128xbf16, #tpu.memory_space<vmem>>, vector<1x1x128xbf16>
    %793 = vector.shape_cast %792 : vector<1x1x128xbf16> to vector<1x128xbf16>
    %794 = arith.extf %793 : vector<1x128xbf16> to vector<1x128xf32>
    %c98 = arith.constant 98 : index
    %c0_298 = arith.constant 0 : index
    %795 = vector.load %arg8[%c98, %c0_298] : memref<128x128xf32, #tpu.memory_space<vmem>>, vector<1x128xf32>
    tpu.vector_store %arg8[%c98, %c0_298], %794 {strides = array<i32>} : memref<128x128xf32, #tpu.memory_space<vmem>>, vector<1x128xf32>,
    %c99_i32 = arith.constant 99 : i32
    %796 = arith.addi %3, %c99_i32 : i32
    %797 = arith.index_cast %796 : i32 to index
    %798 = memref.load %arg1[%797] : memref<128xi32, #tpu.memory_space<smem>>
    %799 = arith.index_cast %798 : i32 to index
    %c0_299 = arith.constant 0 : index
    %c0_300 = arith.constant 0 : index
    %800 = vector.load %arg2[%799, %c0_299, %c0_300] : memref<50x1x128xbf16, #tpu.memory_space<vmem>>, vector<1x1x128xbf16>
    %801 = vector.shape_cast %800 : vector<1x1x128xbf16> to vector<1x128xbf16>
    %802 = arith.extf %801 : vector<1x128xbf16> to vector<1x128xf32>
    %c99 = arith.constant 99 : index
    %c0_301 = arith.constant 0 : index
    %803 = vector.load %arg8[%c99, %c0_301] : memref<128x128xf32, #tpu.memory_space<vmem>>, vector<1x128xf32>
    tpu.vector_store %arg8[%c99, %c0_301], %802 {strides = array<i32>} : memref<128x128xf32, #tpu.memory_space<vmem>>, vector<1x128xf32>,
    %c100_i32 = arith.constant 100 : i32
    %804 = arith.addi %3, %c100_i32 : i32
    %805 = arith.index_cast %804 : i32 to index
    %806 = memref.load %arg1[%805] : memref<128xi32, #tpu.memory_space<smem>>
    %807 = arith.index_cast %806 : i32 to index
    %c0_302 = arith.constant 0 : index
    %c0_303 = arith.constant 0 : index
    %808 = vector.load %arg2[%807, %c0_302, %c0_303] : memref<50x1x128xbf16, #tpu.memory_space<vmem>>, vector<1x1x128xbf16>
    %809 = vector.shape_cast %808 : vector<1x1x128xbf16> to vector<1x128xbf16>
    %810 = arith.extf %809 : vector<1x128xbf16> to vector<1x128xf32>
    %c100 = arith.constant 100 : index
    %c0_304 = arith.constant 0 : index
    %811 = vector.load %arg8[%c100, %c0_304] : memref<128x128xf32, #tpu.memory_space<vmem>>, vector<1x128xf32>
    tpu.vector_store %arg8[%c100, %c0_304], %810 {strides = array<i32>} : memref<128x128xf32, #tpu.memory_space<vmem>>, vector<1x128xf32>,
    %c101_i32 = arith.constant 101 : i32
    %812 = arith.addi %3, %c101_i32 : i32
    %813 = arith.index_cast %812 : i32 to index
    %814 = memref.load %arg1[%813] : memref<128xi32, #tpu.memory_space<smem>>
    %815 = arith.index_cast %814 : i32 to index
    %c0_305 = arith.constant 0 : index
    %c0_306 = arith.constant 0 : index
    %816 = vector.load %arg2[%815, %c0_305, %c0_306] : memref<50x1x128xbf16, #tpu.memory_space<vmem>>, vector<1x1x128xbf16>
    %817 = vector.shape_cast %816 : vector<1x1x128xbf16> to vector<1x128xbf16>
    %818 = arith.extf %817 : vector<1x128xbf16> to vector<1x128xf32>
    %c101 = arith.constant 101 : index
    %c0_307 = arith.constant 0 : index
    %819 = vector.load %arg8[%c101, %c0_307] : memref<128x128xf32, #tpu.memory_space<vmem>>, vector<1x128xf32>
    tpu.vector_store %arg8[%c101, %c0_307], %818 {strides = array<i32>} : memref<128x128xf32, #tpu.memory_space<vmem>>, vector<1x128xf32>,
    %c102_i32 = arith.constant 102 : i32
    %820 = arith.addi %3, %c102_i32 : i32
    %821 = arith.index_cast %820 : i32 to index
    %822 = memref.load %arg1[%821] : memref<128xi32, #tpu.memory_space<smem>>
    %823 = arith.index_cast %822 : i32 to index
    %c0_308 = arith.constant 0 : index
    %c0_309 = arith.constant 0 : index
    %824 = vector.load %arg2[%823, %c0_308, %c0_309] : memref<50x1x128xbf16, #tpu.memory_space<vmem>>, vector<1x1x128xbf16>
    %825 = vector.shape_cast %824 : vector<1x1x128xbf16> to vector<1x128xbf16>
    %826 = arith.extf %825 : vector<1x128xbf16> to vector<1x128xf32>
    %c102 = arith.constant 102 : index
    %c0_310 = arith.constant 0 : index
    %827 = vector.load %arg8[%c102, %c0_310] : memref<128x128xf32, #tpu.memory_space<vmem>>, vector<1x128xf32>
    tpu.vector_store %arg8[%c102, %c0_310], %826 {strides = array<i32>} : memref<128x128xf32, #tpu.memory_space<vmem>>, vector<1x128xf32>,
    %c103_i32 = arith.constant 103 : i32
    %828 = arith.addi %3, %c103_i32 : i32
    %829 = arith.index_cast %828 : i32 to index
    %830 = memref.load %arg1[%829] : memref<128xi32, #tpu.memory_space<smem>>
    %831 = arith.index_cast %830 : i32 to index
    %c0_311 = arith.constant 0 : index
    %c0_312 = arith.constant 0 : index
    %832 = vector.load %arg2[%831, %c0_311, %c0_312] : memref<50x1x128xbf16, #tpu.memory_space<vmem>>, vector<1x1x128xbf16>
    %833 = vector.shape_cast %832 : vector<1x1x128xbf16> to vector<1x128xbf16>
    %834 = arith.extf %833 : vector<1x128xbf16> to vector<1x128xf32>
    %c103 = arith.constant 103 : index
    %c0_313 = arith.constant 0 : index
    %835 = vector.load %arg8[%c103, %c0_313] : memref<128x128xf32, #tpu.memory_space<vmem>>, vector<1x128xf32>
    tpu.vector_store %arg8[%c103, %c0_313], %834 {strides = array<i32>} : memref<128x128xf32, #tpu.memory_space<vmem>>, vector<1x128xf32>,
    %c104_i32 = arith.constant 104 : i32
    %836 = arith.addi %3, %c104_i32 : i32
    %837 = arith.index_cast %836 : i32 to index
    %838 = memref.load %arg1[%837] : memref<128xi32, #tpu.memory_space<smem>>
    %839 = arith.index_cast %838 : i32 to index
    %c0_314 = arith.constant 0 : index
    %c0_315 = arith.constant 0 : index
    %840 = vector.load %arg2[%839, %c0_314, %c0_315] : memref<50x1x128xbf16, #tpu.memory_space<vmem>>, vector<1x1x128xbf16>
    %841 = vector.shape_cast %840 : vector<1x1x128xbf16> to vector<1x128xbf16>
    %842 = arith.extf %841 : vector<1x128xbf16> to vector<1x128xf32>
    %c104 = arith.constant 104 : index
    %c0_316 = arith.constant 0 : index
    %843 = vector.load %arg8[%c104, %c0_316] : memref<128x128xf32, #tpu.memory_space<vmem>>, vector<1x128xf32>
    tpu.vector_store %arg8[%c104, %c0_316], %842 {strides = array<i32>} : memref<128x128xf32, #tpu.memory_space<vmem>>, vector<1x128xf32>,
    %c105_i32 = arith.constant 105 : i32
    %844 = arith.addi %3, %c105_i32 : i32
    %845 = arith.index_cast %844 : i32 to index
    %846 = memref.load %arg1[%845] : memref<128xi32, #tpu.memory_space<smem>>
    %847 = arith.index_cast %846 : i32 to index
    %c0_317 = arith.constant 0 : index
    %c0_318 = arith.constant 0 : index
    %848 = vector.load %arg2[%847, %c0_317, %c0_318] : memref<50x1x128xbf16, #tpu.memory_space<vmem>>, vector<1x1x128xbf16>
    %849 = vector.shape_cast %848 : vector<1x1x128xbf16> to vector<1x128xbf16>
    %850 = arith.extf %849 : vector<1x128xbf16> to vector<1x128xf32>
    %c105 = arith.constant 105 : index
    %c0_319 = arith.constant 0 : index
    %851 = vector.load %arg8[%c105, %c0_319] : memref<128x128xf32, #tpu.memory_space<vmem>>, vector<1x128xf32>
    tpu.vector_store %arg8[%c105, %c0_319], %850 {strides = array<i32>} : memref<128x128xf32, #tpu.memory_space<vmem>>, vector<1x128xf32>,
    %c106_i32 = arith.constant 106 : i32
    %852 = arith.addi %3, %c106_i32 : i32
    %853 = arith.index_cast %852 : i32 to index
    %854 = memref.load %arg1[%853] : memref<128xi32, #tpu.memory_space<smem>>
    %855 = arith.index_cast %854 : i32 to index
    %c0_320 = arith.constant 0 : index
    %c0_321 = arith.constant 0 : index
    %856 = vector.load %arg2[%855, %c0_320, %c0_321] : memref<50x1x128xbf16, #tpu.memory_space<vmem>>, vector<1x1x128xbf16>
    %857 = vector.shape_cast %856 : vector<1x1x128xbf16> to vector<1x128xbf16>
    %858 = arith.extf %857 : vector<1x128xbf16> to vector<1x128xf32>
    %c106 = arith.constant 106 : index
    %c0_322 = arith.constant 0 : index
    %859 = vector.load %arg8[%c106, %c0_322] : memref<128x128xf32, #tpu.memory_space<vmem>>, vector<1x128xf32>
    tpu.vector_store %arg8[%c106, %c0_322], %858 {strides = array<i32>} : memref<128x128xf32, #tpu.memory_space<vmem>>, vector<1x128xf32>,
    %c107_i32 = arith.constant 107 : i32
    %860 = arith.addi %3, %c107_i32 : i32
    %861 = arith.index_cast %860 : i32 to index
    %862 = memref.load %arg1[%861] : memref<128xi32, #tpu.memory_space<smem>>
    %863 = arith.index_cast %862 : i32 to index
    %c0_323 = arith.constant 0 : index
    %c0_324 = arith.constant 0 : index
    %864 = vector.load %arg2[%863, %c0_323, %c0_324] : memref<50x1x128xbf16, #tpu.memory_space<vmem>>, vector<1x1x128xbf16>
    %865 = vector.shape_cast %864 : vector<1x1x128xbf16> to vector<1x128xbf16>
    %866 = arith.extf %865 : vector<1x128xbf16> to vector<1x128xf32>
    %c107 = arith.constant 107 : index
    %c0_325 = arith.constant 0 : index
    %867 = vector.load %arg8[%c107, %c0_325] : memref<128x128xf32, #tpu.memory_space<vmem>>, vector<1x128xf32>
    tpu.vector_store %arg8[%c107, %c0_325], %866 {strides = array<i32>} : memref<128x128xf32, #tpu.memory_space<vmem>>, vector<1x128xf32>,
    %c108_i32 = arith.constant 108 : i32
    %868 = arith.addi %3, %c108_i32 : i32
    %869 = arith.index_cast %868 : i32 to index
    %870 = memref.load %arg1[%869] : memref<128xi32, #tpu.memory_space<smem>>
    %871 = arith.index_cast %870 : i32 to index
    %c0_326 = arith.constant 0 : index
    %c0_327 = arith.constant 0 : index
    %872 = vector.load %arg2[%871, %c0_326, %c0_327] : memref<50x1x128xbf16, #tpu.memory_space<vmem>>, vector<1x1x128xbf16>
    %873 = vector.shape_cast %872 : vector<1x1x128xbf16> to vector<1x128xbf16>
    %874 = arith.extf %873 : vector<1x128xbf16> to vector<1x128xf32>
    %c108 = arith.constant 108 : index
    %c0_328 = arith.constant 0 : index
    %875 = vector.load %arg8[%c108, %c0_328] : memref<128x128xf32, #tpu.memory_space<vmem>>, vector<1x128xf32>
    tpu.vector_store %arg8[%c108, %c0_328], %874 {strides = array<i32>} : memref<128x128xf32, #tpu.memory_space<vmem>>, vector<1x128xf32>,
    %c109_i32 = arith.constant 109 : i32
    %876 = arith.addi %3, %c109_i32 : i32
    %877 = arith.index_cast %876 : i32 to index
    %878 = memref.load %arg1[%877] : memref<128xi32, #tpu.memory_space<smem>>
    %879 = arith.index_cast %878 : i32 to index
    %c0_329 = arith.constant 0 : index
    %c0_330 = arith.constant 0 : index
    %880 = vector.load %arg2[%879, %c0_329, %c0_330] : memref<50x1x128xbf16, #tpu.memory_space<vmem>>, vector<1x1x128xbf16>
    %881 = vector.shape_cast %880 : vector<1x1x128xbf16> to vector<1x128xbf16>
    %882 = arith.extf %881 : vector<1x128xbf16> to vector<1x128xf32>
    %c109 = arith.constant 109 : index
    %c0_331 = arith.constant 0 : index
    %883 = vector.load %arg8[%c109, %c0_331] : memref<128x128xf32, #tpu.memory_space<vmem>>, vector<1x128xf32>
    tpu.vector_store %arg8[%c109, %c0_331], %882 {strides = array<i32>} : memref<128x128xf32, #tpu.memory_space<vmem>>, vector<1x128xf32>,
    %c110_i32 = arith.constant 110 : i32
    %884 = arith.addi %3, %c110_i32 : i32
    %885 = arith.index_cast %884 : i32 to index
    %886 = memref.load %arg1[%885] : memref<128xi32, #tpu.memory_space<smem>>
    %887 = arith.index_cast %886 : i32 to index
    %c0_332 = arith.constant 0 : index
    %c0_333 = arith.constant 0 : index
    %888 = vector.load %arg2[%887, %c0_332, %c0_333] : memref<50x1x128xbf16, #tpu.memory_space<vmem>>, vector<1x1x128xbf16>
    %889 = vector.shape_cast %888 : vector<1x1x128xbf16> to vector<1x128xbf16>
    %890 = arith.extf %889 : vector<1x128xbf16> to vector<1x128xf32>
    %c110 = arith.constant 110 : index
    %c0_334 = arith.constant 0 : index
    %891 = vector.load %arg8[%c110, %c0_334] : memref<128x128xf32, #tpu.memory_space<vmem>>, vector<1x128xf32>
    tpu.vector_store %arg8[%c110, %c0_334], %890 {strides = array<i32>} : memref<128x128xf32, #tpu.memory_space<vmem>>, vector<1x128xf32>,
    %c111_i32 = arith.constant 111 : i32
    %892 = arith.addi %3, %c111_i32 : i32
    %893 = arith.index_cast %892 : i32 to index
    %894 = memref.load %arg1[%893] : memref<128xi32, #tpu.memory_space<smem>>
    %895 = arith.index_cast %894 : i32 to index
    %c0_335 = arith.constant 0 : index
    %c0_336 = arith.constant 0 : index
    %896 = vector.load %arg2[%895, %c0_335, %c0_336] : memref<50x1x128xbf16, #tpu.memory_space<vmem>>, vector<1x1x128xbf16>
    %897 = vector.shape_cast %896 : vector<1x1x128xbf16> to vector<1x128xbf16>
    %898 = arith.extf %897 : vector<1x128xbf16> to vector<1x128xf32>
    %c111 = arith.constant 111 : index
    %c0_337 = arith.constant 0 : index
    %899 = vector.load %arg8[%c111, %c0_337] : memref<128x128xf32, #tpu.memory_space<vmem>>, vector<1x128xf32>
    tpu.vector_store %arg8[%c111, %c0_337], %898 {strides = array<i32>} : memref<128x128xf32, #tpu.memory_space<vmem>>, vector<1x128xf32>,
    %c112_i32 = arith.constant 112 : i32
    %900 = arith.addi %3, %c112_i32 : i32
    %901 = arith.index_cast %900 : i32 to index
    %902 = memref.load %arg1[%901] : memref<128xi32, #tpu.memory_space<smem>>
    %903 = arith.index_cast %902 : i32 to index
    %c0_338 = arith.constant 0 : index
    %c0_339 = arith.constant 0 : index
    %904 = vector.load %arg2[%903, %c0_338, %c0_339] : memref<50x1x128xbf16, #tpu.memory_space<vmem>>, vector<1x1x128xbf16>
    %905 = vector.shape_cast %904 : vector<1x1x128xbf16> to vector<1x128xbf16>
    %906 = arith.extf %905 : vector<1x128xbf16> to vector<1x128xf32>
    %c112 = arith.constant 112 : index
    %c0_340 = arith.constant 0 : index
    %907 = vector.load %arg8[%c112, %c0_340] : memref<128x128xf32, #tpu.memory_space<vmem>>, vector<1x128xf32>
    tpu.vector_store %arg8[%c112, %c0_340], %906 {strides = array<i32>} : memref<128x128xf32, #tpu.memory_space<vmem>>, vector<1x128xf32>,
    %c113_i32 = arith.constant 113 : i32
    %908 = arith.addi %3, %c113_i32 : i32
    %909 = arith.index_cast %908 : i32 to index
    %910 = memref.load %arg1[%909] : memref<128xi32, #tpu.memory_space<smem>>
    %911 = arith.index_cast %910 : i32 to index
    %c0_341 = arith.constant 0 : index
    %c0_342 = arith.constant 0 : index
    %912 = vector.load %arg2[%911, %c0_341, %c0_342] : memref<50x1x128xbf16, #tpu.memory_space<vmem>>, vector<1x1x128xbf16>
    %913 = vector.shape_cast %912 : vector<1x1x128xbf16> to vector<1x128xbf16>
    %914 = arith.extf %913 : vector<1x128xbf16> to vector<1x128xf32>
    %c113 = arith.constant 113 : index
    %c0_343 = arith.constant 0 : index
    %915 = vector.load %arg8[%c113, %c0_343] : memref<128x128xf32, #tpu.memory_space<vmem>>, vector<1x128xf32>
    tpu.vector_store %arg8[%c113, %c0_343], %914 {strides = array<i32>} : memref<128x128xf32, #tpu.memory_space<vmem>>, vector<1x128xf32>,
    %c114_i32 = arith.constant 114 : i32
    %916 = arith.addi %3, %c114_i32 : i32
    %917 = arith.index_cast %916 : i32 to index
    %918 = memref.load %arg1[%917] : memref<128xi32, #tpu.memory_space<smem>>
    %919 = arith.index_cast %918 : i32 to index
    %c0_344 = arith.constant 0 : index
    %c0_345 = arith.constant 0 : index
    %920 = vector.load %arg2[%919, %c0_344, %c0_345] : memref<50x1x128xbf16, #tpu.memory_space<vmem>>, vector<1x1x128xbf16>
    %921 = vector.shape_cast %920 : vector<1x1x128xbf16> to vector<1x128xbf16>
    %922 = arith.extf %921 : vector<1x128xbf16> to vector<1x128xf32>
    %c114 = arith.constant 114 : index
    %c0_346 = arith.constant 0 : index
    %923 = vector.load %arg8[%c114, %c0_346] : memref<128x128xf32, #tpu.memory_space<vmem>>, vector<1x128xf32>
    tpu.vector_store %arg8[%c114, %c0_346], %922 {strides = array<i32>} : memref<128x128xf32, #tpu.memory_space<vmem>>, vector<1x128xf32>,
    %c115_i32 = arith.constant 115 : i32
    %924 = arith.addi %3, %c115_i32 : i32
    %925 = arith.index_cast %924 : i32 to index
    %926 = memref.load %arg1[%925] : memref<128xi32, #tpu.memory_space<smem>>
    %927 = arith.index_cast %926 : i32 to index
    %c0_347 = arith.constant 0 : index
    %c0_348 = arith.constant 0 : index
    %928 = vector.load %arg2[%927, %c0_347, %c0_348] : memref<50x1x128xbf16, #tpu.memory_space<vmem>>, vector<1x1x128xbf16>
    %929 = vector.shape_cast %928 : vector<1x1x128xbf16> to vector<1x128xbf16>
    %930 = arith.extf %929 : vector<1x128xbf16> to vector<1x128xf32>
    %c115 = arith.constant 115 : index
    %c0_349 = arith.constant 0 : index
    %931 = vector.load %arg8[%c115, %c0_349] : memref<128x128xf32, #tpu.memory_space<vmem>>, vector<1x128xf32>
    tpu.vector_store %arg8[%c115, %c0_349], %930 {strides = array<i32>} : memref<128x128xf32, #tpu.memory_space<vmem>>, vector<1x128xf32>,
    %c116_i32 = arith.constant 116 : i32
    %932 = arith.addi %3, %c116_i32 : i32
    %933 = arith.index_cast %932 : i32 to index
    %934 = memref.load %arg1[%933] : memref<128xi32, #tpu.memory_space<smem>>
    %935 = arith.index_cast %934 : i32 to index
    %c0_350 = arith.constant 0 : index
    %c0_351 = arith.constant 0 : index
    %936 = vector.load %arg2[%935, %c0_350, %c0_351] : memref<50x1x128xbf16, #tpu.memory_space<vmem>>, vector<1x1x128xbf16>
    %937 = vector.shape_cast %936 : vector<1x1x128xbf16> to vector<1x128xbf16>
    %938 = arith.extf %937 : vector<1x128xbf16> to vector<1x128xf32>
    %c116 = arith.constant 116 : index
    %c0_352 = arith.constant 0 : index
    %939 = vector.load %arg8[%c116, %c0_352] : memref<128x128xf32, #tpu.memory_space<vmem>>, vector<1x128xf32>
    tpu.vector_store %arg8[%c116, %c0_352], %938 {strides = array<i32>} : memref<128x128xf32, #tpu.memory_space<vmem>>, vector<1x128xf32>,
    %c117_i32 = arith.constant 117 : i32
    %940 = arith.addi %3, %c117_i32 : i32
    %941 = arith.index_cast %940 : i32 to index
    %942 = memref.load %arg1[%941] : memref<128xi32, #tpu.memory_space<smem>>
    %943 = arith.index_cast %942 : i32 to index
    %c0_353 = arith.constant 0 : index
    %c0_354 = arith.constant 0 : index
    %944 = vector.load %arg2[%943, %c0_353, %c0_354] : memref<50x1x128xbf16, #tpu.memory_space<vmem>>, vector<1x1x128xbf16>
    %945 = vector.shape_cast %944 : vector<1x1x128xbf16> to vector<1x128xbf16>
    %946 = arith.extf %945 : vector<1x128xbf16> to vector<1x128xf32>
    %c117 = arith.constant 117 : index
    %c0_355 = arith.constant 0 : index
    %947 = vector.load %arg8[%c117, %c0_355] : memref<128x128xf32, #tpu.memory_space<vmem>>, vector<1x128xf32>
    tpu.vector_store %arg8[%c117, %c0_355], %946 {strides = array<i32>} : memref<128x128xf32, #tpu.memory_space<vmem>>, vector<1x128xf32>,
    %c118_i32 = arith.constant 118 : i32
    %948 = arith.addi %3, %c118_i32 : i32
    %949 = arith.index_cast %948 : i32 to index
    %950 = memref.load %arg1[%949] : memref<128xi32, #tpu.memory_space<smem>>
    %951 = arith.index_cast %950 : i32 to index
    %c0_356 = arith.constant 0 : index
    %c0_357 = arith.constant 0 : index
    %952 = vector.load %arg2[%951, %c0_356, %c0_357] : memref<50x1x128xbf16, #tpu.memory_space<vmem>>, vector<1x1x128xbf16>
    %953 = vector.shape_cast %952 : vector<1x1x128xbf16> to vector<1x128xbf16>
    %954 = arith.extf %953 : vector<1x128xbf16> to vector<1x128xf32>
    %c118 = arith.constant 118 : index
    %c0_358 = arith.constant 0 : index
    %955 = vector.load %arg8[%c118, %c0_358] : memref<128x128xf32, #tpu.memory_space<vmem>>, vector<1x128xf32>
    tpu.vector_store %arg8[%c118, %c0_358], %954 {strides = array<i32>} : memref<128x128xf32, #tpu.memory_space<vmem>>, vector<1x128xf32>,
    %c119_i32 = arith.constant 119 : i32
    %956 = arith.addi %3, %c119_i32 : i32
    %957 = arith.index_cast %956 : i32 to index
    %958 = memref.load %arg1[%957] : memref<128xi32, #tpu.memory_space<smem>>
    %959 = arith.index_cast %958 : i32 to index
    %c0_359 = arith.constant 0 : index
    %c0_360 = arith.constant 0 : index
    %960 = vector.load %arg2[%959, %c0_359, %c0_360] : memref<50x1x128xbf16, #tpu.memory_space<vmem>>, vector<1x1x128xbf16>
    %961 = vector.shape_cast %960 : vector<1x1x128xbf16> to vector<1x128xbf16>
    %962 = arith.extf %961 : vector<1x128xbf16> to vector<1x128xf32>
    %c119 = arith.constant 119 : index
    %c0_361 = arith.constant 0 : index
    %963 = vector.load %arg8[%c119, %c0_361] : memref<128x128xf32, #tpu.memory_space<vmem>>, vector<1x128xf32>
    tpu.vector_store %arg8[%c119, %c0_361], %962 {strides = array<i32>} : memref<128x128xf32, #tpu.memory_space<vmem>>, vector<1x128xf32>,
    %c120_i32 = arith.constant 120 : i32
    %964 = arith.addi %3, %c120_i32 : i32
    %965 = arith.index_cast %964 : i32 to index
    %966 = memref.load %arg1[%965] : memref<128xi32, #tpu.memory_space<smem>>
    %967 = arith.index_cast %966 : i32 to index
    %c0_362 = arith.constant 0 : index
    %c0_363 = arith.constant 0 : index
    %968 = vector.load %arg2[%967, %c0_362, %c0_363] : memref<50x1x128xbf16, #tpu.memory_space<vmem>>, vector<1x1x128xbf16>
    %969 = vector.shape_cast %968 : vector<1x1x128xbf16> to vector<1x128xbf16>
    %970 = arith.extf %969 : vector<1x128xbf16> to vector<1x128xf32>
    %c120 = arith.constant 120 : index
    %c0_364 = arith.constant 0 : index
    %971 = vector.load %arg8[%c120, %c0_364] : memref<128x128xf32, #tpu.memory_space<vmem>>, vector<1x128xf32>
    tpu.vector_store %arg8[%c120, %c0_364], %970 {strides = array<i32>} : memref<128x128xf32, #tpu.memory_space<vmem>>, vector<1x128xf32>,
    %c121_i32 = arith.constant 121 : i32
    %972 = arith.addi %3, %c121_i32 : i32
    %973 = arith.index_cast %972 : i32 to index
    %974 = memref.load %arg1[%973] : memref<128xi32, #tpu.memory_space<smem>>
    %975 = arith.index_cast %974 : i32 to index
    %c0_365 = arith.constant 0 : index
    %c0_366 = arith.constant 0 : index
    %976 = vector.load %arg2[%975, %c0_365, %c0_366] : memref<50x1x128xbf16, #tpu.memory_space<vmem>>, vector<1x1x128xbf16>
    %977 = vector.shape_cast %976 : vector<1x1x128xbf16> to vector<1x128xbf16>
    %978 = arith.extf %977 : vector<1x128xbf16> to vector<1x128xf32>
    %c121 = arith.constant 121 : index
    %c0_367 = arith.constant 0 : index
    %979 = vector.load %arg8[%c121, %c0_367] : memref<128x128xf32, #tpu.memory_space<vmem>>, vector<1x128xf32>
    tpu.vector_store %arg8[%c121, %c0_367], %978 {strides = array<i32>} : memref<128x128xf32, #tpu.memory_space<vmem>>, vector<1x128xf32>,
    %c122_i32 = arith.constant 122 : i32
    %980 = arith.addi %3, %c122_i32 : i32
    %981 = arith.index_cast %980 : i32 to index
    %982 = memref.load %arg1[%981] : memref<128xi32, #tpu.memory_space<smem>>
    %983 = arith.index_cast %982 : i32 to index
    %c0_368 = arith.constant 0 : index
    %c0_369 = arith.constant 0 : index
    %984 = vector.load %arg2[%983, %c0_368, %c0_369] : memref<50x1x128xbf16, #tpu.memory_space<vmem>>, vector<1x1x128xbf16>
    %985 = vector.shape_cast %984 : vector<1x1x128xbf16> to vector<1x128xbf16>
    %986 = arith.extf %985 : vector<1x128xbf16> to vector<1x128xf32>
    %c122 = arith.constant 122 : index
    %c0_370 = arith.constant 0 : index
    %987 = vector.load %arg8[%c122, %c0_370] : memref<128x128xf32, #tpu.memory_space<vmem>>, vector<1x128xf32>
    tpu.vector_store %arg8[%c122, %c0_370], %986 {strides = array<i32>} : memref<128x128xf32, #tpu.memory_space<vmem>>, vector<1x128xf32>,
    %c123_i32 = arith.constant 123 : i32
    %988 = arith.addi %3, %c123_i32 : i32
    %989 = arith.index_cast %988 : i32 to index
    %990 = memref.load %arg1[%989] : memref<128xi32, #tpu.memory_space<smem>>
    %991 = arith.index_cast %990 : i32 to index
    %c0_371 = arith.constant 0 : index
    %c0_372 = arith.constant 0 : index
    %992 = vector.load %arg2[%991, %c0_371, %c0_372] : memref<50x1x128xbf16, #tpu.memory_space<vmem>>, vector<1x1x128xbf16>
    %993 = vector.shape_cast %992 : vector<1x1x128xbf16> to vector<1x128xbf16>
    %994 = arith.extf %993 : vector<1x128xbf16> to vector<1x128xf32>
    %c123 = arith.constant 123 : index
    %c0_373 = arith.constant 0 : index
    %995 = vector.load %arg8[%c123, %c0_373] : memref<128x128xf32, #tpu.memory_space<vmem>>, vector<1x128xf32>
    tpu.vector_store %arg8[%c123, %c0_373], %994 {strides = array<i32>} : memref<128x128xf32, #tpu.memory_space<vmem>>, vector<1x128xf32>,
    %c124_i32 = arith.constant 124 : i32
    %996 = arith.addi %3, %c124_i32 : i32
    %997 = arith.index_cast %996 : i32 to index
    %998 = memref.load %arg1[%997] : memref<128xi32, #tpu.memory_space<smem>>
    %999 = arith.index_cast %998 : i32 to index
    %c0_374 = arith.constant 0 : index
    %c0_375 = arith.constant 0 : index
    %1000 = vector.load %arg2[%999, %c0_374, %c0_375] : memref<50x1x128xbf16, #tpu.memory_space<vmem>>, vector<1x1x128xbf16>
    %1001 = vector.shape_cast %1000 : vector<1x1x128xbf16> to vector<1x128xbf16>
    %1002 = arith.extf %1001 : vector<1x128xbf16> to vector<1x128xf32>
    %c124 = arith.constant 124 : index
    %c0_376 = arith.constant 0 : index
    %1003 = vector.load %arg8[%c124, %c0_376] : memref<128x128xf32, #tpu.memory_space<vmem>>, vector<1x128xf32>
    tpu.vector_store %arg8[%c124, %c0_376], %1002 {strides = array<i32>} : memref<128x128xf32, #tpu.memory_space<vmem>>, vector<1x128xf32>,
    %c125_i32 = arith.constant 125 : i32
    %1004 = arith.addi %3, %c125_i32 : i32
    %1005 = arith.index_cast %1004 : i32 to index
    %1006 = memref.load %arg1[%1005] : memref<128xi32, #tpu.memory_space<smem>>
    %1007 = arith.index_cast %1006 : i32 to index
    %c0_377 = arith.constant 0 : index
    %c0_378 = arith.constant 0 : index
    %1008 = vector.load %arg2[%1007, %c0_377, %c0_378] : memref<50x1x128xbf16, #tpu.memory_space<vmem>>, vector<1x1x128xbf16>
    %1009 = vector.shape_cast %1008 : vector<1x1x128xbf16> to vector<1x128xbf16>
    %1010 = arith.extf %1009 : vector<1x128xbf16> to vector<1x128xf32>
    %c125 = arith.constant 125 : index
    %c0_379 = arith.constant 0 : index
    %1011 = vector.load %arg8[%c125, %c0_379] : memref<128x128xf32, #tpu.memory_space<vmem>>, vector<1x128xf32>
    tpu.vector_store %arg8[%c125, %c0_379], %1010 {strides = array<i32>} : memref<128x128xf32, #tpu.memory_space<vmem>>, vector<1x128xf32>,
    %c126_i32 = arith.constant 126 : i32
    %1012 = arith.addi %3, %c126_i32 : i32
    %1013 = arith.index_cast %1012 : i32 to index
    %1014 = memref.load %arg1[%1013] : memref<128xi32, #tpu.memory_space<smem>>
    %1015 = arith.index_cast %1014 : i32 to index
    %c0_380 = arith.constant 0 : index
    %c0_381 = arith.constant 0 : index
    %1016 = vector.load %arg2[%1015, %c0_380, %c0_381] : memref<50x1x128xbf16, #tpu.memory_space<vmem>>, vector<1x1x128xbf16>
    %1017 = vector.shape_cast %1016 : vector<1x1x128xbf16> to vector<1x128xbf16>
    %1018 = arith.extf %1017 : vector<1x128xbf16> to vector<1x128xf32>
    %c126 = arith.constant 126 : index
    %c0_382 = arith.constant 0 : index
    %1019 = vector.load %arg8[%c126, %c0_382] : memref<128x128xf32, #tpu.memory_space<vmem>>, vector<1x128xf32>
    tpu.vector_store %arg8[%c126, %c0_382], %1018 {strides = array<i32>} : memref<128x128xf32, #tpu.memory_space<vmem>>, vector<1x128xf32>,
    %c127_i32 = arith.constant 127 : i32
    %1020 = arith.addi %3, %c127_i32 : i32
    %1021 = arith.index_cast %1020 : i32 to index
    %1022 = memref.load %arg1[%1021] : memref<128xi32, #tpu.memory_space<smem>>
    %1023 = arith.index_cast %1022 : i32 to index
    %c0_383 = arith.constant 0 : index
    %c0_384 = arith.constant 0 : index
    %1024 = vector.load %arg2[%1023, %c0_383, %c0_384] : memref<50x1x128xbf16, #tpu.memory_space<vmem>>, vector<1x1x128xbf16>
    %1025 = vector.shape_cast %1024 : vector<1x1x128xbf16> to vector<1x128xbf16>
    %1026 = arith.extf %1025 : vector<1x128xbf16> to vector<1x128xf32>
    %c127 = arith.constant 127 : index
    %c0_385 = arith.constant 0 : index
    %1027 = vector.load %arg8[%c127, %c0_385] : memref<128x128xf32, #tpu.memory_space<vmem>>, vector<1x128xf32>
    tpu.vector_store %arg8[%c127, %c0_385], %1026 {strides = array<i32>} : memref<128x128xf32, #tpu.memory_space<vmem>>, vector<1x128xf32>,
    %c0_386 = arith.constant 0 : index
    %c0_387 = arith.constant 0 : index
    %1028 = vector.load %arg8[%c0_386, %c0_387] : memref<128x128xf32, #tpu.memory_space<vmem>>, vector<128x128xf32>
    %1029 = arith.truncf %1028 : vector<128x128xf32> to vector<128x128xbf16>
    %c0_388 = arith.constant 0 : index
    %c0_389 = arith.constant 0 : index
    %1030 = vector.load %arg3[%c0_388, %c0_389] : memref<128x512xbf16, #tpu.memory_space<vmem>>, vector<128x512xbf16>
    %cst = arith.constant dense<0.000000e+00> : vector<128x512xf32>
    %1031 = tpu.matmul %1029, %1030, %cst {dimension_numbers = #tpu.dot_dimension_numbers<[1], [0], [0], [1], [0, 0, 1, 1], [], []>} : vector<128x128xbf16>, vector<128x512xbf16>, vector<128x512xf32> -> vector<128x512xf32>
    %c0_390 = arith.constant 0 : index
    %c0_391 = arith.constant 0 : index
    %1032 = vector.load %arg9[%c0_390, %c0_391] : memref<128x512xf32, #tpu.memory_space<vmem>>, vector<128x512xf32>
    tpu.vector_store %arg9[%c0_390, %c0_391], %1031 {strides = array<i32>} : memref<128x512xf32, #tpu.memory_space<vmem>>, vector<128x512xf32>,
    %c0_392 = arith.constant 0 : index
    %c0_393 = arith.constant 0 : index
    %1033 = vector.load %arg4[%c0_392, %c0_393] : memref<128x512xbf16, #tpu.memory_space<vmem>>, vector<128x512xbf16>
    %c0_394 = arith.constant 0 : index
    %c0_395 = arith.constant 0 : index
    %1034 = vector.load %arg10[%c0_394, %c0_395] : memref<8x128xf32, #tpu.memory_space<vmem>>, vector<8x128xf32>
    %c0_396 = arith.constant 0 : index
    %c0_397 = arith.constant 0 : index
    %1035 = vector.load %arg11[%c0_396, %c0_397] : memref<8x128xf32, #tpu.memory_space<vmem>>, vector<8x128xf32>
    %c0_398 = arith.constant 0 : index
    %c0_399 = arith.constant 0 : index
    %1036 = vector.load %arg9[%c0_398, %c0_399] : memref<128x512xf32, #tpu.memory_space<vmem>>, vector<8x512xf32>
    %1037 = arith.truncf %1034 : vector<8x128xf32> to vector<8x128xbf16>
    %cst_400 = arith.constant dense<0.000000e+00> : vector<8x512xf32>
    %1038 = tpu.matmul %1037, %1033, %cst_400 {dimension_numbers = #tpu.dot_dimension_numbers<[1], [0], [0], [1], [0, 0, 1, 1], [], []>} : vector<8x128xbf16>, vector<128x512xbf16>, vector<8x512xf32> -> vector<8x512xf32>
    %1039 = arith.addf %1036, %1038 : vector<8x512xf32>
    %1040 = vector.extract_strided_slice %1039 {offsets = [0, 0], sizes = [8, 384], strides = [1, 1]} : vector<8x512xf32> to vector<8x384xf32>
    %1041 = arith.negf %1040 : vector<8x384xf32>
    %1042 = math.exp %1041 : vector<8x384xf32>
    %cst_401 = arith.constant 1.000000e+00 : f32
    %1043 = vector.broadcast %cst_401 : f32 to vector<8x384xf32>
    %1044 = arith.addf %1043, %1042 : vector<8x384xf32>
    %1045 = arith.divf %1043, %1044 : vector<8x384xf32>
    %1046 = vector.extract_strided_slice %1045 {offsets = [0, 0], sizes = [8, 128], strides = [1, 1]} : vector<8x384xf32> to vector<8x128xf32>
    %1047 = vector.extract_strided_slice %1045 {offsets = [0, 128], sizes = [8, 128], strides = [1, 1]} : vector<8x384xf32> to vector<8x128xf32>
    %1048 = vector.extract_strided_slice %1045 {offsets = [0, 256], sizes = [8, 128], strides = [1, 1]} : vector<8x384xf32> to vector<8x128xf32>
    %1049 = vector.extract_strided_slice %1039 {offsets = [0, 384], sizes = [8, 128], strides = [1, 1]} : vector<8x512xf32> to vector<8x128xf32>
    %1050 = math.tanh %1049 : vector<8x128xf32>
    %1051 = arith.mulf %1047, %1035 : vector<8x128xf32>
    %1052 = arith.mulf %1046, %1050 : vector<8x128xf32>
    %1053 = arith.addf %1051, %1052 : vector<8x128xf32>
    %1054 = math.tanh %1053 : vector<8x128xf32>
    %1055 = arith.mulf %1048, %1054 : vector<8x128xf32>
    %c8_402 = arith.constant 8 : index
    %c0_403 = arith.constant 0 : index
    %1056 = vector.load %arg9[%c8_402, %c0_403] : memref<128x512xf32, #tpu.memory_space<vmem>>, vector<8x512xf32>
    %1057 = arith.truncf %1055 : vector<8x128xf32> to vector<8x128xbf16>
    %cst_404 = arith.constant dense<0.000000e+00> : vector<8x512xf32>
    %1058 = tpu.matmul %1057, %1033, %cst_404 {dimension_numbers = #tpu.dot_dimension_numbers<[1], [0], [0], [1], [0, 0, 1, 1], [], []>} : vector<8x128xbf16>, vector<128x512xbf16>, vector<8x512xf32> -> vector<8x512xf32>
    %1059 = arith.addf %1056, %1058 : vector<8x512xf32>
    %1060 = vector.extract_strided_slice %1059 {offsets = [0, 0], sizes = [8, 384], strides = [1, 1]} : vector<8x512xf32> to vector<8x384xf32>
    %1061 = arith.negf %1060 : vector<8x384xf32>
    %1062 = math.exp %1061 : vector<8x384xf32>
    %cst_405 = arith.constant 1.000000e+00 : f32
    %1063 = vector.broadcast %cst_405 : f32 to vector<8x384xf32>
    %1064 = arith.addf %1063, %1062 : vector<8x384xf32>
    %1065 = arith.divf %1063, %1064 : vector<8x384xf32>
    %1066 = vector.extract_strided_slice %1065 {offsets = [0, 0], sizes = [8, 128], strides = [1, 1]} : vector<8x384xf32> to vector<8x128xf32>
    %1067 = vector.extract_strided_slice %1065 {offsets = [0, 128], sizes = [8, 128], strides = [1, 1]} : vector<8x384xf32> to vector<8x128xf32>
    %1068 = vector.extract_strided_slice %1065 {offsets = [0, 256], sizes = [8, 128], strides = [1, 1]} : vector<8x384xf32> to vector<8x128xf32>
    %1069 = vector.extract_strided_slice %1059 {offsets = [0, 384], sizes = [8, 128], strides = [1, 1]} : vector<8x512xf32> to vector<8x128xf32>
    %1070 = math.tanh %1069 : vector<8x128xf32>
    %1071 = arith.mulf %1067, %1053 : vector<8x128xf32>
    %1072 = arith.mulf %1066, %1070 : vector<8x128xf32>
    %1073 = arith.addf %1071, %1072 : vector<8x128xf32>
    %1074 = math.tanh %1073 : vector<8x128xf32>
    %1075 = arith.mulf %1068, %1074 : vector<8x128xf32>
    %c16_406 = arith.constant 16 : index
    %c0_407 = arith.constant 0 : index
    %1076 = vector.load %arg9[%c16_406, %c0_407] : memref<128x512xf32, #tpu.memory_space<vmem>>, vector<8x512xf32>
    %1077 = arith.truncf %1075 : vector<8x128xf32> to vector<8x128xbf16>
    %cst_408 = arith.constant dense<0.000000e+00> : vector<8x512xf32>
    %1078 = tpu.matmul %1077, %1033, %cst_408 {dimension_numbers = #tpu.dot_dimension_numbers<[1], [0], [0], [1], [0, 0, 1, 1], [], []>} : vector<8x128xbf16>, vector<128x512xbf16>, vector<8x512xf32> -> vector<8x512xf32>
    %1079 = arith.addf %1076, %1078 : vector<8x512xf32>
    %1080 = vector.extract_strided_slice %1079 {offsets = [0, 0], sizes = [8, 384], strides = [1, 1]} : vector<8x512xf32> to vector<8x384xf32>
    %1081 = arith.negf %1080 : vector<8x384xf32>
    %1082 = math.exp %1081 : vector<8x384xf32>
    %cst_409 = arith.constant 1.000000e+00 : f32
    %1083 = vector.broadcast %cst_409 : f32 to vector<8x384xf32>
    %1084 = arith.addf %1083, %1082 : vector<8x384xf32>
    %1085 = arith.divf %1083, %1084 : vector<8x384xf32>
    %1086 = vector.extract_strided_slice %1085 {offsets = [0, 0], sizes = [8, 128], strides = [1, 1]} : vector<8x384xf32> to vector<8x128xf32>
    %1087 = vector.extract_strided_slice %1085 {offsets = [0, 128], sizes = [8, 128], strides = [1, 1]} : vector<8x384xf32> to vector<8x128xf32>
    %1088 = vector.extract_strided_slice %1085 {offsets = [0, 256], sizes = [8, 128], strides = [1, 1]} : vector<8x384xf32> to vector<8x128xf32>
    %1089 = vector.extract_strided_slice %1079 {offsets = [0, 384], sizes = [8, 128], strides = [1, 1]} : vector<8x512xf32> to vector<8x128xf32>
    %1090 = math.tanh %1089 : vector<8x128xf32>
    %1091 = arith.mulf %1087, %1073 : vector<8x128xf32>
    %1092 = arith.mulf %1086, %1090 : vector<8x128xf32>
    %1093 = arith.addf %1091, %1092 : vector<8x128xf32>
    %1094 = math.tanh %1093 : vector<8x128xf32>
    %1095 = arith.mulf %1088, %1094 : vector<8x128xf32>
    %c24_410 = arith.constant 24 : index
    %c0_411 = arith.constant 0 : index
    %1096 = vector.load %arg9[%c24_410, %c0_411] : memref<128x512xf32, #tpu.memory_space<vmem>>, vector<8x512xf32>
    %1097 = arith.truncf %1095 : vector<8x128xf32> to vector<8x128xbf16>
    %cst_412 = arith.constant dense<0.000000e+00> : vector<8x512xf32>
    %1098 = tpu.matmul %1097, %1033, %cst_412 {dimension_numbers = #tpu.dot_dimension_numbers<[1], [0], [0], [1], [0, 0, 1, 1], [], []>} : vector<8x128xbf16>, vector<128x512xbf16>, vector<8x512xf32> -> vector<8x512xf32>
    %1099 = arith.addf %1096, %1098 : vector<8x512xf32>
    %1100 = vector.extract_strided_slice %1099 {offsets = [0, 0], sizes = [8, 384], strides = [1, 1]} : vector<8x512xf32> to vector<8x384xf32>
    %1101 = arith.negf %1100 : vector<8x384xf32>
    %1102 = math.exp %1101 : vector<8x384xf32>
    %cst_413 = arith.constant 1.000000e+00 : f32
    %1103 = vector.broadcast %cst_413 : f32 to vector<8x384xf32>
    %1104 = arith.addf %1103, %1102 : vector<8x384xf32>
    %1105 = arith.divf %1103, %1104 : vector<8x384xf32>
    %1106 = vector.extract_strided_slice %1105 {offsets = [0, 0], sizes = [8, 128], strides = [1, 1]} : vector<8x384xf32> to vector<8x128xf32>
    %1107 = vector.extract_strided_slice %1105 {offsets = [0, 128], sizes = [8, 128], strides = [1, 1]} : vector<8x384xf32> to vector<8x128xf32>
    %1108 = vector.extract_strided_slice %1105 {offsets = [0, 256], sizes = [8, 128], strides = [1, 1]} : vector<8x384xf32> to vector<8x128xf32>
    %1109 = vector.extract_strided_slice %1099 {offsets = [0, 384], sizes = [8, 128], strides = [1, 1]} : vector<8x512xf32> to vector<8x128xf32>
    %1110 = math.tanh %1109 : vector<8x128xf32>
    %1111 = arith.mulf %1107, %1093 : vector<8x128xf32>
    %1112 = arith.mulf %1106, %1110 : vector<8x128xf32>
    %1113 = arith.addf %1111, %1112 : vector<8x128xf32>
    %1114 = math.tanh %1113 : vector<8x128xf32>
    %1115 = arith.mulf %1108, %1114 : vector<8x128xf32>
    %c32_414 = arith.constant 32 : index
    %c0_415 = arith.constant 0 : index
    %1116 = vector.load %arg9[%c32_414, %c0_415] : memref<128x512xf32, #tpu.memory_space<vmem>>, vector<8x512xf32>
    %1117 = arith.truncf %1115 : vector<8x128xf32> to vector<8x128xbf16>
    %cst_416 = arith.constant dense<0.000000e+00> : vector<8x512xf32>
    %1118 = tpu.matmul %1117, %1033, %cst_416 {dimension_numbers = #tpu.dot_dimension_numbers<[1], [0], [0], [1], [0, 0, 1, 1], [], []>} : vector<8x128xbf16>, vector<128x512xbf16>, vector<8x512xf32> -> vector<8x512xf32>
    %1119 = arith.addf %1116, %1118 : vector<8x512xf32>
    %1120 = vector.extract_strided_slice %1119 {offsets = [0, 0], sizes = [8, 384], strides = [1, 1]} : vector<8x512xf32> to vector<8x384xf32>
    %1121 = arith.negf %1120 : vector<8x384xf32>
    %1122 = math.exp %1121 : vector<8x384xf32>
    %cst_417 = arith.constant 1.000000e+00 : f32
    %1123 = vector.broadcast %cst_417 : f32 to vector<8x384xf32>
    %1124 = arith.addf %1123, %1122 : vector<8x384xf32>
    %1125 = arith.divf %1123, %1124 : vector<8x384xf32>
    %1126 = vector.extract_strided_slice %1125 {offsets = [0, 0], sizes = [8, 128], strides = [1, 1]} : vector<8x384xf32> to vector<8x128xf32>
    %1127 = vector.extract_strided_slice %1125 {offsets = [0, 128], sizes = [8, 128], strides = [1, 1]} : vector<8x384xf32> to vector<8x128xf32>
    %1128 = vector.extract_strided_slice %1125 {offsets = [0, 256], sizes = [8, 128], strides = [1, 1]} : vector<8x384xf32> to vector<8x128xf32>
    %1129 = vector.extract_strided_slice %1119 {offsets = [0, 384], sizes = [8, 128], strides = [1, 1]} : vector<8x512xf32> to vector<8x128xf32>
    %1130 = math.tanh %1129 : vector<8x128xf32>
    %1131 = arith.mulf %1127, %1113 : vector<8x128xf32>
    %1132 = arith.mulf %1126, %1130 : vector<8x128xf32>
    %1133 = arith.addf %1131, %1132 : vector<8x128xf32>
    %1134 = math.tanh %1133 : vector<8x128xf32>
    %1135 = arith.mulf %1128, %1134 : vector<8x128xf32>
    %c40_418 = arith.constant 40 : index
    %c0_419 = arith.constant 0 : index
    %1136 = vector.load %arg9[%c40_418, %c0_419] : memref<128x512xf32, #tpu.memory_space<vmem>>, vector<8x512xf32>
    %1137 = arith.truncf %1135 : vector<8x128xf32> to vector<8x128xbf16>
    %cst_420 = arith.constant dense<0.000000e+00> : vector<8x512xf32>
    %1138 = tpu.matmul %1137, %1033, %cst_420 {dimension_numbers = #tpu.dot_dimension_numbers<[1], [0], [0], [1], [0, 0, 1, 1], [], []>} : vector<8x128xbf16>, vector<128x512xbf16>, vector<8x512xf32> -> vector<8x512xf32>
    %1139 = arith.addf %1136, %1138 : vector<8x512xf32>
    %1140 = vector.extract_strided_slice %1139 {offsets = [0, 0], sizes = [8, 384], strides = [1, 1]} : vector<8x512xf32> to vector<8x384xf32>
    %1141 = arith.negf %1140 : vector<8x384xf32>
    %1142 = math.exp %1141 : vector<8x384xf32>
    %cst_421 = arith.constant 1.000000e+00 : f32
    %1143 = vector.broadcast %cst_421 : f32 to vector<8x384xf32>
    %1144 = arith.addf %1143, %1142 : vector<8x384xf32>
    %1145 = arith.divf %1143, %1144 : vector<8x384xf32>
    %1146 = vector.extract_strided_slice %1145 {offsets = [0, 0], sizes = [8, 128], strides = [1, 1]} : vector<8x384xf32> to vector<8x128xf32>
    %1147 = vector.extract_strided_slice %1145 {offsets = [0, 128], sizes = [8, 128], strides = [1, 1]} : vector<8x384xf32> to vector<8x128xf32>
    %1148 = vector.extract_strided_slice %1145 {offsets = [0, 256], sizes = [8, 128], strides = [1, 1]} : vector<8x384xf32> to vector<8x128xf32>
    %1149 = vector.extract_strided_slice %1139 {offsets = [0, 384], sizes = [8, 128], strides = [1, 1]} : vector<8x512xf32> to vector<8x128xf32>
    %1150 = math.tanh %1149 : vector<8x128xf32>
    %1151 = arith.mulf %1147, %1133 : vector<8x128xf32>
    %1152 = arith.mulf %1146, %1150 : vector<8x128xf32>
    %1153 = arith.addf %1151, %1152 : vector<8x128xf32>
    %1154 = math.tanh %1153 : vector<8x128xf32>
    %1155 = arith.mulf %1148, %1154 : vector<8x128xf32>
    %c48_422 = arith.constant 48 : index
    %c0_423 = arith.constant 0 : index
    %1156 = vector.load %arg9[%c48_422, %c0_423] : memref<128x512xf32, #tpu.memory_space<vmem>>, vector<8x512xf32>
    %1157 = arith.truncf %1155 : vector<8x128xf32> to vector<8x128xbf16>
    %cst_424 = arith.constant dense<0.000000e+00> : vector<8x512xf32>
    %1158 = tpu.matmul %1157, %1033, %cst_424 {dimension_numbers = #tpu.dot_dimension_numbers<[1], [0], [0], [1], [0, 0, 1, 1], [], []>} : vector<8x128xbf16>, vector<128x512xbf16>, vector<8x512xf32> -> vector<8x512xf32>
    %1159 = arith.addf %1156, %1158 : vector<8x512xf32>
    %1160 = vector.extract_strided_slice %1159 {offsets = [0, 0], sizes = [8, 384], strides = [1, 1]} : vector<8x512xf32> to vector<8x384xf32>
    %1161 = arith.negf %1160 : vector<8x384xf32>
    %1162 = math.exp %1161 : vector<8x384xf32>
    %cst_425 = arith.constant 1.000000e+00 : f32
    %1163 = vector.broadcast %cst_425 : f32 to vector<8x384xf32>
    %1164 = arith.addf %1163, %1162 : vector<8x384xf32>
    %1165 = arith.divf %1163, %1164 : vector<8x384xf32>
    %1166 = vector.extract_strided_slice %1165 {offsets = [0, 0], sizes = [8, 128], strides = [1, 1]} : vector<8x384xf32> to vector<8x128xf32>
    %1167 = vector.extract_strided_slice %1165 {offsets = [0, 128], sizes = [8, 128], strides = [1, 1]} : vector<8x384xf32> to vector<8x128xf32>
    %1168 = vector.extract_strided_slice %1165 {offsets = [0, 256], sizes = [8, 128], strides = [1, 1]} : vector<8x384xf32> to vector<8x128xf32>
    %1169 = vector.extract_strided_slice %1159 {offsets = [0, 384], sizes = [8, 128], strides = [1, 1]} : vector<8x512xf32> to vector<8x128xf32>
    %1170 = math.tanh %1169 : vector<8x128xf32>
    %1171 = arith.mulf %1167, %1153 : vector<8x128xf32>
    %1172 = arith.mulf %1166, %1170 : vector<8x128xf32>
    %1173 = arith.addf %1171, %1172 : vector<8x128xf32>
    %1174 = math.tanh %1173 : vector<8x128xf32>
    %1175 = arith.mulf %1168, %1174 : vector<8x128xf32>
    %c56_426 = arith.constant 56 : index
    %c0_427 = arith.constant 0 : index
    %1176 = vector.load %arg9[%c56_426, %c0_427] : memref<128x512xf32, #tpu.memory_space<vmem>>, vector<8x512xf32>
    %1177 = arith.truncf %1175 : vector<8x128xf32> to vector<8x128xbf16>
    %cst_428 = arith.constant dense<0.000000e+00> : vector<8x512xf32>
    %1178 = tpu.matmul %1177, %1033, %cst_428 {dimension_numbers = #tpu.dot_dimension_numbers<[1], [0], [0], [1], [0, 0, 1, 1], [], []>} : vector<8x128xbf16>, vector<128x512xbf16>, vector<8x512xf32> -> vector<8x512xf32>
    %1179 = arith.addf %1176, %1178 : vector<8x512xf32>
    %1180 = vector.extract_strided_slice %1179 {offsets = [0, 0], sizes = [8, 384], strides = [1, 1]} : vector<8x512xf32> to vector<8x384xf32>
    %1181 = arith.negf %1180 : vector<8x384xf32>
    %1182 = math.exp %1181 : vector<8x384xf32>
    %cst_429 = arith.constant 1.000000e+00 : f32
    %1183 = vector.broadcast %cst_429 : f32 to vector<8x384xf32>
    %1184 = arith.addf %1183, %1182 : vector<8x384xf32>
    %1185 = arith.divf %1183, %1184 : vector<8x384xf32>
    %1186 = vector.extract_strided_slice %1185 {offsets = [0, 0], sizes = [8, 128], strides = [1, 1]} : vector<8x384xf32> to vector<8x128xf32>
    %1187 = vector.extract_strided_slice %1185 {offsets = [0, 128], sizes = [8, 128], strides = [1, 1]} : vector<8x384xf32> to vector<8x128xf32>
    %1188 = vector.extract_strided_slice %1185 {offsets = [0, 256], sizes = [8, 128], strides = [1, 1]} : vector<8x384xf32> to vector<8x128xf32>
    %1189 = vector.extract_strided_slice %1179 {offsets = [0, 384], sizes = [8, 128], strides = [1, 1]} : vector<8x512xf32> to vector<8x128xf32>
    %1190 = math.tanh %1189 : vector<8x128xf32>
    %1191 = arith.mulf %1187, %1173 : vector<8x128xf32>
    %1192 = arith.mulf %1186, %1190 : vector<8x128xf32>
    %1193 = arith.addf %1191, %1192 : vector<8x128xf32>
    %1194 = math.tanh %1193 : vector<8x128xf32>
    %1195 = arith.mulf %1188, %1194 : vector<8x128xf32>
    %c64_430 = arith.constant 64 : index
    %c0_431 = arith.constant 0 : index
    %1196 = vector.load %arg9[%c64_430, %c0_431] : memref<128x512xf32, #tpu.memory_space<vmem>>, vector<8x512xf32>
    %1197 = arith.truncf %1195 : vector<8x128xf32> to vector<8x128xbf16>
    %cst_432 = arith.constant dense<0.000000e+00> : vector<8x512xf32>
    %1198 = tpu.matmul %1197, %1033, %cst_432 {dimension_numbers = #tpu.dot_dimension_numbers<[1], [0], [0], [1], [0, 0, 1, 1], [], []>} : vector<8x128xbf16>, vector<128x512xbf16>, vector<8x512xf32> -> vector<8x512xf32>
    %1199 = arith.addf %1196, %1198 : vector<8x512xf32>
    %1200 = vector.extract_strided_slice %1199 {offsets = [0, 0], sizes = [8, 384], strides = [1, 1]} : vector<8x512xf32> to vector<8x384xf32>
    %1201 = arith.negf %1200 : vector<8x384xf32>
    %1202 = math.exp %1201 : vector<8x384xf32>
    %cst_433 = arith.constant 1.000000e+00 : f32
    %1203 = vector.broadcast %cst_433 : f32 to vector<8x384xf32>
    %1204 = arith.addf %1203, %1202 : vector<8x384xf32>
    %1205 = arith.divf %1203, %1204 : vector<8x384xf32>
    %1206 = vector.extract_strided_slice %1205 {offsets = [0, 0], sizes = [8, 128], strides = [1, 1]} : vector<8x384xf32> to vector<8x128xf32>
    %1207 = vector.extract_strided_slice %1205 {offsets = [0, 128], sizes = [8, 128], strides = [1, 1]} : vector<8x384xf32> to vector<8x128xf32>
    %1208 = vector.extract_strided_slice %1205 {offsets = [0, 256], sizes = [8, 128], strides = [1, 1]} : vector<8x384xf32> to vector<8x128xf32>
    %1209 = vector.extract_strided_slice %1199 {offsets = [0, 384], sizes = [8, 128], strides = [1, 1]} : vector<8x512xf32> to vector<8x128xf32>
    %1210 = math.tanh %1209 : vector<8x128xf32>
    %1211 = arith.mulf %1207, %1193 : vector<8x128xf32>
    %1212 = arith.mulf %1206, %1210 : vector<8x128xf32>
    %1213 = arith.addf %1211, %1212 : vector<8x128xf32>
    %1214 = math.tanh %1213 : vector<8x128xf32>
    %1215 = arith.mulf %1208, %1214 : vector<8x128xf32>
    %c72_434 = arith.constant 72 : index
    %c0_435 = arith.constant 0 : index
    %1216 = vector.load %arg9[%c72_434, %c0_435] : memref<128x512xf32, #tpu.memory_space<vmem>>, vector<8x512xf32>
    %1217 = arith.truncf %1215 : vector<8x128xf32> to vector<8x128xbf16>
    %cst_436 = arith.constant dense<0.000000e+00> : vector<8x512xf32>
    %1218 = tpu.matmul %1217, %1033, %cst_436 {dimension_numbers = #tpu.dot_dimension_numbers<[1], [0], [0], [1], [0, 0, 1, 1], [], []>} : vector<8x128xbf16>, vector<128x512xbf16>, vector<8x512xf32> -> vector<8x512xf32>
    %1219 = arith.addf %1216, %1218 : vector<8x512xf32>
    %1220 = vector.extract_strided_slice %1219 {offsets = [0, 0], sizes = [8, 384], strides = [1, 1]} : vector<8x512xf32> to vector<8x384xf32>
    %1221 = arith.negf %1220 : vector<8x384xf32>
    %1222 = math.exp %1221 : vector<8x384xf32>
    %cst_437 = arith.constant 1.000000e+00 : f32
    %1223 = vector.broadcast %cst_437 : f32 to vector<8x384xf32>
    %1224 = arith.addf %1223, %1222 : vector<8x384xf32>
    %1225 = arith.divf %1223, %1224 : vector<8x384xf32>
    %1226 = vector.extract_strided_slice %1225 {offsets = [0, 0], sizes = [8, 128], strides = [1, 1]} : vector<8x384xf32> to vector<8x128xf32>
    %1227 = vector.extract_strided_slice %1225 {offsets = [0, 128], sizes = [8, 128], strides = [1, 1]} : vector<8x384xf32> to vector<8x128xf32>
    %1228 = vector.extract_strided_slice %1225 {offsets = [0, 256], sizes = [8, 128], strides = [1, 1]} : vector<8x384xf32> to vector<8x128xf32>
    %1229 = vector.extract_strided_slice %1219 {offsets = [0, 384], sizes = [8, 128], strides = [1, 1]} : vector<8x512xf32> to vector<8x128xf32>
    %1230 = math.tanh %1229 : vector<8x128xf32>
    %1231 = arith.mulf %1227, %1213 : vector<8x128xf32>
    %1232 = arith.mulf %1226, %1230 : vector<8x128xf32>
    %1233 = arith.addf %1231, %1232 : vector<8x128xf32>
    %1234 = math.tanh %1233 : vector<8x128xf32>
    %1235 = arith.mulf %1228, %1234 : vector<8x128xf32>
    %c80_438 = arith.constant 80 : index
    %c0_439 = arith.constant 0 : index
    %1236 = vector.load %arg9[%c80_438, %c0_439] : memref<128x512xf32, #tpu.memory_space<vmem>>, vector<8x512xf32>
    %1237 = arith.truncf %1235 : vector<8x128xf32> to vector<8x128xbf16>
    %cst_440 = arith.constant dense<0.000000e+00> : vector<8x512xf32>
    %1238 = tpu.matmul %1237, %1033, %cst_440 {dimension_numbers = #tpu.dot_dimension_numbers<[1], [0], [0], [1], [0, 0, 1, 1], [], []>} : vector<8x128xbf16>, vector<128x512xbf16>, vector<8x512xf32> -> vector<8x512xf32>
    %1239 = arith.addf %1236, %1238 : vector<8x512xf32>
    %1240 = vector.extract_strided_slice %1239 {offsets = [0, 0], sizes = [8, 384], strides = [1, 1]} : vector<8x512xf32> to vector<8x384xf32>
    %1241 = arith.negf %1240 : vector<8x384xf32>
    %1242 = math.exp %1241 : vector<8x384xf32>
    %cst_441 = arith.constant 1.000000e+00 : f32
    %1243 = vector.broadcast %cst_441 : f32 to vector<8x384xf32>
    %1244 = arith.addf %1243, %1242 : vector<8x384xf32>
    %1245 = arith.divf %1243, %1244 : vector<8x384xf32>
    %1246 = vector.extract_strided_slice %1245 {offsets = [0, 0], sizes = [8, 128], strides = [1, 1]} : vector<8x384xf32> to vector<8x128xf32>
    %1247 = vector.extract_strided_slice %1245 {offsets = [0, 128], sizes = [8, 128], strides = [1, 1]} : vector<8x384xf32> to vector<8x128xf32>
    %1248 = vector.extract_strided_slice %1245 {offsets = [0, 256], sizes = [8, 128], strides = [1, 1]} : vector<8x384xf32> to vector<8x128xf32>
    %1249 = vector.extract_strided_slice %1239 {offsets = [0, 384], sizes = [8, 128], strides = [1, 1]} : vector<8x512xf32> to vector<8x128xf32>
    %1250 = math.tanh %1249 : vector<8x128xf32>
    %1251 = arith.mulf %1247, %1233 : vector<8x128xf32>
    %1252 = arith.mulf %1246, %1250 : vector<8x128xf32>
    %1253 = arith.addf %1251, %1252 : vector<8x128xf32>
    %1254 = math.tanh %1253 : vector<8x128xf32>
    %1255 = arith.mulf %1248, %1254 : vector<8x128xf32>
    %c88_442 = arith.constant 88 : index
    %c0_443 = arith.constant 0 : index
    %1256 = vector.load %arg9[%c88_442, %c0_443] : memref<128x512xf32, #tpu.memory_space<vmem>>, vector<8x512xf32>
    %1257 = arith.truncf %1255 : vector<8x128xf32> to vector<8x128xbf16>
    %cst_444 = arith.constant dense<0.000000e+00> : vector<8x512xf32>
    %1258 = tpu.matmul %1257, %1033, %cst_444 {dimension_numbers = #tpu.dot_dimension_numbers<[1], [0], [0], [1], [0, 0, 1, 1], [], []>} : vector<8x128xbf16>, vector<128x512xbf16>, vector<8x512xf32> -> vector<8x512xf32>
    %1259 = arith.addf %1256, %1258 : vector<8x512xf32>
    %1260 = vector.extract_strided_slice %1259 {offsets = [0, 0], sizes = [8, 384], strides = [1, 1]} : vector<8x512xf32> to vector<8x384xf32>
    %1261 = arith.negf %1260 : vector<8x384xf32>
    %1262 = math.exp %1261 : vector<8x384xf32>
    %cst_445 = arith.constant 1.000000e+00 : f32
    %1263 = vector.broadcast %cst_445 : f32 to vector<8x384xf32>
    %1264 = arith.addf %1263, %1262 : vector<8x384xf32>
    %1265 = arith.divf %1263, %1264 : vector<8x384xf32>
    %1266 = vector.extract_strided_slice %1265 {offsets = [0, 0], sizes = [8, 128], strides = [1, 1]} : vector<8x384xf32> to vector<8x128xf32>
    %1267 = vector.extract_strided_slice %1265 {offsets = [0, 128], sizes = [8, 128], strides = [1, 1]} : vector<8x384xf32> to vector<8x128xf32>
    %1268 = vector.extract_strided_slice %1265 {offsets = [0, 256], sizes = [8, 128], strides = [1, 1]} : vector<8x384xf32> to vector<8x128xf32>
    %1269 = vector.extract_strided_slice %1259 {offsets = [0, 384], sizes = [8, 128], strides = [1, 1]} : vector<8x512xf32> to vector<8x128xf32>
    %1270 = math.tanh %1269 : vector<8x128xf32>
    %1271 = arith.mulf %1267, %1253 : vector<8x128xf32>
    %1272 = arith.mulf %1266, %1270 : vector<8x128xf32>
    %1273 = arith.addf %1271, %1272 : vector<8x128xf32>
    %1274 = math.tanh %1273 : vector<8x128xf32>
    %1275 = arith.mulf %1268, %1274 : vector<8x128xf32>
    %c96_446 = arith.constant 96 : index
    %c0_447 = arith.constant 0 : index
    %1276 = vector.load %arg9[%c96_446, %c0_447] : memref<128x512xf32, #tpu.memory_space<vmem>>, vector<8x512xf32>
    %1277 = arith.truncf %1275 : vector<8x128xf32> to vector<8x128xbf16>
    %cst_448 = arith.constant dense<0.000000e+00> : vector<8x512xf32>
    %1278 = tpu.matmul %1277, %1033, %cst_448 {dimension_numbers = #tpu.dot_dimension_numbers<[1], [0], [0], [1], [0, 0, 1, 1], [], []>} : vector<8x128xbf16>, vector<128x512xbf16>, vector<8x512xf32> -> vector<8x512xf32>
    %1279 = arith.addf %1276, %1278 : vector<8x512xf32>
    %1280 = vector.extract_strided_slice %1279 {offsets = [0, 0], sizes = [8, 384], strides = [1, 1]} : vector<8x512xf32> to vector<8x384xf32>
    %1281 = arith.negf %1280 : vector<8x384xf32>
    %1282 = math.exp %1281 : vector<8x384xf32>
    %cst_449 = arith.constant 1.000000e+00 : f32
    %1283 = vector.broadcast %cst_449 : f32 to vector<8x384xf32>
    %1284 = arith.addf %1283, %1282 : vector<8x384xf32>
    %1285 = arith.divf %1283, %1284 : vector<8x384xf32>
    %1286 = vector.extract_strided_slice %1285 {offsets = [0, 0], sizes = [8, 128], strides = [1, 1]} : vector<8x384xf32> to vector<8x128xf32>
    %1287 = vector.extract_strided_slice %1285 {offsets = [0, 128], sizes = [8, 128], strides = [1, 1]} : vector<8x384xf32> to vector<8x128xf32>
    %1288 = vector.extract_strided_slice %1285 {offsets = [0, 256], sizes = [8, 128], strides = [1, 1]} : vector<8x384xf32> to vector<8x128xf32>
    %1289 = vector.extract_strided_slice %1279 {offsets = [0, 384], sizes = [8, 128], strides = [1, 1]} : vector<8x512xf32> to vector<8x128xf32>
    %1290 = math.tanh %1289 : vector<8x128xf32>
    %1291 = arith.mulf %1287, %1273 : vector<8x128xf32>
    %1292 = arith.mulf %1286, %1290 : vector<8x128xf32>
    %1293 = arith.addf %1291, %1292 : vector<8x128xf32>
    %1294 = math.tanh %1293 : vector<8x128xf32>
    %1295 = arith.mulf %1288, %1294 : vector<8x128xf32>
    %c104_450 = arith.constant 104 : index
    %c0_451 = arith.constant 0 : index
    %1296 = vector.load %arg9[%c104_450, %c0_451] : memref<128x512xf32, #tpu.memory_space<vmem>>, vector<8x512xf32>
    %1297 = arith.truncf %1295 : vector<8x128xf32> to vector<8x128xbf16>
    %cst_452 = arith.constant dense<0.000000e+00> : vector<8x512xf32>
    %1298 = tpu.matmul %1297, %1033, %cst_452 {dimension_numbers = #tpu.dot_dimension_numbers<[1], [0], [0], [1], [0, 0, 1, 1], [], []>} : vector<8x128xbf16>, vector<128x512xbf16>, vector<8x512xf32> -> vector<8x512xf32>
    %1299 = arith.addf %1296, %1298 : vector<8x512xf32>
    %1300 = vector.extract_strided_slice %1299 {offsets = [0, 0], sizes = [8, 384], strides = [1, 1]} : vector<8x512xf32> to vector<8x384xf32>
    %1301 = arith.negf %1300 : vector<8x384xf32>
    %1302 = math.exp %1301 : vector<8x384xf32>
    %cst_453 = arith.constant 1.000000e+00 : f32
    %1303 = vector.broadcast %cst_453 : f32 to vector<8x384xf32>
    %1304 = arith.addf %1303, %1302 : vector<8x384xf32>
    %1305 = arith.divf %1303, %1304 : vector<8x384xf32>
    %1306 = vector.extract_strided_slice %1305 {offsets = [0, 0], sizes = [8, 128], strides = [1, 1]} : vector<8x384xf32> to vector<8x128xf32>
    %1307 = vector.extract_strided_slice %1305 {offsets = [0, 128], sizes = [8, 128], strides = [1, 1]} : vector<8x384xf32> to vector<8x128xf32>
    %1308 = vector.extract_strided_slice %1305 {offsets = [0, 256], sizes = [8, 128], strides = [1, 1]} : vector<8x384xf32> to vector<8x128xf32>
    %1309 = vector.extract_strided_slice %1299 {offsets = [0, 384], sizes = [8, 128], strides = [1, 1]} : vector<8x512xf32> to vector<8x128xf32>
    %1310 = math.tanh %1309 : vector<8x128xf32>
    %1311 = arith.mulf %1307, %1293 : vector<8x128xf32>
    %1312 = arith.mulf %1306, %1310 : vector<8x128xf32>
    %1313 = arith.addf %1311, %1312 : vector<8x128xf32>
    %1314 = math.tanh %1313 : vector<8x128xf32>
    %1315 = arith.mulf %1308, %1314 : vector<8x128xf32>
    %c112_454 = arith.constant 112 : index
    %c0_455 = arith.constant 0 : index
    %1316 = vector.load %arg9[%c112_454, %c0_455] : memref<128x512xf32, #tpu.memory_space<vmem>>, vector<8x512xf32>
    %1317 = arith.truncf %1315 : vector<8x128xf32> to vector<8x128xbf16>
    %cst_456 = arith.constant dense<0.000000e+00> : vector<8x512xf32>
    %1318 = tpu.matmul %1317, %1033, %cst_456 {dimension_numbers = #tpu.dot_dimension_numbers<[1], [0], [0], [1], [0, 0, 1, 1], [], []>} : vector<8x128xbf16>, vector<128x512xbf16>, vector<8x512xf32> -> vector<8x512xf32>
    %1319 = arith.addf %1316, %1318 : vector<8x512xf32>
    %1320 = vector.extract_strided_slice %1319 {offsets = [0, 0], sizes = [8, 384], strides = [1, 1]} : vector<8x512xf32> to vector<8x384xf32>
    %1321 = arith.negf %1320 : vector<8x384xf32>
    %1322 = math.exp %1321 : vector<8x384xf32>
    %cst_457 = arith.constant 1.000000e+00 : f32
    %1323 = vector.broadcast %cst_457 : f32 to vector<8x384xf32>
    %1324 = arith.addf %1323, %1322 : vector<8x384xf32>
    %1325 = arith.divf %1323, %1324 : vector<8x384xf32>
    %1326 = vector.extract_strided_slice %1325 {offsets = [0, 0], sizes = [8, 128], strides = [1, 1]} : vector<8x384xf32> to vector<8x128xf32>
    %1327 = vector.extract_strided_slice %1325 {offsets = [0, 128], sizes = [8, 128], strides = [1, 1]} : vector<8x384xf32> to vector<8x128xf32>
    %1328 = vector.extract_strided_slice %1325 {offsets = [0, 256], sizes = [8, 128], strides = [1, 1]} : vector<8x384xf32> to vector<8x128xf32>
    %1329 = vector.extract_strided_slice %1319 {offsets = [0, 384], sizes = [8, 128], strides = [1, 1]} : vector<8x512xf32> to vector<8x128xf32>
    %1330 = math.tanh %1329 : vector<8x128xf32>
    %1331 = arith.mulf %1327, %1313 : vector<8x128xf32>
    %1332 = arith.mulf %1326, %1330 : vector<8x128xf32>
    %1333 = arith.addf %1331, %1332 : vector<8x128xf32>
    %1334 = math.tanh %1333 : vector<8x128xf32>
    %1335 = arith.mulf %1328, %1334 : vector<8x128xf32>
    %c120_458 = arith.constant 120 : index
    %c0_459 = arith.constant 0 : index
    %1336 = vector.load %arg9[%c120_458, %c0_459] : memref<128x512xf32, #tpu.memory_space<vmem>>, vector<8x512xf32>
    %1337 = arith.truncf %1335 : vector<8x128xf32> to vector<8x128xbf16>
    %cst_460 = arith.constant dense<0.000000e+00> : vector<8x512xf32>
    %1338 = tpu.matmul %1337, %1033, %cst_460 {dimension_numbers = #tpu.dot_dimension_numbers<[1], [0], [0], [1], [0, 0, 1, 1], [], []>} : vector<8x128xbf16>, vector<128x512xbf16>, vector<8x512xf32> -> vector<8x512xf32>
    %1339 = arith.addf %1336, %1338 : vector<8x512xf32>
    %1340 = vector.extract_strided_slice %1339 {offsets = [0, 0], sizes = [8, 384], strides = [1, 1]} : vector<8x512xf32> to vector<8x384xf32>
    %1341 = arith.negf %1340 : vector<8x384xf32>
    %1342 = math.exp %1341 : vector<8x384xf32>
    %cst_461 = arith.constant 1.000000e+00 : f32
    %1343 = vector.broadcast %cst_461 : f32 to vector<8x384xf32>
    %1344 = arith.addf %1343, %1342 : vector<8x384xf32>
    %1345 = arith.divf %1343, %1344 : vector<8x384xf32>
    %1346 = vector.extract_strided_slice %1345 {offsets = [0, 0], sizes = [8, 128], strides = [1, 1]} : vector<8x384xf32> to vector<8x128xf32>
    %1347 = vector.extract_strided_slice %1345 {offsets = [0, 128], sizes = [8, 128], strides = [1, 1]} : vector<8x384xf32> to vector<8x128xf32>
    %1348 = vector.extract_strided_slice %1345 {offsets = [0, 256], sizes = [8, 128], strides = [1, 1]} : vector<8x384xf32> to vector<8x128xf32>
    %1349 = vector.extract_strided_slice %1339 {offsets = [0, 384], sizes = [8, 128], strides = [1, 1]} : vector<8x512xf32> to vector<8x128xf32>
    %1350 = math.tanh %1349 : vector<8x128xf32>
    %1351 = arith.mulf %1347, %1333 : vector<8x128xf32>
    %1352 = arith.mulf %1346, %1350 : vector<8x128xf32>
    %1353 = arith.addf %1351, %1352 : vector<8x128xf32>
    %1354 = math.tanh %1353 : vector<8x128xf32>
    %1355 = arith.mulf %1348, %1354 : vector<8x128xf32>
    %c0_462 = arith.constant 0 : index
    %c0_463 = arith.constant 0 : index
    %1356 = vector.load %arg10[%c0_462, %c0_463] : memref<8x128xf32, #tpu.memory_space<vmem>>, vector<8x128xf32>
    tpu.vector_store %arg10[%c0_462, %c0_463], %1355 {strides = array<i32>} : memref<8x128xf32, #tpu.memory_space<vmem>>, vector<8x128xf32>,
    %c0_464 = arith.constant 0 : index
    %c0_465 = arith.constant 0 : index
    %1357 = vector.load %arg11[%c0_464, %c0_465] : memref<8x128xf32, #tpu.memory_space<vmem>>, vector<8x128xf32>
    tpu.vector_store %arg11[%c0_464, %c0_465], %1353 {strides = array<i32>} : memref<8x128xf32, #tpu.memory_space<vmem>>, vector<8x128xf32>,
    %c0_i32_466 = arith.constant 0 : i32
    %1358 = arith.cmpi eq, %arg0, %c0_i32_466 : i32
    %1359 = arith.extui %1358 : i1 to i32
    %c0_i32_467 = arith.constant 0 : i32
    %1360 = arith.cmpi ne, %1359, %c0_i32_467 : i32
    scf.if %1360 {
      %1361 = arith.truncf %1355 : vector<8x128xf32> to vector<8x128xbf16>
      %c0_468 = arith.constant 0 : index
      %c0_469 = arith.constant 0 : index
      %1362 = vector.load %arg5[%c0_468, %c0_469] : memref<128x128xbf16, #tpu.memory_space<vmem>>, vector<128x128xbf16>
      %cst_470 = arith.constant dense<0.000000e+00> : vector<8x128xf32>
      %1363 = tpu.matmul %1361, %1362, %cst_470 {dimension_numbers = #tpu.dot_dimension_numbers<[1], [0], [0], [1], [0, 0, 1, 1], [], []>} : vector<8x128xbf16>, vector<128x128xbf16>, vector<8x128xf32> -> vector<8x128xf32>
      %c0_471 = arith.constant 0 : index
      %c0_472 = arith.constant 0 : index
      %1364 = vector.load %arg6[%c0_471, %c0_472] : memref<1x128xf32, #tpu.memory_space<vmem>>, vector<1x128xf32>
      %1365 = vector.broadcast %1364 : vector<1x128xf32> to vector<8x128xf32>
      %1366 = arith.addf %1363, %1365 : vector<8x128xf32>
      %c0_473 = arith.constant 0 : index
      %c0_474 = arith.constant 0 : index
      %1367 = vector.load %arg7[%c0_473, %c0_474] : memref<8x128xf32, #tpu.memory_space<vmem>>, vector<8x128xf32>
      tpu.vector_store %arg7[%c0_473, %c0_474], %1366 {strides = array<i32>} : memref<8x128xf32, #tpu.memory_space<vmem>>, vector<8x128xf32>,
    } else {
    }
    return
  }
  func.func @transform_0(%arg0: i32, %arg1: memref<128xi32, #tpu.memory_space<smem>>) -> (i32, i32, i32) {
    %c0_i32 = arith.constant 0 : i32
    %c0_i32_0 = arith.constant 0 : i32
    %c0_i32_1 = arith.constant 0 : i32
    %c0_i32_2 = arith.constant 0 : i32
    return %c0_i32, %c0_i32_0, %c0_i32_1 : i32, i32, i32
  }
  func.func @transform_1(%arg0: i32, %arg1: memref<128xi32, #tpu.memory_space<smem>>) -> (i32, i32) {
    %c0_i32 = arith.constant 0 : i32
    %c0_i32_0 = arith.constant 0 : i32
    %c0_i32_1 = arith.constant 0 : i32
    return %c0_i32, %c0_i32_0 : i32, i32
  }
  func.func @transform_2(%arg0: i32, %arg1: memref<128xi32, #tpu.memory_space<smem>>) -> (i32, i32) {
    %c0_i32 = arith.constant 0 : i32
    %c0_i32_0 = arith.constant 0 : i32
    %c0_i32_1 = arith.constant 0 : i32
    return %c0_i32, %c0_i32_0 : i32, i32
  }
  func.func @transform_3(%arg0: i32, %arg1: memref<128xi32, #tpu.memory_space<smem>>) -> (i32, i32) {
    %c0_i32 = arith.constant 0 : i32
    %c0_i32_0 = arith.constant 0 : i32
    %c0_i32_1 = arith.constant 0 : i32
    return %c0_i32, %c0_i32_0 : i32, i32
  }
  func.func @transform_4(%arg0: i32, %arg1: memref<128xi32, #tpu.memory_space<smem>>) -> (i32, i32) {
    %c0_i32 = arith.constant 0 : i32
    %c0_i32_0 = arith.constant 0 : i32
    %c0_i32_1 = arith.constant 0 : i32
    return %c0_i32, %c0_i32_0 : i32, i32
  }
  func.func @transform_5(%arg0: i32, %arg1: memref<128xi32, #tpu.memory_space<smem>>) -> (i32, i32) {
    %c0_i32 = arith.constant 0 : i32
    %c0_i32_0 = arith.constant 0 : i32
    %c0_i32_1 = arith.constant 0 : i32
    return %c0_i32, %c0_i32_0 : i32, i32
  }
}

</mosaic_0001>

<bundles_post_ra>
// kernel: tpu_custom_call.1
= control target key start
LH: loop header
LB: loop body
LE: loop exit
PB: predicated region body
PF: predicated region fallthrough
CT: control target
= control target key end

     0   :  { %s6317_s0 = inlined_call_operand.vmem [shape: s32[128], index: 0, kind: input, shape index: {}]   ;;  %s6318_s1 = inlined_call_operand.vmem [shape: bf16[50,1,128], index: 1, kind: input, shape index: {}]   ;;  %s6319_s2 = inlined_call_operand.hbm [shape: bf16[128,512], index: 2, kind: input, shape index: {}]   ;;  %s6320_s3 = inlined_call_operand.hbm [shape: bf16[128,512], index: 3, kind: input, shape index: {}]   ;;  %s6321_s4 = inlined_call_operand.vmem [shape: bf16[128,128], index: 4, kind: input, shape index: {}]   ;;  %s6322_s5 = inlined_call_operand.vmem [shape: f32[1,128], index: 5, kind: input, shape index: {}]   ;;  %s6323_s6 = inlined_call_operand.hbm [shape: f32[8,128], index: 6, kind: output, shape index: {}]  }
   0x1   :  { %6328 = sst [smem:[#allocation66_spill]] %s6321_s4  ;;  %s11_s23 = sshll.u32 %s6317_s0, 4  ;;  %s12_s23 = int_to_ptr.vmem [resolvable:$true] %s11_s23 }
   0x2   :  { %6329 = sst [smem:[#allocation67_spill]] %s6322_s5  ;;  %s4364_s24 = scalar_lea.vmem %s12_s23, 16 }
   0x3   :  { %6330 = sst [smem:[#allocation68_spill]] %s6323_s6  ;;  %p4365_p0 = scmp.ne.s32.totalorder %s12_s23, %s4364_s24 }
   0x4   :  { %p4369_p1 = scmp.lt.s32.totalorder %s12_s23, %s12_s23  ;;  %p4370_p2 = scmp.lt.s32.totalorder %s4364_s24, %s4364_s24 }
   0x6   :  { %p4371_p3 = por %p4370_p2, %p4369_p1 }
   0x8   :  { %p4372_p4 = pnand %p4371_p3, %p4365_p0 }
   0xa   :  { %4375 = shalt.err (!%p4372_p4)  }
   0xb   :  { %s4450_s25 = smov [#allocation7]  }
   0xc   :  { %14 = dma.vmem_to_smem %s12_s23, 16, %s4450_s25, [#allocation6] }
   0xd   :  { %4442 = dma.done.wait [#allocation6], 16 }
   0xe   :  { %4443 = vsyncadd [#allocation6], 4294967280 }
   0xf   :  { %16 = sfence }
  0x10   :  { %17 = vsyncpa [#allocation9], 0 }
  0x11   :  { %18 = vsyncpa [#allocation12], 0 }
  0x12   :  { %19 = vsyncpa [#allocation10], 0  ;;  %s4451_s26 = smov [#allocation8]   ;;  %s4376_s29 = scalar_lea.hbm %s6319_s2, 4096 }
  0x13   :  { %s27_s27 = sshll.u32 %s4451_s26, 4  ;;  %p4377_p5 = scmp.ne.s32.totalorder %s6319_s2, %s4376_s29  ;;  %s28_s27 = int_to_ptr.vmem [resolvable:$true] %s27_s27 }
  0x14   :  { %p4380_p6 = scmp.lt.u32.totalorder %s4376_s29, %s6319_s2 }
  0x16   :  { %p4382_p7 = pnand %p4380_p6, %p4377_p5 }
  0x18   :  { %4385 = shalt.err (!%p4382_p7)
}
  0x19   :  { %s4386_s10 = scalar_lea.vmem %s28_s27, 4096  ;;  %p4391_p9 = scmp.lt.s32.totalorder %s28_s27, %s28_s27 }
  0x1a   :  { %p4387_p8 = scmp.ne.s32.totalorder %s28_s27, %s4386_s10  ;;  %p4392_p10 = scmp.lt.s32.totalorder %s4386_s10, %s4386_s10 }
  0x1c   :  { %p4393_p11 = por %p4392_p10, %p4391_p9 }
  0x1e   :  { %p4394_p12 = pnand %p4393_p11, %p4387_p8 }
  0x20   :  { %4397 = shalt.err (!%p4394_p12)
}
  0x21   :  { %s4452_s11 = smov 256   ;;  %s4453_s12 = smov 16  }
  0x22   :  { %33 = dma.hbm_to_vmem [thread:$0]  %s6319_s2, 4096, %s28_s27, [#allocation9], %s4452_s11, %s4452_s11, %s4453_s12  }
  0x23   :  { %s4454_s15 = smov [#allocation11]   ;;  %s4398_s19 = scalar_lea.hbm %s6320_s3, 4096 }
  0x24   :  { %s39_s16 = sshll.u32 %s4454_s15, 4  ;;  %p4399_p13 = scmp.ne.s32.totalorder %s6320_s3, %s4398_s19  ;;  %s40_s16 = int_to_ptr.vmem [resolvable:$true] %s39_s16 }
  0x25   :  { %p4402_p0 = scmp.lt.u32.totalorder %s4398_s19, %s6320_s3 }
  0x27   :  { %p4404_p1 = pnand %p4402_p0, %p4399_p13 }
  0x29   :  { %4407 = shalt.err (!%p4404_p1)
}
  0x2a   :  { %s4408_s24 = scalar_lea.vmem %s40_s16, 4096  ;;  %p4413_p3 = scmp.lt.s32.totalorder %s40_s16, %s40_s16 }
  0x2b   :  { %p4409_p2 = scmp.ne.s32.totalorder %s40_s16, %s4408_s24  ;;  %p4414_p4 = scmp.lt.s32.totalorder %s4408_s24, %s4408_s24 }
  0x2d   :  { %p4415_p5 = por %p4414_p4, %p4413_p3 }
  0x2f   :  { %p4416_p6 = pnand %p4415_p5, %p4409_p2 }
  0x31   :  { %4419 = shalt.err (!%p4416_p6)
}
  0x32   :  { %45 = dma.hbm_to_vmem [thread:$0]  %s6320_s3, 4096, %s40_s16, [#allocation12], %s4452_s11, %s4452_s11, %s4453_s12  }
  0x33   :  { %4444 = dma.done.wait [#allocation9], 4096  }
  0x34   :  { %4445 = vsyncadd [#allocation9], 4294963200 }
  0x35   :  { %4446 = dma.done.wait [#allocation12], 4096  }
  0x36   :  { %4447 = vsyncadd [#allocation12], 4294963200  ;;  %v6326_v0 = vmov 0   ;;  %s4524_s26 = sld [smem:[#allocation7]]  ;;  %s4526_s27 = sld [smem:[#allocation7 + $0x1]]  ;;  %vm4458_vm0 = vmmov 0  }
  0x37   :  { %1079 = vmatprep.mubr.bf16.mxu0 %v6326_v0  ;;  %1192 = vmatprep.mubr.bf16.mxu1 %v6326_v0  ;;  %s4528_s0 = sld [smem:[#allocation7 + $0x2]]  ;;  %v3920_v1 = vld [vmem:[#allocation8 + $0x4] ss:$16 sps:$4 sm:$0xff]   ;;  %s4530_s28 = sld [smem:[#allocation7 + $0x3]]  ;;  %v3922_v2 = vld [vmem:[#allocation8 + $0xc] ss:$16 sps:$4 sm:$0xff]  }
  0x38   :  { %s4532_s3 = sld [smem:[#allocation7 + $0x4]]  ;;  %1047 = vmatprep.subr.bf16.mxu0 %v3920_v1  ;;  %v3924_v3 = vld [vmem:[#allocation8] ss:$16 sps:$4 sm:$0xff]   ;;  %v3925_v4 = vld [vmem:[#allocation8 + $0x8] ss:$16 sps:$4 sm:$0xff]   ;;  %1160 = vmatprep.subr.bf16.mxu1 %v3922_v2  ;;  %s4534_s29 = sld [smem:[#allocation7 + $0x5]] }
  0x39   :  { %v3926_v5 = vld [vmem:[#allocation8 + $0x24] ss:$16 sps:$4 sm:$0xff]   ;;  %1048 = vmatpush1.bf16.msra.mxu0 %v3924_v3  ;;  %1161 = vmatpush1.bf16.msra.mxu1 %v3925_v4  ;;  %v3928_v6 = vld [vmem:[#allocation8 + $0x2c] ss:$16 sps:$4 sm:$0xff]   ;;  %v3930_v7 = vld [vmem:[#allocation8 + $0x20] ss:$16 sps:$4 sm:$0xff]  }
  0x3a   :  { %1049 = vmatprep.subr.bf16.mxu0 %v3926_v5  ;;  %v3931_v8 = vld [vmem:[#allocation8 + $0x28] ss:$16 sps:$4 sm:$0xff]   ;;  %s4536_s30 = sld [smem:[#allocation7 + $0x6]]  ;;  %1162 = vmatprep.subr.bf16.mxu1 %v3928_v6  ;;  %v3932_v9 = vld [vmem:[#allocation8 + $0x44] ss:$16 sps:$4 sm:$0xff]   ;;  %s4538_s7 = sld [smem:[#allocation7 + $0x7]] }
  0x3b   :  { %v3934_v10 = vld [vmem:[#allocation8 + $0x4c] ss:$16 sps:$4 sm:$0xff]   ;;  %v3936_v11 = vld [vmem:[#allocation8 + $0x40] ss:$16 sps:$4 sm:$0xff]   ;;  %v3937_v12 = vld [vmem:[#allocation8 + $0x48] ss:$16 sps:$4 sm:$0xff]  }
  0x3c   :  { %v3938_v13 = vld [vmem:[#allocation8 + $0x64] ss:$16 sps:$4 sm:$0xff]   ;;  %s4540_s8 = sld [smem:[#allocation7 + $0x8]]  ;;  %v3940_v14 = vld [vmem:[#allocation8 + $0x6c] ss:$16 sps:$4 sm:$0xff]   ;;  %s4542_s9 = sld [smem:[#allocation7 + $0x9]] }
  0x3d   :  { %1050 = vmatpush1.bf16.msra.mxu0 %v3930_v7  ;;  %1163 = vmatpush1.bf16.msra.mxu1 %v3931_v8  ;;  %s4544_s10 = sld [smem:[#allocation7 + $0xa]]  ;;  %s4546_s11 = sld [smem:[#allocation7 + $0xb]]  ;;  %v3942_v15 = vld [vmem:[#allocation8 + $0x60] ss:$16 sps:$4 sm:$0xff]   ;;  %v3943_v16 = vld [vmem:[#allocation8 + $0x68] ss:$16 sps:$4 sm:$0xff]  }
  0x3e   :  { %1051 = vmatprep.subr.bf16.mxu0 %v3932_v9  ;;  %1164 = vmatprep.subr.bf16.mxu1 %v3934_v10  ;;  %s4548_s12 = sld [smem:[#allocation7 + $0xc]]  ;;  %v3944_v17 = vld [vmem:[#allocation8 + $0x84] ss:$16 sps:$4 sm:$0xff]   ;;  %v3946_v18 = vld [vmem:[#allocation8 + $0x8c] ss:$16 sps:$4 sm:$0xff]   ;;  %s4562_s22 = sld [smem:[#allocation7 + $0xd]] }
  0x3f   :  { %s4564_s23 = sld [smem:[#allocation7 + $0xe]]  ;;  %s4566_s24 = sld [smem:[#allocation7 + $0xf]]  ;;  %v3948_v19 = vld [vmem:[#allocation8 + $0x80] ss:$16 sps:$4 sm:$0xff]   ;;  %v3949_v20 = vld [vmem:[#allocation8 + $0x88] ss:$16 sps:$4 sm:$0xff]  }
  0x40   :  { %s4572_s14 = sld [smem:[#allocation7 + $0x10]]  ;;  %v3950_v21 = vld [vmem:[#allocation8 + $0xa4] ss:$16 sps:$4 sm:$0xff]   ;;  %s4578_s20 = sld [smem:[#allocation7 + $0x11]]  ;;  %v3952_v22 = vld [vmem:[#allocation8 + $0xac] ss:$16 sps:$4 sm:$0xff]  }
  0x41   :  { %1052 = vmatpush1.bf16.msra.mxu0 %v3936_v11  ;;  %1165 = vmatpush1.bf16.msra.mxu1 %v3937_v12  ;;  %s4584_s13 = sld [smem:[#allocation7 + $0x12]]  ;;  %s4590_s17 = sld [smem:[#allocation7 + $0x13]]  ;;  %v3954_v23 = vld [vmem:[#allocation8 + $0xa0] ss:$16 sps:$4 sm:$0xff]   ;;  %v3955_v24 = vld [vmem:[#allocation8 + $0xa8] ss:$16 sps:$4 sm:$0xff]  }
  0x42   :  { %1053 = vmatprep.subr.bf16.mxu0 %v3938_v13  ;;  %1166 = vmatprep.subr.bf16.mxu1 %v3940_v14  ;;  %s4596_s4 = sld [smem:[#allocation7 + $0x14]]  ;;  %v3956_v25 = vld [vmem:[#allocation8 + $0xc4] ss:$16 sps:$4 sm:$0xff]   ;;  %v3958_v26 = vld [vmem:[#allocation8 + $0xcc] ss:$16 sps:$4 sm:$0xff]   ;;  %s6334_s5 = scalar_lea.vmem %s6318_s1, %s4524_s26 }
  0x43   :  { %v66_v27 = vld [vmem:[%s6334_s5] sm:$0x1]  ;;  %s6335_s15 = scalar_lea.vmem %s6318_s1, %s4526_s27  ;;  %v3961_v30 = vld [vmem:[#allocation8 + $0xc8] ss:$16 sps:$4 sm:$0xff]   ;;  %s6336_s26 = scalar_lea.vmem %s6318_s1, %s4528_s0  ;;  %v3962_v36 = vld [vmem:[#allocation8 + $0xe4] ss:$16 sps:$4 sm:$0xff]  }
  0x44   :  { %v72_v28 = vld [vmem:[%s6335_s15] sm:$0x1]  ;;  %v67_v31 = vunpack.c.l.bf16 %v66_v27  ;;  %s6337_s21 = scalar_lea.vmem %s6318_s1, %s4530_s28  ;;  %s6338_s19 = scalar_lea.vmem %s6318_s1, %s4532_s3  ;;  %v3964_v37 = vld [vmem:[#allocation8 + $0xec] ss:$16 sps:$4 sm:$0xff]   ;;  %v3967_v62 = vld [vmem:[#allocation8 + $0xe8] ss:$16 sps:$4 sm:$0xff]  }
  0x45   :  { %1054 = vmatpush1.bf16.msra.mxu0 %v3942_v15  ;;  %1167 = vmatpush1.bf16.msra.mxu1 %v3943_v16  ;;  %v3960_v29 = vld [vmem:[#allocation8 + $0xc0] ss:$16 sps:$4 sm:$0xff]   ;;  %v73_v32 = vunpack.c.l.bf16 %v72_v28  ;;  %s137_s2 = scalar_lea.vmem %s6318_s1, %s4548_s12  ;;  %s6339_s3 = scalar_lea.vmem %s6318_s1, %s4534_s29  ;;  %v4730_v2 = vld [vmem:[#allocation11 + $0x4] ss:$16 sps:$4 sm:$0xff]   ;;  %v4761_v14 = vld [vmem:[#allocation11 + $0xc] ss:$16 sps:$4 sm:$0xff]  }
  0x46   :  { %1055 = vmatprep.subr.bf16.mxu0 %v3944_v17  ;;  %1168 = vmatprep.subr.bf16.mxu1 %v3946_v18  ;;  %v78_v33 = vld [vmem:[%s6336_s26] sm:$0x1]  ;;  %s6340_s27 = scalar_lea.vmem %s6318_s1, %s4536_s30  ;;  %s149_s6 = scalar_lea.vmem %s6318_s1, %s4564_s23  ;;  %68 = vst [vmem:[#allocation2] sm:$0x1] %v67_v31  ;;  %v3978_v28 = vld [vmem:[#allocation11 + $0x8] ss:$16 sps:$4 sm:$0xff]  }
  0x47   :  { %6331 = sst [smem:[#allocation18_spill]] %s4584_s13  ;;  %v84_v34 = vld [vmem:[%s6337_s21] sm:$0x1]  ;;  %v79_v38 = vunpack.c.l.bf16 %v78_v33  ;;  %s155_s29 = scalar_lea.vmem %s6318_s1, %s4566_s24  ;;  %74 = vst [vmem:[#allocation2 + $0x1] sm:$0x1] %v73_v32 }
  0x48   :  { %6332 = sst [smem:[#allocation19_spill]] %s4590_s17  ;;  %v90_v35 = vld [vmem:[%s6338_s19] sm:$0x1]  ;;  %v85_v39 = vunpack.c.l.bf16 %v84_v34  ;;  %s6341_s17 = scalar_lea.vmem %s6318_s1, %s4538_s7  ;;  %v3976_v33 = vld [vmem:[#allocation11 + $0x44] ss:$16 sps:$4 sm:$0xff]  }
  0x49   :  { %6333 = sst [smem:[#allocation20_spill]] %s4596_s4  ;;  %1056 = vmatpush1.bf16.msra.mxu0 %v3948_v19  ;;  %1169 = vmatpush1.bf16.msra.mxu1 %v3949_v20  ;;  %s143_s4 = scalar_lea.vmem %s6318_s1, %s4562_s22  ;;  %v91_v40 = vunpack.c.l.bf16 %v90_v35  ;;  %v96_v41 = vld [vmem:[%s6339_s3] sm:$0x1]  ;;  %80 = vst [vmem:[#allocation2 + $0x2] sm:$0x1] %v79_v38 }
  0x4a   :  { %1057 = vmatprep.subr.bf16.mxu0 %v3950_v21  ;;  %1170 = vmatprep.subr.bf16.mxu1 %v3952_v22  ;;  %v102_v42 = vld [vmem:[%s6340_s27] sm:$0x1]  ;;  %v97_v44 = vunpack.c.l.bf16 %v96_v41  ;;  %s6342_s18 = scalar_lea.vmem %s6318_s1, %s4540_s8  ;;  %s6343_s3 = scalar_lea.vmem %s6318_s1, %s4542_s9  ;;  %86 = vst [vmem:[#allocation2 + $0x3] sm:$0x1] %v85_v39  ;;  %v3971_v22 = vld [vmem:[#allocation11 + $0x24] ss:$16 sps:$4 sm:$0xff]  }
  0x4b   :  { %v108_v43 = vld [vmem:[%s6341_s17] sm:$0x1]  ;;  %v103_v45 = vunpack.c.l.bf16 %v102_v42  ;;  %s6344_s5 = sld [smem:[#allocation18_spill]]  ;;  %s6345_s13 = scalar_lea.vmem %s6318_s1, %s4544_s10  ;;  %92 = vst [vmem:[#allocation2 + $0x4] sm:$0x1] %v91_v40 }
  0x4c   :  { %v109_v46 = vunpack.c.l.bf16 %v108_v43  ;;  %v114_v47 = vld [vmem:[%s6342_s18] sm:$0x1]  ;;  %s161_s21 = scalar_lea.vmem %s6318_s1, %s4572_s14  ;;  %s6346_s8 = sld [smem:[#allocation19_spill]]  ;;  %98 = vst [vmem:[#allocation2 + $0x5] sm:$0x1] %v97_v44 }
  0x4d   :  { %1058 = vmatpush1.bf16.msra.mxu0 %v3954_v23  ;;  %1171 = vmatpush1.bf16.msra.mxu1 %v3955_v24  ;;  %v120_v48 = vld [vmem:[%s6343_s3] sm:$0x1]  ;;  %v115_v50 = vunpack.c.l.bf16 %v114_v47  ;;  %s6347_s10 = scalar_lea.vmem %s6318_s1, %s4546_s11  ;;  %s6348_s19 = sld [smem:[#allocation20_spill]]  ;;  %104 = vst [vmem:[#allocation2 + $0x6] sm:$0x1] %v103_v45 }
  0x4e   :  { %v126_v49 = vld [vmem:[%s6345_s13] sm:$0x1]  ;;  %1059 = vmatprep.subr.bf16.mxu0 %v3956_v25  ;;  %1172 = vmatprep.subr.bf16.mxu1 %v3958_v26  ;;  %v121_v51 = vunpack.c.l.bf16 %v120_v48  ;;  %s167_s3 = scalar_lea.vmem %s6318_s1, %s4578_s20  ;;  %110 = vst [vmem:[#allocation2 + $0x7] sm:$0x1] %v109_v46  ;;  %s4741_s14 = sld [smem:[#allocation7 + $0x18]] }
  0x4f   :  { %v127_v52 = vunpack.c.l.bf16 %v126_v49  ;;  %v132_v53 = vld [vmem:[%s6347_s10] sm:$0x1]  ;;  %116 = vst [vmem:[#allocation2 + $0x8] sm:$0x1] %v115_v50  ;;  %s4745_s25 = sld [smem:[#allocation7 + $0x1a]]  ;;  %s4747_s10 = sld [smem:[#allocation7 + $0x1b]] }
  0x50   :  { %v138_v54 = vld [vmem:[%s137_s2] sm:$0x1]  ;;  %v133_v57 = vunpack.c.l.bf16 %v132_v53  ;;  %122 = vst [vmem:[#allocation2 + $0x9] sm:$0x1] %v121_v51  ;;  %s4752_s15 = sld [smem:[#allocation7 + $0x1d]]  ;;  %s4754_s30 = sld [smem:[#allocation7 + $0x1e]] }
  0x51   :  { %v144_v55 = vld [vmem:[%s143_s4] sm:$0x1]  ;;  %s173_s11 = scalar_lea.vmem %s6318_s1, %s6344_s5  ;;  %v139_v58 = vunpack.c.l.bf16 %v138_v54  ;;  %128 = vst [vmem:[#allocation2 + $0xa] sm:$0x1] %v127_v52  ;;  %1060 = vmatpush1.bf16.msra.mxu0 %v3960_v29  ;;  %1173 = vmatpush1.bf16.msra.mxu1 %v3961_v30  ;;  %s4756_s7 = sld [smem:[#allocation7 + $0x1f]] }
  0x52   :  { %v3966_v56 = vld [vmem:[#allocation8 + $0xe0] ss:$16 sps:$4 sm:$0xff]   ;;  %v145_v59 = vunpack.c.l.bf16 %v144_v55  ;;  %s179_s13 = scalar_lea.vmem %s6318_s1, %s6346_s8  ;;  %134 = vst [vmem:[#allocation2 + $0xb] sm:$0x1] %v133_v57  ;;  %1061 = vmatprep.subr.bf16.mxu0 %v3962_v36  ;;  %1174 = vmatprep.subr.bf16.mxu1 %v3964_v37  ;;  %s4739_s8 = sld [smem:[#allocation7 + $0x17]] }
  0x53   :  { %v150_v60 = vld [vmem:[%s149_s6] sm:$0x1]  ;;  %s185_s9 = scalar_lea.vmem %s6318_s1, %s6348_s19  ;;  %140 = vst [vmem:[#allocation2 + $0xc] sm:$0x1] %v139_v58  ;;  %s3653_s6 = sld [smem:[#allocation7 + $0x15]] }
  0x54   :  { %v156_v61 = vld [vmem:[%s155_s29] sm:$0x1]  ;;  %v151_v63 = vunpack.c.l.bf16 %v150_v60  ;;  %146 = vst [vmem:[#allocation2 + $0xd] sm:$0x1] %v145_v59  ;;  %s4737_s29 = sld [smem:[#allocation7 + $0x16]]  ;;  %s4750_s19 = sld [smem:[#allocation7 + $0x1c]] }
  0x55   :  { %v157_v1 = vunpack.c.l.bf16 %v156_v61  ;;  %v162_v3 = vld [vmem:[%s161_s21] sm:$0x1]  ;;  %s4743_s21 = sld [smem:[#allocation7 + $0x19]]  ;;  %1062 = vmatpush1.bf16.msra.mxu0 %v3966_v56  ;;  %1175 = vmatpush1.bf16.msra.mxu1 %v3967_v62  ;;  %s209_s5 = scalar_lea.vmem %s6318_s1, %s4741_s14  ;;  %v3980_v38 = vld [vmem:[#allocation11 + $0x2c] ss:$16 sps:$4 sm:$0xff]  }
  0x56   :  { %v168_v4 = vld [vmem:[%s167_s3] sm:$0x1]  ;;  %152 = vst [vmem:[#allocation2 + $0xe] sm:$0x1] %v151_v63  ;;  %v163_v6 = vunpack.c.l.bf16 %v162_v3  ;;  %1536 = vmatprep.subr.bf16.mxu0 %v4730_v2  ;;  %s4763_s3 = sld [smem:[#allocation7 + $0x20]]  ;;  %1577 = vmatprep.subr.bf16.mxu1 %v4761_v14  ;;  %s221_s24 = scalar_lea.vmem %s6318_s1, %s4745_s25 }
  0x57   :  { %v174_v5 = vld [vmem:[%s173_s11] sm:$0x1]  ;;  %158 = vst [vmem:[#allocation2 + $0xf] sm:$0x1] %v157_v1  ;;  %v169_v7 = vunpack.c.l.bf16 %v168_v4  ;;  %s245_s27 = scalar_lea.vmem %s6318_s1, %s4754_s30  ;;  %s251_s12 = scalar_lea.vmem %s6318_s1, %s4756_s7  ;;  %v3982_v48 = vld [vmem:[#allocation11 + $0x64] ss:$16 sps:$4 sm:$0xff]  }
  0x58   :  { %v175_v8 = vunpack.c.l.bf16 %v174_v5  ;;  %v180_v9 = vld [vmem:[%s179_s13] sm:$0x1]  ;;  %164 = vst [vmem:[#allocation2 + $0x10] sm:$0x1] %v163_v6  ;;  %s203_s22 = scalar_lea.vmem %s6318_s1, %s4739_s8  ;;  %s227_s8 = scalar_lea.vmem %s6318_s1, %s4747_s10  ;;  %v3984_v49 = vld [vmem:[#allocation11 + $0x28] ss:$16 sps:$4 sm:$0xff]  }
  0x59   :  { %v186_v10 = vld [vmem:[%s185_s9] sm:$0x1]  ;;  %v181_v11 = vunpack.c.l.bf16 %v180_v9  ;;  %170 = vst [vmem:[#allocation2 + $0x11] sm:$0x1] %v169_v7  ;;  %s191_s28 = scalar_lea.vmem %s6318_s1, %s3653_s6  ;;  %s4812_s4 = sld [smem:[#allocation7 + $0x21]] }
  0x5a   :  { %v187_v12 = vunpack.c.l.bf16 %v186_v10  ;;  %176 = vst [vmem:[#allocation2 + $0x12] sm:$0x1] %v175_v8  ;;  %v831_v13 = vld [vmem:[#allocation2] sm:$0xff]  ;;  %s197_s11 = scalar_lea.vmem %s6318_s1, %s4737_s29  ;;  %s233_s18 = scalar_lea.vmem %s6318_s1, %s4750_s19  ;;  %v3986_v53 = vld [vmem:[#allocation11 + $0x4c] ss:$16 sps:$4 sm:$0xff]  }
  0x5b   :  { %182 = vst [vmem:[#allocation2 + $0x13] sm:$0x1] %v181_v11  ;;  %v3970_v16 = vld [vmem:[#allocation11] ss:$16 sps:$4 sm:$0xff]   ;;  %s215_s17 = scalar_lea.vmem %s6318_s1, %s4743_s21  ;;  %s4814_s30 = sld [smem:[#allocation7 + $0x22]] }
  0x5c   :  { %188 = vst [vmem:[#allocation2 + $0x14] sm:$0x1] %v187_v12  ;;  %v192_v17 = vld [vmem:[%s191_s28] sm:$0x1]  ;;  %s239_s28 = scalar_lea.vmem %s6318_s1, %s4752_s15  ;;  %s4816_s7 = sld [smem:[#allocation7 + $0x23]] }
  0x5d   :  { %v193_v19 = vunpack.c.l.bf16 %v192_v17  ;;  %v198_v20 = vld [vmem:[%s197_s11] sm:$0x1]  ;;  %s4818_s20 = sld [smem:[#allocation7 + $0x24]]  ;;  %s4824_s13 = sld [smem:[#allocation7 + $0x27]]  ;;  %v3988_v61 = vld [vmem:[#allocation11 + $0x84] ss:$16 sps:$4 sm:$0xff]  }
  0x5e   :  { %v832_v15 = vld [vmem:[#allocation2 + $0x8] sm:$0xff]  ;;  %v204_v21 = vld [vmem:[%s203_s22] sm:$0x1]  ;;  %v199_v23 = vunpack.c.l.bf16 %v198_v20  ;;  %s257_s22 = scalar_lea.vmem %s6318_s1, %s4763_s3  ;;  %s4822_s3 = sld [smem:[#allocation7 + $0x26]] }
  0x5f   :  { %v847_v18 = vpack.c.bf16 %v832_v15, %v831_v13  ;;  %v205_v24 = vunpack.c.l.bf16 %v204_v21  ;;  %v210_v25 = vld [vmem:[%s209_s5] sm:$0x1]  ;;  %194 = vst [vmem:[#allocation2 + $0x15] sm:$0x1] %v193_v19  ;;  %s4820_s5 = sld [smem:[#allocation7 + $0x25]]  ;;  %s4826_s16 = sld [smem:[#allocation7 + $0x28]] }
  0x60   :  { %v216_v26 = vld [vmem:[%s215_s17] sm:$0x1]  ;;  %v211_v29 = vunpack.c.l.bf16 %v210_v25  ;;  %200 = vst [vmem:[#allocation2 + $0x16] sm:$0x1] %v199_v23  ;;  %s4828_s17 = sld [smem:[#allocation7 + $0x29]]  ;;  %s4830_s9 = sld [smem:[#allocation7 + $0x2a]] }
  0x61   :  { %v3973_v27 = vld [vmem:[#allocation11 + $0x20] ss:$16 sps:$4 sm:$0xff]   ;;  %1080 = vmatmul.mubr.bf16.vlgmr.msra.gmra.mrb[0].mxu0 %v847_v18  ;;  %1193 = vmatmul.mubr.bf16.vlgmr.msra.gmra.mrb[0].mxu1 %v847_v18  ;;  %v217_v30 = vunpack.c.l.bf16 %v216_v26  ;;  %206 = vst [vmem:[#allocation2 + $0x17] sm:$0x1] %v205_v24  ;;  %s4832_s23 = sld [smem:[#allocation7 + $0x2b]]  ;;  %s263_s29 = scalar_lea.vmem %s6318_s1, %s4812_s4 }
  0x62   :  { %v222_v31 = vld [vmem:[%s221_s24] sm:$0x1]  ;;  %1537 = vmatpush1.bf16.msra.mxu0 %v3970_v16  ;;  %1089 = vmatprep.mubr.bf16.mxu0 %v6326_v0  ;;  %212 = vst [vmem:[#allocation2 + $0x18] sm:$0x1] %v211_v29  ;;  %v3990_v10 = vld [vmem:[#allocation11 + $0x48] ss:$16 sps:$4 sm:$0xff]  }
  0x63   :  { %v228_v32 = vld [vmem:[%s227_s8] sm:$0x1]  ;;  %v223_v34 = vunpack.c.l.bf16 %v222_v31  ;;  %1202 = vmatprep.mubr.bf16.mxu1 %v6326_v0  ;;  %218 = vst [vmem:[#allocation2 + $0x19] sm:$0x1] %v217_v30  ;;  %1538 = vmatprep.subr.bf16.mxu0 %v3971_v22  ;;  %s4838_s8 = sld [smem:[#allocation7 + $0x2c]]  ;;  %s4884_s10 = sld [smem:[#allocation7 + $0x2d]] }
  0x64   :  { %v229_v35 = vunpack.c.l.bf16 %v228_v32  ;;  %v234_v36 = vld [vmem:[%s233_s18] sm:$0x1]  ;;  %1578 = vmatpush1.bf16.msra.mxu1 %v3978_v28  ;;  %s269_s18 = scalar_lea.vmem %s6318_s1, %s4814_s30  ;;  %s4894_s26 = sld [smem:[#allocation7 + $0x31]]  ;;  %v3992_v21 = vld [vmem:[#allocation11 + $0x6c] ss:$16 sps:$4 sm:$0xff]  }
  0x65   :  { %v240_v37 = vld [vmem:[%s239_s28] sm:$0x1]  ;;  %v235_v39 = vunpack.c.l.bf16 %v234_v36  ;;  %224 = vst [vmem:[#allocation2 + $0x1a] sm:$0x1] %v223_v34  ;;  %1579 = vmatprep.subr.bf16.mxu1 %v3980_v38  ;;  %s275_s28 = scalar_lea.vmem %s6318_s1, %s4816_s7  ;;  %s299_s7 = scalar_lea.vmem %s6318_s1, %s4824_s13  ;;  %v3994_v22 = vld [vmem:[#allocation11 + $0xa4] ss:$16 sps:$4 sm:$0xff]  }
  0x66   :  { %v241_v40 = vunpack.c.l.bf16 %v240_v37  ;;  %v246_v41 = vld [vmem:[%s245_s27] sm:$0x1]  ;;  %230 = vst [vmem:[#allocation2 + $0x1b] sm:$0x1] %v229_v35  ;;  %1539 = vmatpush1.bf16.msra.mxu0 %v3973_v27  ;;  %s281_s27 = scalar_lea.vmem %s6318_s1, %s4818_s20  ;;  %s305_s24 = scalar_lea.vmem %s6318_s1, %s4826_s16  ;;  %v3996_v23 = vld [vmem:[#allocation11 + $0x68] ss:$16 sps:$4 sm:$0xff]  }
  0x67   :  { %v252_v42 = vld [vmem:[%s251_s12] sm:$0x1]  ;;  %v247_v43 = vunpack.c.l.bf16 %v246_v41  ;;  %236 = vst [vmem:[#allocation2 + $0x1c] sm:$0x1] %v235_v39  ;;  %1540 = vmatprep.subr.bf16.mxu0 %v3976_v33  ;;  %s287_s12 = scalar_lea.vmem %s6318_s1, %s4820_s5  ;;  %s317_s21 = scalar_lea.vmem %s6318_s1, %s4830_s9  ;;  %v4946_v37 = vld [vmem:[#allocation11 + $0x8c] ss:$16 sps:$4 sm:$0xff]  }
  0x68   :  { %v253_v44 = vunpack.c.l.bf16 %v252_v42  ;;  %v258_v45 = vld [vmem:[%s257_s22] sm:$0x1]  ;;  %242 = vst [vmem:[#allocation2 + $0x1d] sm:$0x1] %v241_v40  ;;  %v833_v51 = vld [vmem:[#allocation2 + $0x10] sm:$0xff]  ;;  %1580 = vmatpush1.bf16.msra.mxu1 %v3984_v49  ;;  %s293_s22 = scalar_lea.vmem %s6318_s1, %s4822_s3  ;;  %s323_s16 = scalar_lea.vmem %s6318_s1, %s4832_s23 }
  0x69   :  { %v3979_v46 = vld [vmem:[#allocation11 + $0x40] ss:$16 sps:$4 sm:$0xff]   ;;  %v259_v47 = vunpack.c.l.bf16 %v258_v45  ;;  %248 = vst [vmem:[#allocation2 + $0x1e] sm:$0x1] %v247_v43  ;;  %1581 = vmatprep.subr.bf16.mxu1 %v3986_v53  ;;  %s4886_s9 = sld [smem:[#allocation7 + $0x2e]]  ;;  %s4888_s23 = sld [smem:[#allocation7 + $0x2f]] }
  0x6a   :  { %254 = vst [vmem:[#allocation2 + $0x1f] sm:$0x1] %v253_v44  ;;  %v3985_v50 = vld [vmem:[#allocation11 + $0x60] ss:$16 sps:$4 sm:$0xff]   ;;  %1541 = vmatpush1.bf16.msra.mxu0 %v3979_v46  ;;  %s4898_s19 = sld [smem:[#allocation7 + $0x33]]  ;;  %s4900_s11 = sld [smem:[#allocation7 + $0x34]] }
  0x6b   :  { %260 = vst [vmem:[#allocation2 + $0x20] sm:$0x1] %v259_v47  ;;  %v264_v52 = vld [vmem:[%s263_s29] sm:$0x1]  ;;  %1542 = vmatprep.subr.bf16.mxu0 %v3982_v48  ;;  %s311_s29 = scalar_lea.vmem %s6318_s1, %s4828_s17  ;;  %s4904_s15 = sld [smem:[#allocation7 + $0x36]] }
  0x6c   :  { %v265_v54 = vunpack.c.l.bf16 %v264_v52  ;;  %v270_v55 = vld [vmem:[%s269_s18] sm:$0x1]  ;;  %1582 = vmatpush1.bf16.msra.mxu1 %v3990_v10  ;;  %s4906_s2 = sld [smem:[#allocation7 + $0x37]]  ;;  %s335_s30 = scalar_lea.vmem %s6318_s1, %s4884_s10  ;;  %v4981_v52 = vld [vmem:[#allocation11 + $0x88] ss:$16 sps:$4 sm:$0xff]  }
  0x6d   :  { %v276_v56 = vld [vmem:[%s275_s28] sm:$0x1]  ;;  %v271_v57 = vunpack.c.l.bf16 %v270_v55  ;;  %s329_s28 = scalar_lea.vmem %s6318_s1, %s4838_s8  ;;  %s4892_s8 = sld [smem:[#allocation7 + $0x30]]  ;;  %1583 = vmatprep.subr.bf16.mxu1 %v3992_v21  ;;  %v4997_v55 = vld [vmem:[#allocation11 + $0xac] ss:$16 sps:$4 sm:$0xff]  }
  0x6e   :  { %v277_v58 = vunpack.c.l.bf16 %v276_v56  ;;  %v282_v59 = vld [vmem:[%s281_s27] sm:$0x1]  ;;  %266 = vst [vmem:[#allocation2 + $0x21] sm:$0x1] %v265_v54  ;;  %1543 = vmatpush1.bf16.msra.mxu0 %v3985_v50  ;;  %s4896_s27 = sld [smem:[#allocation7 + $0x32]]  ;;  %s4960_s13 = sld [smem:[#allocation7 + $0x39]] }
  0x6f   :  { %v288_v60 = vld [vmem:[%s287_s12] sm:$0x1]  ;;  %v283_v63 = vunpack.c.l.bf16 %v282_v59  ;;  %272 = vst [vmem:[#allocation2 + $0x22] sm:$0x1] %v271_v57  ;;  %1544 = vmatprep.subr.bf16.mxu0 %v3988_v61  ;;  %s4902_s12 = sld [smem:[#allocation7 + $0x35]]  ;;  %s4967_s14 = sld [smem:[#allocation7 + $0x3c]] }
  0x70   :  { %v289_v1 = vunpack.c.l.bf16 %v288_v60  ;;  %v294_v3 = vld [vmem:[%s293_s22] sm:$0x1]  ;;  %278 = vst [vmem:[#allocation2 + $0x23] sm:$0x1] %v277_v58  ;;  %1584 = vmatpush1.bf16.msra.mxu1 %v3996_v23  ;;  %s377_s22 = scalar_lea.vmem %s6318_s1, %s4900_s11  ;;  %s4973_s18 = sld [smem:[#allocation7 + $0x3f]] }
  0x71   :  { %v834_v62 = vld [vmem:[#allocation2 + $0x18] sm:$0xff]  ;;  %v300_v4 = vld [vmem:[%s299_s7] sm:$0x1]  ;;  %v295_v6 = vunpack.c.l.bf16 %v294_v3  ;;  %284 = vst [vmem:[#allocation2 + $0x24] sm:$0x1] %v283_v63  ;;  %s4912_s7 = sld [smem:[#allocation7 + $0x38]]  ;;  %s389_s5 = scalar_lea.vmem %s6318_s1, %s4904_s15  ;;  %1585 = vmatprep.subr.bf16.mxu1 %v4946_v37 }
  0x72   :  { %v848_v5 = vpack.c.bf16 %v834_v62, %v833_v51  ;;  %v301_v7 = vunpack.c.l.bf16 %v300_v4  ;;  %v306_v8 = vld [vmem:[%s305_s24] sm:$0x1]  ;;  %290 = vst [vmem:[#allocation2 + $0x25] sm:$0x1] %v289_v1  ;;  %s341_s24 = scalar_lea.vmem %s6318_s1, %s4886_s9  ;;  %s395_s11 = scalar_lea.vmem %s6318_s1, %s4906_s2  ;;  %v4975_v51 = vld [vmem:[#allocation11 + $0xc4] ss:$16 sps:$4 sm:$0xff]  }
  0x73   :  { %v312_v9 = vld [vmem:[%s311_s29] sm:$0x1]  ;;  %v307_v11 = vunpack.c.l.bf16 %v306_v8  ;;  %296 = vst [vmem:[#allocation2 + $0x26] sm:$0x1] %v295_v6  ;;  %s347_s29 = scalar_lea.vmem %s6318_s1, %s4888_s23  ;;  %s371_s23 = scalar_lea.vmem %s6318_s1, %s4898_s19  ;;  %v5008_v58 = vld [vmem:[#allocation11 + $0xa8] ss:$16 sps:$4 sm:$0xff]  }
  0x74   :  { %v313_v12 = vunpack.c.l.bf16 %v312_v9  ;;  %v318_v13 = vld [vmem:[%s317_s21] sm:$0x1]  ;;  %1090 = vmatmul.mubr.bf16.gmra.mrb[4].mxu0 %v848_v5  ;;  %1203 = vmatmul.mubr.bf16.gmra.mrb[4].mxu1 %v848_v5  ;;  %302 = vst [vmem:[#allocation2 + $0x27] sm:$0x1] %v301_v7  ;;  %s353_s21 = scalar_lea.vmem %s6318_s1, %s4892_s8  ;;  %s4963_s15 = sld [smem:[#allocation7 + $0x3a]] }
  0x75   :  { %v324_v15 = vld [vmem:[%s323_s16] sm:$0x1]  ;;  %v319_v16 = vunpack.c.l.bf16 %v318_v13  ;;  %1099 = vmatprep.mubr.bf16.mxu0 %v6326_v0  ;;  %1212 = vmatprep.mubr.bf16.mxu1 %v6326_v0  ;;  %308 = vst [vmem:[#allocation2 + $0x28] sm:$0x1] %v307_v11  ;;  %s359_s16 = scalar_lea.vmem %s6318_s1, %s4894_s26  ;;  %s4965_s2 = sld [smem:[#allocation7 + $0x3b]] }
  0x76   :  { %v325_v17 = vunpack.c.l.bf16 %v324_v15  ;;  %v330_v18 = vld [vmem:[%s329_s28] sm:$0x1]  ;;  %314 = vst [vmem:[#allocation2 + $0x29] sm:$0x1] %v313_v12  ;;  %s365_s28 = scalar_lea.vmem %s6318_s1, %s4896_s27  ;;  %s383_s27 = scalar_lea.vmem %s6318_s1, %s4902_s12  ;;  %1586 = vmatpush1.bf16.msra.mxu1 %v4981_v52  ;;  %v5027_v4 = vld [vmem:[#allocation11 + $0xe4] ss:$16 sps:$4 sm:$0xff]  }
  0x77   :  { %v331_v19 = vunpack.c.l.bf16 %v330_v18  ;;  %v3991_v20 = vld [vmem:[#allocation11 + $0x80] ss:$16 sps:$4 sm:$0xff]   ;;  %320 = vst [vmem:[#allocation2 + $0x2a] sm:$0x1] %v319_v16  ;;  %s4977_s25 = sld [smem:[#allocation7 + $0x40]]  ;;  %s4983_s17 = sld [smem:[#allocation7 + $0x42]]  ;;  %1587 = vmatprep.subr.bf16.mxu1 %v4997_v55 }
  0x78   :  { %326 = vst [vmem:[#allocation2 + $0x2b] sm:$0x1] %v325_v17  ;;  %1545 = vmatpush1.bf16.msra.mxu0 %v3991_v20  ;;  %v336_v24 = vld [vmem:[%s335_s30] sm:$0x1]  ;;  %s4985_s0 = sld [smem:[#allocation7 + $0x43]]  ;;  %s407_s9 = scalar_lea.vmem %s6318_s1, %s4960_s13 }
  0x79   :  { %332 = vst [vmem:[#allocation2 + $0x2c] sm:$0x1] %v331_v19  ;;  %v3997_v25 = vld [vmem:[#allocation11 + $0xa0] ss:$16 sps:$4 sm:$0xff]   ;;  %v337_v26 = vunpack.c.l.bf16 %v336_v24  ;;  %1546 = vmatprep.subr.bf16.mxu0 %v3994_v22  ;;  %s5053_s19 = sld [smem:[#allocation7 + $0x45]]  ;;  %s5059_s20 = sld [smem:[#allocation7 + $0x48]] }
  0x7a   :  { %v342_v27 = vld [vmem:[%s341_s24] sm:$0x1]  ;;  %1588 = vmatpush1.bf16.msra.mxu1 %v5008_v58  ;;  %s5065_s24 = sld [smem:[#allocation7 + $0x4b]]  ;;  %v5067_v22 = vld [vmem:[#allocation11 + $0xcc] ss:$16 sps:$4 sm:$0xff]   ;;  %s5069_s6 = sld [smem:[#allocation7 + $0x4c]] }
  0x7b   :  { %v348_v28 = vld [vmem:[%s347_s29] sm:$0x1]  ;;  %v343_v29 = vunpack.c.l.bf16 %v342_v27  ;;  %338 = vst [vmem:[#allocation2 + $0x2d] sm:$0x1] %v337_v26  ;;  %s401_s29 = scalar_lea.vmem %s6318_s1, %s4912_s7  ;;  %s4969_s7 = sld [smem:[#allocation7 + $0x3d]]  ;;  %1589 = vmatprep.subr.bf16.mxu1 %v5067_v22 }
  0x7c   :  { %v349_v30 = vunpack.c.l.bf16 %v348_v28  ;;  %v354_v31 = vld [vmem:[%s353_s21] sm:$0x1]  ;;  %1547 = vmatpush1.bf16.msra.mxu0 %v3997_v25  ;;  %s4971_s21 = sld [smem:[#allocation7 + $0x3e]]  ;;  %s5077_s3 = sld [smem:[#allocation7 + $0x4f]]  ;;  %v5080_v24 = vld [vmem:[#allocation11 + $0xc8] ss:$16 sps:$4 sm:$0xff]  }
  0x7d   :  { %v360_v32 = vld [vmem:[%s359_s16] sm:$0x1]  ;;  %v355_v33 = vunpack.c.l.bf16 %v354_v31  ;;  %344 = vst [vmem:[#allocation2 + $0x2e] sm:$0x1] %v343_v29  ;;  %s4979_s16 = sld [smem:[#allocation7 + $0x41]]  ;;  %1548 = vmatprep.subr.bf16.mxu0 %v4975_v51  ;;  %s461_s26 = scalar_lea.vmem %s6318_s1, %s4983_s17 }
  0x7e   :  { %v361_v34 = vunpack.c.l.bf16 %v360_v32  ;;  %v366_v35 = vld [vmem:[%s365_s28] sm:$0x1]  ;;  %350 = vst [vmem:[#allocation2 + $0x2f] sm:$0x1] %v349_v30  ;;  %s467_s30 = scalar_lea.vmem %s6318_s1, %s4985_s0  ;;  %s5055_s17 = sld [smem:[#allocation7 + $0x46]]  ;;  %1590 = vmatpush1.bf16.msra.mxu1 %v5080_v24 }
  0x7f   :  { %v372_v36 = vld [vmem:[%s371_s23] sm:$0x1]  ;;  %v367_v38 = vunpack.c.l.bf16 %v366_v35  ;;  %356 = vst [vmem:[#allocation2 + $0x30] sm:$0x1] %v355_v33  ;;  %s4994_s23 = sld [smem:[#allocation7 + $0x44]]  ;;  %s5057_s0 = sld [smem:[#allocation7 + $0x47]] }
  0x80   :  { %v373_v39 = vunpack.c.l.bf16 %v372_v36  ;;  %v378_v40 = vld [vmem:[%s377_s22] sm:$0x1]  ;;  %362 = vst [vmem:[#allocation2 + $0x31] sm:$0x1] %v361_v34  ;;  %s413_s22 = scalar_lea.vmem %s6318_s1, %s4963_s15  ;;  %s5075_s12 = sld [smem:[#allocation7 + $0x4e]] }
  0x81   :  { %v384_v41 = vld [vmem:[%s383_s27] sm:$0x1]  ;;  %v379_v42 = vunpack.c.l.bf16 %v378_v40  ;;  %368 = vst [vmem:[#allocation2 + $0x32] sm:$0x1] %v367_v38  ;;  %s419_s27 = scalar_lea.vmem %s6318_s1, %s4965_s2  ;;  %s443_s2 = scalar_lea.vmem %s6318_s1, %s4973_s18  ;;  %v5089_v26 = vld [vmem:[#allocation11 + $0xec] ss:$16 sps:$4 sm:$0xff]  }
  0x82   :  { %v385_v43 = vunpack.c.l.bf16 %v384_v41  ;;  %v390_v44 = vld [vmem:[%s389_s5] sm:$0x1]  ;;  %374 = vst [vmem:[#allocation2 + $0x33] sm:$0x1] %v373_v39  ;;  %s425_s5 = scalar_lea.vmem %s6318_s1, %s4967_s14  ;;  %s479_s15 = scalar_lea.vmem %s6318_s1, %s5053_s19  ;;  %v5100_v28 = vld [vmem:[#allocation11 + $0xe8] ss:$16 sps:$4 sm:$0xff]   ;;  %1591 = vmatprep.subr.bf16.mxu1 %v5089_v26 }
  0x83   :  { %v396_v45 = vld [vmem:[%s395_s11] sm:$0x1]  ;;  %v391_v46 = vunpack.c.l.bf16 %v390_v44  ;;  %380 = vst [vmem:[#allocation2 + $0x34] sm:$0x1] %v379_v42  ;;  %s431_s11 = scalar_lea.vmem %s6318_s1, %s4969_s7  ;;  %s455_s18 = scalar_lea.vmem %s6318_s1, %s4979_s16  ;;  %1592 = vmatpush1.bf16.msra.mxu1 %v5100_v28 }
  0x84   :  { %v397_v47 = vunpack.c.l.bf16 %v396_v45  ;;  %v402_v48 = vld [vmem:[%s401_s29] sm:$0x1]  ;;  %386 = vst [vmem:[#allocation2 + $0x35] sm:$0x1] %v385_v43  ;;  %s437_s29 = scalar_lea.vmem %s6318_s1, %s4971_s21  ;;  %s449_s21 = scalar_lea.vmem %s6318_s1, %s4977_s25  ;;  %1692 = vmatprep.subr.bf16.mxu1 %v4761_v14 }
  0x85   :  { %v835_v49 = vld [vmem:[#allocation2 + $0x20] sm:$0xff]  ;;  %v403_v50 = vunpack.c.l.bf16 %v402_v48  ;;  %392 = vst [vmem:[#allocation2 + $0x36] sm:$0x1] %v391_v46  ;;  %v836_v54 = vld [vmem:[#allocation2 + $0x28] sm:$0xff]  ;;  %s3716_s8 = sld [smem:[#allocation7 + $0x54]]  ;;  %s5144_s4 = sld [smem:[#allocation7 + $0x58]] }
  0x86   :  { %398 = vst [vmem:[#allocation2 + $0x37] sm:$0x1] %v397_v47  ;;  %v4988_v53 = vld [vmem:[#allocation11 + $0xc0] ss:$16 sps:$4 sm:$0xff]   ;;  %v849_v56 = vpack.c.bf16 %v836_v54, %v835_v49  ;;  %s533_s7 = scalar_lea.vmem %s6318_s1, %s5075_s12  ;;  %s3714_s12 = sld [smem:[#allocation7 + $0x52]] }
  0x87   :  { %404 = vst [vmem:[#allocation2 + $0x38] sm:$0x1] %v403_v50  ;;  %v408_v57 = vld [vmem:[%s407_s9] sm:$0x1]  ;;  %1549 = vmatpush1.bf16.msra.mxu0 %v4988_v53  ;;  %s3713_s9 = sld [smem:[#allocation7 + $0x51]]  ;;  %s5148_s25 = sld [smem:[#allocation7 + $0x5a]] }
  0x88   :  { %v409_v59 = vunpack.c.l.bf16 %v408_v57  ;;  %v414_v60 = vld [vmem:[%s413_s22] sm:$0x1]  ;;  %1100 = vmatmul.mubr.bf16.gmra.mrb[8].mxu0 %v849_v56  ;;  %1213 = vmatmul.mubr.bf16.gmra.mrb[8].mxu1 %v849_v56  ;;  %s3719_s22 = sld [smem:[#allocation7 + $0x57]]  ;;  %s5150_s16 = sld [smem:[#allocation7 + $0x5b]] }
  0x89   :  { %v420_v61 = vld [vmem:[%s419_s27] sm:$0x1]  ;;  %v415_v62 = vunpack.c.l.bf16 %v414_v60  ;;  %1109 = vmatprep.mubr.bf16.mxu0 %v6326_v0  ;;  %1222 = vmatprep.mubr.bf16.mxu1 %v6326_v0  ;;  %s473_s27 = scalar_lea.vmem %s6318_s1, %s4994_s23  ;;  %s5063_s23 = sld [smem:[#allocation7 + $0x4a]] }
  0x8a   :  { %v421_v63 = vunpack.c.l.bf16 %v420_v61  ;;  %v426_v1 = vld [vmem:[%s425_s5] sm:$0x1]  ;;  %410 = vst [vmem:[#allocation2 + $0x39] sm:$0x1] %v409_v59  ;;  %1550 = vmatprep.subr.bf16.mxu0 %v5027_v4  ;;  %s5061_s5 = sld [smem:[#allocation7 + $0x49]]  ;;  %s5197_s28 = sld [smem:[#allocation7 + $0x64]] }
  0x8b   :  { %v432_v3 = vld [vmem:[%s431_s11] sm:$0x1]  ;;  %v427_v5 = vunpack.c.l.bf16 %v426_v1  ;;  %416 = vst [vmem:[#allocation2 + $0x3a] sm:$0x1] %v415_v62  ;;  %s5071_s11 = sld [smem:[#allocation7 + $0x4d]]  ;;  %s5203_s10 = sld [smem:[#allocation7 + $0x67]] }
  0x8c   :  { %v433_v6 = vunpack.c.l.bf16 %v432_v3  ;;  %v438_v7 = vld [vmem:[%s437_s29] sm:$0x1]  ;;  %422 = vst [vmem:[#allocation2 + $0x3b] sm:$0x1] %v421_v63  ;;  %s521_s29 = scalar_lea.vmem %s6318_s1, %s5069_s6  ;;  %s539_s6 = scalar_lea.vmem %s6318_s1, %s5077_s3 }
  0x8d   :  { %v444_v8 = vld [vmem:[%s443_s2] sm:$0x1]  ;;  %v439_v9 = vunpack.c.l.bf16 %v438_v7  ;;  %428 = vst [vmem:[#allocation2 + $0x3c] sm:$0x1] %v427_v5  ;;  %v837_v25 = vld [vmem:[#allocation2 + $0x30] sm:$0xff]  ;;  %s5086_s2 = sld [smem:[#allocation7 + $0x50]] }
  0x8e   :  { %v445_v10 = vunpack.c.l.bf16 %v444_v8  ;;  %v450_v11 = vld [vmem:[%s449_s21] sm:$0x1]  ;;  %434 = vst [vmem:[#allocation2 + $0x3d] sm:$0x1] %v433_v6  ;;  %s485_s21 = scalar_lea.vmem %s6318_s1, %s5055_s17  ;;  %s3715_s3 = sld [smem:[#allocation7 + $0x53]] }
  0x8f   :  { %v456_v12 = vld [vmem:[%s455_s18] sm:$0x1]  ;;  %v451_v13 = vunpack.c.l.bf16 %v450_v11  ;;  %440 = vst [vmem:[#allocation2 + $0x3e] sm:$0x1] %v439_v9  ;;  %s491_s18 = scalar_lea.vmem %s6318_s1, %s5057_s0  ;;  %s515_s0 = scalar_lea.vmem %s6318_s1, %s5065_s24 }
  0x90   :  { %v457_v15 = vunpack.c.l.bf16 %v456_v12  ;;  %v462_v16 = vld [vmem:[%s461_s26] sm:$0x1]  ;;  %446 = vst [vmem:[#allocation2 + $0x3f] sm:$0x1] %v445_v10  ;;  %s497_s26 = scalar_lea.vmem %s6318_s1, %s5059_s20  ;;  %s551_s17 = scalar_lea.vmem %s6318_s1, %s3713_s9 }
  0x91   :  { %v468_v17 = vld [vmem:[%s467_s30] sm:$0x1]  ;;  %v463_v18 = vunpack.c.l.bf16 %v462_v16  ;;  %452 = vst [vmem:[#allocation2 + $0x40] sm:$0x1] %v451_v13  ;;  %s503_s30 = scalar_lea.vmem %s6318_s1, %s5061_s5  ;;  %s527_s14 = scalar_lea.vmem %s6318_s1, %s5071_s11 }
  0x92   :  { %v469_v19 = vunpack.c.l.bf16 %v468_v17  ;;  %v474_v20 = vld [vmem:[%s473_s27] sm:$0x1]  ;;  %458 = vst [vmem:[#allocation2 + $0x41] sm:$0x1] %v457_v15  ;;  %s509_s27 = scalar_lea.vmem %s6318_s1, %s5063_s23  ;;  %s605_s5 = scalar_lea.vmem %s6318_s1, %s5148_s25 }
  0x93   :  { %v475_v21 = vunpack.c.l.bf16 %v474_v20  ;;  %464 = vst [vmem:[#allocation2 + $0x42] sm:$0x1] %v463_v18  ;;  %v5073_v23 = vld [vmem:[#allocation11 + $0xe0] ss:$16 sps:$4 sm:$0xff]   ;;  %s3725_s23 = sld [smem:[#allocation7 + $0x5d]]  ;;  %s3726_s25 = sld [smem:[#allocation7 + $0x5e]] }
  0x94   :  { %470 = vst [vmem:[#allocation2 + $0x43] sm:$0x1] %v469_v19  ;;  %1551 = vmatpush1.bf16.msra.mxu0 %v5073_v23  ;;  %v480_v27 = vld [vmem:[%s479_s15] sm:$0x1]  ;;  %s3728_s24 = sld [smem:[#allocation7 + $0x60]]  ;;  %s5201_s11 = sld [smem:[#allocation7 + $0x66]] }
  0x95   :  { %476 = vst [vmem:[#allocation2 + $0x44] sm:$0x1] %v475_v21  ;;  %1651 = vmatprep.subr.bf16.mxu0 %v4730_v2  ;;  %v481_v30 = vunpack.c.l.bf16 %v480_v27  ;;  %v486_v31 = vld [vmem:[%s485_s21] sm:$0x1]  ;;  %s3731_s21 = sld [smem:[#allocation7 + $0x63]]  ;;  %s5250_s13 = sld [smem:[#allocation7 + $0x6f]] }
  0x96   :  { %v492_v32 = vld [vmem:[%s491_s18] sm:$0x1]  ;;  %v487_v34 = vunpack.c.l.bf16 %v486_v31  ;;  %s545_s18 = scalar_lea.vmem %s6318_s1, %s5086_s2  ;;  %s3718_s2 = sld [smem:[#allocation7 + $0x56]] }
  0x97   :  { %v838_v29 = vld [vmem:[#allocation2 + $0x38] sm:$0xff]  ;;  %v493_v35 = vunpack.c.l.bf16 %v492_v32  ;;  %v498_v2 = vld [vmem:[%s497_s26] sm:$0x1]  ;;  %482 = vst [vmem:[#allocation2 + $0x45] sm:$0x1] %v481_v30  ;;  %s3717_s26 = sld [smem:[#allocation7 + $0x55]] }
  0x98   :  { %v850_v33 = vpack.c.bf16 %v838_v29, %v837_v25  ;;  %v504_v36 = vld [vmem:[%s503_s30] sm:$0x1]  ;;  %v499_v38 = vunpack.c.l.bf16 %v498_v2  ;;  %488 = vst [vmem:[#allocation2 + $0x46] sm:$0x1] %v487_v34  ;;  %s5146_s30 = sld [smem:[#allocation7 + $0x59]]  ;;  %s3739_s20 = sld [smem:[#allocation7 + $0x6b]] }
  0x99   :  { %v505_v39 = vunpack.c.l.bf16 %v504_v36  ;;  %v510_v40 = vld [vmem:[%s509_s27] sm:$0x1]  ;;  %494 = vst [vmem:[#allocation2 + $0x47] sm:$0x1] %v493_v35  ;;  %s593_s27 = scalar_lea.vmem %s6318_s1, %s5144_s4  ;;  %s611_s4 = scalar_lea.vmem %s6318_s1, %s5150_s16 }
  0x9a   :  { %v516_v41 = vld [vmem:[%s515_s0] sm:$0x1]  ;;  %1110 = vmatmul.mubr.bf16.gmra.mrb[12].mxu0 %v850_v33  ;;  %1223 = vmatmul.mubr.bf16.gmra.mrb[12].mxu1 %v850_v33  ;;  %v511_v42 = vunpack.c.l.bf16 %v510_v40  ;;  %500 = vst [vmem:[#allocation2 + $0x48] sm:$0x1] %v499_v38  ;;  %s5155_s0 = sld [smem:[#allocation7 + $0x5c]]  ;;  %s3727_s16 = sld [smem:[#allocation7 + $0x5f]] }
  0x9b   :  { %v517_v43 = vunpack.c.l.bf16 %v516_v41  ;;  %v522_v44 = vld [vmem:[%s521_s29] sm:$0x1]  ;;  %1119 = vmatprep.mubr.bf16.mxu0 %v6326_v0  ;;  %1232 = vmatprep.mubr.bf16.mxu1 %v6326_v0  ;;  %506 = vst [vmem:[#allocation2 + $0x49] sm:$0x1] %v505_v39  ;;  %s557_s29 = scalar_lea.vmem %s6318_s1, %s3714_s12  ;;  %s623_s12 = scalar_lea.vmem %s6318_s1, %s3725_s23 }
  0x9c   :  { %v528_v45 = vld [vmem:[%s527_s14] sm:$0x1]  ;;  %v523_v46 = vunpack.c.l.bf16 %v522_v44  ;;  %512 = vst [vmem:[#allocation2 + $0x4a] sm:$0x1] %v511_v42  ;;  %s563_s14 = scalar_lea.vmem %s6318_s1, %s3715_s3  ;;  %s587_s3 = scalar_lea.vmem %s6318_s1, %s3719_s22 }
  0x9d   :  { %v529_v47 = vunpack.c.l.bf16 %v528_v45  ;;  %v534_v48 = vld [vmem:[%s533_s7] sm:$0x1]  ;;  %518 = vst [vmem:[#allocation2 + $0x4b] sm:$0x1] %v517_v43  ;;  %s569_s7 = scalar_lea.vmem %s6318_s1, %s3716_s8  ;;  %s3737_s22 = sld [smem:[#allocation7 + $0x69]] }
  0x9e   :  { %v540_v49 = vld [vmem:[%s539_s6] sm:$0x1]  ;;  %v535_v50 = vunpack.c.l.bf16 %v534_v48  ;;  %524 = vst [vmem:[#allocation2 + $0x4c] sm:$0x1] %v523_v46  ;;  %s575_s6 = scalar_lea.vmem %s6318_s1, %s3717_s26  ;;  %s677_s26 = scalar_lea.vmem %s6318_s1, %s5201_s11 }
  0x9f   :  { %v541_v54 = vunpack.c.l.bf16 %v540_v49  ;;  %v546_v56 = vld [vmem:[%s545_s18] sm:$0x1]  ;;  %530 = vst [vmem:[#allocation2 + $0x4d] sm:$0x1] %v529_v47  ;;  %s581_s18 = scalar_lea.vmem %s6318_s1, %s3718_s2  ;;  %s599_s2 = scalar_lea.vmem %s6318_s1, %s5146_s30 }
  0xa0   :  { %v547_v57 = vunpack.c.l.bf16 %v546_v56  ;;  %536 = vst [vmem:[#allocation2 + $0x4e] sm:$0x1] %v535_v50  ;;  %v839_v59 = vld [vmem:[#allocation2 + $0x40] sm:$0xff]  ;;  %s3738_s11 = sld [smem:[#allocation7 + $0x6a]]  ;;  %s5258_s15 = sld [smem:[#allocation7 + $0x73]] }
  0xa1   :  { %542 = vst [vmem:[#allocation2 + $0x4f] sm:$0x1] %v541_v54  ;;  %v552_v14 = vld [vmem:[%s551_s17] sm:$0x1]  ;;  %s683_s17 = scalar_lea.vmem %s6318_s1, %s5203_s10  ;;  %s3740_s10 = sld [smem:[#allocation7 + $0x6c]] }
  0xa2   :  { %548 = vst [vmem:[#allocation2 + $0x50] sm:$0x1] %v547_v57  ;;  %v553_v60 = vunpack.c.l.bf16 %v552_v14  ;;  %v558_v61 = vld [vmem:[%s557_s29] sm:$0x1]  ;;  %s5248_s29 = sld [smem:[#allocation7 + $0x6e]]  ;;  %s5256_s30 = sld [smem:[#allocation7 + $0x72]] }
  0xa3   :  { %v564_v62 = vld [vmem:[%s563_s14] sm:$0x1]  ;;  %v559_v63 = vunpack.c.l.bf16 %v558_v61  ;;  %s617_s14 = scalar_lea.vmem %s6318_s1, %s5155_s0  ;;  %s3730_s0 = sld [smem:[#allocation7 + $0x62]] }
  0xa4   :  { %v565_v1 = vunpack.c.l.bf16 %v564_v62  ;;  %v570_v3 = vld [vmem:[%s569_s7] sm:$0x1]  ;;  %554 = vst [vmem:[#allocation2 + $0x51] sm:$0x1] %v553_v60  ;;  %s3729_s7 = sld [smem:[#allocation7 + $0x61]]  ;;  %s3755_s19 = sld [smem:[#allocation7 + $0x7b]] }
  0xa5   :  { %v576_v5 = vld [vmem:[%s575_s6] sm:$0x1]  ;;  %v571_v7 = vunpack.c.l.bf16 %v570_v3  ;;  %560 = vst [vmem:[#allocation2 + $0x52] sm:$0x1] %v559_v63  ;;  %s5199_s6 = sld [smem:[#allocation7 + $0x65]] }
  0xa6   :  { %v577_v8 = vunpack.c.l.bf16 %v576_v5  ;;  %v582_v9 = vld [vmem:[%s581_s18] sm:$0x1]  ;;  %566 = vst [vmem:[#allocation2 + $0x53] sm:$0x1] %v565_v1  ;;  %s665_s18 = scalar_lea.vmem %s6318_s1, %s5197_s28  ;;  %s5311_s28 = sld [smem:[#allocation7 + $0x7e]] }
  0xa7   :  { %v588_v10 = vld [vmem:[%s587_s3] sm:$0x1]  ;;  %v583_v12 = vunpack.c.l.bf16 %v582_v9  ;;  %572 = vst [vmem:[#allocation2 + $0x54] sm:$0x1] %v571_v7  ;;  %s5208_s3 = sld [smem:[#allocation7 + $0x68]] }
  0xa8   :  { %v840_v6 = vld [vmem:[#allocation2 + $0x48] sm:$0xff]  ;;  %v589_v13 = vunpack.c.l.bf16 %v588_v10  ;;  %v594_v15 = vld [vmem:[%s593_s27] sm:$0x1]  ;;  %578 = vst [vmem:[#allocation2 + $0x55] sm:$0x1] %v577_v8  ;;  %s629_s27 = scalar_lea.vmem %s6318_s1, %s3726_s25  ;;  %s695_s25 = scalar_lea.vmem %s6318_s1, %s3737_s22 }
  0xa9   :  { %v851_v11 = vpack.c.bf16 %v840_v6, %v839_v59  ;;  %v600_v16 = vld [vmem:[%s599_s2] sm:$0x1]  ;;  %v595_v17 = vunpack.c.l.bf16 %v594_v15  ;;  %584 = vst [vmem:[#allocation2 + $0x56] sm:$0x1] %v583_v12  ;;  %s635_s2 = scalar_lea.vmem %s6318_s1, %s3727_s16  ;;  %s659_s16 = scalar_lea.vmem %s6318_s1, %s3731_s21 }
  0xaa   :  { %v601_v18 = vunpack.c.l.bf16 %v600_v16  ;;  %v606_v19 = vld [vmem:[%s605_s5] sm:$0x1]  ;;  %590 = vst [vmem:[#allocation2 + $0x57] sm:$0x1] %v589_v13  ;;  %s641_s5 = scalar_lea.vmem %s6318_s1, %s3728_s24  ;;  %s3751_s21 = sld [smem:[#allocation7 + $0x77]] }
  0xab   :  { %v612_v20 = vld [vmem:[%s611_s4] sm:$0x1]  ;;  %1120 = vmatmul.mubr.bf16.gmra.mrb[16].mxu0 %v851_v11  ;;  %1233 = vmatmul.mubr.bf16.gmra.mrb[16].mxu1 %v851_v11  ;;  %v607_v21 = vunpack.c.l.bf16 %v606_v19  ;;  %596 = vst [vmem:[#allocation2 + $0x58] sm:$0x1] %v595_v17  ;;  %s647_s4 = scalar_lea.vmem %s6318_s1, %s3729_s7  ;;  %s671_s8 = scalar_lea.vmem %s6318_s1, %s5199_s6 }
  0xac   :  { %v613_v25 = vunpack.c.l.bf16 %v612_v20  ;;  %v618_v27 = vld [vmem:[%s617_s14] sm:$0x1]  ;;  %1129 = vmatprep.mubr.bf16.mxu0 %v6326_v0  ;;  %1242 = vmatprep.mubr.bf16.mxu1 %v6326_v0  ;;  %602 = vst [vmem:[#allocation2 + $0x59] sm:$0x1] %v601_v18  ;;  %s653_s14 = scalar_lea.vmem %s6318_s1, %s3730_s0  ;;  %s749_s7 = scalar_lea.vmem %s6318_s1, %s5256_s30 }
  0xad   :  { %v619_v29 = vunpack.c.l.bf16 %v618_v27  ;;  %608 = vst [vmem:[#allocation2 + $0x5a] sm:$0x1] %v607_v21  ;;  %v624_v30 = vld [vmem:[%s623_s12] sm:$0x1]  ;;  %s755_s12 = scalar_lea.vmem %s6318_s1, %s5258_s15  ;;  %s3749_s0 = sld [smem:[#allocation7 + $0x75]] }
  0xae   :  { %614 = vst [vmem:[#allocation2 + $0x5b] sm:$0x1] %v613_v25  ;;  %v625_v31 = vunpack.c.l.bf16 %v624_v30  ;;  %v630_v32 = vld [vmem:[%s629_s27] sm:$0x1]  ;;  %s3750_s30 = sld [smem:[#allocation7 + $0x76]]  ;;  %s3752_s15 = sld [smem:[#allocation7 + $0x78]] }
  0xaf   :  { %620 = vst [vmem:[#allocation2 + $0x5c] sm:$0x1] %v619_v29  ;;  %v636_v33 = vld [vmem:[%s635_s2] sm:$0x1]  ;;  %v631_v34 = vunpack.c.l.bf16 %v630_v32  ;;  %s689_s2 = scalar_lea.vmem %s6318_s1, %s5208_s3  ;;  %s5252_s3 = sld [smem:[#allocation7 + $0x70]] }
  0xb0   :  { %v637_v35 = vunpack.c.l.bf16 %v636_v33  ;;  %v642_v2 = vld [vmem:[%s641_s5] sm:$0x1]  ;;  %626 = vst [vmem:[#allocation2 + $0x5d] sm:$0x1] %v625_v31  ;;  %s3741_s5 = sld [smem:[#allocation7 + $0x6d]]  ;;  %s3754_s27 = sld [smem:[#allocation7 + $0x7a]] }
  0xb1   :  { %v648_v36 = vld [vmem:[%s647_s4] sm:$0x1]  ;;  %v643_v38 = vunpack.c.l.bf16 %v642_v2  ;;  %632 = vst [vmem:[#allocation2 + $0x5e] sm:$0x1] %v631_v34  ;;  %v841_v59 = vld [vmem:[#allocation2 + $0x50] sm:$0xff]  ;;  %s5254_s4 = sld [smem:[#allocation7 + $0x71]]  ;;  %s779_s23 = scalar_lea.vmem %s6318_s1, %s3751_s21 }
  0xb2   :  { %v649_v39 = vunpack.c.l.bf16 %v648_v36  ;;  %v654_v40 = vld [vmem:[%s653_s14] sm:$0x1]  ;;  %638 = vst [vmem:[#allocation2 + $0x5f] sm:$0x1] %v637_v35  ;;  %s5313_s6 = sld [smem:[#allocation7 + $0x7f]]  ;;  %s6441_s21 = sld [smem:[#allocation67_spill]] }
  0xb3   :  { %v660_v41 = vld [vmem:[%s659_s16] sm:$0x1]  ;;  %v655_v42 = vunpack.c.l.bf16 %v654_v40  ;;  %644 = vst [vmem:[#allocation2 + $0x60] sm:$0x1] %v643_v38  ;;  %s5263_s16 = sld [smem:[#allocation7 + $0x74]] }
  0xb4   :  { %v661_v43 = vunpack.c.l.bf16 %v660_v41  ;;  %v666_v44 = vld [vmem:[%s665_s18] sm:$0x1]  ;;  %650 = vst [vmem:[#allocation2 + $0x61] sm:$0x1] %v649_v39  ;;  %s701_s18 = scalar_lea.vmem %s6318_s1, %s3738_s11  ;;  %s767_s11 = scalar_lea.vmem %s6318_s1, %s3749_s0 }
  0xb5   :  { %v672_v45 = vld [vmem:[%s671_s8] sm:$0x1]  ;;  %v667_v46 = vunpack.c.l.bf16 %v666_v44  ;;  %656 = vst [vmem:[#allocation2 + $0x62] sm:$0x1] %v655_v42  ;;  %s707_s8 = scalar_lea.vmem %s6318_s1, %s3739_s20  ;;  %s731_s20 = scalar_lea.vmem %s6318_s1, %s5250_s13 }
  0xb6   :  { %v673_v47 = vunpack.c.l.bf16 %v672_v45  ;;  %v678_v48 = vld [vmem:[%s677_s26] sm:$0x1]  ;;  %662 = vst [vmem:[#allocation2 + $0x63] sm:$0x1] %v661_v43  ;;  %s713_s26 = scalar_lea.vmem %s6318_s1, %s3740_s10  ;;  %s737_s14 = scalar_lea.vmem %s6318_s1, %s5252_s3 }
  0xb7   :  { %v684_v49 = vld [vmem:[%s683_s17] sm:$0x1]  ;;  %v679_v50 = vunpack.c.l.bf16 %v678_v48  ;;  %668 = vst [vmem:[#allocation2 + $0x64] sm:$0x1] %v667_v46  ;;  %s719_s17 = scalar_lea.vmem %s6318_s1, %s3741_s5  ;;  %s743_s13 = scalar_lea.vmem %s6318_s1, %s5254_s4 }
  0xb8   :  { %v685_v54 = vunpack.c.l.bf16 %v684_v49  ;;  %v690_v56 = vld [vmem:[%s689_s2] sm:$0x1]  ;;  %674 = vst [vmem:[#allocation2 + $0x65] sm:$0x1] %v673_v47  ;;  %s725_s2 = scalar_lea.vmem %s6318_s1, %s5248_s29  ;;  %s773_s5 = scalar_lea.vmem %s6318_s1, %s3750_s30 }
  0xb9   :  { %v691_v57 = vunpack.c.l.bf16 %v690_v56  ;;  %680 = vst [vmem:[#allocation2 + $0x66] sm:$0x1] %v679_v50  ;;  %v842_v14 = vld [vmem:[#allocation2 + $0x58] sm:$0xff]  ;;  %v696_v61 = vld [vmem:[%s695_s25] sm:$0x1]  ;;  %s785_s24 = scalar_lea.vmem %s6318_s1, %s3752_s15  ;;  %s797_s4 = scalar_lea.vmem %s6318_s1, %s3754_s27 }
  0xba   :  { %686 = vst [vmem:[#allocation2 + $0x67] sm:$0x1] %v685_v54  ;;  %v852_v60 = vpack.c.bf16 %v842_v14, %v841_v59  ;;  %v697_v62 = vunpack.c.l.bf16 %v696_v61  ;;  %v702_v63 = vld [vmem:[%s701_s18] sm:$0x1]  ;;  %s803_s30 = scalar_lea.vmem %s6318_s1, %s3755_s19  ;;  %s4459_s15 = smov [#allocation13]  }
  0xbb   :  { %692 = vst [vmem:[#allocation2 + $0x68] sm:$0x1] %v691_v57  ;;  %v708_v1 = vld [vmem:[%s707_s8] sm:$0x1]  ;;  %v703_v3 = vunpack.c.l.bf16 %v702_v63  ;;  %s761_s8 = scalar_lea.vmem %s6318_s1, %s5263_s16  ;;  %s5309_s16 = sld [smem:[#allocation7 + $0x7d]] }
  0xbc   :  { %1130 = vmatmul.mubr.bf16.gmra.mrb[20].mxu0 %v852_v60  ;;  %1243 = vmatmul.mubr.bf16.gmra.mrb[20].mxu1 %v852_v60  ;;  %v709_v5 = vunpack.c.l.bf16 %v708_v1  ;;  %v714_v6 = vld [vmem:[%s713_s26] sm:$0x1]  ;;  %698 = vst [vmem:[#allocation2 + $0x69] sm:$0x1] %v697_v62  ;;  %s3753_s26 = sld [smem:[#allocation7 + $0x79]]  ;;  %v4456_v62 = vmov 0.0|0.0  }
  0xbd   :  { %v720_v7 = vld [vmem:[%s719_s17] sm:$0x1]  ;;  %1139 = vmatprep.mubr.bf16.mxu0 %v6326_v0  ;;  %1252 = vmatprep.mubr.bf16.mxu1 %v6326_v0  ;;  %v715_v8 = vunpack.c.l.bf16 %v714_v6  ;;  %704 = vst [vmem:[#allocation2 + $0x6a] sm:$0x1] %v703_v3  ;;  %s5307_s17 = sld [smem:[#allocation7 + $0x7c]] }
  0xbe   :  { %v721_v9 = vunpack.c.l.bf16 %v720_v7  ;;  %v726_v10 = vld [vmem:[%s725_s2] sm:$0x1]  ;;  %710 = vst [vmem:[#allocation2 + $0x6b] sm:$0x1] %v709_v5  ;;  %v5359_v1 = vld [vmem:[#allocation11 + $0x8] ss:$16 sps:$4 sm:$0xff]  }
  0xbf   :  { %v732_v11 = vld [vmem:[%s731_s20] sm:$0x1]  ;;  %v727_v12 = vunpack.c.l.bf16 %v726_v10  ;;  %716 = vst [vmem:[#allocation2 + $0x6c] sm:$0x1] %v715_v8  ;;  %s821_s20 = scalar_lea.vmem %s6318_s1, %s5311_s28  ;;  %v5362_v3 = vld [vmem:[#allocation11 + $0x24] ss:$16 sps:$4 sm:$0xff]  }
  0xc0   :  { %v733_v13 = vunpack.c.l.bf16 %v732_v11  ;;  %v738_v15 = vld [vmem:[%s737_s14] sm:$0x1]  ;;  %722 = vst [vmem:[#allocation2 + $0x6d] sm:$0x1] %v721_v9  ;;  %v5365_v5 = vld [vmem:[#allocation11 + $0x2c] ss:$16 sps:$4 sm:$0xff]  }
  0xc1   :  { %v744_v16 = vld [vmem:[%s743_s13] sm:$0x1]  ;;  %v739_v17 = vunpack.c.l.bf16 %v738_v15  ;;  %728 = vst [vmem:[#allocation2 + $0x6e] sm:$0x1] %v727_v12  ;;  %v5373_v7 = vld [vmem:[#allocation11 + $0x28] ss:$16 sps:$4 sm:$0xff]  }
  0xc2   :  { %v745_v18 = vunpack.c.l.bf16 %v744_v16  ;;  %v750_v19 = vld [vmem:[%s749_s7] sm:$0x1]  ;;  %734 = vst [vmem:[#allocation2 + $0x6f] sm:$0x1] %v733_v13  ;;  %s791_s9 = scalar_lea.vmem %s6318_s1, %s3753_s26  ;;  %v5376_v8 = vld [vmem:[#allocation11 + $0x44] ss:$16 sps:$4 sm:$0xff]  }
  0xc3   :  { %v756_v20 = vld [vmem:[%s755_s12] sm:$0x1]  ;;  %v751_v21 = vunpack.c.l.bf16 %v750_v19  ;;  %740 = vst [vmem:[#allocation2 + $0x70] sm:$0x1] %v739_v17  ;;  %s809_s26 = scalar_lea.vmem %s6318_s1, %s5307_s17  ;;  %s827_s17 = scalar_lea.vmem %s6318_s1, %s5313_s6  ;;  %v5379_v9 = vld [vmem:[#allocation11 + $0x4c] ss:$16 sps:$4 sm:$0xff]  }
  0xc4   :  { %v757_v25 = vunpack.c.l.bf16 %v756_v20  ;;  %v762_v27 = vld [vmem:[%s761_s8] sm:$0x1]  ;;  %746 = vst [vmem:[#allocation2 + $0x71] sm:$0x1] %v745_v18  ;;  %v5385_v11 = vld [vmem:[#allocation11 + $0x48] ss:$16 sps:$4 sm:$0xff]  }
  0xc5   :  { %v763_v29 = vunpack.c.l.bf16 %v762_v27  ;;  %752 = vst [vmem:[#allocation2 + $0x72] sm:$0x1] %v751_v21  ;;  %v843_v30 = vld [vmem:[#allocation2 + $0x60] sm:$0xff]  ;;  %v5391_v13 = vld [vmem:[#allocation11 + $0x6c] ss:$16 sps:$4 sm:$0xff]   ;;  %s6436_s28 = sld [smem:[#allocation66_spill]] }
  0xc6   :  { %758 = vst [vmem:[#allocation2 + $0x73] sm:$0x1] %v757_v25  ;;  %v768_v31 = vld [vmem:[%s767_s11] sm:$0x1]  ;;  %s815_s11 = scalar_lea.vmem %s6318_s1, %s5309_s16  ;;  %v5388_v12 = vld [vmem:[#allocation11 + $0x64] ss:$16 sps:$4 sm:$0xff]  }
  0xc7   :  { %764 = vst [vmem:[#allocation2 + $0x74] sm:$0x1] %v763_v29  ;;  %v769_v33 = vunpack.c.l.bf16 %v768_v31  ;;  %v774_v34 = vld [vmem:[%s773_s5] sm:$0x1]  ;;  %v5397_v16 = vld [vmem:[#allocation11 + $0x68] ss:$16 sps:$4 sm:$0xff]  }
  0xc8   :  { %v780_v35 = vld [vmem:[%s779_s23] sm:$0x1]  ;;  %v775_v36 = vunpack.c.l.bf16 %v774_v34  ;;  %v5400_v17 = vld [vmem:[#allocation11 + $0x84] ss:$16 sps:$4 sm:$0xff]  }
  0xc9   :  { %v844_v32 = vld [vmem:[#allocation2 + $0x68] sm:$0xff]  ;;  %v781_v38 = vunpack.c.l.bf16 %v780_v35  ;;  %v786_v39 = vld [vmem:[%s785_s24] sm:$0x1]  ;;  %770 = vst [vmem:[#allocation2 + $0x75] sm:$0x1] %v769_v33 }
  0xca   :  { %v853_v2 = vpack.c.bf16 %v844_v32, %v843_v30  ;;  %v792_v40 = vld [vmem:[%s791_s9] sm:$0x1]  ;;  %v787_v41 = vunpack.c.l.bf16 %v786_v39  ;;  %776 = vst [vmem:[#allocation2 + $0x76] sm:$0x1] %v775_v36  ;;  %v5408_v19 = vld [vmem:[#allocation11 + $0xa4] ss:$16 sps:$4 sm:$0xff]  }
  0xcb   :  { %v793_v42 = vunpack.c.l.bf16 %v792_v40  ;;  %v798_v43 = vld [vmem:[%s797_s4] sm:$0x1]  ;;  %782 = vst [vmem:[#allocation2 + $0x77] sm:$0x1] %v781_v38 }
  0xcc   :  { %v804_v44 = vld [vmem:[%s803_s30] sm:$0x1]  ;;  %1140 = vmatmul.mubr.bf16.gmra.mrb[24].mxu0 %v853_v2  ;;  %1253 = vmatmul.mubr.bf16.gmra.mrb[24].mxu1 %v853_v2  ;;  %v799_v45 = vunpack.c.l.bf16 %v798_v43  ;;  %788 = vst [vmem:[#allocation2 + $0x78] sm:$0x1] %v787_v41 }
  0xcd   :  { %v805_v46 = vunpack.c.l.bf16 %v804_v44  ;;  %v810_v47 = vld [vmem:[%s809_s26] sm:$0x1]  ;;  %1149 = vmatprep.mubr.bf16.mxu0 %v6326_v0  ;;  %1262 = vmatprep.mubr.bf16.mxu1 %v6326_v0  ;;  %794 = vst [vmem:[#allocation2 + $0x79] sm:$0x1] %v793_v42  ;;  %s3495_s26 = sshll.u32 %s4459_s15, 4  ;;  %s3496_s26 = int_to_ptr.vmem [resolvable:$true] %s3495_s26 }
  0xce   :  { %v816_v48 = vld [vmem:[%s815_s11] sm:$0x1]  ;;  %v811_v49 = vunpack.c.l.bf16 %v810_v47  ;;  %800 = vst [vmem:[#allocation2 + $0x7a] sm:$0x1] %v799_v45  ;;  %s4420_s2 = scalar_lea.vmem %s3496_s26, 128  ;;  %p4425_p8 = scmp.lt.s32.totalorder %s3496_s26, %s3496_s26 }
  0xcf   :  { %v817_v50 = vunpack.c.l.bf16 %v816_v48  ;;  %v822_v54 = vld [vmem:[%s821_s20] sm:$0x1]  ;;  %806 = vst [vmem:[#allocation2 + $0x7b] sm:$0x1] %v805_v46  ;;  %p4421_p7 = scmp.ne.s32.totalorder %s3496_s26, %s4420_s2  ;;  %p4426_p9 = scmp.lt.s32.totalorder %s4420_s2, %s4420_s2 }
  0xd0   :  { %v828_v56 = vld [vmem:[%s827_s17] sm:$0x1]  ;;  %v823_v57 = vunpack.c.l.bf16 %v822_v54  ;;  %812 = vst [vmem:[#allocation2 + $0x7c] sm:$0x1] %v811_v49 }
  0xd1   :  { %v829_v59 = vunpack.c.l.bf16 %v828_v56  ;;  %818 = vst [vmem:[#allocation2 + $0x7d] sm:$0x1] %v817_v50  ;;  %v5356_v63 = vld [vmem:[#allocation11] ss:$16 sps:$4 sm:$0xff]   ;;  %p4427_p10 = por %p4426_p9, %p4425_p8 }
  0xd2   :  { %824 = vst [vmem:[#allocation2 + $0x7e] sm:$0x1] %v823_v57  ;;  %v845_v14 = vld [vmem:[#allocation2 + $0x70] sm:$0xff] }
  0xd3   :  { %830 = vst [vmem:[#allocation2 + $0x7f] sm:$0x1] %v829_v59  ;;  %v5370_v6 = vld [vmem:[#allocation11 + $0x20] ss:$16 sps:$4 sm:$0xff]   ;;  %p4428_p11 = pnand %p4427_p10, %p4421_p7 }
  0xd4   :  { %v5382_v10 = vld [vmem:[#allocation11 + $0x40] ss:$16 sps:$4 sm:$0xff]  }
  0xd5   :  { %v5394_v15 = vld [vmem:[#allocation11 + $0x60] ss:$16 sps:$4 sm:$0xff]  }
  0xd6   :  { %v5404_v18 = vld [vmem:[#allocation11 + $0x80] ss:$16 sps:$4 sm:$0xff]  }
  0xd7   :  { %v5412_v20 = vld [vmem:[#allocation11 + $0xa0] ss:$16 sps:$4 sm:$0xff]  }
  0xda   :  { %v846_v60 = vld [vmem:[#allocation2 + $0x78] sm:$0xff] }
  0xdb   :  { %v854_v61 = vpack.c.bf16 %v846_v60, %v845_v14 }
  0xdd   :  { %1150 = vmatmul.mubr.bf16.gmra.mrb[28].mxu0 %v854_v61  ;;  %1263 = vmatmul.mubr.bf16.gmra.mrb[28].mxu1 %v854_v61 }
  0xde   :  { %1568 = vmatprep.mubr.bf16.mxu0 %v6326_v0  ;;  %1609 = vmatprep.mubr.bf16.mxu1 %v6326_v0 }
  0xe5   :  { %1569 = vmatmul.mubr.bf16.vlgmr.msra.gmra.mrb[32].mxu0 %v4456_v62  ;;  %1610 = vmatmul.mubr.bf16.vlgmr.msra.gmra.mrb[32].mxu1 %v4456_v62 }
  0xe6   :  { %1652 = vmatpush1.bf16.msra.mxu0 %v5356_v63  ;;  %1693 = vmatpush1.bf16.msra.mxu1 %v5359_v1 }
  0xe7   :  { %1653 = vmatprep.subr.bf16.mxu0 %v5362_v3  ;;  %1694 = vmatprep.subr.bf16.mxu1 %v5365_v5 }
  0xe8   :  { %1683 = vmatprep.mubr.bf16.mxu0 %v6326_v0  ;;  %1724 = vmatprep.mubr.bf16.mxu1 %v6326_v0 }
  0xea   :  { %1654 = vmatpush1.bf16.msra.mxu0 %v5370_v6  ;;  %1695 = vmatpush1.bf16.msra.mxu1 %v5373_v7 }
  0xeb   :  { %1655 = vmatprep.subr.bf16.mxu0 %v5376_v8  ;;  %1696 = vmatprep.subr.bf16.mxu1 %v5379_v9 }
  0xee   :  { %1656 = vmatpush1.bf16.msra.mxu0 %v5382_v10  ;;  %1697 = vmatpush1.bf16.msra.mxu1 %v5385_v11 }
  0xef   :  { %1657 = vmatprep.subr.bf16.mxu0 %v5388_v12  ;;  %1698 = vmatprep.subr.bf16.mxu1 %v5391_v13 }
  0xf2   :  { %1658 = vmatpush1.bf16.msra.mxu0 %v5394_v15  ;;  %1699 = vmatpush1.bf16.msra.mxu1 %v5397_v16 }
  0xf3   :  { %1659 = vmatprep.subr.bf16.mxu0 %v5400_v17  ;;  %1700 = vmatprep.subr.bf16.mxu1 %v4946_v37  ;;  %v5424_v37 = vld [vmem:[#allocation11 + $0x4] ss:$16 sps:$4 sm:$0xff]  }
  0xf6   :  { %1660 = vmatpush1.bf16.msra.mxu0 %v5404_v18  ;;  %1701 = vmatpush1.bf16.msra.mxu1 %v4981_v52  ;;  %v5427_v52 = vld [vmem:[#allocation11 + $0xc] ss:$16 sps:$4 sm:$0xff]  }
  0xf7   :  { %1661 = vmatprep.subr.bf16.mxu0 %v5408_v19  ;;  %1702 = vmatprep.subr.bf16.mxu1 %v4997_v55 }
  0xfa   :  { %1662 = vmatpush1.bf16.msra.mxu0 %v5412_v20  ;;  %1703 = vmatpush1.bf16.msra.mxu1 %v5008_v58 }
  0xfb   :  { %1663 = vmatprep.subr.bf16.mxu0 %v4975_v51  ;;  %1704 = vmatprep.subr.bf16.mxu1 %v5067_v22 }
  0xfe   :  { %1664 = vmatpush1.bf16.msra.mxu0 %v4988_v53  ;;  %1705 = vmatpush1.bf16.msra.mxu1 %v5080_v24 }
  0xff   :  { %1665 = vmatprep.subr.bf16.mxu0 %v5027_v4  ;;  %1706 = vmatprep.subr.bf16.mxu1 %v5089_v26 }
 0x102   :  { %1666 = vmatpush1.bf16.msra.mxu0 %v5073_v23  ;;  %1707 = vmatpush1.bf16.msra.mxu1 %v5100_v28 }
 0x103   :  { %1766 = vmatprep.subr.bf16.mxu0 %v5424_v37  ;;  %1807 = vmatprep.subr.bf16.mxu1 %v5427_v52 }
 0x134   :  { %v5430_v51 = vpop.f32.mrb[0].mxu0  ;;  %v5432_v53 = vpop.f32.mrb[0].mxu1 }
 0x135   :  { %v5434_v55 = vpop.f32.mrb[1].mxu0  ;;  %v5436_v58 = vpop.f32.mrb[1].mxu1 }
 0x136   :  { %v5438_v4 = vpop.f32.mrb[2].mxu0  ;;  %v5440_v22 = vpop.f32.mrb[2].mxu1 }
 0x137   :  { %v5442_v23 = vpop.f32.mrb[3].mxu0  ;;  %v5444_v24 = vpop.f32.mrb[3].mxu1 }
 0x147   :  { %v5446_v21 = vpop.f32.mrb[4].mxu0  ;;  %v5448_v25 = vpop.f32.mrb[4].mxu1 }
 0x148   :  { %v5450_v27 = vpop.f32.mrb[5].mxu0  ;;  %v5452_v29 = vpop.f32.mrb[5].mxu1 }
 0x149   :  { %v5454_v30 = vpop.f32.mrb[6].mxu0  ;;  %v5456_v31 = vpop.f32.mrb[6].mxu1 }
 0x14a   :  { %v5458_v32 = vpop.f32.mrb[7].mxu0  ;;  %v5460_v33 = vpop.f32.mrb[7].mxu1 }
 0x15b   :  { %v5462_v34 = vpop.f32.mrb[8].mxu0  ;;  %v5464_v35 = vpop.f32.mrb[8].mxu1 }
 0x15c   :  { %v5466_v2 = vpop.f32.mrb[9].mxu0  ;;  %v5468_v36 = vpop.f32.mrb[9].mxu1 }
 0x15d   :  { %6349 = vst [vmem:[#allocation21_spill] sm:$0xff] %v5468_v36  ;;  %v5470_v38 = vpop.f32.mrb[10].mxu0  ;;  %v5472_v39 = vpop.f32.mrb[10].mxu1 }
 0x15e   :  { %6350 = vst [vmem:[#allocation22_spill] sm:$0xff] %v5470_v38  ;;  %6351 = vst [vmem:[#allocation23_spill] sm:$0xff] %v5472_v39  ;;  %v5474_v40 = vpop.f32.mrb[11].mxu0  ;;  %v5476_v41 = vpop.f32.mrb[11].mxu1 }
 0x15f   :  { %6352 = vst [vmem:[#allocation24_spill] sm:$0xff] %v5474_v40  ;;  %6353 = vst [vmem:[#allocation25_spill] sm:$0xff] %v5476_v41 }
 0x16d   :  { %v5478_v42 = vpop.f32.mrb[12].mxu0  ;;  %v5480_v43 = vpop.f32.mrb[12].mxu1 }
 0x16e   :  { %6354 = vst [vmem:[#allocation26_spill] sm:$0xff] %v5478_v42  ;;  %6355 = vst [vmem:[#allocation27_spill] sm:$0xff] %v5480_v43  ;;  %v5482_v44 = vpop.f32.mrb[13].mxu0  ;;  %v5484_v45 = vpop.f32.mrb[13].mxu1 }
 0x16f   :  { %6356 = vst [vmem:[#allocation28_spill] sm:$0xff] %v5482_v44  ;;  %6357 = vst [vmem:[#allocation29_spill] sm:$0xff] %v5484_v45  ;;  %v5486_v46 = vpop.f32.mrb[14].mxu0  ;;  %v5488_v47 = vpop.f32.mrb[14].mxu1 }
 0x170   :  { %6358 = vst [vmem:[#allocation30_spill] sm:$0xff] %v5486_v46  ;;  %6359 = vst [vmem:[#allocation31_spill] sm:$0xff] %v5488_v47  ;;  %v5490_v48 = vpop.f32.mrb[15].mxu0  ;;  %v5492_v49 = vpop.f32.mrb[15].mxu1 }
 0x171   :  { %6360 = vst [vmem:[#allocation32_spill] sm:$0xff] %v5490_v48  ;;  %6361 = vst [vmem:[#allocation33_spill] sm:$0xff] %v5492_v49 }
 0x17e   :  { %v5494_v50 = vpop.f32.mrb[16].mxu0  ;;  %v5496_v54 = vpop.f32.mrb[16].mxu1 }
 0x17f   :  { %6362 = vst [vmem:[#allocation34_spill] sm:$0xff] %v5494_v50  ;;  %6363 = vst [vmem:[#allocation35_spill] sm:$0xff] %v5496_v54  ;;  %v5498_v56 = vpop.f32.mrb[17].mxu0  ;;  %v5500_v57 = vpop.f32.mrb[17].mxu1 }
 0x180   :  { %6364 = vst [vmem:[#allocation36_spill] sm:$0xff] %v5498_v56  ;;  %6365 = vst [vmem:[#allocation37_spill] sm:$0xff] %v5500_v57  ;;  %v5502_v59 = vpop.f32.mrb[18].mxu0  ;;  %v5504_v14 = vpop.f32.mrb[18].mxu1 }
 0x181   :  { %6366 = vst [vmem:[#allocation38_spill] sm:$0xff] %v5502_v59  ;;  %6367 = vst [vmem:[#allocation39_spill] sm:$0xff] %v5504_v14  ;;  %v5506_v60 = vpop.f32.mrb[19].mxu0  ;;  %v5508_v61 = vpop.f32.mrb[19].mxu1 }
 0x182   :  { %6368 = vst [vmem:[#allocation40_spill] sm:$0xff] %v5506_v60  ;;  %6369 = vst [vmem:[#allocation41_spill] sm:$0xff] %v5508_v61 }
 0x18f   :  { %v5510_v62 = vpop.f32.mrb[20].mxu0  ;;  %v5512_v0 = vpop.f32.mrb[20].mxu1 }
 0x190   :  { %6370 = vst [vmem:[#allocation42_spill] sm:$0xff] %v5510_v62  ;;  %6371 = vst [vmem:[#allocation43_spill] sm:$0xff] %v5512_v0  ;;  %v5514_v49 = vpop.f32.mrb[21].mxu0  ;;  %v5516_v50 = vpop.f32.mrb[21].mxu1 }
 0x191   :  { %6372 = vst [vmem:[#allocation44_spill] sm:$0xff] %v5514_v49  ;;  %6373 = vst [vmem:[#allocation45_spill] sm:$0xff] %v5516_v50  ;;  %v5518_v54 = vpop.f32.mrb[22].mxu0  ;;  %v5520_v56 = vpop.f32.mrb[22].mxu1 }
 0x192   :  { %6374 = vst [vmem:[#allocation46_spill] sm:$0xff] %v5518_v54  ;;  %6375 = vst [vmem:[#allocation47_spill] sm:$0xff] %v5520_v56  ;;  %v5522_v57 = vpop.f32.mrb[23].mxu0  ;;  %v5524_v59 = vpop.f32.mrb[23].mxu1 }
 0x193   :  { %6376 = vst [vmem:[#allocation48_spill] sm:$0xff] %v5522_v57  ;;  %6377 = vst [vmem:[#allocation49_spill] sm:$0xff] %v5524_v59 }
 0x19f   :  { %v5526_v14 = vpop.f32.mrb[24].mxu0  ;;  %v5528_v60 = vpop.f32.mrb[24].mxu1 }
 0x1a0   :  { %6378 = vst [vmem:[#allocation50_spill] sm:$0xff] %v5526_v14  ;;  %6379 = vst [vmem:[#allocation51_spill] sm:$0xff] %v5528_v60  ;;  %v5530_v61 = vpop.f32.mrb[25].mxu0  ;;  %v5532_v62 = vpop.f32.mrb[25].mxu1 }
 0x1a1   :  { %6380 = vst [vmem:[#allocation52_spill] sm:$0xff] %v5530_v61  ;;  %6381 = vst [vmem:[#allocation53_spill] sm:$0xff] %v5532_v62  ;;  %v5534_v0 = vpop.f32.mrb[26].mxu0  ;;  %v5536_v49 = vpop.f32.mrb[26].mxu1 }
 0x1a2   :  { %6382 = vst [vmem:[#allocation54_spill] sm:$0xff] %v5534_v0  ;;  %6383 = vst [vmem:[#allocation55_spill] sm:$0xff] %v5536_v49  ;;  %v5538_v50 = vpop.f32.mrb[27].mxu0  ;;  %v5540_v54 = vpop.f32.mrb[27].mxu1 }
 0x1a3   :  { %6384 = vst [vmem:[#allocation56_spill] sm:$0xff] %v5538_v50  ;;  %6385 = vst [vmem:[#allocation57_spill] sm:$0xff] %v5540_v54 }
 0x1b0   :  { %v5542_v56 = vpop.f32.mrb[28].mxu0  ;;  %v5544_v57 = vpop.f32.mrb[28].mxu1 }
 0x1b1   :  { %6386 = vst [vmem:[#allocation58_spill] sm:$0xff] %v5542_v56  ;;  %6387 = vst [vmem:[#allocation59_spill] sm:$0xff] %v5544_v57  ;;  %v5546_v59 = vpop.f32.mrb[29].mxu0  ;;  %v5548_v14 = vpop.f32.mrb[29].mxu1 }
 0x1b2   :  { %6388 = vst [vmem:[#allocation60_spill] sm:$0xff] %v5546_v59  ;;  %6389 = vst [vmem:[#allocation61_spill] sm:$0xff] %v5548_v14  ;;  %v5550_v60 = vpop.f32.mrb[30].mxu0  ;;  %v5552_v61 = vpop.f32.mrb[30].mxu1 }
 0x1b3   :  { %6390 = vst [vmem:[#allocation62_spill] sm:$0xff] %v5550_v60  ;;  %6391 = vst [vmem:[#allocation63_spill] sm:$0xff] %v5552_v61  ;;  %v5554_v62 = vpop.f32.mrb[31].mxu0  ;;  %v5556_v0 = vpop.f32.mrb[31].mxu1 }
 0x1b4   :  { %6392 = vst [vmem:[#allocation64_spill] sm:$0xff] %v5554_v62  ;;  %6393 = vst [vmem:[#allocation65_spill] sm:$0xff] %v5556_v0 }
 0x1b8   :  { %v1570_v49 = vpop.f32.mrb[32].mxu0  ;;  %v1611_v50 = vpop.f32.mrb[32].mxu1 }
 0x1b9   :  { %v1618_v54 = vadd.f32 %v1570_v49, %v5430_v51  ;;  %v1620_v56 = vadd.f32 %v1611_v50, %v5432_v53  ;;  %v1572_v48 = vpop.f32.mrb[33].mxu0  ;;  %v1613_v57 = vpop.f32.mrb[33].mxu1 }
 0x1ba   :  { %v1619_v59 = vadd.f32 %v1572_v48, %v5434_v55  ;;  %v1621_v14 = vadd.f32 %v1613_v57, %v5436_v58  ;;  %v1574_v47 = vpop.f32.mrb[34].mxu0  ;;  %v1615_v60 = vpop.f32.mrb[34].mxu1 }
 0x1bb   :  { %v3824_v46 = vmul.f32 -1.442695, %v1618_v54  ;;  %v1575_v61 = vpop.f32.mrb[35].mxu0  ;;  %v1616_v45 = vpop.f32.mrb[35].mxu1  ;;  %v3826_v0 = vmul.f32 -1.442695, %v1620_v56 }
 0x1bc   :  { %v3825_v62 = vmul.f32 -1.442695, %v1619_v59  ;;  %v5586_v59 = vld [vmem:[#allocation11 + $0x88] ss:$16 sps:$4 sm:$0xff]   ;;  %v5597_v61 = vld [vmem:[#allocation11 + $0xc4] ss:$16 sps:$4 sm:$0xff]  }
 0x1bd   :  { %4024 = vpow2.f32 %v3824_v46  ;;  %v5594_v60 = vld [vmem:[#allocation11 + $0xa8] ss:$16 sps:$4 sm:$0xff]  }
 0x1be   :  { %4026 = vpow2.f32 %v3825_v62  ;;  %v5600_v62 = vld [vmem:[#allocation11 + $0xcc] ss:$16 sps:$4 sm:$0xff]  }
 0x1bf   :  { %4028 = vtanh.f32 %v1621_v14  ;;  %v5590_v14 = vld [vmem:[#allocation11 + $0xac] ss:$16 sps:$4 sm:$0xff]  }
 0x1c0   :  { %4030 = vpow2.f32 %v3826_v0  ;;  %v6394_v0 = vmov 0  }
 0x1c7   :  { %v4025_v44 = vpop.eup %4024 }
 0x1c8   :  { %v1631_v43 = vadd.f32 1.0, %v4025_v44  ;;  %v4027_v51 = vpop.eup %4026 }
 0x1c9   :  { %v1632_v53 = vadd.f32 1.0, %v4027_v51  ;;  %v4029_v55 = vpop.eup %4028  ;;  %v5603_v51 = vld [vmem:[#allocation11 + $0xc0] ss:$16 sps:$4 sm:$0xff]  }
 0x1ca   :  { %4032 = vrcp.f32 %v1631_v43  ;;  %v4031_v48 = vpop.eup %4030  ;;  %v5582_v43 = vld [vmem:[#allocation11 + $0x8c] ss:$16 sps:$4 sm:$0xff]  }
 0x1cb   :  { %4034 = vrcp.f32 %v1632_v53  ;;  %v1633_v50 = vadd.f32 1.0, %v4031_v48  ;;  %v5606_v53 = vld [vmem:[#allocation11 + $0xc8] ss:$16 sps:$4 sm:$0xff]   ;;  %v5613_v48 = vld [vmem:[#allocation11 + $0xe0] ss:$16 sps:$4 sm:$0xff]  }
 0x1cd   :  { %4036 = vrcp.f32 %v1633_v50 }
 0x1d4   :  { %v4033_v58 = vpop.eup %4032 }
 0x1d5   :  { %v1642_v47 = vmul.f32 %v4033_v58, %v4029_v55  ;;  %v4035_v49 = vpop.eup %4034  ;;  %v5609_v55 = vld [vmem:[#allocation11 + $0xe4] ss:$16 sps:$4 sm:$0xff]  }
 0x1d6   :  { %v1641_v54 = vmul.f32 0.0, %v4035_v49 }
 0x1d7   :  { %v4037_v46 = vpop.eup %4036 }
 0x1d8   :  { %v5562_v45 = vadd.f32 %v1642_v47, %v1641_v54 }
 0x1da   :  { %4038 = vtanh.f32 %v5562_v45 }
 0x1e4   :  { %v4039_v44 = vpop.eup %4038 }
 0x1e5   :  { %v1645_v56 = vmul.f32 %v4039_v44, %v4037_v46 }
 0x1e7   :  { %v1650_v57 = vpack.c.bf16 %v1645_v56, %v1645_v56 }
 0x1e9   :  { %1684 = vmatmul.mubr.bf16.vlgmr.msra.gmra.mrb[36].mxu0 %v1650_v57  ;;  %1725 = vmatmul.mubr.bf16.vlgmr.msra.gmra.mrb[36].mxu1 %v1650_v57 }
 0x1ea   :  { %1767 = vmatpush1.bf16.msra.mxu0 %v5356_v63  ;;  %1808 = vmatpush1.bf16.msra.mxu1 %v5359_v1 }
 0x1eb   :  { %1768 = vmatprep.subr.bf16.mxu0 %v5362_v3  ;;  %1809 = vmatprep.subr.bf16.mxu1 %v5365_v5 }
 0x1ec   :  { %1798 = vmatprep.mubr.bf16.mxu0 %v6394_v0  ;;  %1839 = vmatprep.mubr.bf16.mxu1 %v6394_v0 }
 0x1ee   :  { %1769 = vmatpush1.bf16.msra.mxu0 %v5370_v6  ;;  %1810 = vmatpush1.bf16.msra.mxu1 %v5373_v7 }
 0x1ef   :  { %1770 = vmatprep.subr.bf16.mxu0 %v5376_v8  ;;  %1811 = vmatprep.subr.bf16.mxu1 %v5379_v9 }
 0x1f2   :  { %1771 = vmatpush1.bf16.msra.mxu0 %v5382_v10  ;;  %1812 = vmatpush1.bf16.msra.mxu1 %v5385_v11 }
 0x1f3   :  { %1772 = vmatprep.subr.bf16.mxu0 %v5388_v12  ;;  %1813 = vmatprep.subr.bf16.mxu1 %v5391_v13 }
 0x1f6   :  { %1773 = vmatpush1.bf16.msra.mxu0 %v5394_v15  ;;  %1814 = vmatpush1.bf16.msra.mxu1 %v5397_v16 }
 0x1f7   :  { %1774 = vmatprep.subr.bf16.mxu0 %v5400_v17  ;;  %1815 = vmatprep.subr.bf16.mxu1 %v5582_v43 }
 0x1fa   :  { %1775 = vmatpush1.bf16.msra.mxu0 %v5404_v18  ;;  %1816 = vmatpush1.bf16.msra.mxu1 %v5586_v59 }
 0x1fb   :  { %1776 = vmatprep.subr.bf16.mxu0 %v5408_v19  ;;  %1817 = vmatprep.subr.bf16.mxu1 %v5590_v14 }
 0x1fe   :  { %1777 = vmatpush1.bf16.msra.mxu0 %v5412_v20  ;;  %1818 = vmatpush1.bf16.msra.mxu1 %v5594_v60 }
 0x1ff   :  { %1778 = vmatprep.subr.bf16.mxu0 %v5597_v61  ;;  %1819 = vmatprep.subr.bf16.mxu1 %v5600_v62 }
 0x202   :  { %1779 = vmatpush1.bf16.msra.mxu0 %v5603_v51  ;;  %1820 = vmatpush1.bf16.msra.mxu1 %v5606_v53 }
 0x203   :  { %1780 = vmatprep.subr.bf16.mxu0 %v5609_v55  ;;  %1821 = vmatprep.subr.bf16.mxu1 %v5089_v26 }
 0x206   :  { %1781 = vmatpush1.bf16.msra.mxu0 %v5613_v48  ;;  %1822 = vmatpush1.bf16.msra.mxu1 %v5100_v28 }
 0x207   :  { %1881 = vmatprep.subr.bf16.mxu0 %v5424_v37  ;;  %1922 = vmatprep.subr.bf16.mxu1 %v5427_v52 }
 0x2bc   :  { %v1685_v58 = vpop.f32.mrb[36].mxu0  ;;  %v1726_v47 = vpop.f32.mrb[36].mxu1 }
 0x2bd   :  { %v1733_v49 = vadd.f32 %v1685_v58, %v5438_v4  ;;  %v1735_v50 = vadd.f32 %v1726_v47, %v5440_v22  ;;  %v1687_v54 = vpop.f32.mrb[37].mxu0  ;;  %v1728_v46 = vpop.f32.mrb[37].mxu1 }
 0x2be   :  { %v1734_v26 = vadd.f32 %v1687_v54, %v5442_v23  ;;  %v1736_v44 = vadd.f32 %v1728_v46, %v5444_v24  ;;  %v1689_v56 = vpop.f32.mrb[38].mxu0  ;;  %v1730_v57 = vpop.f32.mrb[38].mxu1 }
 0x2bf   :  { %v3827_v42 = vmul.f32 -1.442695, %v1733_v49  ;;  %v1690_v28 = vpop.f32.mrb[39].mxu0  ;;  %v1731_v41 = vpop.f32.mrb[39].mxu1  ;;  %v3829_v39 = vmul.f32 -1.442695, %v1735_v50 }
 0x2c0   :  { %v3828_v40 = vmul.f32 -1.442695, %v1734_v26 }
 0x2c1   :  { %4040 = vpow2.f32 %v3827_v42 }
 0x2c2   :  { %4042 = vpow2.f32 %v3828_v40 }
 0x2c3   :  { %4044 = vtanh.f32 %v1736_v44 }
 0x2c4   :  { %4046 = vpow2.f32 %v3829_v39 }
 0x2cb   :  { %v4041_v38 = vpop.eup %4040 }
 0x2cc   :  { %v1746_v36 = vadd.f32 1.0, %v4041_v38  ;;  %v4043_v4 = vpop.eup %4042 }
 0x2cd   :  { %v1747_v22 = vadd.f32 1.0, %v4043_v4  ;;  %v4045_v23 = vpop.eup %4044 }
 0x2ce   :  { %4048 = vrcp.f32 %v1746_v36  ;;  %v4047_v58 = vpop.eup %4046  ;;  %v5656_v36 = vld [vmem:[#allocation11 + $0xec] ss:$16 sps:$4 sm:$0xff]  }
 0x2cf   :  { %4050 = vrcp.f32 %v1747_v22  ;;  %v1748_v49 = vadd.f32 1.0, %v4047_v58 }
 0x2d1   :  { %4052 = vrcp.f32 %v1748_v49 }
 0x2d8   :  { %v4049_v24 = vpop.eup %4048 }
 0x2d9   :  { %v1757_v47 = vmul.f32 %v4049_v24, %v4045_v23  ;;  %v4051_v54 = vpop.eup %4050 }
 0x2da   :  { %v1756_v41 = vmul.f32 %v4051_v54, %v5562_v45  ;;  %v5660_v45 = vld [vmem:[#allocation11 + $0xe8] ss:$16 sps:$4 sm:$0xff]  }
 0x2db   :  { %v4053_v38 = vpop.eup %4052 }
 0x2dc   :  { %v5624_v46 = vadd.f32 %v1757_v47, %v1756_v41 }
 0x2de   :  { %4054 = vtanh.f32 %v5624_v46 }
 0x2e8   :  { %v4055_v40 = vpop.eup %4054 }
 0x2e9   :  { %v1760_v42 = vmul.f32 %v4055_v40, %v4053_v38 }
 0x2eb   :  { %v1765_v39 = vpack.c.bf16 %v1760_v42, %v1760_v42 }
 0x2ed   :  { %1799 = vmatmul.mubr.bf16.vlgmr.msra.gmra.mrb[40].mxu0 %v1765_v39  ;;  %1840 = vmatmul.mubr.bf16.vlgmr.msra.gmra.mrb[40].mxu1 %v1765_v39 }
 0x2ee   :  { %1882 = vmatpush1.bf16.msra.mxu0 %v5356_v63  ;;  %1923 = vmatpush1.bf16.msra.mxu1 %v5359_v1 }
 0x2ef   :  { %1883 = vmatprep.subr.bf16.mxu0 %v5362_v3  ;;  %1924 = vmatprep.subr.bf16.mxu1 %v5365_v5 }
 0x2f0   :  { %1913 = vmatprep.mubr.bf16.mxu0 %v6394_v0  ;;  %1954 = vmatprep.mubr.bf16.mxu1 %v6394_v0 }
 0x2f2   :  { %1884 = vmatpush1.bf16.msra.mxu0 %v5370_v6  ;;  %1925 = vmatpush1.bf16.msra.mxu1 %v5373_v7 }
 0x2f3   :  { %1885 = vmatprep.subr.bf16.mxu0 %v5376_v8  ;;  %1926 = vmatprep.subr.bf16.mxu1 %v5379_v9 }
 0x2f6   :  { %1886 = vmatpush1.bf16.msra.mxu0 %v5382_v10  ;;  %1927 = vmatpush1.bf16.msra.mxu1 %v5385_v11 }
 0x2f7   :  { %1887 = vmatprep.subr.bf16.mxu0 %v5388_v12  ;;  %1928 = vmatprep.subr.bf16.mxu1 %v5391_v13 }
 0x2fa   :  { %1888 = vmatpush1.bf16.msra.mxu0 %v5394_v15  ;;  %1929 = vmatpush1.bf16.msra.mxu1 %v5397_v16 }
 0x2fb   :  { %1889 = vmatprep.subr.bf16.mxu0 %v5400_v17  ;;  %1930 = vmatprep.subr.bf16.mxu1 %v5582_v43 }
 0x2fe   :  { %1890 = vmatpush1.bf16.msra.mxu0 %v5404_v18  ;;  %1931 = vmatpush1.bf16.msra.mxu1 %v5586_v59 }
 0x2ff   :  { %1891 = vmatprep.subr.bf16.mxu0 %v5408_v19  ;;  %1932 = vmatprep.subr.bf16.mxu1 %v5590_v14 }
 0x302   :  { %1892 = vmatpush1.bf16.msra.mxu0 %v5412_v20  ;;  %1933 = vmatpush1.bf16.msra.mxu1 %v5594_v60 }
 0x303   :  { %1893 = vmatprep.subr.bf16.mxu0 %v5597_v61  ;;  %1934 = vmatprep.subr.bf16.mxu1 %v5600_v62 }
 0x306   :  { %1894 = vmatpush1.bf16.msra.mxu0 %v5603_v51  ;;  %1935 = vmatpush1.bf16.msra.mxu1 %v5606_v53 }
 0x307   :  { %1895 = vmatprep.subr.bf16.mxu0 %v5609_v55  ;;  %1936 = vmatprep.subr.bf16.mxu1 %v5656_v36 }
 0x30a   :  { %1896 = vmatpush1.bf16.msra.mxu0 %v5613_v48  ;;  %1937 = vmatpush1.bf16.msra.mxu1 %v5660_v45 }
 0x30b   :  { %1996 = vmatprep.subr.bf16.mxu0 %v5424_v37  ;;  %2037 = vmatprep.subr.bf16.mxu1 %v5427_v52 }
 0x3c0   :  { %v1800_v50 = vpop.f32.mrb[40].mxu0  ;;  %v1841_v26 = vpop.f32.mrb[40].mxu1 }
 0x3c1   :  { %v1848_v44 = vadd.f32 %v1800_v50, %v5446_v21  ;;  %v1850_v56 = vadd.f32 %v1841_v26, %v5448_v25  ;;  %v1802_v57 = vpop.f32.mrb[41].mxu0  ;;  %v1843_v28 = vpop.f32.mrb[41].mxu1 }
 0x3c2   :  { %v1849_v4 = vadd.f32 %v1802_v57, %v5450_v27  ;;  %v1851_v22 = vadd.f32 %v1843_v28, %v5452_v29  ;;  %v1804_v23 = vpop.f32.mrb[42].mxu0  ;;  %v1845_v58 = vpop.f32.mrb[42].mxu1 }
 0x3c3   :  { %v3830_v24 = vmul.f32 -1.442695, %v1848_v44  ;;  %v1805_v47 = vpop.f32.mrb[43].mxu0  ;;  %v1846_v54 = vpop.f32.mrb[43].mxu1  ;;  %v3832_v41 = vmul.f32 -1.442695, %v1850_v56 }
 0x3c4   :  { %v3831_v49 = vmul.f32 -1.442695, %v1849_v4 }
 0x3c5   :  { %4056 = vpow2.f32 %v3830_v24 }
 0x3c6   :  { %4058 = vpow2.f32 %v3831_v49 }
 0x3c7   :  { %4060 = vtanh.f32 %v1851_v22 }
 0x3c8   :  { %4062 = vpow2.f32 %v3832_v41 }
 0x3cf   :  { %v4057_v38 = vpop.eup %4056 }
 0x3d0   :  { %v1861_v40 = vadd.f32 1.0, %v4057_v38  ;;  %v4059_v21 = vpop.eup %4058 }
 0x3d1   :  { %v1862_v25 = vadd.f32 1.0, %v4059_v21  ;;  %v4061_v27 = vpop.eup %4060 }
 0x3d2   :  { %4064 = vrcp.f32 %v1861_v40  ;;  %v4063_v42 = vpop.eup %4062 }
 0x3d3   :  { %4066 = vrcp.f32 %v1862_v25  ;;  %v1863_v26 = vadd.f32 1.0, %v4063_v42 }
 0x3d5   :  { %4068 = vrcp.f32 %v1863_v26 }
 0x3dc   :  { %v4065_v29 = vpop.eup %4064 }
 0x3dd   :  { %v1872_v39 = vmul.f32 %v4065_v29, %v4061_v27  ;;  %v4067_v50 = vpop.eup %4066 }
 0x3de   :  { %v1871_v44 = vmul.f32 %v4067_v50, %v5624_v46 }
 0x3df   :  { %v4069_v56 = vpop.eup %4068 }
 0x3e0   :  { %v5670_v57 = vadd.f32 %v1872_v39, %v1871_v44 }
 0x3e2   :  { %4070 = vtanh.f32 %v5670_v57 }
 0x3ec   :  { %v4071_v28 = vpop.eup %4070 }
 0x3ed   :  { %v1875_v4 = vmul.f32 %v4071_v28, %v4069_v56 }
 0x3ef   :  { %v1880_v22 = vpack.c.bf16 %v1875_v4, %v1875_v4 }
 0x3f1   :  { %1914 = vmatmul.mubr.bf16.vlgmr.msra.gmra.mrb[44].mxu0 %v1880_v22  ;;  %1955 = vmatmul.mubr.bf16.vlgmr.msra.gmra.mrb[44].mxu1 %v1880_v22 }
 0x3f2   :  { %1997 = vmatpush1.bf16.msra.mxu0 %v5356_v63  ;;  %2038 = vmatpush1.bf16.msra.mxu1 %v5359_v1 }
 0x3f3   :  { %1998 = vmatprep.subr.bf16.mxu0 %v5362_v3  ;;  %2039 = vmatprep.subr.bf16.mxu1 %v5365_v5 }
 0x3f4   :  { %2028 = vmatprep.mubr.bf16.mxu0 %v6394_v0  ;;  %2069 = vmatprep.mubr.bf16.mxu1 %v6394_v0 }
 0x3f6   :  { %1999 = vmatpush1.bf16.msra.mxu0 %v5370_v6  ;;  %2040 = vmatpush1.bf16.msra.mxu1 %v5373_v7 }
 0x3f7   :  { %2000 = vmatprep.subr.bf16.mxu0 %v5376_v8  ;;  %2041 = vmatprep.subr.bf16.mxu1 %v5379_v9 }
 0x3fa   :  { %2001 = vmatpush1.bf16.msra.mxu0 %v5382_v10  ;;  %2042 = vmatpush1.bf16.msra.mxu1 %v5385_v11 }
 0x3fb   :  { %2002 = vmatprep.subr.bf16.mxu0 %v5388_v12  ;;  %2043 = vmatprep.subr.bf16.mxu1 %v5391_v13 }
 0x3fe   :  { %2003 = vmatpush1.bf16.msra.mxu0 %v5394_v15  ;;  %2044 = vmatpush1.bf16.msra.mxu1 %v5397_v16 }
 0x3ff   :  { %2004 = vmatprep.subr.bf16.mxu0 %v5400_v17  ;;  %2045 = vmatprep.subr.bf16.mxu1 %v5582_v43 }
 0x402   :  { %2005 = vmatpush1.bf16.msra.mxu0 %v5404_v18  ;;  %2046 = vmatpush1.bf16.msra.mxu1 %v5586_v59 }
 0x403   :  { %2006 = vmatprep.subr.bf16.mxu0 %v5408_v19  ;;  %2047 = vmatprep.subr.bf16.mxu1 %v5590_v14 }
 0x406   :  { %2007 = vmatpush1.bf16.msra.mxu0 %v5412_v20  ;;  %2048 = vmatpush1.bf16.msra.mxu1 %v5594_v60 }
 0x407   :  { %2008 = vmatprep.subr.bf16.mxu0 %v5597_v61  ;;  %2049 = vmatprep.subr.bf16.mxu1 %v5600_v62 }
 0x40a   :  { %2009 = vmatpush1.bf16.msra.mxu0 %v5603_v51  ;;  %2050 = vmatpush1.bf16.msra.mxu1 %v5606_v53 }
 0x40b   :  { %2010 = vmatprep.subr.bf16.mxu0 %v5609_v55  ;;  %2051 = vmatprep.subr.bf16.mxu1 %v5656_v36 }
 0x40e   :  { %2011 = vmatpush1.bf16.msra.mxu0 %v5613_v48  ;;  %2052 = vmatpush1.bf16.msra.mxu1 %v5660_v45 }
 0x40f   :  { %2111 = vmatprep.subr.bf16.mxu0 %v5424_v37  ;;  %2152 = vmatprep.subr.bf16.mxu1 %v5427_v52 }
 0x4c4   :  { %v1915_v46 = vpop.f32.mrb[44].mxu0  ;;  %v1956_v23 = vpop.f32.mrb[44].mxu1 }
 0x4c5   :  { %v1963_v58 = vadd.f32 %v1915_v46, %v5454_v30  ;;  %v1965_v24 = vadd.f32 %v1956_v23, %v5456_v31  ;;  %v1917_v47 = vpop.f32.mrb[45].mxu0  ;;  %v1958_v54 = vpop.f32.mrb[45].mxu1 }
 0x4c6   :  { %v1964_v49 = vadd.f32 %v1917_v47, %v5458_v32  ;;  %v1966_v41 = vadd.f32 %v1958_v54, %v5460_v33  ;;  %v1919_v38 = vpop.f32.mrb[46].mxu0  ;;  %v1960_v40 = vpop.f32.mrb[46].mxu1 }
 0x4c7   :  { %v3833_v21 = vmul.f32 -1.442695, %v1963_v58  ;;  %v1920_v25 = vpop.f32.mrb[47].mxu0  ;;  %v1961_v27 = vpop.f32.mrb[47].mxu1  ;;  %v3835_v29 = vmul.f32 -1.442695, %v1965_v24 }
 0x4c8   :  { %v3834_v42 = vmul.f32 -1.442695, %v1964_v49 }
 0x4c9   :  { %4072 = vpow2.f32 %v3833_v21  ;;  %v6395_v21 = vld [vmem:[#allocation21_spill] sm:$0xff] }
 0x4ca   :  { %4074 = vpow2.f32 %v3834_v42 }
 0x4cb   :  { %4076 = vtanh.f32 %v1966_v41 }
 0x4cc   :  { %4078 = vpow2.f32 %v3835_v29 }
 0x4d3   :  { %v4073_v39 = vpop.eup %4072 }
 0x4d4   :  { %v1976_v50 = vadd.f32 1.0, %v4073_v39  ;;  %v4075_v30 = vpop.eup %4074 }
 0x4d5   :  { %v1977_v31 = vadd.f32 1.0, %v4075_v30  ;;  %v4077_v32 = vpop.eup %4076 }
 0x4d6   :  { %4080 = vrcp.f32 %v1976_v50  ;;  %v4079_v26 = vpop.eup %4078 }
 0x4d7   :  { %4082 = vrcp.f32 %v1977_v31  ;;  %v1978_v28 = vadd.f32 1.0, %v4079_v26 }
 0x4d9   :  { %4084 = vrcp.f32 %v1978_v28 }
 0x4e0   :  { %v4081_v33 = vpop.eup %4080 }
 0x4e1   :  { %v1987_v44 = vmul.f32 %v4081_v33, %v4077_v32  ;;  %v4083_v56 = vpop.eup %4082 }
 0x4e2   :  { %v1986_v4 = vmul.f32 %v4083_v56, %v5670_v57 }
 0x4e3   :  { %v4085_v46 = vpop.eup %4084 }
 0x4e4   :  { %v5712_v22 = vadd.f32 %v1987_v44, %v1986_v4 }
 0x4e6   :  { %4086 = vtanh.f32 %v5712_v22 }
 0x4f0   :  { %v4087_v23 = vpop.eup %4086 }
 0x4f1   :  { %v1990_v58 = vmul.f32 %v4087_v23, %v4085_v46 }
 0x4f3   :  { %v1995_v24 = vpack.c.bf16 %v1990_v58, %v1990_v58 }
 0x4f5   :  { %2029 = vmatmul.mubr.bf16.vlgmr.msra.gmra.mrb[48].mxu0 %v1995_v24  ;;  %2070 = vmatmul.mubr.bf16.vlgmr.msra.gmra.mrb[48].mxu1 %v1995_v24 }
 0x4f6   :  { %2112 = vmatpush1.bf16.msra.mxu0 %v5356_v63  ;;  %2153 = vmatpush1.bf16.msra.mxu1 %v5359_v1 }
 0x4f7   :  { %2113 = vmatprep.subr.bf16.mxu0 %v5362_v3  ;;  %2154 = vmatprep.subr.bf16.mxu1 %v5365_v5 }
 0x4f8   :  { %2143 = vmatprep.mubr.bf16.mxu0 %v6394_v0  ;;  %2184 = vmatprep.mubr.bf16.mxu1 %v6394_v0 }
 0x4fa   :  { %2114 = vmatpush1.bf16.msra.mxu0 %v5370_v6  ;;  %2155 = vmatpush1.bf16.msra.mxu1 %v5373_v7 }
 0x4fb   :  { %2115 = vmatprep.subr.bf16.mxu0 %v5376_v8  ;;  %2156 = vmatprep.subr.bf16.mxu1 %v5379_v9 }
 0x4fe   :  { %2116 = vmatpush1.bf16.msra.mxu0 %v5382_v10  ;;  %2157 = vmatpush1.bf16.msra.mxu1 %v5385_v11 }
 0x4ff   :  { %2117 = vmatprep.subr.bf16.mxu0 %v5388_v12  ;;  %2158 = vmatprep.subr.bf16.mxu1 %v5391_v13 }
 0x502   :  { %2118 = vmatpush1.bf16.msra.mxu0 %v5394_v15  ;;  %2159 = vmatpush1.bf16.msra.mxu1 %v5397_v16 }
 0x503   :  { %2119 = vmatprep.subr.bf16.mxu0 %v5400_v17  ;;  %2160 = vmatprep.subr.bf16.mxu1 %v5582_v43 }
 0x506   :  { %2120 = vmatpush1.bf16.msra.mxu0 %v5404_v18  ;;  %2161 = vmatpush1.bf16.msra.mxu1 %v5586_v59 }
 0x507   :  { %2121 = vmatprep.subr.bf16.mxu0 %v5408_v19  ;;  %2162 = vmatprep.subr.bf16.mxu1 %v5590_v14 }
 0x50a   :  { %2122 = vmatpush1.bf16.msra.mxu0 %v5412_v20  ;;  %2163 = vmatpush1.bf16.msra.mxu1 %v5594_v60 }
 0x50b   :  { %2123 = vmatprep.subr.bf16.mxu0 %v5597_v61  ;;  %2164 = vmatprep.subr.bf16.mxu1 %v5600_v62 }
 0x50e   :  { %2124 = vmatpush1.bf16.msra.mxu0 %v5603_v51  ;;  %2165 = vmatpush1.bf16.msra.mxu1 %v5606_v53 }
 0x50f   :  { %2125 = vmatprep.subr.bf16.mxu0 %v5609_v55  ;;  %2166 = vmatprep.subr.bf16.mxu1 %v5656_v36 }
 0x512   :  { %2126 = vmatpush1.bf16.msra.mxu0 %v5613_v48  ;;  %2167 = vmatpush1.bf16.msra.mxu1 %v5660_v45 }
 0x513   :  { %2226 = vmatprep.subr.bf16.mxu0 %v5424_v37  ;;  %2267 = vmatprep.subr.bf16.mxu1 %v5427_v52 }
 0x5c8   :  { %v2030_v57 = vpop.f32.mrb[48].mxu0  ;;  %v2071_v47 = vpop.f32.mrb[48].mxu1 }
 0x5c9   :  { %v2078_v54 = vadd.f32 %v2030_v57, %v5462_v34  ;;  %v2080_v49 = vadd.f32 %v2071_v47, %v5464_v35  ;;  %v2032_v41 = vpop.f32.mrb[49].mxu0  ;;  %v2073_v38 = vpop.f32.mrb[49].mxu1 }
 0x5ca   :  { %v2079_v40 = vadd.f32 %v2032_v41, %v5466_v2  ;;  %v2081_v25 = vadd.f32 %v2073_v38, %v6395_v21  ;;  %v2034_v27 = vpop.f32.mrb[50].mxu0  ;;  %v2075_v42 = vpop.f32.mrb[50].mxu1 }
 0x5cb   :  { %v3836_v29 = vmul.f32 -1.442695, %v2078_v54  ;;  %v2035_v39 = vpop.f32.mrb[51].mxu0  ;;  %v2076_v50 = vpop.f32.mrb[51].mxu1  ;;  %v3838_v31 = vmul.f32 -1.442695, %v2080_v49 }
 0x5cc   :  { %v3837_v30 = vmul.f32 -1.442695, %v2079_v40 }
 0x5cd   :  { %4088 = vpow2.f32 %v3836_v29 }
 0x5ce   :  { %4090 = vpow2.f32 %v3837_v30 }
 0x5cf   :  { %4092 = vtanh.f32 %v2081_v25 }
 0x5d0   :  { %4094 = vpow2.f32 %v3838_v31 }
 0x5d7   :  { %v4089_v32 = vpop.eup %4088 }
 0x5d8   :  { %v2091_v26 = vadd.f32 1.0, %v4089_v32  ;;  %v4091_v34 = vpop.eup %4090  ;;  %v5799_v32 = vld [vmem:[#allocation11] ss:$16 sps:$4 sm:$0xff]  }
 0x5d9   :  { %v2092_v35 = vadd.f32 1.0, %v4091_v34  ;;  %v4093_v2 = vpop.eup %4092  ;;  %v5805_v34 = vld [vmem:[#allocation11 + $0x24] ss:$16 sps:$4 sm:$0xff]  }
 0x5da   :  { %4096 = vrcp.f32 %v2091_v26  ;;  %v4095_v33 = vpop.eup %4094  ;;  %v5802_v26 = vld [vmem:[#allocation11 + $0x8] ss:$16 sps:$4 sm:$0xff]  }
 0x5db   :  { %4098 = vrcp.f32 %v2092_v35  ;;  %v2093_v4 = vadd.f32 1.0, %v4095_v33  ;;  %v5808_v35 = vld [vmem:[#allocation11 + $0x2c] ss:$16 sps:$4 sm:$0xff]   ;;  %v5816_v33 = vld [vmem:[#allocation11 + $0x28] ss:$16 sps:$4 sm:$0xff]  }
 0x5dd   :  { %4100 = vrcp.f32 %v2093_v4  ;;  %v5828_v4 = vld [vmem:[#allocation11 + $0x48] ss:$16 sps:$4 sm:$0xff]  }
 0x5e4   :  { %v4097_v44 = vpop.eup %4096 }
 0x5e5   :  { %v2102_v56 = vmul.f32 %v4097_v44, %v4093_v2  ;;  %v4099_v28 = vpop.eup %4098  ;;  %v5813_v2 = vld [vmem:[#allocation11 + $0x20] ss:$16 sps:$4 sm:$0xff]   ;;  %v5819_v44 = vld [vmem:[#allocation11 + $0x44] ss:$16 sps:$4 sm:$0xff]  }
 0x5e6   :  { %v2101_v46 = vmul.f32 %v4099_v28, %v5712_v22  ;;  %v5825_v28 = vld [vmem:[#allocation11 + $0x40] ss:$16 sps:$4 sm:$0xff]  }
 0x5e7   :  { %v4101_v58 = vpop.eup %4100 }
 0x5e8   :  { %v5754_v23 = vadd.f32 %v2102_v56, %v2101_v46  ;;  %v5822_v56 = vld [vmem:[#allocation11 + $0x4c] ss:$16 sps:$4 sm:$0xff]   ;;  %v5831_v46 = vld [vmem:[#allocation11 + $0x64] ss:$16 sps:$4 sm:$0xff]  }
 0x5ea   :  { %4102 = vtanh.f32 %v5754_v23 }
 0x5f4   :  { %v4103_v24 = vpop.eup %4102 }
 0x5f5   :  { %v2105_v57 = vmul.f32 %v4103_v24, %v4101_v58  ;;  %v5837_v58 = vld [vmem:[#allocation11 + $0x60] ss:$16 sps:$4 sm:$0xff]   ;;  %v5840_v24 = vld [vmem:[#allocation11 + $0x68] ss:$16 sps:$4 sm:$0xff]  }
 0x5f7   :  { %v2110_v47 = vpack.c.bf16 %v2105_v57, %v2105_v57  ;;  %v5843_v57 = vld [vmem:[#allocation11 + $0x84] ss:$16 sps:$4 sm:$0xff]  }
 0x5f9   :  { %2144 = vmatmul.mubr.bf16.vlgmr.msra.gmra.mrb[52].mxu0 %v2110_v47  ;;  %2185 = vmatmul.mubr.bf16.vlgmr.msra.gmra.mrb[52].mxu1 %v2110_v47  ;;  %v5847_v47 = vld [vmem:[#allocation11 + $0x80] ss:$16 sps:$4 sm:$0xff]  }
 0x5fa   :  { %2227 = vmatpush1.bf16.msra.mxu0 %v5356_v63  ;;  %2268 = vmatpush1.bf16.msra.mxu1 %v5359_v1 }
 0x5fb   :  { %2228 = vmatprep.subr.bf16.mxu0 %v5362_v3  ;;  %2269 = vmatprep.subr.bf16.mxu1 %v5365_v5  ;;  %v6396_v3 = vld [vmem:[#allocation22_spill] sm:$0xff] }
 0x5fc   :  { %2258 = vmatprep.mubr.bf16.mxu0 %v6394_v0  ;;  %2299 = vmatprep.mubr.bf16.mxu1 %v6394_v0 }
 0x5fe   :  { %2229 = vmatpush1.bf16.msra.mxu0 %v5370_v6  ;;  %2270 = vmatpush1.bf16.msra.mxu1 %v5373_v7  ;;  %v6397_v6 = vld [vmem:[#allocation23_spill] sm:$0xff] }
 0x5ff   :  { %2230 = vmatprep.subr.bf16.mxu0 %v5376_v8  ;;  %2271 = vmatprep.subr.bf16.mxu1 %v5379_v9 }
 0x602   :  { %2231 = vmatpush1.bf16.msra.mxu0 %v5382_v10  ;;  %2272 = vmatpush1.bf16.msra.mxu1 %v5385_v11  ;;  %v6398_v10 = vld [vmem:[#allocation24_spill] sm:$0xff] }
 0x603   :  { %2232 = vmatprep.subr.bf16.mxu0 %v5388_v12  ;;  %2273 = vmatprep.subr.bf16.mxu1 %v5391_v13  ;;  %v6399_v12 = vld [vmem:[#allocation25_spill] sm:$0xff] }
 0x606   :  { %2233 = vmatpush1.bf16.msra.mxu0 %v5394_v15  ;;  %2274 = vmatpush1.bf16.msra.mxu1 %v5397_v16 }
 0x607   :  { %2234 = vmatprep.subr.bf16.mxu0 %v5400_v17  ;;  %2275 = vmatprep.subr.bf16.mxu1 %v5582_v43 }
 0x60a   :  { %2235 = vmatpush1.bf16.msra.mxu0 %v5404_v18  ;;  %2276 = vmatpush1.bf16.msra.mxu1 %v5586_v59 }
 0x60b   :  { %2236 = vmatprep.subr.bf16.mxu0 %v5408_v19  ;;  %2277 = vmatprep.subr.bf16.mxu1 %v5590_v14 }
 0x60e   :  { %2237 = vmatpush1.bf16.msra.mxu0 %v5412_v20  ;;  %2278 = vmatpush1.bf16.msra.mxu1 %v5594_v60 }
 0x60f   :  { %2238 = vmatprep.subr.bf16.mxu0 %v5597_v61  ;;  %2279 = vmatprep.subr.bf16.mxu1 %v5600_v62 }
 0x612   :  { %2239 = vmatpush1.bf16.msra.mxu0 %v5603_v51  ;;  %2280 = vmatpush1.bf16.msra.mxu1 %v5606_v53 }
 0x613   :  { %2240 = vmatprep.subr.bf16.mxu0 %v5609_v55  ;;  %2281 = vmatprep.subr.bf16.mxu1 %v5656_v36 }
 0x616   :  { %2241 = vmatpush1.bf16.msra.mxu0 %v5613_v48  ;;  %2282 = vmatpush1.bf16.msra.mxu1 %v5660_v45 }
 0x617   :  { %2341 = vmatprep.subr.bf16.mxu0 %v5424_v37  ;;  %2382 = vmatprep.subr.bf16.mxu1 %v5427_v52 }
 0x6cc   :  { %v2145_v63 = vpop.f32.mrb[52].mxu0  ;;  %v2186_v1 = vpop.f32.mrb[52].mxu1 }
 0x6cd   :  { %v2193_v5 = vadd.f32 %v2145_v63, %v6396_v3  ;;  %v2195_v7 = vadd.f32 %v2186_v1, %v6397_v6  ;;  %v2147_v8 = vpop.f32.mrb[53].mxu0  ;;  %v2188_v9 = vpop.f32.mrb[53].mxu1  ;;  %v5851_v63 = vld [vmem:[#allocation11 + $0xa4] ss:$16 sps:$4 sm:$0xff]   ;;  %v5855_v1 = vld [vmem:[#allocation11 + $0xa0] ss:$16 sps:$4 sm:$0xff]  }
 0x6ce   :  { %v2194_v11 = vadd.f32 %v2147_v8, %v6398_v10  ;;  %v2196_v13 = vadd.f32 %v2188_v9, %v6399_v12  ;;  %v2149_v15 = vpop.f32.mrb[54].mxu0  ;;  %v2190_v16 = vpop.f32.mrb[54].mxu1  ;;  %v5867_v3 = vld [vmem:[#allocation11 + $0x4] ss:$16 sps:$4 sm:$0xff]   ;;  %v6401_v10 = vld [vmem:[#allocation27_spill] sm:$0xff] }
 0x6cf   :  { %v3839_v17 = vmul.f32 -1.442695, %v2193_v5  ;;  %v2150_v18 = vpop.f32.mrb[55].mxu0  ;;  %v2191_v19 = vpop.f32.mrb[55].mxu1  ;;  %v3841_v37 = vmul.f32 -1.442695, %v2195_v7 }
 0x6d0   :  { %v3840_v20 = vmul.f32 -1.442695, %v2194_v11  ;;  %v5870_v5 = vld [vmem:[#allocation11 + $0xc] ss:$16 sps:$4 sm:$0xff]   ;;  %v6400_v8 = vld [vmem:[#allocation26_spill] sm:$0xff]  ;;  %v6402_v15 = vld [vmem:[#allocation28_spill] sm:$0xff] }
 0x6d1   :  { %4104 = vpow2.f32 %v3839_v17  ;;  %v6403_v17 = vld [vmem:[#allocation29_spill] sm:$0xff] }
 0x6d2   :  { %4106 = vpow2.f32 %v3840_v20 }
 0x6d3   :  { %4108 = vtanh.f32 %v2196_v13 }
 0x6d4   :  { %4110 = vpow2.f32 %v3841_v37 }
 0x6db   :  { %v4105_v52 = vpop.eup %4104 }
 0x6dc   :  { %v2206_v22 = vadd.f32 1.0, %v4105_v52  ;;  %v4107_v54 = vpop.eup %4106 }
 0x6dd   :  { %v2207_v49 = vadd.f32 1.0, %v4107_v54  ;;  %v4109_v41 = vpop.eup %4108 }
 0x6de   :  { %4112 = vrcp.f32 %v2206_v22  ;;  %v4111_v38 = vpop.eup %4110 }
 0x6df   :  { %4114 = vrcp.f32 %v2207_v49  ;;  %v2208_v27 = vadd.f32 1.0, %v4111_v38 }
 0x6e1   :  { %4116 = vrcp.f32 %v2208_v27 }
 0x6e8   :  { %v4113_v40 = vpop.eup %4112 }
 0x6e9   :  { %v2217_v21 = vmul.f32 %v4113_v40, %v4109_v41  ;;  %v4115_v25 = vpop.eup %4114 }
 0x6ea   :  { %v2216_v42 = vmul.f32 %v4115_v25, %v5754_v23  ;;  %v5834_v23 = vld [vmem:[#allocation11 + $0x6c] ss:$16 sps:$4 sm:$0xff]  }
 0x6eb   :  { %v4117_v39 = vpop.eup %4116 }
 0x6ec   :  { %v5796_v29 = vadd.f32 %v2217_v21, %v2216_v42 }
 0x6ee   :  { %4118 = vtanh.f32 %v5796_v29 }
 0x6f8   :  { %v4119_v50 = vpop.eup %4118 }
 0x6f9   :  { %v2220_v30 = vmul.f32 %v4119_v50, %v4117_v39 }
 0x6fb   :  { %v2225_v31 = vpack.c.bf16 %v2220_v30, %v2220_v30 }
 0x6fd   :  { %2259 = vmatmul.mubr.bf16.vlgmr.msra.gmra.mrb[56].mxu0 %v2225_v31  ;;  %2300 = vmatmul.mubr.bf16.vlgmr.msra.gmra.mrb[56].mxu1 %v2225_v31 }
 0x6fe   :  { %2342 = vmatpush1.bf16.msra.mxu0 %v5799_v32  ;;  %2383 = vmatpush1.bf16.msra.mxu1 %v5802_v26 }
 0x6ff   :  { %2343 = vmatprep.subr.bf16.mxu0 %v5805_v34  ;;  %2384 = vmatprep.subr.bf16.mxu1 %v5808_v35 }
 0x700   :  { %2373 = vmatprep.mubr.bf16.mxu0 %v6394_v0  ;;  %2414 = vmatprep.mubr.bf16.mxu1 %v6394_v0 }
 0x702   :  { %2344 = vmatpush1.bf16.msra.mxu0 %v5813_v2  ;;  %2385 = vmatpush1.bf16.msra.mxu1 %v5816_v33 }
 0x703   :  { %2345 = vmatprep.subr.bf16.mxu0 %v5819_v44  ;;  %2386 = vmatprep.subr.bf16.mxu1 %v5822_v56 }
 0x706   :  { %2346 = vmatpush1.bf16.msra.mxu0 %v5825_v28  ;;  %2387 = vmatpush1.bf16.msra.mxu1 %v5828_v4 }
 0x707   :  { %2347 = vmatprep.subr.bf16.mxu0 %v5831_v46  ;;  %2388 = vmatprep.subr.bf16.mxu1 %v5834_v23 }
 0x70a   :  { %2348 = vmatpush1.bf16.msra.mxu0 %v5837_v58  ;;  %2389 = vmatpush1.bf16.msra.mxu1 %v5840_v24 }
 0x70b   :  { %2349 = vmatprep.subr.bf16.mxu0 %v5843_v57  ;;  %2390 = vmatprep.subr.bf16.mxu1 %v5582_v43 }
 0x70e   :  { %2350 = vmatpush1.bf16.msra.mxu0 %v5847_v47  ;;  %2391 = vmatpush1.bf16.msra.mxu1 %v5586_v59 }
 0x70f   :  { %2351 = vmatprep.subr.bf16.mxu0 %v5851_v63  ;;  %2392 = vmatprep.subr.bf16.mxu1 %v5590_v14 }
 0x712   :  { %2352 = vmatpush1.bf16.msra.mxu0 %v5855_v1  ;;  %2393 = vmatpush1.bf16.msra.mxu1 %v5594_v60 }
 0x713   :  { %2353 = vmatprep.subr.bf16.mxu0 %v5597_v61  ;;  %2394 = vmatprep.subr.bf16.mxu1 %v5600_v62 }
 0x716   :  { %2354 = vmatpush1.bf16.msra.mxu0 %v5603_v51  ;;  %2395 = vmatpush1.bf16.msra.mxu1 %v5606_v53 }
 0x717   :  { %2355 = vmatprep.subr.bf16.mxu0 %v5609_v55  ;;  %2396 = vmatprep.subr.bf16.mxu1 %v5656_v36 }
 0x71a   :  { %2356 = vmatpush1.bf16.msra.mxu0 %v5613_v48  ;;  %2397 = vmatpush1.bf16.msra.mxu1 %v5660_v45 }
 0x71b   :  { %2456 = vmatprep.subr.bf16.mxu0 %v5867_v3  ;;  %2497 = vmatprep.subr.bf16.mxu1 %v5870_v5 }
 0x7d0   :  { %v2260_v6 = vpop.f32.mrb[56].mxu0  ;;  %v2301_v7 = vpop.f32.mrb[56].mxu1 }
 0x7d1   :  { %v2308_v9 = vadd.f32 %v2260_v6, %v6400_v8  ;;  %v2310_v11 = vadd.f32 %v2301_v7, %v6401_v10  ;;  %v2262_v12 = vpop.f32.mrb[57].mxu0  ;;  %v2303_v13 = vpop.f32.mrb[57].mxu1 }
 0x7d2   :  { %v2309_v16 = vadd.f32 %v2262_v12, %v6402_v15  ;;  %v2311_v18 = vadd.f32 %v2303_v13, %v6403_v17  ;;  %v2264_v19 = vpop.f32.mrb[58].mxu0  ;;  %v2305_v20 = vpop.f32.mrb[58].mxu1 }
 0x7d3   :  { %v3842_v37 = vmul.f32 -1.442695, %v2308_v9  ;;  %v2265_v52 = vpop.f32.mrb[59].mxu0  ;;  %v2306_v22 = vpop.f32.mrb[59].mxu1  ;;  %v3844_v49 = vmul.f32 -1.442695, %v2310_v11 }
 0x7d4   :  { %v3843_v54 = vmul.f32 -1.442695, %v2309_v16  ;;  %v6407_v11 = vld [vmem:[#allocation33_spill] sm:$0xff] }
 0x7d5   :  { %4120 = vpow2.f32 %v3842_v37 }
 0x7d6   :  { %4122 = vpow2.f32 %v3843_v54 }
 0x7d7   :  { %4124 = vtanh.f32 %v2311_v18 }
 0x7d8   :  { %4126 = vpow2.f32 %v3844_v49 }
 0x7df   :  { %v4121_v41 = vpop.eup %4120 }
 0x7e0   :  { %v2321_v38 = vadd.f32 1.0, %v4121_v41  ;;  %v4123_v40 = vpop.eup %4122 }
 0x7e1   :  { %v2322_v21 = vadd.f32 1.0, %v4123_v40  ;;  %v4125_v25 = vpop.eup %4124 }
 0x7e2   :  { %4128 = vrcp.f32 %v2321_v38  ;;  %v4127_v27 = vpop.eup %4126 }
 0x7e3   :  { %4130 = vrcp.f32 %v2322_v21  ;;  %v2323_v30 = vadd.f32 1.0, %v4127_v27 }
 0x7e5   :  { %4132 = vrcp.f32 %v2323_v30 }
 0x7ec   :  { %v4129_v42 = vpop.eup %4128 }
 0x7ed   :  { %v2332_v39 = vmul.f32 %v4129_v42, %v4125_v25  ;;  %v4131_v50 = vpop.eup %4130 }
 0x7ee   :  { %v2331_v31 = vmul.f32 %v4131_v50, %v5796_v29  ;;  %v6406_v29 = vld [vmem:[#allocation32_spill] sm:$0xff] }
 0x7ef   :  { %v4133_v7 = vpop.eup %4132 }
 0x7f0   :  { %v5878_v6 = vadd.f32 %v2332_v39, %v2331_v31  ;;  %v5940_v31 = vld [vmem:[#allocation11 + $0x8c] ss:$16 sps:$4 sm:$0xff]  }
 0x7f2   :  { %4134 = vtanh.f32 %v5878_v6 }
 0x7fc   :  { %v4135_v8 = vpop.eup %4134 }
 0x7fd   :  { %v2335_v9 = vmul.f32 %v4135_v8, %v4133_v7  ;;  %v5948_v7 = vld [vmem:[#allocation11 + $0xac] ss:$16 sps:$4 sm:$0xff]   ;;  %v5952_v8 = vld [vmem:[#allocation11 + $0xa8] ss:$16 sps:$4 sm:$0xff]  }
 0x7ff   :  { %v2340_v10 = vpack.c.bf16 %v2335_v9, %v2335_v9  ;;  %v5955_v9 = vld [vmem:[#allocation11 + $0xc4] ss:$16 sps:$4 sm:$0xff]  }
 0x801   :  { %2374 = vmatmul.mubr.bf16.vlgmr.msra.gmra.mrb[60].mxu0 %v2340_v10  ;;  %2415 = vmatmul.mubr.bf16.vlgmr.msra.gmra.mrb[60].mxu1 %v2340_v10  ;;  %v5958_v10 = vld [vmem:[#allocation11 + $0xcc] ss:$16 sps:$4 sm:$0xff]  }
 0x802   :  { %2457 = vmatpush1.bf16.msra.mxu0 %v5799_v32  ;;  %2498 = vmatpush1.bf16.msra.mxu1 %v5802_v26 }
 0x803   :  { %2458 = vmatprep.subr.bf16.mxu0 %v5805_v34  ;;  %2499 = vmatprep.subr.bf16.mxu1 %v5808_v35 }
 0x804   :  { %2488 = vmatprep.mubr.bf16.mxu0 %v6394_v0  ;;  %2529 = vmatprep.mubr.bf16.mxu1 %v6394_v0 }
 0x806   :  { %2459 = vmatpush1.bf16.msra.mxu0 %v5813_v2  ;;  %2500 = vmatpush1.bf16.msra.mxu1 %v5816_v33 }
 0x807   :  { %2460 = vmatprep.subr.bf16.mxu0 %v5819_v44  ;;  %2501 = vmatprep.subr.bf16.mxu1 %v5822_v56 }
 0x80a   :  { %2461 = vmatpush1.bf16.msra.mxu0 %v5825_v28  ;;  %2502 = vmatpush1.bf16.msra.mxu1 %v5828_v4 }
 0x80b   :  { %2462 = vmatprep.subr.bf16.mxu0 %v5831_v46  ;;  %2503 = vmatprep.subr.bf16.mxu1 %v5834_v23 }
 0x80e   :  { %2463 = vmatpush1.bf16.msra.mxu0 %v5837_v58  ;;  %2504 = vmatpush1.bf16.msra.mxu1 %v5840_v24 }
 0x80f   :  { %2464 = vmatprep.subr.bf16.mxu0 %v5843_v57  ;;  %2505 = vmatprep.subr.bf16.mxu1 %v5582_v43 }
 0x812   :  { %2465 = vmatpush1.bf16.msra.mxu0 %v5847_v47  ;;  %2506 = vmatpush1.bf16.msra.mxu1 %v5586_v59 }
 0x813   :  { %2466 = vmatprep.subr.bf16.mxu0 %v5851_v63  ;;  %2507 = vmatprep.subr.bf16.mxu1 %v5590_v14  ;;  %v6404_v14 = vld [vmem:[#allocation30_spill] sm:$0xff] }
 0x816   :  { %2467 = vmatpush1.bf16.msra.mxu0 %v5855_v1  ;;  %2508 = vmatpush1.bf16.msra.mxu1 %v5594_v60 }
 0x817   :  { %2468 = vmatprep.subr.bf16.mxu0 %v5597_v61  ;;  %2509 = vmatprep.subr.bf16.mxu1 %v5600_v62  ;;  %v6405_v61 = vld [vmem:[#allocation31_spill] sm:$0xff] }
 0x81a   :  { %2469 = vmatpush1.bf16.msra.mxu0 %v5603_v51  ;;  %2510 = vmatpush1.bf16.msra.mxu1 %v5606_v53 }
 0x81b   :  { %2470 = vmatprep.subr.bf16.mxu0 %v5609_v55  ;;  %2511 = vmatprep.subr.bf16.mxu1 %v5656_v36 }
 0x81e   :  { %2471 = vmatpush1.bf16.msra.mxu0 %v5613_v48  ;;  %2512 = vmatpush1.bf16.msra.mxu1 %v5660_v45 }
 0x81f   :  { %2571 = vmatprep.subr.bf16.mxu0 %v5867_v3  ;;  %2612 = vmatprep.subr.bf16.mxu1 %v5870_v5 }
 0x8d4   :  { %v2375_v43 = vpop.f32.mrb[60].mxu0  ;;  %v2416_v59 = vpop.f32.mrb[60].mxu1 }
 0x8d5   :  { %v2423_v60 = vadd.f32 %v2375_v43, %v6404_v14  ;;  %v2425_v62 = vadd.f32 %v2416_v59, %v6405_v61  ;;  %v2377_v51 = vpop.f32.mrb[61].mxu0  ;;  %v2418_v53 = vpop.f32.mrb[61].mxu1  ;;  %v5961_v43 = vld [vmem:[#allocation11 + $0xc0] ss:$16 sps:$4 sm:$0xff]   ;;  %v5964_v59 = vld [vmem:[#allocation11 + $0xc8] ss:$16 sps:$4 sm:$0xff]  }
 0x8d6   :  { %v2424_v55 = vadd.f32 %v2377_v51, %v6406_v29  ;;  %v2426_v12 = vadd.f32 %v2418_v53, %v6407_v11  ;;  %v2379_v13 = vpop.f32.mrb[62].mxu0  ;;  %v2420_v48 = vpop.f32.mrb[62].mxu1  ;;  %v5967_v14 = vld [vmem:[#allocation11 + $0xe4] ss:$16 sps:$4 sm:$0xff]   ;;  %v6409_v29 = vld [vmem:[#allocation35_spill] sm:$0xff] }
 0x8d7   :  { %v3845_v15 = vmul.f32 -1.442695, %v2423_v60  ;;  %v2380_v16 = vpop.f32.mrb[63].mxu0  ;;  %v2421_v17 = vpop.f32.mrb[63].mxu1  ;;  %v3847_v19 = vmul.f32 -1.442695, %v2425_v62 }
 0x8d8   :  { %v3846_v18 = vmul.f32 -1.442695, %v2424_v55  ;;  %v5971_v60 = vld [vmem:[#allocation11 + $0xe0] ss:$16 sps:$4 sm:$0xff]   ;;  %v6411_v48 = vld [vmem:[#allocation37_spill] sm:$0xff] }
 0x8d9   :  { %4136 = vpow2.f32 %v3845_v15  ;;  %v6408_v51 = vld [vmem:[#allocation34_spill] sm:$0xff]  ;;  %v6410_v13 = vld [vmem:[#allocation36_spill] sm:$0xff] }
 0x8da   :  { %4138 = vpow2.f32 %v3846_v18 }
 0x8db   :  { %4140 = vtanh.f32 %v2426_v12 }
 0x8dc   :  { %4142 = vpow2.f32 %v3847_v19 }
 0x8e3   :  { %v4137_v20 = vpop.eup %4136 }
 0x8e4   :  { %v2436_v37 = vadd.f32 1.0, %v4137_v20  ;;  %v4139_v52 = vpop.eup %4138 }
 0x8e5   :  { %v2437_v22 = vadd.f32 1.0, %v4139_v52  ;;  %v4141_v54 = vpop.eup %4140 }
 0x8e6   :  { %4144 = vrcp.f32 %v2436_v37  ;;  %v4143_v49 = vpop.eup %4142 }
 0x8e7   :  { %4146 = vrcp.f32 %v2437_v22  ;;  %v2438_v21 = vadd.f32 1.0, %v4143_v49 }
 0x8e9   :  { %4148 = vrcp.f32 %v2438_v21 }
 0x8f0   :  { %v4145_v41 = vpop.eup %4144 }
 0x8f1   :  { %v2447_v38 = vmul.f32 %v4145_v41, %v4141_v54  ;;  %v4147_v40 = vpop.eup %4146 }
 0x8f2   :  { %v2446_v25 = vmul.f32 %v4147_v40, %v5878_v6  ;;  %v5944_v6 = vld [vmem:[#allocation11 + $0x88] ss:$16 sps:$4 sm:$0xff]  }
 0x8f3   :  { %v4149_v42 = vpop.eup %4148 }
 0x8f4   :  { %v5920_v27 = vadd.f32 %v2447_v38, %v2446_v25 }
 0x8f6   :  { %4150 = vtanh.f32 %v5920_v27 }
 0x900   :  { %v4151_v39 = vpop.eup %4150 }
 0x901   :  { %v2450_v50 = vmul.f32 %v4151_v39, %v4149_v42 }
 0x903   :  { %v2455_v30 = vpack.c.bf16 %v2450_v50, %v2450_v50 }
 0x905   :  { %2489 = vmatmul.mubr.bf16.vlgmr.msra.gmra.mrb[64].mxu0 %v2455_v30  ;;  %2530 = vmatmul.mubr.bf16.vlgmr.msra.gmra.mrb[64].mxu1 %v2455_v30 }
 0x906   :  { %2572 = vmatpush1.bf16.msra.mxu0 %v5799_v32  ;;  %2613 = vmatpush1.bf16.msra.mxu1 %v5802_v26 }
 0x907   :  { %2573 = vmatprep.subr.bf16.mxu0 %v5805_v34  ;;  %2614 = vmatprep.subr.bf16.mxu1 %v5808_v35 }
 0x908   :  { %2603 = vmatprep.mubr.bf16.mxu0 %v6394_v0  ;;  %2644 = vmatprep.mubr.bf16.mxu1 %v6394_v0 }
 0x90a   :  { %2574 = vmatpush1.bf16.msra.mxu0 %v5813_v2  ;;  %2615 = vmatpush1.bf16.msra.mxu1 %v5816_v33 }
 0x90b   :  { %2575 = vmatprep.subr.bf16.mxu0 %v5819_v44  ;;  %2616 = vmatprep.subr.bf16.mxu1 %v5822_v56 }
 0x90e   :  { %2576 = vmatpush1.bf16.msra.mxu0 %v5825_v28  ;;  %2617 = vmatpush1.bf16.msra.mxu1 %v5828_v4 }
 0x90f   :  { %2577 = vmatprep.subr.bf16.mxu0 %v5831_v46  ;;  %2618 = vmatprep.subr.bf16.mxu1 %v5834_v23 }
 0x912   :  { %2578 = vmatpush1.bf16.msra.mxu0 %v5837_v58  ;;  %2619 = vmatpush1.bf16.msra.mxu1 %v5840_v24 }
 0x913   :  { %2579 = vmatprep.subr.bf16.mxu0 %v5843_v57  ;;  %2620 = vmatprep.subr.bf16.mxu1 %v5940_v31 }
 0x916   :  { %2580 = vmatpush1.bf16.msra.mxu0 %v5847_v47  ;;  %2621 = vmatpush1.bf16.msra.mxu1 %v5944_v6 }
 0x917   :  { %2581 = vmatprep.subr.bf16.mxu0 %v5851_v63  ;;  %2622 = vmatprep.subr.bf16.mxu1 %v5948_v7 }
 0x91a   :  { %2582 = vmatpush1.bf16.msra.mxu0 %v5855_v1  ;;  %2623 = vmatpush1.bf16.msra.mxu1 %v5952_v8 }
 0x91b   :  { %2583 = vmatprep.subr.bf16.mxu0 %v5955_v9  ;;  %2624 = vmatprep.subr.bf16.mxu1 %v5958_v10 }
 0x91e   :  { %2584 = vmatpush1.bf16.msra.mxu0 %v5961_v43  ;;  %2625 = vmatpush1.bf16.msra.mxu1 %v5964_v59 }
 0x91f   :  { %2585 = vmatprep.subr.bf16.mxu0 %v5967_v14  ;;  %2626 = vmatprep.subr.bf16.mxu1 %v5656_v36 }
 0x922   :  { %2586 = vmatpush1.bf16.msra.mxu0 %v5971_v60  ;;  %2627 = vmatpush1.bf16.msra.mxu1 %v5660_v45 }
 0x923   :  { %2686 = vmatprep.subr.bf16.mxu0 %v5867_v3  ;;  %2727 = vmatprep.subr.bf16.mxu1 %v5870_v5 }
 0x9d8   :  { %v2490_v61 = vpop.f32.mrb[64].mxu0  ;;  %v2531_v62 = vpop.f32.mrb[64].mxu1 }
 0x9d9   :  { %v2538_v53 = vadd.f32 %v2490_v61, %v6408_v51  ;;  %v2540_v55 = vadd.f32 %v2531_v62, %v6409_v29  ;;  %v2492_v11 = vpop.f32.mrb[65].mxu0  ;;  %v2533_v12 = vpop.f32.mrb[65].mxu1 }
 0x9da   :  { %v2539_v36 = vadd.f32 %v2492_v11, %v6410_v13  ;;  %v2541_v15 = vadd.f32 %v2533_v12, %v6411_v48  ;;  %v2494_v16 = vpop.f32.mrb[66].mxu0  ;;  %v2535_v17 = vpop.f32.mrb[66].mxu1  ;;  %v6412_v11 = vld [vmem:[#allocation38_spill] sm:$0xff]  ;;  %v6413_v13 = vld [vmem:[#allocation39_spill] sm:$0xff] }
 0x9db   :  { %v3848_v18 = vmul.f32 -1.442695, %v2538_v53  ;;  %v2495_v45 = vpop.f32.mrb[67].mxu0  ;;  %v2536_v19 = vpop.f32.mrb[67].mxu1  ;;  %v3850_v37 = vmul.f32 -1.442695, %v2540_v55 }
 0x9dc   :  { %v3849_v20 = vmul.f32 -1.442695, %v2539_v36  ;;  %v6018_v53 = vld [vmem:[#allocation11 + $0xe8] ss:$16 sps:$4 sm:$0xff]   ;;  %v6414_v16 = vld [vmem:[#allocation40_spill] sm:$0xff] }
 0x9dd   :  { %4152 = vpow2.f32 %v3848_v18  ;;  %v6415_v18 = vld [vmem:[#allocation41_spill] sm:$0xff] }
 0x9de   :  { %4154 = vpow2.f32 %v3849_v20 }
 0x9df   :  { %4156 = vtanh.f32 %v2541_v15 }
 0x9e0   :  { %4158 = vpow2.f32 %v3850_v37 }
 0x9e7   :  { %v4153_v52 = vpop.eup %4152 }
 0x9e8   :  { %v2551_v22 = vadd.f32 1.0, %v4153_v52  ;;  %v4155_v54 = vpop.eup %4154 }
 0x9e9   :  { %v2552_v49 = vadd.f32 1.0, %v4155_v54  ;;  %v4157_v41 = vpop.eup %4156 }
 0x9ea   :  { %4160 = vrcp.f32 %v2551_v22  ;;  %v4159_v38 = vpop.eup %4158 }
 0x9eb   :  { %4162 = vrcp.f32 %v2552_v49  ;;  %v2553_v42 = vadd.f32 1.0, %v4159_v38 }
 0x9ed   :  { %4164 = vrcp.f32 %v2553_v42 }
 0x9f4   :  { %v4161_v40 = vpop.eup %4160 }
 0x9f5   :  { %v2562_v21 = vmul.f32 %v4161_v40, %v4157_v41  ;;  %v4163_v25 = vpop.eup %4162 }
 0x9f6   :  { %v2561_v39 = vmul.f32 %v4163_v25, %v5920_v27  ;;  %v6014_v27 = vld [vmem:[#allocation11 + $0xec] ss:$16 sps:$4 sm:$0xff]  }
 0x9f7   :  { %v4165_v30 = vpop.eup %4164 }
 0x9f8   :  { %v5982_v50 = vadd.f32 %v2562_v21, %v2561_v39 }
 0x9fa   :  { %4166 = vtanh.f32 %v5982_v50 }
 0xa04   :  { %v4167_v61 = vpop.eup %4166 }
 0xa05   :  { %v2565_v62 = vmul.f32 %v4167_v61, %v4165_v30 }
 0xa07   :  { %v2570_v51 = vpack.c.bf16 %v2565_v62, %v2565_v62 }
 0xa09   :  { %2604 = vmatmul.mubr.bf16.vlgmr.msra.gmra.mrb[68].mxu0 %v2570_v51  ;;  %2645 = vmatmul.mubr.bf16.vlgmr.msra.gmra.mrb[68].mxu1 %v2570_v51 }
 0xa0a   :  { %2687 = vmatpush1.bf16.msra.mxu0 %v5799_v32  ;;  %2728 = vmatpush1.bf16.msra.mxu1 %v5802_v26 }
 0xa0b   :  { %2688 = vmatprep.subr.bf16.mxu0 %v5805_v34  ;;  %2729 = vmatprep.subr.bf16.mxu1 %v5808_v35 }
 0xa0c   :  { %2718 = vmatprep.mubr.bf16.mxu0 %v6394_v0  ;;  %2759 = vmatprep.mubr.bf16.mxu1 %v6394_v0 }
 0xa0e   :  { %2689 = vmatpush1.bf16.msra.mxu0 %v5813_v2  ;;  %2730 = vmatpush1.bf16.msra.mxu1 %v5816_v33 }
 0xa0f   :  { %2690 = vmatprep.subr.bf16.mxu0 %v5819_v44  ;;  %2731 = vmatprep.subr.bf16.mxu1 %v5822_v56 }
 0xa12   :  { %2691 = vmatpush1.bf16.msra.mxu0 %v5825_v28  ;;  %2732 = vmatpush1.bf16.msra.mxu1 %v5828_v4 }
 0xa13   :  { %2692 = vmatprep.subr.bf16.mxu0 %v5831_v46  ;;  %2733 = vmatprep.subr.bf16.mxu1 %v5834_v23 }
 0xa16   :  { %2693 = vmatpush1.bf16.msra.mxu0 %v5837_v58  ;;  %2734 = vmatpush1.bf16.msra.mxu1 %v5840_v24 }
 0xa17   :  { %2694 = vmatprep.subr.bf16.mxu0 %v5843_v57  ;;  %2735 = vmatprep.subr.bf16.mxu1 %v5940_v31 }
 0xa1a   :  { %2695 = vmatpush1.bf16.msra.mxu0 %v5847_v47  ;;  %2736 = vmatpush1.bf16.msra.mxu1 %v5944_v6 }
 0xa1b   :  { %2696 = vmatprep.subr.bf16.mxu0 %v5851_v63  ;;  %2737 = vmatprep.subr.bf16.mxu1 %v5948_v7 }
 0xa1e   :  { %2697 = vmatpush1.bf16.msra.mxu0 %v5855_v1  ;;  %2738 = vmatpush1.bf16.msra.mxu1 %v5952_v8 }
 0xa1f   :  { %2698 = vmatprep.subr.bf16.mxu0 %v5955_v9  ;;  %2739 = vmatprep.subr.bf16.mxu1 %v5958_v10 }
 0xa22   :  { %2699 = vmatpush1.bf16.msra.mxu0 %v5961_v43  ;;  %2740 = vmatpush1.bf16.msra.mxu1 %v5964_v59 }
 0xa23   :  { %2700 = vmatprep.subr.bf16.mxu0 %v5967_v14  ;;  %2741 = vmatprep.subr.bf16.mxu1 %v6014_v27 }
 0xa26   :  { %2701 = vmatpush1.bf16.msra.mxu0 %v5971_v60  ;;  %2742 = vmatpush1.bf16.msra.mxu1 %v6018_v53 }
 0xa27   :  { %2801 = vmatprep.subr.bf16.mxu0 %v5867_v3  ;;  %2842 = vmatprep.subr.bf16.mxu1 %v5870_v5 }
 0xadc   :  { %v2605_v29 = vpop.f32.mrb[68].mxu0  ;;  %v2646_v55 = vpop.f32.mrb[68].mxu1 }
 0xadd   :  { %v2653_v12 = vadd.f32 %v2605_v29, %v6412_v11  ;;  %v2655_v36 = vadd.f32 %v2646_v55, %v6413_v13  ;;  %v2607_v48 = vpop.f32.mrb[69].mxu0  ;;  %v2648_v15 = vpop.f32.mrb[69].mxu1 }
 0xade   :  { %v2654_v17 = vadd.f32 %v2607_v48, %v6414_v16  ;;  %v2656_v45 = vadd.f32 %v2648_v15, %v6415_v18  ;;  %v2609_v19 = vpop.f32.mrb[70].mxu0  ;;  %v2650_v20 = vpop.f32.mrb[70].mxu1  ;;  %v6416_v48 = vld [vmem:[#allocation42_spill] sm:$0xff]  ;;  %v6417_v16 = vld [vmem:[#allocation43_spill] sm:$0xff] }
 0xadf   :  { %v3851_v37 = vmul.f32 -1.442695, %v2653_v12  ;;  %v2610_v52 = vpop.f32.mrb[71].mxu0  ;;  %v2651_v22 = vpop.f32.mrb[71].mxu1  ;;  %v3853_v49 = vmul.f32 -1.442695, %v2655_v36 }
 0xae0   :  { %v3852_v54 = vmul.f32 -1.442695, %v2654_v17  ;;  %v6418_v19 = vld [vmem:[#allocation44_spill] sm:$0xff] }
 0xae1   :  { %4168 = vpow2.f32 %v3851_v37  ;;  %v6419_v37 = vld [vmem:[#allocation45_spill] sm:$0xff] }
 0xae2   :  { %4170 = vpow2.f32 %v3852_v54 }
 0xae3   :  { %4172 = vtanh.f32 %v2656_v45 }
 0xae4   :  { %4174 = vpow2.f32 %v3853_v49 }
 0xaeb   :  { %v4169_v41 = vpop.eup %4168 }
 0xaec   :  { %v2666_v38 = vadd.f32 1.0, %v4169_v41  ;;  %v4171_v40 = vpop.eup %4170 }
 0xaed   :  { %v2667_v21 = vadd.f32 1.0, %v4171_v40  ;;  %v4173_v25 = vpop.eup %4172 }
 0xaee   :  { %4176 = vrcp.f32 %v2666_v38  ;;  %v4175_v42 = vpop.eup %4174 }
 0xaef   :  { %4178 = vrcp.f32 %v2667_v21  ;;  %v2668_v62 = vadd.f32 1.0, %v4175_v42 }
 0xaf1   :  { %4180 = vrcp.f32 %v2668_v62 }
 0xaf8   :  { %v4177_v39 = vpop.eup %4176 }
 0xaf9   :  { %v2677_v30 = vmul.f32 %v4177_v39, %v4173_v25  ;;  %v4179_v61 = vpop.eup %4178 }
 0xafa   :  { %v2676_v51 = vmul.f32 %v4179_v61, %v5982_v50 }
 0xafb   :  { %v4181_v55 = vpop.eup %4180 }
 0xafc   :  { %v6028_v29 = vadd.f32 %v2677_v30, %v2676_v51 }
 0xafe   :  { %4182 = vtanh.f32 %v6028_v29 }
 0xb08   :  { %v4183_v11 = vpop.eup %4182 }
 0xb09   :  { %v2680_v12 = vmul.f32 %v4183_v11, %v4181_v55 }
 0xb0b   :  { %v2685_v13 = vpack.c.bf16 %v2680_v12, %v2680_v12 }
 0xb0d   :  { %2719 = vmatmul.mubr.bf16.vlgmr.msra.gmra.mrb[72].mxu0 %v2685_v13  ;;  %2760 = vmatmul.mubr.bf16.vlgmr.msra.gmra.mrb[72].mxu1 %v2685_v13 }
 0xb0e   :  { %2802 = vmatpush1.bf16.msra.mxu0 %v5799_v32  ;;  %2843 = vmatpush1.bf16.msra.mxu1 %v5802_v26 }
 0xb0f   :  { %2803 = vmatprep.subr.bf16.mxu0 %v5805_v34  ;;  %2844 = vmatprep.subr.bf16.mxu1 %v5808_v35 }
 0xb10   :  { %2833 = vmatprep.mubr.bf16.mxu0 %v6394_v0  ;;  %2874 = vmatprep.mubr.bf16.mxu1 %v6394_v0 }
 0xb12   :  { %2804 = vmatpush1.bf16.msra.mxu0 %v5813_v2  ;;  %2845 = vmatpush1.bf16.msra.mxu1 %v5816_v33 }
 0xb13   :  { %2805 = vmatprep.subr.bf16.mxu0 %v5819_v44  ;;  %2846 = vmatprep.subr.bf16.mxu1 %v5822_v56 }
 0xb16   :  { %2806 = vmatpush1.bf16.msra.mxu0 %v5825_v28  ;;  %2847 = vmatpush1.bf16.msra.mxu1 %v5828_v4 }
 0xb17   :  { %2807 = vmatprep.subr.bf16.mxu0 %v5831_v46  ;;  %2848 = vmatprep.subr.bf16.mxu1 %v5834_v23 }
 0xb1a   :  { %2808 = vmatpush1.bf16.msra.mxu0 %v5837_v58  ;;  %2849 = vmatpush1.bf16.msra.mxu1 %v5840_v24 }
 0xb1b   :  { %2809 = vmatprep.subr.bf16.mxu0 %v5843_v57  ;;  %2850 = vmatprep.subr.bf16.mxu1 %v5940_v31 }
 0xb1e   :  { %2810 = vmatpush1.bf16.msra.mxu0 %v5847_v47  ;;  %2851 = vmatpush1.bf16.msra.mxu1 %v5944_v6 }
 0xb1f   :  { %2811 = vmatprep.subr.bf16.mxu0 %v5851_v63  ;;  %2852 = vmatprep.subr.bf16.mxu1 %v5948_v7 }
 0xb22   :  { %2812 = vmatpush1.bf16.msra.mxu0 %v5855_v1  ;;  %2853 = vmatpush1.bf16.msra.mxu1 %v5952_v8 }
 0xb23   :  { %2813 = vmatprep.subr.bf16.mxu0 %v5955_v9  ;;  %2854 = vmatprep.subr.bf16.mxu1 %v5958_v10 }
 0xb26   :  { %2814 = vmatpush1.bf16.msra.mxu0 %v5961_v43  ;;  %2855 = vmatpush1.bf16.msra.mxu1 %v5964_v59 }
 0xb27   :  { %2815 = vmatprep.subr.bf16.mxu0 %v5967_v14  ;;  %2856 = vmatprep.subr.bf16.mxu1 %v6014_v27 }
 0xb2a   :  { %2816 = vmatpush1.bf16.msra.mxu0 %v5971_v60  ;;  %2857 = vmatpush1.bf16.msra.mxu1 %v6018_v53 }
 0xb2b   :  { %2916 = vmatprep.subr.bf16.mxu0 %v5867_v3  ;;  %2957 = vmatprep.subr.bf16.mxu1 %v5870_v5 }
 0xbe0   :  { %v2720_v50 = vpop.f32.mrb[72].mxu0  ;;  %v2761_v36 = vpop.f32.mrb[72].mxu1 }
 0xbe1   :  { %v2768_v15 = vadd.f32 %v2720_v50, %v6416_v48  ;;  %v2770_v17 = vadd.f32 %v2761_v36, %v6417_v16  ;;  %v2722_v18 = vpop.f32.mrb[73].mxu0  ;;  %v2763_v45 = vpop.f32.mrb[73].mxu1 }
 0xbe2   :  { %v2769_v20 = vadd.f32 %v2722_v18, %v6418_v19  ;;  %v2771_v52 = vadd.f32 %v2763_v45, %v6419_v37  ;;  %v2724_v22 = vpop.f32.mrb[74].mxu0  ;;  %v2765_v54 = vpop.f32.mrb[74].mxu1  ;;  %v6420_v18 = vld [vmem:[#allocation46_spill] sm:$0xff]  ;;  %v6421_v19 = vld [vmem:[#allocation47_spill] sm:$0xff] }
 0xbe3   :  { %v3854_v49 = vmul.f32 -1.442695, %v2768_v15  ;;  %v2725_v41 = vpop.f32.mrb[75].mxu0  ;;  %v2766_v38 = vpop.f32.mrb[75].mxu1  ;;  %v3856_v21 = vmul.f32 -1.442695, %v2770_v17 }
 0xbe4   :  { %v3855_v40 = vmul.f32 -1.442695, %v2769_v20  ;;  %v6422_v22 = vld [vmem:[#allocation48_spill] sm:$0xff] }
 0xbe5   :  { %4184 = vpow2.f32 %v3854_v49  ;;  %v6423_v49 = vld [vmem:[#allocation49_spill] sm:$0xff] }
 0xbe6   :  { %4186 = vpow2.f32 %v3855_v40 }
 0xbe7   :  { %4188 = vtanh.f32 %v2771_v52 }
 0xbe8   :  { %4190 = vpow2.f32 %v3856_v21 }
 0xbef   :  { %v4185_v25 = vpop.eup %4184 }
 0xbf0   :  { %v2781_v42 = vadd.f32 1.0, %v4185_v25  ;;  %v4187_v39 = vpop.eup %4186 }
 0xbf1   :  { %v2782_v30 = vadd.f32 1.0, %v4187_v39  ;;  %v4189_v61 = vpop.eup %4188 }
 0xbf2   :  { %4192 = vrcp.f32 %v2781_v42  ;;  %v4191_v62 = vpop.eup %4190 }
 0xbf3   :  { %4194 = vrcp.f32 %v2782_v30  ;;  %v2783_v12 = vadd.f32 1.0, %v4191_v62 }
 0xbf5   :  { %4196 = vrcp.f32 %v2783_v12 }
 0xbfc   :  { %v4193_v51 = vpop.eup %4192 }
 0xbfd   :  { %v2792_v55 = vmul.f32 %v4193_v51, %v4189_v61  ;;  %v4195_v11 = vpop.eup %4194 }
 0xbfe   :  { %v2791_v13 = vmul.f32 %v4195_v11, %v6028_v29 }
 0xbff   :  { %v4197_v36 = vpop.eup %4196 }
 0xc00   :  { %v6070_v50 = vadd.f32 %v2792_v55, %v2791_v13 }
 0xc02   :  { %4198 = vtanh.f32 %v6070_v50 }
 0xc0c   :  { %v4199_v48 = vpop.eup %4198 }
 0xc0d   :  { %v2795_v15 = vmul.f32 %v4199_v48, %v4197_v36 }
 0xc0f   :  { %v2800_v16 = vpack.c.bf16 %v2795_v15, %v2795_v15 }
 0xc11   :  { %2834 = vmatmul.mubr.bf16.vlgmr.msra.gmra.mrb[76].mxu0 %v2800_v16  ;;  %2875 = vmatmul.mubr.bf16.vlgmr.msra.gmra.mrb[76].mxu1 %v2800_v16 }
 0xc12   :  { %2917 = vmatpush1.bf16.msra.mxu0 %v5799_v32  ;;  %2958 = vmatpush1.bf16.msra.mxu1 %v5802_v26 }
 0xc13   :  { %2918 = vmatprep.subr.bf16.mxu0 %v5805_v34  ;;  %2959 = vmatprep.subr.bf16.mxu1 %v5808_v35 }
 0xc14   :  { %2948 = vmatprep.mubr.bf16.mxu0 %v6394_v0  ;;  %2989 = vmatprep.mubr.bf16.mxu1 %v6394_v0 }
 0xc16   :  { %2919 = vmatpush1.bf16.msra.mxu0 %v5813_v2  ;;  %2960 = vmatpush1.bf16.msra.mxu1 %v5816_v33 }
 0xc17   :  { %2920 = vmatprep.subr.bf16.mxu0 %v5819_v44  ;;  %2961 = vmatprep.subr.bf16.mxu1 %v5822_v56 }
 0xc1a   :  { %2921 = vmatpush1.bf16.msra.mxu0 %v5825_v28  ;;  %2962 = vmatpush1.bf16.msra.mxu1 %v5828_v4 }
 0xc1b   :  { %2922 = vmatprep.subr.bf16.mxu0 %v5831_v46  ;;  %2963 = vmatprep.subr.bf16.mxu1 %v5834_v23 }
 0xc1e   :  { %2923 = vmatpush1.bf16.msra.mxu0 %v5837_v58  ;;  %2964 = vmatpush1.bf16.msra.mxu1 %v5840_v24 }
 0xc1f   :  { %2924 = vmatprep.subr.bf16.mxu0 %v5843_v57  ;;  %2965 = vmatprep.subr.bf16.mxu1 %v5940_v31 }
 0xc22   :  { %2925 = vmatpush1.bf16.msra.mxu0 %v5847_v47  ;;  %2966 = vmatpush1.bf16.msra.mxu1 %v5944_v6 }
 0xc23   :  { %2926 = vmatprep.subr.bf16.mxu0 %v5851_v63  ;;  %2967 = vmatprep.subr.bf16.mxu1 %v5948_v7 }
 0xc26   :  { %2927 = vmatpush1.bf16.msra.mxu0 %v5855_v1  ;;  %2968 = vmatpush1.bf16.msra.mxu1 %v5952_v8 }
 0xc27   :  { %2928 = vmatprep.subr.bf16.mxu0 %v5955_v9  ;;  %2969 = vmatprep.subr.bf16.mxu1 %v5958_v10 }
 0xc2a   :  { %2929 = vmatpush1.bf16.msra.mxu0 %v5961_v43  ;;  %2970 = vmatpush1.bf16.msra.mxu1 %v5964_v59 }
 0xc2b   :  { %2930 = vmatprep.subr.bf16.mxu0 %v5967_v14  ;;  %2971 = vmatprep.subr.bf16.mxu1 %v6014_v27 }
 0xc2e   :  { %2931 = vmatpush1.bf16.msra.mxu0 %v5971_v60  ;;  %2972 = vmatpush1.bf16.msra.mxu1 %v6018_v53 }
 0xc2f   :  { %3031 = vmatprep.subr.bf16.mxu0 %v5867_v3  ;;  %3072 = vmatprep.subr.bf16.mxu1 %v5870_v5 }
 0xce4   :  { %v2835_v29 = vpop.f32.mrb[76].mxu0  ;;  %v2876_v17 = vpop.f32.mrb[76].mxu1 }
 0xce5   :  { %v2883_v45 = vadd.f32 %v2835_v29, %v6420_v18  ;;  %v2885_v20 = vadd.f32 %v2876_v17, %v6421_v19  ;;  %v2837_v37 = vpop.f32.mrb[77].mxu0  ;;  %v2878_v52 = vpop.f32.mrb[77].mxu1 }
 0xce6   :  { %v2884_v54 = vadd.f32 %v2837_v37, %v6422_v22  ;;  %v2886_v41 = vadd.f32 %v2878_v52, %v6423_v49  ;;  %v2839_v38 = vpop.f32.mrb[78].mxu0  ;;  %v2880_v40 = vpop.f32.mrb[78].mxu1 }
 0xce7   :  { %v3857_v21 = vmul.f32 -1.442695, %v2883_v45  ;;  %v2840_v25 = vpop.f32.mrb[79].mxu0  ;;  %v2881_v42 = vpop.f32.mrb[79].mxu1  ;;  %v3859_v30 = vmul.f32 -1.442695, %v2885_v20 }
 0xce8   :  { %v3858_v39 = vmul.f32 -1.442695, %v2884_v54 }
 0xce9   :  { %4200 = vpow2.f32 %v3857_v21 }
 0xcea   :  { %4202 = vpow2.f32 %v3858_v39 }
 0xceb   :  { %4204 = vtanh.f32 %v2886_v41 }
 0xcec   :  { %4206 = vpow2.f32 %v3859_v30 }
 0xcf3   :  { %v4201_v61 = vpop.eup %4200 }
 0xcf4   :  { %v2896_v62 = vadd.f32 1.0, %v4201_v61  ;;  %v4203_v51 = vpop.eup %4202  ;;  %v6157_v61 = vld [vmem:[#allocation11] ss:$16 sps:$4 sm:$0xff]  }
 0xcf5   :  { %v2897_v55 = vadd.f32 1.0, %v4203_v51  ;;  %v4205_v11 = vpop.eup %4204  ;;  %v6163_v51 = vld [vmem:[#allocation11 + $0x24] ss:$16 sps:$4 sm:$0xff]  }
 0xcf6   :  { %4208 = vrcp.f32 %v2896_v62  ;;  %v4207_v12 = vpop.eup %4206  ;;  %v6160_v62 = vld [vmem:[#allocation11 + $0x8] ss:$16 sps:$4 sm:$0xff]  }
 0xcf7   :  { %4210 = vrcp.f32 %v2897_v55  ;;  %v2898_v15 = vadd.f32 1.0, %v4207_v12  ;;  %v6166_v55 = vld [vmem:[#allocation11 + $0x2c] ss:$16 sps:$4 sm:$0xff]   ;;  %v6174_v12 = vld [vmem:[#allocation11 + $0x28] ss:$16 sps:$4 sm:$0xff]  }
 0xcf9   :  { %4212 = vrcp.f32 %v2898_v15  ;;  %v6186_v15 = vld [vmem:[#allocation11 + $0x48] ss:$16 sps:$4 sm:$0xff]  }
 0xd00   :  { %v4209_v13 = vpop.eup %4208 }
 0xd01   :  { %v2907_v36 = vmul.f32 %v4209_v13, %v4205_v11  ;;  %v4211_v48 = vpop.eup %4210  ;;  %v6171_v11 = vld [vmem:[#allocation11 + $0x20] ss:$16 sps:$4 sm:$0xff]   ;;  %v6177_v13 = vld [vmem:[#allocation11 + $0x44] ss:$16 sps:$4 sm:$0xff]  }
 0xd02   :  { %v2906_v16 = vmul.f32 %v4211_v48, %v6070_v50  ;;  %v6183_v48 = vld [vmem:[#allocation11 + $0x40] ss:$16 sps:$4 sm:$0xff]  }
 0xd03   :  { %v4213_v17 = vpop.eup %4212 }
 0xd04   :  { %v6112_v29 = vadd.f32 %v2907_v36, %v2906_v16  ;;  %v6180_v36 = vld [vmem:[#allocation11 + $0x4c] ss:$16 sps:$4 sm:$0xff]   ;;  %v6189_v16 = vld [vmem:[#allocation11 + $0x64] ss:$16 sps:$4 sm:$0xff]  }
 0xd06   :  { %4214 = vtanh.f32 %v6112_v29 }
 0xd10   :  { %v4215_v18 = vpop.eup %4214 }
 0xd11   :  { %v2910_v45 = vmul.f32 %v4215_v18, %v4213_v17  ;;  %v6195_v17 = vld [vmem:[#allocation11 + $0x60] ss:$16 sps:$4 sm:$0xff]   ;;  %v6198_v18 = vld [vmem:[#allocation11 + $0x68] ss:$16 sps:$4 sm:$0xff]  }
 0xd13   :  { %v2915_v19 = vpack.c.bf16 %v2910_v45, %v2910_v45  ;;  %v6201_v45 = vld [vmem:[#allocation11 + $0x84] ss:$16 sps:$4 sm:$0xff]  }
 0xd15   :  { %2949 = vmatmul.mubr.bf16.vlgmr.msra.gmra.mrb[80].mxu0 %v2915_v19  ;;  %2990 = vmatmul.mubr.bf16.vlgmr.msra.gmra.mrb[80].mxu1 %v2915_v19  ;;  %v6205_v19 = vld [vmem:[#allocation11 + $0x80] ss:$16 sps:$4 sm:$0xff]  }
 0xd16   :  { %3032 = vmatpush1.bf16.msra.mxu0 %v5799_v32  ;;  %3073 = vmatpush1.bf16.msra.mxu1 %v5802_v26 }
 0xd17   :  { %3033 = vmatprep.subr.bf16.mxu0 %v5805_v34  ;;  %3074 = vmatprep.subr.bf16.mxu1 %v5808_v35  ;;  %v6424_v34 = vld [vmem:[#allocation50_spill] sm:$0xff] }
 0xd18   :  { %3063 = vmatprep.mubr.bf16.mxu0 %v6394_v0  ;;  %3104 = vmatprep.mubr.bf16.mxu1 %v6394_v0 }
 0xd1a   :  { %3034 = vmatpush1.bf16.msra.mxu0 %v5813_v2  ;;  %3075 = vmatpush1.bf16.msra.mxu1 %v5816_v33  ;;  %v6425_v2 = vld [vmem:[#allocation51_spill] sm:$0xff] }
 0xd1b   :  { %3035 = vmatprep.subr.bf16.mxu0 %v5819_v44  ;;  %3076 = vmatprep.subr.bf16.mxu1 %v5822_v56 }
 0xd1e   :  { %3036 = vmatpush1.bf16.msra.mxu0 %v5825_v28  ;;  %3077 = vmatpush1.bf16.msra.mxu1 %v5828_v4  ;;  %v6426_v28 = vld [vmem:[#allocation52_spill] sm:$0xff] }
 0xd1f   :  { %3037 = vmatprep.subr.bf16.mxu0 %v5831_v46  ;;  %3078 = vmatprep.subr.bf16.mxu1 %v5834_v23  ;;  %v6427_v46 = vld [vmem:[#allocation53_spill] sm:$0xff] }
 0xd22   :  { %3038 = vmatpush1.bf16.msra.mxu0 %v5837_v58  ;;  %3079 = vmatpush1.bf16.msra.mxu1 %v5840_v24 }
 0xd23   :  { %3039 = vmatprep.subr.bf16.mxu0 %v5843_v57  ;;  %3080 = vmatprep.subr.bf16.mxu1 %v5940_v31 }
 0xd26   :  { %3040 = vmatpush1.bf16.msra.mxu0 %v5847_v47  ;;  %3081 = vmatpush1.bf16.msra.mxu1 %v5944_v6 }
 0xd27   :  { %3041 = vmatprep.subr.bf16.mxu0 %v5851_v63  ;;  %3082 = vmatprep.subr.bf16.mxu1 %v5948_v7 }
 0xd2a   :  { %3042 = vmatpush1.bf16.msra.mxu0 %v5855_v1  ;;  %3083 = vmatpush1.bf16.msra.mxu1 %v5952_v8 }
 0xd2b   :  { %3043 = vmatprep.subr.bf16.mxu0 %v5955_v9  ;;  %3084 = vmatprep.subr.bf16.mxu1 %v5958_v10 }
 0xd2e   :  { %3044 = vmatpush1.bf16.msra.mxu0 %v5961_v43  ;;  %3085 = vmatpush1.bf16.msra.mxu1 %v5964_v59 }
 0xd2f   :  { %3045 = vmatprep.subr.bf16.mxu0 %v5967_v14  ;;  %3086 = vmatprep.subr.bf16.mxu1 %v6014_v27 }
 0xd32   :  { %3046 = vmatpush1.bf16.msra.mxu0 %v5971_v60  ;;  %3087 = vmatpush1.bf16.msra.mxu1 %v6018_v53 }
 0xd33   :  { %3146 = vmatprep.subr.bf16.mxu0 %v5867_v3  ;;  %3187 = vmatprep.subr.bf16.mxu1 %v5870_v5 }
 0xde8   :  { %v2950_v32 = vpop.f32.mrb[80].mxu0  ;;  %v2991_v26 = vpop.f32.mrb[80].mxu1 }
 0xde9   :  { %v2998_v35 = vadd.f32 %v2950_v32, %v6424_v34  ;;  %v3000_v33 = vadd.f32 %v2991_v26, %v6425_v2  ;;  %v2952_v44 = vpop.f32.mrb[81].mxu0  ;;  %v2993_v56 = vpop.f32.mrb[81].mxu1  ;;  %v6209_v32 = vld [vmem:[#allocation11 + $0xa4] ss:$16 sps:$4 sm:$0xff]   ;;  %v6213_v26 = vld [vmem:[#allocation11 + $0xa0] ss:$16 sps:$4 sm:$0xff]  }
 0xdea   :  { %v2999_v4 = vadd.f32 %v2952_v44, %v6426_v28  ;;  %v3001_v23 = vadd.f32 %v2993_v56, %v6427_v46  ;;  %v2954_v58 = vpop.f32.mrb[82].mxu0  ;;  %v2995_v24 = vpop.f32.mrb[82].mxu1  ;;  %v4362_v34 = vld [vmem:[#allocation11 + $0x4] ss:$16 sps:$4 sm:$0xff]   ;;  %v6429_v28 = vld [vmem:[#allocation55_spill] sm:$0xff] }
 0xdeb   :  { %v3860_v57 = vmul.f32 -1.442695, %v2998_v35  ;;  %v2955_v47 = vpop.f32.mrb[83].mxu0  ;;  %v2996_v63 = vpop.f32.mrb[83].mxu1  ;;  %v3862_v3 = vmul.f32 -1.442695, %v3000_v33 }
 0xdec   :  { %v3861_v1 = vmul.f32 -1.442695, %v2999_v4  ;;  %v4363_v35 = vld [vmem:[#allocation11 + $0xc] ss:$16 sps:$4 sm:$0xff]   ;;  %v6428_v44 = vld [vmem:[#allocation54_spill] sm:$0xff]  ;;  %v6430_v58 = vld [vmem:[#allocation56_spill] sm:$0xff] }
 0xded   :  { %4216 = vpow2.f32 %v3860_v57  ;;  %v6431_v57 = vld [vmem:[#allocation57_spill] sm:$0xff] }
 0xdee   :  { %4218 = vpow2.f32 %v3861_v1 }
 0xdef   :  { %4220 = vtanh.f32 %v3001_v23 }
 0xdf0   :  { %4222 = vpow2.f32 %v3862_v3 }
 0xdf7   :  { %v4217_v5 = vpop.eup %4216 }
 0xdf8   :  { %v3011_v50 = vadd.f32 1.0, %v4217_v5  ;;  %v4219_v20 = vpop.eup %4218 }
 0xdf9   :  { %v3012_v37 = vadd.f32 1.0, %v4219_v20  ;;  %v4221_v52 = vpop.eup %4220 }
 0xdfa   :  { %4224 = vrcp.f32 %v3011_v50  ;;  %v4223_v22 = vpop.eup %4222 }
 0xdfb   :  { %4226 = vrcp.f32 %v3012_v37  ;;  %v3013_v38 = vadd.f32 1.0, %v4223_v22 }
 0xdfd   :  { %4228 = vrcp.f32 %v3013_v38 }
 0xe04   :  { %v4225_v54 = vpop.eup %4224 }
 0xe05   :  { %v3022_v49 = vmul.f32 %v4225_v54, %v4221_v52  ;;  %v4227_v41 = vpop.eup %4226 }
 0xe06   :  { %v3021_v40 = vmul.f32 %v4227_v41, %v6112_v29  ;;  %v6192_v29 = vld [vmem:[#allocation11 + $0x6c] ss:$16 sps:$4 sm:$0xff]  }
 0xe07   :  { %v4229_v25 = vpop.eup %4228 }
 0xe08   :  { %v6154_v21 = vadd.f32 %v3022_v49, %v3021_v40 }
 0xe0a   :  { %4230 = vtanh.f32 %v6154_v21 }
 0xe14   :  { %v4231_v42 = vpop.eup %4230 }
 0xe15   :  { %v3025_v39 = vmul.f32 %v4231_v42, %v4229_v25 }
 0xe17   :  { %v3030_v30 = vpack.c.bf16 %v3025_v39, %v3025_v39 }
 0xe19   :  { %3064 = vmatmul.mubr.bf16.vlgmr.msra.gmra.mrb[84].mxu0 %v3030_v30  ;;  %3105 = vmatmul.mubr.bf16.vlgmr.msra.gmra.mrb[84].mxu1 %v3030_v30 }
 0xe1a   :  { %3147 = vmatpush1.bf16.msra.mxu0 %v6157_v61  ;;  %3188 = vmatpush1.bf16.msra.mxu1 %v6160_v62 }
 0xe1b   :  { %3148 = vmatprep.subr.bf16.mxu0 %v6163_v51  ;;  %3189 = vmatprep.subr.bf16.mxu1 %v6166_v55 }
 0xe1c   :  { %3178 = vmatprep.mubr.bf16.mxu0 %v6394_v0  ;;  %3219 = vmatprep.mubr.bf16.mxu1 %v6394_v0 }
 0xe1e   :  { %3149 = vmatpush1.bf16.msra.mxu0 %v6171_v11  ;;  %3190 = vmatpush1.bf16.msra.mxu1 %v6174_v12 }
 0xe1f   :  { %3150 = vmatprep.subr.bf16.mxu0 %v6177_v13  ;;  %3191 = vmatprep.subr.bf16.mxu1 %v6180_v36 }
 0xe22   :  { %3151 = vmatpush1.bf16.msra.mxu0 %v6183_v48  ;;  %3192 = vmatpush1.bf16.msra.mxu1 %v6186_v15 }
 0xe23   :  { %3152 = vmatprep.subr.bf16.mxu0 %v6189_v16  ;;  %3193 = vmatprep.subr.bf16.mxu1 %v6192_v29 }
 0xe26   :  { %3153 = vmatpush1.bf16.msra.mxu0 %v6195_v17  ;;  %3194 = vmatpush1.bf16.msra.mxu1 %v6198_v18 }
 0xe27   :  { %3154 = vmatprep.subr.bf16.mxu0 %v6201_v45  ;;  %3195 = vmatprep.subr.bf16.mxu1 %v5940_v31 }
 0xe2a   :  { %3155 = vmatpush1.bf16.msra.mxu0 %v6205_v19  ;;  %3196 = vmatpush1.bf16.msra.mxu1 %v5944_v6 }
 0xe2b   :  { %3156 = vmatprep.subr.bf16.mxu0 %v6209_v32  ;;  %3197 = vmatprep.subr.bf16.mxu1 %v5948_v7 }
 0xe2e   :  { %3157 = vmatpush1.bf16.msra.mxu0 %v6213_v26  ;;  %3198 = vmatpush1.bf16.msra.mxu1 %v5952_v8 }
 0xe2f   :  { %3158 = vmatprep.subr.bf16.mxu0 %v5955_v9  ;;  %3199 = vmatprep.subr.bf16.mxu1 %v5958_v10 }
 0xe32   :  { %3159 = vmatpush1.bf16.msra.mxu0 %v5961_v43  ;;  %3200 = vmatpush1.bf16.msra.mxu1 %v5964_v59 }
 0xe33   :  { %3160 = vmatprep.subr.bf16.mxu0 %v5967_v14  ;;  %3201 = vmatprep.subr.bf16.mxu1 %v6014_v27 }
 0xe36   :  { %3161 = vmatpush1.bf16.msra.mxu0 %v5971_v60  ;;  %3202 = vmatpush1.bf16.msra.mxu1 %v6018_v53 }
 0xe37   :  { %3261 = vmatprep.subr.bf16.mxu0 %v4362_v34  ;;  %3302 = vmatprep.subr.bf16.mxu1 %v4363_v35 }
 0xeec   :  { %v3065_v2 = vpop.f32.mrb[84].mxu0  ;;  %v3106_v33 = vpop.f32.mrb[84].mxu1 }
 0xeed   :  { %v3113_v56 = vadd.f32 %v3065_v2, %v6428_v44  ;;  %v3115_v4 = vadd.f32 %v3106_v33, %v6429_v28  ;;  %v3067_v46 = vpop.f32.mrb[85].mxu0  ;;  %v3108_v23 = vpop.f32.mrb[85].mxu1 }
 0xeee   :  { %v3114_v24 = vadd.f32 %v3067_v46, %v6430_v58  ;;  %v3116_v47 = vadd.f32 %v3108_v23, %v6431_v57  ;;  %v3069_v63 = vpop.f32.mrb[86].mxu0  ;;  %v3110_v1 = vpop.f32.mrb[86].mxu1  ;;  %v4016_v46 = vld [vmem:[%s6436_s28] sm:$0xff]   ;;  %v4457_v23 = vmov 0.0   ;;  %v4017_v58 = vld [vmem:[%s6436_s28 + $0x8] sm:$0xff]   ;;  %v4019_v57 = vld [vmem:[%s6436_s28 + $0x18] sm:$0xff]  }
 0xeef   :  { %v3863_v3 = vmul.f32 -1.442695, %v3113_v56  ;;  %v3070_v5 = vpop.f32.mrb[87].mxu0  ;;  %v3111_v50 = vpop.f32.mrb[87].mxu1  ;;  %v3865_v37 = vmul.f32 -1.442695, %v3115_v4 }
 0xef0   :  { %v3864_v20 = vmul.f32 -1.442695, %v3114_v24  ;;  %v4018_v24 = vld [vmem:[%s6436_s28 + $0x10] sm:$0xff]   ;;  %v4021_v63 = vld [vmem:[%s6436_s28 + $0x28] sm:$0xff]  }
 0xef1   :  { %4232 = vpow2.f32 %v3863_v3  ;;  %v4022_v1 = vld [vmem:[%s6436_s28 + $0x30] sm:$0xff]   ;;  %v4023_v3 = vld [vmem:[%s6436_s28 + $0x38] sm:$0xff]  }
 0xef2   :  { %4234 = vpow2.f32 %v3864_v20  ;;  %v6437_v20 = vld [vmem:[#allocation62_spill] sm:$0xff] }
 0xef3   :  { %4236 = vtanh.f32 %v3116_v47  ;;  %v4020_v47 = vld [vmem:[%s6436_s28 + $0x20] sm:$0xff]  }
 0xef4   :  { %4238 = vpow2.f32 %v3865_v37 }
 0xefb   :  { %v4233_v52 = vpop.eup %4232 }
 0xefc   :  { %v3126_v22 = vadd.f32 1.0, %v4233_v52  ;;  %v4235_v54 = vpop.eup %4234  ;;  %v6438_v52 = vld [vmem:[#allocation63_spill] sm:$0xff] }
 0xefd   :  { %v3127_v49 = vadd.f32 1.0, %v4235_v54  ;;  %v4237_v41 = vpop.eup %4236 }
 0xefe   :  { %4240 = vrcp.f32 %v3126_v22  ;;  %v4239_v38 = vpop.eup %4238 }
 0xeff   :  { %4242 = vrcp.f32 %v3127_v49  ;;  %v3128_v39 = vadd.f32 1.0, %v4239_v38 }
 0xf01   :  { %4244 = vrcp.f32 %v3128_v39 }
 0xf08   :  { %v4241_v40 = vpop.eup %4240 }
 0xf09   :  { %v3137_v25 = vmul.f32 %v4241_v40, %v4237_v41  ;;  %v4243_v42 = vpop.eup %4242  ;;  %v6439_v41 = vld [vmem:[#allocation64_spill] sm:$0xff]  ;;  %v6440_v40 = vld [vmem:[#allocation65_spill] sm:$0xff] }
 0xf0a   :  { %v3136_v30 = vmul.f32 %v4243_v42, %v6154_v21 }
 0xf0b   :  { %v4245_v35 = vpop.eup %4244 }
 0xf0c   :  { %v6230_v34 = vadd.f32 %v3137_v25, %v3136_v30 }
 0xf0e   :  { %4246 = vtanh.f32 %v6230_v34 }
 0xf18   :  { %v4247_v2 = vpop.eup %4246 }
 0xf19   :  { %v3140_v33 = vmul.f32 %v4247_v2, %v4245_v35 }
 0xf1b   :  { %v3145_v44 = vpack.c.bf16 %v3140_v33, %v3140_v33 }
 0xf1d   :  { %3179 = vmatmul.mubr.bf16.vlgmr.msra.gmra.mrb[88].mxu0 %v3145_v44  ;;  %3220 = vmatmul.mubr.bf16.vlgmr.msra.gmra.mrb[88].mxu1 %v3145_v44 }
 0xf1e   :  { %3262 = vmatpush1.bf16.msra.mxu0 %v6157_v61  ;;  %3303 = vmatpush1.bf16.msra.mxu1 %v6160_v62  ;;  %v6434_v61 = vld [vmem:[#allocation60_spill] sm:$0xff]  ;;  %v6435_v62 = vld [vmem:[#allocation61_spill] sm:$0xff] }
 0xf1f   :  { %3263 = vmatprep.subr.bf16.mxu0 %v6163_v51  ;;  %3304 = vmatprep.subr.bf16.mxu1 %v6166_v55 }
 0xf20   :  { %3293 = vmatprep.mubr.bf16.mxu0 %v6394_v0  ;;  %3334 = vmatprep.mubr.bf16.mxu1 %v6394_v0 }
 0xf22   :  { %3264 = vmatpush1.bf16.msra.mxu0 %v6171_v11  ;;  %3305 = vmatpush1.bf16.msra.mxu1 %v6174_v12 }
 0xf23   :  { %3265 = vmatprep.subr.bf16.mxu0 %v6177_v13  ;;  %3306 = vmatprep.subr.bf16.mxu1 %v6180_v36 }
 0xf26   :  { %3266 = vmatpush1.bf16.msra.mxu0 %v6183_v48  ;;  %3307 = vmatpush1.bf16.msra.mxu1 %v6186_v15 }
 0xf27   :  { %3267 = vmatprep.subr.bf16.mxu0 %v6189_v16  ;;  %3308 = vmatprep.subr.bf16.mxu1 %v6192_v29 }
 0xf2a   :  { %3268 = vmatpush1.bf16.msra.mxu0 %v6195_v17  ;;  %3309 = vmatpush1.bf16.msra.mxu1 %v6198_v18 }
 0xf2b   :  { %3269 = vmatprep.subr.bf16.mxu0 %v6201_v45  ;;  %3310 = vmatprep.subr.bf16.mxu1 %v5940_v31 }
 0xf2e   :  { %3270 = vmatpush1.bf16.msra.mxu0 %v6205_v19  ;;  %3311 = vmatpush1.bf16.msra.mxu1 %v5944_v6  ;;  %v6432_v6 = vld [vmem:[#allocation58_spill] sm:$0xff] }
 0xf2f   :  { %3271 = vmatprep.subr.bf16.mxu0 %v6209_v32  ;;  %3312 = vmatprep.subr.bf16.mxu1 %v5948_v7 }
 0xf32   :  { %3272 = vmatpush1.bf16.msra.mxu0 %v6213_v26  ;;  %3313 = vmatpush1.bf16.msra.mxu1 %v5952_v8  ;;  %v6433_v8 = vld [vmem:[#allocation59_spill] sm:$0xff] }
 0xf33   :  { %3273 = vmatprep.subr.bf16.mxu0 %v5955_v9  ;;  %3314 = vmatprep.subr.bf16.mxu1 %v5958_v10 }
 0xf36   :  { %3274 = vmatpush1.bf16.msra.mxu0 %v5961_v43  ;;  %3315 = vmatpush1.bf16.msra.mxu1 %v5964_v59 }
 0xf37   :  { %3275 = vmatprep.subr.bf16.mxu0 %v5967_v14  ;;  %3316 = vmatprep.subr.bf16.mxu1 %v6014_v27 }
 0xf3a   :  { %3276 = vmatpush1.bf16.msra.mxu0 %v5971_v60  ;;  %3317 = vmatpush1.bf16.msra.mxu1 %v6018_v53 }
 0xf3b   :  { %3890 = vmatprep.subr.bf16.mxu0 %v4457_v23 }
 0xff0   :  { %v3180_v0 = vpop.f32.mrb[88].mxu0  ;;  %v3221_v31 = vpop.f32.mrb[88].mxu1 }
 0xff1   :  { %v3228_v7 = vadd.f32 %v3180_v0, %v6432_v6  ;;  %v3230_v9 = vadd.f32 %v3221_v31, %v6433_v8  ;;  %v3182_v21 = vpop.f32.mrb[89].mxu0  ;;  %v3223_v10 = vpop.f32.mrb[89].mxu1 }
 0xff2   :  { %v3229_v43 = vadd.f32 %v3182_v21, %v6434_v61  ;;  %v3231_v59 = vadd.f32 %v3223_v10, %v6435_v62  ;;  %v3184_v51 = vpop.f32.mrb[90].mxu0  ;;  %v3225_v14 = vpop.f32.mrb[90].mxu1 }
 0xff3   :  { %v3866_v55 = vmul.f32 -1.442695, %v3228_v7  ;;  %v3185_v27 = vpop.f32.mrb[91].mxu0  ;;  %v3226_v11 = vpop.f32.mrb[91].mxu1  ;;  %v3868_v53 = vmul.f32 -1.442695, %v3230_v9 }
 0xff4   :  { %v3867_v60 = vmul.f32 -1.442695, %v3229_v43  ;;  %v3872_v27 = vld [vmem:[%s6441_s21] ss:$0 sm:$0xff] }
 0xff5   :  { %4248 = vpow2.f32 %v3866_v55 }
 0xff6   :  { %4250 = vpow2.f32 %v3867_v60 }
 0xff7   :  { %4252 = vtanh.f32 %v3231_v59 }
 0xff8   :  { %4254 = vpow2.f32 %v3868_v53 }
 0xfff   :  { %v4249_v12 = vpop.eup %4248 }
0x1000   :  { %v3241_v13 = vadd.f32 1.0, %v4249_v12  ;;  %v4251_v36 = vpop.eup %4250 }
0x1001   :  { %v3242_v48 = vadd.f32 1.0, %v4251_v36  ;;  %v4253_v15 = vpop.eup %4252 }
0x1002   :  { %4256 = vrcp.f32 %v3241_v13  ;;  %v4255_v16 = vpop.eup %4254 }
0x1003   :  { %4258 = vrcp.f32 %v3242_v48  ;;  %v3243_v45 = vadd.f32 1.0, %v4255_v16 }
0x1005   :  { %4260 = vrcp.f32 %v3243_v45 }
0x100c   :  { %v4257_v29 = vpop.eup %4256 }
0x100d   :  { %v3252_v17 = vmul.f32 %v4257_v29, %v4253_v15  ;;  %v4259_v18 = vpop.eup %4258 }
0x100e   :  { %v3251_v19 = vmul.f32 %v4259_v18, %v6230_v34 }
0x100f   :  { %v4261_v26 = vpop.eup %4260 }
0x1010   :  { %v6270_v32 = vadd.f32 %v3252_v17, %v3251_v19 }
0x1012   :  { %4262 = vtanh.f32 %v6270_v32 }
0x101c   :  { %v4263_v56 = vpop.eup %4262 }
0x101d   :  { %v3255_v28 = vmul.f32 %v4263_v56, %v4261_v26 }
0x101f   :  { %v3260_v4 = vpack.c.bf16 %v3255_v28, %v3255_v28 }
0x1021   :  { %3294 = vmatmul.mubr.bf16.vlgmr.msra.gmra.mrb[92].mxu0 %v3260_v4  ;;  %3335 = vmatmul.mubr.bf16.vlgmr.msra.gmra.mrb[92].mxu1 %v3260_v4 }
0x1022   :  { %3891 = vmatpush3.bf16.msra.mxu0 %v4016_v46  ;;  %3906 = vmatprep.mubr.msk.bf16.mxu0 %vm4458_vm0, %v4457_v23 }
0x1023   :  { %3892 = vmatprep.subr.bf16.mxu0 %v4457_v23 }
0x1026   :  { %3893 = vmatpush3.bf16.msra.mxu0 %v4017_v58 }
0x1027   :  { %3894 = vmatprep.subr.bf16.mxu0 %v4457_v23 }
0x102a   :  { %3895 = vmatpush3.bf16.msra.mxu0 %v4018_v24 }
0x102b   :  { %3896 = vmatprep.subr.bf16.mxu0 %v4457_v23 }
0x102e   :  { %3897 = vmatpush3.bf16.msra.mxu0 %v4019_v57 }
0x102f   :  { %3898 = vmatprep.subr.bf16.mxu0 %v4457_v23 }
0x1032   :  { %3899 = vmatpush3.bf16.msra.mxu0 %v4020_v47 }
0x1033   :  { %3900 = vmatprep.subr.bf16.mxu0 %v4457_v23 }
0x1036   :  { %3901 = vmatpush3.bf16.msra.mxu0 %v4021_v63 }
0x1037   :  { %3902 = vmatprep.subr.bf16.mxu0 %v4457_v23 }
0x103a   :  { %3903 = vmatpush3.bf16.msra.mxu0 %v4022_v1 }
0x103b   :  { %3904 = vmatprep.subr.bf16.mxu0 %v4457_v23 }
0x103e   :  { %3905 = vmatpush3.bf16.msra.mxu0 %v4023_v3 }
0x10f4   :  { %v3295_v5 = vpop.f32.mrb[92].mxu0  ;;  %v3336_v50 = vpop.f32.mrb[92].mxu1 }
0x10f5   :  { %v3343_v37 = vadd.f32 %v3295_v5, %v6437_v20  ;;  %v3345_v22 = vadd.f32 %v3336_v50, %v6438_v52  ;;  %v3297_v54 = vpop.f32.mrb[93].mxu0  ;;  %v3338_v49 = vpop.f32.mrb[93].mxu1 }
0x10f6   :  { %v3344_v38 = vadd.f32 %v3297_v54, %v6439_v41  ;;  %v3346_v25 = vadd.f32 %v3338_v49, %v6440_v40  ;;  %v3299_v42 = vpop.f32.mrb[94].mxu0  ;;  %v3340_v39 = vpop.f32.mrb[94].mxu1 }
0x10f7   :  { %v3869_v30 = vmul.f32 -1.442695, %v3343_v37  ;;  %v3300_v34 = vpop.f32.mrb[95].mxu0  ;;  %v3341_v35 = vpop.f32.mrb[95].mxu1  ;;  %v3871_v33 = vmul.f32 -1.442695, %v3345_v22 }
0x10f8   :  { %v3870_v2 = vmul.f32 -1.442695, %v3344_v38 }
0x10f9   :  { %4264 = vpow2.f32 %v3869_v30 }
0x10fa   :  { %4266 = vpow2.f32 %v3870_v2 }
0x10fb   :  { %4268 = vtanh.f32 %v3346_v25 }
0x10fc   :  { %4270 = vpow2.f32 %v3871_v33 }
0x1103   :  { %v4265_v44 = vpop.eup %4264 }
0x1104   :  { %v3356_v0 = vadd.f32 1.0, %v4265_v44  ;;  %v4267_v31 = vpop.eup %4266 }
0x1105   :  { %v3357_v6 = vadd.f32 1.0, %v4267_v31  ;;  %v4269_v7 = vpop.eup %4268 }
0x1106   :  { %4272 = vrcp.f32 %v3356_v0  ;;  %v4271_v8 = vpop.eup %4270 }
0x1107   :  { %4274 = vrcp.f32 %v3357_v6  ;;  %v3358_v61 = vadd.f32 1.0, %v4271_v8 }
0x1109   :  { %4276 = vrcp.f32 %v3358_v61 }
0x1110   :  { %v4273_v9 = vpop.eup %4272 }
0x1111   :  { %v3367_v21 = vmul.f32 %v4273_v9, %v4269_v7  ;;  %v4275_v10 = vpop.eup %4274 }
0x1112   :  { %v3366_v43 = vmul.f32 %v4275_v10, %v6270_v32 }
0x1113   :  { %v4277_v59 = vpop.eup %4276 }
0x1114   :  { %v3368_v62 = vadd.f32 %v3367_v21, %v3366_v43 }
0x1116   :  { %4278 = vtanh.f32 %v3368_v62 }
0x1120   :  { %v4279_v51 = vpop.eup %4278 }
0x1121   :  { %v3370_v14 = vmul.f32 %v4279_v51, %v4277_v59 }
0x1123   :  { %v3376_v55 = vpack.c.bf16 %v3370_v14, %v3370_v14 }
0x1125   :  { %3907 = vmatmul.mubr.bf16.vlgmr.msra.gmra.mrb[96].mxu0 %v3376_v55 }
0x11f8   :  { %v3482_v11 = vpop.f32.mrb[96].mxu0 }
0x11f9   :  { %v3483_v60 = vadd.f32 %v3872_v27, %v3482_v11  ;;  %v3908_v53 = vpop.f32.mrb[97].mxu0 }
0x11fa   :  { %v3485_v12 = vpop.f32.mrb[98].mxu0 }
0x11fb   :  { %3488 = vst [vmem:[#allocation13] sm:$0xff] %v3483_v60  ;;  %v3909_v13 = vpop.f32.mrb[99].mxu0 }
0x11fc   :  { %4431 = shalt.err (!%p4428_p11)
}
0x11fd   :  { %s6442_s27 = sld [smem:[#allocation68_spill]] }
0x1203   :  { %s4432_s19 = scalar_lea.hbm %s6442_s27, 128 }
0x1204   :  { %p4433_p12 = scmp.ne.s32.totalorder %s6442_s27, %s4432_s19  ;;  %p4436_p13 = scmp.lt.u32.totalorder %s4432_s19, %s6442_s27 }
0x1206   :  { %p4438_p0 = pnand %p4436_p13, %p4433_p12 }
0x1208   :  { %4441 = shalt.err (!%p4438_p0)
}
0x1209   :  { %3498 = dma.vmem_to_hbm [thread:$0]  %s3496_s26, 128, %s6442_s27, [#allocation10]  }
0x120a   :  { %4448 = dma.done.wait [#allocation10], 128  }
0x120b   :  { %4449 = vsyncadd [#allocation10], 4294967168 }
0x120c   :  { %3502 = vsyncpa [#allocation9], 1 }
0x120d   :  { %3503 = vsyncpa [#allocation12], 1 }
0x120e   :  { %3504 = vsyncpa [#allocation10], 1 }

</bundles_post_ra>
